<compile_context>
chip_gen: v6e
topology: v6e:2x2x1
jax: 0.10.0
libtpu: 0.0.40
codegen_flags: <defaults>
</compile_context>

<pallas_src>
import functools

import jax
import jax.numpy as jnp
from jax.experimental import pallas as pl
from jax.experimental.pallas import tpu as pltpu

D_IN = 512     # LayerNorm / Linear input features
D_OUT = 768    # Linear output features
LN_EPS = 1e-5  # nn.LayerNorm default


def _feature_projection_kernel(x_ref, w_ref, b_ref, o_ref):
    # x_ref: (tile_rows, D_IN)   VMEM (input dtype)
    # w_ref: (D_IN, D_OUT)       VMEM (bf16, gamma already folded in)
    # b_ref: (1, D_OUT)          VMEM (f32, beta@w + b already folded in)
    # o_ref: (tile_rows, D_OUT)  VMEM
    x = x_ref[...].astype(jnp.float32)

    # --- LayerNorm statistics in f32 (no affine; folded into w/b) ---
    mean = jnp.mean(x, axis=-1, keepdims=True)
    centered = x - mean
    var = jnp.mean(centered * centered, axis=-1, keepdims=True)
    x_norm = centered * jax.lax.rsqrt(var + LN_EPS)

    # --- Linear projection 512 -> 768 on the MXU: bf16 operands, f32 accumulate ---
    y = jnp.dot(x_norm.astype(jnp.bfloat16), w_ref[...],
                preferred_element_type=jnp.float32)
    y = y + b_ref[...]

    # --- Dropout(p=0.1): identity in eval mode ---
    o_ref[...] = y.astype(o_ref.dtype)


@functools.partial(jax.jit, static_argnames=("tile_rows",))
def feature_projection(x, gamma, beta, w, b, *, tile_rows=512):
    """x: (B, T, 512), gamma/beta: (512,), w: (512, 768), b: (768,) -> (B, T, 768)."""
    B, T, d_in = x.shape
    assert d_in == D_IN
    n_rows = B * T
    n_pad = pl.cdiv(n_rows, tile_rows) * tile_rows

    # Fold the LayerNorm affine transform into the projection (exact algebra,
    # done once in f32 in the wrapper).
    w_f32 = w.astype(jnp.float32)
    w_folded = (gamma.astype(jnp.float32)[:, None] * w_f32).astype(jnp.bfloat16)
    b_folded = (beta.astype(jnp.float32) @ w_f32
                + b.astype(jnp.float32)).reshape(1, D_OUT)

    x2d = x.reshape(n_rows, D_IN)
    if n_pad != n_rows:
        x2d = jnp.pad(x2d, ((0, n_pad - n_rows), (0, 0)))

    grid = (n_pad // tile_rows,)

    out2d = pl.pallas_call(
        _feature_projection_kernel,
        out_shape=jax.ShapeDtypeStruct((n_pad, D_OUT), x.dtype),
        grid_spec=pltpu.PrefetchScalarGridSpec(
            num_scalar_prefetch=0,
            grid=grid,
            in_specs=[
                pl.BlockSpec((tile_rows, D_IN), lambda i: (i, 0)),   # x rows
                pl.BlockSpec((D_IN, D_OUT), lambda i: (0, 0)),       # folded weight
                pl.BlockSpec((1, D_OUT), lambda i: (0, 0)),          # folded bias
            ],
            out_specs=pl.BlockSpec((tile_rows, D_OUT), lambda i: (i, 0)),
        ),
        compiler_params=pltpu.CompilerParams(
            dimension_semantics=("parallel",)),
    )(x2d, w_folded, b_folded)

    return out2d[:n_rows].reshape(B, T, D_OUT)


def _reference(x, gamma, beta, w, b):
    xf = x.astype(jnp.float32)
    mean = jnp.mean(xf, axis=-1, keepdims=True)
    var = jnp.mean((xf - mean) ** 2, axis=-1, keepdims=True)
    xn = (xf - mean) * jax.lax.rsqrt(var + LN_EPS)
    xn = xn * gamma + beta
    return (xn @ w + b).astype(x.dtype)


if __name__ == "__main__":
    key = jax.random.PRNGKey(0)
    k_x, k_g, k_b, k_w, k_pb = jax.random.split(key, 5)

    B, T = 2, 8  # B*T = 16 rows (padded to one 512-row tile inside the wrapper)
    x = jax.random.normal(k_x, (B, T, D_IN), dtype=jnp.float32)

    # Deterministic synthetic parameters (shapes from the module __init__).
    gamma = 1.0 + 0.01 * jax.random.normal(k_g, (D_IN,), dtype=jnp.float32)
    beta = 0.01 * jax.random.normal(k_b, (D_IN,), dtype=jnp.float32)
    # nn.Linear stores weight as (768, 512); kernel consumes the transpose.
    w = 0.02 * jax.random.normal(k_w, (D_IN, D_OUT), dtype=jnp.float32)
    b = 0.02 * jax.random.normal(k_pb, (D_OUT,), dtype=jnp.float32)

    out = feature_projection(x, gamma, beta, w, b)
    out = jax.block_until_ready(out)

    ref = _reference(x, gamma, beta, w, b)
    assert out.shape == (B, T, D_OUT), out.shape
    # bf16 matmul operands (f32 accumulate) => small drift vs pure-f32 reference.
    assert jnp.allclose(out, ref, atol=3e-2, rtol=3e-2), \
        float(jnp.max(jnp.abs(out - ref)))

    print("KERNEL_OK")
</pallas_src>

<mosaic_0001>
module attributes {stable_mosaic.version = 11 : i64} {
  func.func @_feature_projection_kernel(%arg0: i32, %arg1: memref<512x512xf32, #tpu.memory_space<vmem>>, %arg2: memref<512x768xbf16, #tpu.memory_space<vmem>>, %arg3: memref<1x768xf32, #tpu.memory_space<vmem>>, %arg4: memref<512x768xf32, #tpu.memory_space<vmem>>) attributes {dimension_semantics = [#tpu.dimension_semantics<parallel>], iteration_bounds = array<i64: 1>, scalar_prefetch = 0 : i64, scratch_operands = 0 : i64, tpu.core_type = #tpu.core_type<tc>, window_params = [{transform_indices = @transform_0, window_bounds = array<i64: 512, 512>}, {pipeline_mode = #tpu.pipeline_mode<synchronous>, transform_indices = @transform_1, window_bounds = array<i64: 512, 768>}, {pipeline_mode = #tpu.pipeline_mode<synchronous>, transform_indices = @transform_2, window_bounds = array<i64: 1, 768>}, {transform_indices = @transform_3, window_bounds = array<i64: 512, 768>}]} {
    %c0 = arith.constant 0 : index
    %c0_0 = arith.constant 0 : index
    %0 = vector.load %arg1[%c0, %c0_0] : memref<512x512xf32, #tpu.memory_space<vmem>>, vector<512x512xf32>
    %cst = arith.constant dense<0.000000e+00> : vector<512xf32>
    %1 = vector.multi_reduction <add>, %0, %cst [1] : vector<512x512xf32> to vector<512xf32>
    %2 = vector.shape_cast %1 : vector<512xf32> to vector<512x1xf32>
    %cst_1 = arith.constant 5.120000e+02 : f32
    %3 = vector.broadcast %cst_1 : f32 to vector<512x1xf32>
    %4 = arith.divf %2, %3 : vector<512x1xf32>
    %5 = vector.broadcast %4 : vector<512x1xf32> to vector<512x512xf32>
    %6 = arith.subf %0, %5 : vector<512x512xf32>
    %7 = arith.mulf %6, %6 : vector<512x512xf32>
    %cst_2 = arith.constant dense<0.000000e+00> : vector<512xf32>
    %8 = vector.multi_reduction <add>, %7, %cst_2 [1] : vector<512x512xf32> to vector<512xf32>
    %9 = vector.shape_cast %8 : vector<512xf32> to vector<512x1xf32>
    %cst_3 = arith.constant 5.120000e+02 : f32
    %10 = vector.broadcast %cst_3 : f32 to vector<512x1xf32>
    %11 = arith.divf %9, %10 : vector<512x1xf32>
    %cst_4 = arith.constant 9.99999974E-6 : f32
    %12 = vector.broadcast %cst_4 : f32 to vector<512x1xf32>
    %13 = arith.addf %11, %12 : vector<512x1xf32>
    %14 = math.rsqrt %13 : vector<512x1xf32>
    %15 = vector.broadcast %14 : vector<512x1xf32> to vector<512x512xf32>
    %16 = arith.mulf %6, %15 : vector<512x512xf32>
    %17 = arith.truncf %16 : vector<512x512xf32> to vector<512x512xbf16>
    %c0_5 = arith.constant 0 : index
    %c0_6 = arith.constant 0 : index
    %18 = vector.load %arg2[%c0_5, %c0_6] : memref<512x768xbf16, #tpu.memory_space<vmem>>, vector<512x768xbf16>
    %cst_7 = arith.constant dense<0.000000e+00> : vector<512x768xf32>
    %19 = tpu.matmul %17, %18, %cst_7 {dimension_numbers = #tpu.dot_dimension_numbers<[1], [0], [0], [1], [0, 0, 1, 1], [], []>} : vector<512x512xbf16>, vector<512x768xbf16>, vector<512x768xf32> -> vector<512x768xf32>
    %c0_8 = arith.constant 0 : index
    %c0_9 = arith.constant 0 : index
    %20 = vector.load %arg3[%c0_8, %c0_9] : memref<1x768xf32, #tpu.memory_space<vmem>>, vector<1x768xf32>
    %21 = vector.broadcast %20 : vector<1x768xf32> to vector<512x768xf32>
    %22 = arith.addf %19, %21 : vector<512x768xf32>
    %c0_10 = arith.constant 0 : index
    %c0_11 = arith.constant 0 : index
    %23 = vector.load %arg4[%c0_10, %c0_11] : memref<512x768xf32, #tpu.memory_space<vmem>>, vector<512x768xf32>
    tpu.vector_store %arg4[%c0_10, %c0_11], %22 {strides = array<i32>} : memref<512x768xf32, #tpu.memory_space<vmem>>, vector<512x768xf32>,
    return
  }
  func.func @transform_0(%arg0: i32) -> (i32, i32) {
    %c0_i32 = arith.constant 0 : i32
    %c0_i32_0 = arith.constant 0 : i32
    return %arg0, %c0_i32 : i32, i32
  }
  func.func @transform_1(%arg0: i32) -> (i32, i32) {
    %c0_i32 = arith.constant 0 : i32
    %c0_i32_0 = arith.constant 0 : i32
    %c0_i32_1 = arith.constant 0 : i32
    return %c0_i32, %c0_i32_0 : i32, i32
  }
  func.func @transform_2(%arg0: i32) -> (i32, i32) {
    %c0_i32 = arith.constant 0 : i32
    %c0_i32_0 = arith.constant 0 : i32
    %c0_i32_1 = arith.constant 0 : i32
    return %c0_i32, %c0_i32_0 : i32, i32
  }
  func.func @transform_3(%arg0: i32) -> (i32, i32) {
    %c0_i32 = arith.constant 0 : i32
    %c0_i32_0 = arith.constant 0 : i32
    return %arg0, %c0_i32 : i32, i32
  }
}

</mosaic_0001>

<bundles_post_ra>
// kernel: feature_projection.1
= control target key start
LH: loop header
LB: loop body
LE: loop exit
PB: predicated region body
PF: predicated region fallthrough
CT: control target
= control target key end

     0   :  { %s12810_s0 = inlined_call_operand.vmem [shape: f32[512,512], index: 0, kind: input, shape index: {}]   ;;  %s12811_s1 = inlined_call_operand.vmem [shape: bf16[512,768], index: 1, kind: input, shape index: {}]   ;;  %s12812_s2 = inlined_call_operand.vmem [shape: f32[1,768], index: 2, kind: input, shape index: {}]   ;;  %s12813_s3 = inlined_call_operand.vmem [shape: f32[512,768], index: 3, kind: output, shape index: {}]  }
   0x1   :  { %v6604_v0 = vld [vmem:[%s12810_s0] sm:$0xff]  ;;  %v6609_v1 = vld [vmem:[%s12810_s0 + $0x8] sm:$0xff]  ;;  %v6614_v2 = vld [vmem:[%s12810_s0 + $0x10] sm:$0xff] }
   0x2   :  { %v270_v3 = vadd.f32 %v6609_v1, %v6604_v0  ;;  %v6621_v4 = vld [vmem:[%s12810_s0 + $0x40] sm:$0xff]  ;;  %v6626_v5 = vld [vmem:[%s12810_s0 + $0x48] sm:$0xff]  ;;  %v6631_v6 = vld [vmem:[%s12810_s0 + $0x18] sm:$0xff] }
   0x3   :  { %v6636_v7 = vld [vmem:[%s12810_s0 + $0x50] sm:$0xff]  ;;  %v280_v8 = vadd.f32 %v6626_v5, %v6621_v4  ;;  %v6643_v9 = vld [vmem:[%s12810_s0 + $0x20] sm:$0xff]  ;;  %v6649_v11 = vld [vmem:[%s12810_s0 + $0x58] sm:$0xff] }
   0x4   :  { %v271_v10 = vadd.f32 %v270_v3, %v6614_v2  ;;  %v6654_v12 = vld [vmem:[%s12810_s0 + $0x28] sm:$0xff]  ;;  %v6659_v13 = vld [vmem:[%s12810_s0 + $0x30] sm:$0xff]  ;;  %v6667_v16 = vld [vmem:[%s12810_s0 + $0x60] sm:$0xff] }
   0x5   :  { %v281_v14 = vadd.f32 %v280_v8, %v6636_v7  ;;  %v275_v15 = vadd.f32 %v6654_v12, %v6643_v9  ;;  %v6672_v17 = vld [vmem:[%s12810_s0 + $0x68] sm:$0xff]  ;;  %v6677_v18 = vld [vmem:[%s12810_s0 + $0x70] sm:$0xff]  ;;  %v6683_v20 = vld [vmem:[%s12810_s0 + $0x38] sm:$0xff] }
   0x6   :  { %v272_v19 = vadd.f32 %v271_v10, %v6631_v6  ;;  %v285_v21 = vadd.f32 %v6672_v17, %v6667_v16  ;;  %v6690_v22 = vld [vmem:[%s12810_s0 + $0xa0] sm:$0xff]  ;;  %v6695_v23 = vld [vmem:[%s12810_s0 + $0xa8] sm:$0xff]  ;;  %v6702_v26 = vld [vmem:[%s12810_s0 + $0x78] sm:$0xff] }
   0x7   :  { %v282_v24 = vadd.f32 %v281_v14, %v6649_v11  ;;  %v276_v25 = vadd.f32 %v275_v15, %v6659_v13  ;;  %v6707_v27 = vld [vmem:[%s12810_s0 + $0xb0] sm:$0xff]  ;;  %v295_v28 = vadd.f32 %v6695_v23, %v6690_v22  ;;  %v6714_v29 = vld [vmem:[%s12810_s0 + $0x80] sm:$0xff]  ;;  %v6720_v31 = vld [vmem:[%s12810_s0 + $0xb8] sm:$0xff] }
   0x8   :  { %273 = vadd.xlane.f32.xlu0 %v272_v19  ;;  %v286_v30 = vadd.f32 %v285_v21, %v6677_v18  ;;  %v6725_v32 = vld [vmem:[%s12810_s0 + $0x88] sm:$0xff]  ;;  %v6730_v33 = vld [vmem:[%s12810_s0 + $0x90] sm:$0xff]  ;;  %v6737_v36 = vld [vmem:[%s12810_s0 + $0x98] sm:$0xff] }
   0x9   :  { %283 = vadd.xlane.f32.xlu1 %v282_v24  ;;  %v277_v34 = vadd.f32 %v276_v25, %v6683_v20  ;;  %v296_v35 = vadd.f32 %v295_v28, %v6707_v27  ;;  %v290_v37 = vadd.f32 %v6725_v32, %v6714_v29  ;;  %v6744_v38 = vld [vmem:[%s12810_s0 + $0xe0] sm:$0xff]  ;;  %v6749_v39 = vld [vmem:[%s12810_s0 + $0xe8] sm:$0xff]  ;;  %v6755_v41 = vld [vmem:[%s12810_s0 + $0xf0] sm:$0xff] }
   0xa   :  { %v287_v40 = vadd.f32 %v286_v30, %v6702_v26  ;;  %v305_v42 = vadd.f32 %v6749_v39, %v6744_v38  ;;  %v6762_v43 = vld [vmem:[%s12810_s0 + $0xc0] sm:$0xff]  ;;  %v6767_v44 = vld [vmem:[%s12810_s0 + $0xc8] sm:$0xff]  ;;  %v6773_v46 = vld [vmem:[%s12810_s0 + $0xd0] sm:$0xff] }
   0xb   :  { %v291_v45 = vadd.f32 %v290_v37, %v6730_v33  ;;  %v300_v47 = vadd.f32 %v6767_v44, %v6762_v43  ;;  %v50_v48 = vld [vmem:[%s12810_s0 + $0x120] sm:$0xff]  ;;  %v297_v49 = vadd.f32 %v296_v35, %v6720_v31  ;;  %v6784_v50 = vld [vmem:[%s12810_s0 + $0xf8] sm:$0xff]  ;;  %v51_v52 = vld [vmem:[%s12810_s0 + $0x128] sm:$0xff] }
   0xc   :  { %278 = vadd.xlane.f32.xlu0 %v277_v34  ;;  %v6789_v51 = vld [vmem:[%s12810_s0 + $0xd8] sm:$0xff]  ;;  %v306_v54 = vadd.f32 %v305_v42, %v6755_v41  ;;  %v315_v56 = vadd.f32 %v51_v52, %v50_v48  ;;  %v6800_v57 = vld [vmem:[%s12810_s0 + $0x100] sm:$0xff]  ;;  %v6805_v58 = vld [vmem:[%s12810_s0 + $0x108] sm:$0xff] }
   0xd   :  { %288 = vadd.xlane.f32.xlu1 %v287_v40  ;;  %v292_v53 = vadd.f32 %v291_v45, %v6737_v36  ;;  %v301_v55 = vadd.f32 %v300_v47, %v6773_v46  ;;  %v6810_v59 = vld [vmem:[%s12810_s0 + $0x110] sm:$0xff]  ;;  %v310_v61 = vadd.f32 %v6805_v58, %v6800_v57  ;;  %v58_v62 = vld [vmem:[%s12810_s0 + $0x160] sm:$0xff]  ;;  %v59_v63 = vld [vmem:[%s12810_s0 + $0x168] sm:$0xff] }
   0xe   :  { %v52_v60 = vld [vmem:[%s12810_s0 + $0x130] sm:$0xff]  ;;  %v6826_v3 = vld [vmem:[%s12810_s0 + $0x140] sm:$0xff]  ;;  %v53_v10 = vld [vmem:[%s12810_s0 + $0x138] sm:$0xff]  ;;  %v307_v21 = vadd.f32 %v306_v54, %v6784_v50  ;;  %v325_v28 = vadd.f32 %v59_v63, %v58_v62 }
   0xf   :  { %v302_v8 = vadd.f32 %v301_v55, %v6789_v51  ;;  %v6835_v14 = vld [vmem:[%s12810_s0 + $0x118] sm:$0xff]  ;;  %v311_v15 = vadd.f32 %v310_v61, %v6810_v59  ;;  %v6841_v19 = vld [vmem:[%s12810_s0 + $0x148] sm:$0xff]  ;;  %v316_v24 = vadd.f32 %v315_v56, %v52_v60  ;;  %v60_v25 = vld [vmem:[%s12810_s0 + $0x170] sm:$0xff] }
  0x10   :  { %293 = vadd.xlane.f32.xlu0 %v292_v53  ;;  %v56_v30 = vld [vmem:[%s12810_s0 + $0x150] sm:$0xff]  ;;  %v320_v34 = vadd.f32 %v6841_v19, %v6826_v3  ;;  %v66_v35 = vld [vmem:[%s12810_s0 + $0x1a0] sm:$0xff]  ;;  %v67_v37 = vld [vmem:[%s12810_s0 + $0x1a8] sm:$0xff]  ;;  %v326_v54 = vadd.f32 %v325_v28, %v60_v25 }
  0x11   :  { %298 = vadd.xlane.f32.xlu1 %v297_v49  ;;  %v62_v40 = vld [vmem:[%s12810_s0 + $0x180] sm:$0xff]  ;;  %v63_v42 = vld [vmem:[%s12810_s0 + $0x188] sm:$0xff]  ;;  %v312_v45 = vadd.f32 %v311_v15, %v6835_v14  ;;  %v61_v47 = vld [vmem:[%s12810_s0 + $0x178] sm:$0xff]  ;;  %v317_v53 = vadd.f32 %v316_v24, %v53_v10  ;;  %v335_v55 = vadd.f32 %v67_v37, %v66_v35 }
  0x12   :  { %v57_v48 = vld [vmem:[%s12810_s0 + $0x158] sm:$0xff]  ;;  %v321_v49 = vadd.f32 %v320_v34, %v56_v30  ;;  %v330_v52 = vadd.f32 %v63_v42, %v62_v40  ;;  %v64_v56 = vld [vmem:[%s12810_s0 + $0x190] sm:$0xff]  ;;  %v70_v60 = vld [vmem:[%s12810_s0 + $0x1c0] sm:$0xff]  ;;  %v327_v28 = vadd.f32 %v326_v54, %v61_v47 }
  0x13   :  { %v71_v61 = vld [vmem:[%s12810_s0 + $0x1c8] sm:$0xff]  ;;  %v68_v62 = vld [vmem:[%s12810_s0 + $0x1b0] sm:$0xff]  ;;  %v74_v63 = vld [vmem:[%s12810_s0 + $0x1e0] sm:$0xff] }
  0x14   :  { %303 = vadd.xlane.f32.xlu0 %v302_v8  ;;  %v75_v8 = vld [vmem:[%s12810_s0 + $0x1e8] sm:$0xff]  ;;  %v322_v10 = vadd.f32 %v321_v49, %v57_v48  ;;  %v69_v15 = vld [vmem:[%s12810_s0 + $0x1b8] sm:$0xff]  ;;  %v331_v24 = vadd.f32 %v330_v52, %v64_v56  ;;  %v340_v25 = vadd.f32 %v71_v61, %v70_v60  ;;  %v336_v30 = vadd.f32 %v335_v55, %v68_v62  ;;  %v72_v35 = vld [vmem:[%s12810_s0 + $0x1d0] sm:$0xff] }
  0x15   :  { %308 = vadd.xlane.f32.xlu1 %v307_v21  ;;  %v65_v21 = vld [vmem:[%s12810_s0 + $0x198] sm:$0xff]  ;;  %v345_v34 = vadd.f32 %v75_v8, %v74_v63  ;;  %v78_v37 = vld [vmem:[%s12810_s0 + $0x200] sm:$0xff]  ;;  %v79_v40 = vld [vmem:[%s12810_s0 + $0x208] sm:$0xff] }
  0x16   :  { %v76_v42 = vld [vmem:[%s12810_s0 + $0x1f0] sm:$0xff]  ;;  %v83_v47 = vld [vmem:[%s12810_s0 + $0x228] sm:$0xff]  ;;  %v332_v48 = vadd.f32 %v331_v24, %v65_v21  ;;  %v77_v49 = vld [vmem:[%s12810_s0 + $0x1f8] sm:$0xff]  ;;  %v350_v54 = vadd.f32 %v79_v40, %v78_v37  ;;  %v337_v55 = vadd.f32 %v336_v30, %v69_v15 }
  0x17   :  { %v73_v52 = vld [vmem:[%s12810_s0 + $0x1d8] sm:$0xff]  ;;  %v346_v56 = vadd.f32 %v345_v34, %v76_v42  ;;  %v80_v61 = vld [vmem:[%s12810_s0 + $0x210] sm:$0xff]  ;;  %v86_v62 = vld [vmem:[%s12810_s0 + $0x240] sm:$0xff] }
  0x18   :  { %313 = vadd.xlane.f32.xlu0 %v312_v45  ;;  %v82_v45 = vld [vmem:[%s12810_s0 + $0x220] sm:$0xff]  ;;  %v87_v63 = vld [vmem:[%s12810_s0 + $0x248] sm:$0xff]  ;;  %v84_v8 = vld [vmem:[%s12810_s0 + $0x230] sm:$0xff] }
  0x19   :  { %318 = vadd.xlane.f32.xlu1 %v317_v53  ;;  %v341_v53 = vadd.f32 %v340_v25, %v72_v35  ;;  %v355_v60 = vadd.f32 %v83_v47, %v82_v45  ;;  %v91_v15 = vld [vmem:[%s12810_s0 + $0x268] sm:$0xff]  ;;  %v85_v24 = vld [vmem:[%s12810_s0 + $0x238] sm:$0xff]  ;;  %v360_v30 = vadd.f32 %v87_v63, %v86_v62  ;;  %v347_v34 = vadd.f32 %v346_v56, %v77_v49  ;;  %v88_v40 = vld [vmem:[%s12810_s0 + $0x250] sm:$0xff] }
  0x1a   :  { %v81_v25 = vld [vmem:[%s12810_s0 + $0x218] sm:$0xff]  ;;  %v94_v42 = vld [vmem:[%s12810_s0 + $0x280] sm:$0xff]  ;;  %v95_v45 = vld [vmem:[%s12810_s0 + $0x288] sm:$0xff] }
  0x1b   :  { %v342_v21 = vadd.f32 %v341_v53, %v73_v52  ;;  %v356_v35 = vadd.f32 %v355_v60, %v84_v8  ;;  %v92_v47 = vld [vmem:[%s12810_s0 + $0x270] sm:$0xff]  ;;  %v99_v49 = vld [vmem:[%s12810_s0 + $0x2a8] sm:$0xff]  ;;  %v361_v53 = vadd.f32 %v360_v30, %v88_v40  ;;  %v89_v60 = vld [vmem:[%s12810_s0 + $0x258] sm:$0xff] }
  0x1c   :  { %323 = vadd.xlane.f32.xlu0 %v322_v10  ;;  %v90_v10 = vld [vmem:[%s12810_s0 + $0x260] sm:$0xff]  ;;  %v93_v63 = vld [vmem:[%s12810_s0 + $0x278] sm:$0xff]  ;;  %v100_v8 = vld [vmem:[%s12810_s0 + $0x2b0] sm:$0xff] }
  0x1d   :  { %328 = vadd.xlane.f32.xlu1 %v327_v28  ;;  %v351_v28 = vadd.f32 %v350_v54, %v80_v61  ;;  %v365_v37 = vadd.f32 %v91_v15, %v90_v10  ;;  %v370_v54 = vadd.f32 %v95_v45, %v94_v42  ;;  %v96_v61 = vld [vmem:[%s12810_s0 + $0x290] sm:$0xff]  ;;  %v362_v10 = vadd.f32 %v361_v53, %v89_v60  ;;  %v5951_v45 = vld [vmem:[%s12811_s1 + $0x124] ss:$24 sps:$4 sm:$0xff]  }
  0x1e   :  { %v5949_v40 = vld [vmem:[%s12811_s1 + $0x150] ss:$24 sps:$4 sm:$0xff]   ;;  %v5959_v53 = vld [vmem:[%s12811_s1 + $0x3f4] ss:$24 sps:$4 sm:$0xff]   ;;  %v5965_v60 = vld [vmem:[%s12811_s1 + $0x3c4] ss:$24 sps:$4 sm:$0xff]  }
  0x1f   :  { %v352_v52 = vadd.f32 %v351_v28, %v81_v25  ;;  %v366_v56 = vadd.f32 %v365_v37, %v92_v47  ;;  %v371_v15 = vadd.f32 %v370_v54, %v96_v61  ;;  %v101_v28 = vld [vmem:[%s12810_s0 + $0x2b8] sm:$0xff]  ;;  %v5947_v37 = vld [vmem:[%s12811_s1 + $0x454] ss:$24 sps:$4 sm:$0xff]   ;;  %v5950_v42 = vld [vmem:[%s12811_s1 + $0x450] ss:$24 sps:$4 sm:$0xff]  }
  0x20   :  { %333 = vadd.xlane.f32.xlu0 %v332_v48  ;;  %v98_v48 = vld [vmem:[%s12810_s0 + $0x2a0] sm:$0xff]  ;;  %3600 = vmatprep.subr.bf16.mxu1 %v5947_v37  ;;  %v5961_v54 = vld [vmem:[%s12811_s1 + $0xf0] ss:$24 sps:$4 sm:$0xff]  }
  0x21   :  { %338 = vadd.xlane.f32.xlu1 %v337_v55  ;;  %v357_v55 = vadd.f32 %v356_v35, %v85_v24  ;;  %v375_v62 = vadd.f32 %v99_v49, %v98_v48  ;;  %v97_v24 = vld [vmem:[%s12810_s0 + $0x298] sm:$0xff]  ;;  %v5945_v35 = vld [vmem:[%s12811_s1 + $0x154] ss:$24 sps:$4 sm:$0xff]   ;;  %3601 = vmatpush1.bf16.msra.mxu1 %v5950_v42 }
  0x22   :  { %v372_v30 = vadd.f32 %v371_v15, %v97_v24  ;;  %3247 = vmatprep.subr.bf16.mxu0 %v5945_v35  ;;  %v5953_v47 = vld [vmem:[%s12811_s1 + $0x424] ss:$24 sps:$4 sm:$0xff]   ;;  %v5955_v48 = vld [vmem:[%s12811_s1 + $0x120] ss:$24 sps:$4 sm:$0xff]   ;;  %v103_v15 = vld [vmem:[%s12810_s0 + $0x2c8] sm:$0xff] }
  0x23   :  { %v376_v25 = vadd.f32 %v375_v62, %v100_v8  ;;  %3248 = vmatpush1.bf16.msra.mxu0 %v5949_v40  ;;  %v5956_v49 = vld [vmem:[%s12811_s1 + $0x420] ss:$24 sps:$4 sm:$0xff]   ;;  %3602 = vmatprep.subr.bf16.mxu1 %v5953_v47  ;;  %v5971_v8 = vld [vmem:[%s12811_s1 + $0x394] ss:$24 sps:$4 sm:$0xff]  }
  0x24   :  { %343 = vadd.xlane.f32.xlu0 %v342_v21  ;;  %v367_v21 = vadd.f32 %v366_v56, %v93_v63  ;;  %3249 = vmatprep.subr.bf16.mxu0 %v5951_v45  ;;  %v5963_v56 = vld [vmem:[%s12811_s1 + $0xc4] ss:$24 sps:$4 sm:$0xff]   ;;  %v5967_v61 = vld [vmem:[%s12811_s1 + $0xc0] ss:$24 sps:$4 sm:$0xff]   ;;  %v5969_v63 = vld [vmem:[%s12811_s1 + $0x94] ss:$24 sps:$4 sm:$0xff]  }
  0x25   :  { %348 = vadd.xlane.f32.xlu1 %v347_v34  ;;  %v377_v34 = vadd.f32 %v376_v25, %v101_v28  ;;  %3603 = vmatpush1.bf16.msra.mxu1 %v5956_v49  ;;  %v5968_v62 = vld [vmem:[%s12811_s1 + $0x3c0] ss:$24 sps:$4 sm:$0xff]   ;;  %v107_v24 = vld [vmem:[%s12810_s0 + $0x2e8] sm:$0xff]  ;;  %v104_v35 = vld [vmem:[%s12810_s0 + $0x2d0] sm:$0xff] }
  0x26   :  { %3604 = vmatprep.subr.bf16.mxu1 %v5959_v53  ;;  %v5973_v25 = vld [vmem:[%s12811_s1 + $0x90] ss:$24 sps:$4 sm:$0xff]   ;;  %v110_v40 = vld [vmem:[%s12810_s0 + $0x300] sm:$0xff]  ;;  %v5981_v53 = vld [vmem:[%s12811_s1 + $0x34] ss:$24 sps:$4 sm:$0xff]  }
  0x27   :  { %3250 = vmatpush1.bf16.msra.mxu0 %v5955_v48  ;;  %v5974_v28 = vld [vmem:[%s12811_s1 + $0x390] ss:$24 sps:$4 sm:$0xff]   ;;  %v5979_v45 = vld [vmem:[%s12811_s1 + $0x60] ss:$24 sps:$4 sm:$0xff]  }
  0x28   :  { %353 = vadd.xlane.f32.xlu0 %v352_v52  ;;  %v5957_v52 = vld [vmem:[%s12811_s1 + $0xf4] ss:$24 sps:$4 sm:$0xff]   ;;  %v114_v49 = vld [vmem:[%s12810_s0 + $0x320] sm:$0xff] }
  0x29   :  { %358 = vadd.xlane.f32.xlu1 %v357_v55  ;;  %v5962_v55 = vld [vmem:[%s12811_s1 + $0x3f0] ss:$24 sps:$4 sm:$0xff]   ;;  %3251 = vmatprep.subr.bf16.mxu0 %v5957_v52  ;;  %v5980_v52 = vld [vmem:[%s12811_s1 + $0x360] ss:$24 sps:$4 sm:$0xff]  }
  0x2a   :  { %3605 = vmatpush1.bf16.msra.mxu1 %v5962_v55  ;;  %v108_v37 = vld [vmem:[%s12810_s0 + $0x2f0] sm:$0xff]  ;;  %v111_v42 = vld [vmem:[%s12810_s0 + $0x308] sm:$0xff] }
  0x2b   :  { %3252 = vmatpush1.bf16.msra.mxu0 %v5961_v54  ;;  %3606 = vmatprep.subr.bf16.mxu1 %v5965_v60  ;;  %v5983_v54 = vld [vmem:[%s12811_s1 + $0x334] ss:$24 sps:$4 sm:$0xff]   ;;  %v109_v60 = vld [vmem:[%s12810_s0 + $0x2f8] sm:$0xff] }
  0x2c   :  { %363 = vadd.xlane.f32.xlu0 %v362_v10  ;;  %3253 = vmatprep.subr.bf16.mxu0 %v5963_v56  ;;  %v102_v10 = vld [vmem:[%s12810_s0 + $0x2c0] sm:$0xff]  ;;  %v115_v55 = vld [vmem:[%s12810_s0 + $0x328] sm:$0xff]  ;;  %v105_v56 = vld [vmem:[%s12810_s0 + $0x2d8] sm:$0xff] }
  0x2d   :  { %368 = vadd.xlane.f32.xlu1 %v367_v21  ;;  %v106_v21 = vld [vmem:[%s12810_s0 + $0x2e0] sm:$0xff]  ;;  %v380_v47 = vadd.f32 %v103_v15, %v102_v10  ;;  %v390_v15 = vadd.f32 %v111_v42, %v110_v40  ;;  %v5993_v42 = vld [vmem:[%s12811_s1 + $0x2d4] ss:$24 sps:$4 sm:$0xff]  }
  0x2e   :  { %3607 = vmatpush1.bf16.msra.mxu1 %v5968_v62  ;;  %v385_v48 = vadd.f32 %v107_v24, %v106_v21  ;;  %v5985_v62 = vld [vmem:[%s12811_s1 + $0x30] ss:$24 sps:$4 sm:$0xff]   ;;  %v5987_v24 = vld [vmem:[%s12811_s1 + $0x4] ss:$24 sps:$4 sm:$0xff]  }
  0x2f   :  { %3254 = vmatpush1.bf16.msra.mxu0 %v5967_v61  ;;  %3608 = vmatprep.subr.bf16.mxu1 %v5971_v8  ;;  %v112_v61 = vld [vmem:[%s12810_s0 + $0x310] sm:$0xff]  ;;  %v381_v8 = vadd.f32 %v380_v47, %v104_v35  ;;  %v5992_v35 = vld [vmem:[%s12811_s1 + $0x300] ss:$24 sps:$4 sm:$0xff]  }
  0x30   :  { %373 = vadd.xlane.f32.xlu0 %v372_v30  ;;  %v5975_v30 = vld [vmem:[%s12811_s1 + $0x64] ss:$24 sps:$4 sm:$0xff]   ;;  %3255 = vmatprep.subr.bf16.mxu0 %v5969_v63  ;;  %v5986_v63 = vld [vmem:[%s12811_s1 + $0x330] ss:$24 sps:$4 sm:$0xff]   ;;  %v386_v10 = vadd.f32 %v385_v48, %v108_v37 }
  0x31   :  { %378 = vadd.xlane.f32.xlu1 %v377_v34  ;;  %v5977_v34 = vld [vmem:[%s12811_s1 + $0x364] ss:$24 sps:$4 sm:$0xff]   ;;  %v116_v21 = vld [vmem:[%s12810_s0 + $0x330] sm:$0xff]  ;;  %v7120_v47 = vadd.f32 %v381_v8, %v105_v56 }
  0x32   :  { %3609 = vmatpush1.bf16.msra.mxu1 %v5974_v28  ;;  %v5989_v28 = vld [vmem:[%s12811_s1 + $0x304] ss:$24 sps:$4 sm:$0xff]   ;;  %v7122_v48 = vadd.f32 %v386_v10, %v109_v60 }
  0x33   :  { %3256 = vmatpush1.bf16.msra.mxu0 %v5973_v25  ;;  %3610 = vmatprep.subr.bf16.mxu1 %v5977_v34  ;;  %v395_v25 = vadd.f32 %v115_v55, %v114_v49  ;;  %v5991_v34 = vld [vmem:[%s12811_s1] ss:$24 sps:$4 sm:$0xff]   ;;  %v7124_v49 = vadd.f32 %v390_v15, %v112_v61  ;;  %v119_v15 = vld [vmem:[%s12810_s0 + $0x348] sm:$0xff] }
  0x34   :  { %3257 = vmatprep.subr.bf16.mxu0 %v5975_v30  ;;  %v118_v10 = vld [vmem:[%s12810_s0 + $0x340] sm:$0xff] }
  0x35   :  { %v7138_v56 = vadd.f32 %v395_v25, %v116_v21  ;;  %v5999_v21 = vld [vmem:[%s12811_s1 + $0x2a4] ss:$24 sps:$4 sm:$0xff]  }
  0x36   :  { %3611 = vmatpush1.bf16.msra.mxu1 %v5980_v52  ;;  %v5995_v52 = vld [vmem:[%s12811_s1 + $0x5d4] ss:$24 sps:$4 sm:$0xff]  }
  0x37   :  { %3258 = vmatpush1.bf16.msra.mxu0 %v5979_v45  ;;  %3612 = vmatprep.subr.bf16.mxu1 %v5983_v54 }
  0x38   :  { %3259 = vmatprep.subr.bf16.mxu0 %v5981_v53 }
  0x3a   :  { %3613 = vmatpush1.bf16.msra.mxu1 %v5986_v63 }
  0x3b   :  { %3260 = vmatpush1.bf16.msra.mxu0 %v5985_v62  ;;  %3614 = vmatprep.subr.bf16.mxu1 %v5989_v28 }
  0x3c   :  { %3261 = vmatprep.subr.bf16.mxu0 %v5987_v24 }
  0x3e   :  { %3615 = vmatpush1.bf16.msra.mxu1 %v5992_v35 }
  0x3f   :  { %3262 = vmatpush1.bf16.msra.mxu0 %v5991_v34  ;;  %3616 = vmatprep.subr.bf16.mxu1 %v5995_v52 }
  0x40   :  { %3263 = vmatprep.subr.bf16.mxu0 %v5993_v42 }
  0x91   :  { %v274_v30 = vpop.xlane.xlu0 %273 }
  0x92   :  { %v591_v37 = vmul.f32 0.001953125, %v274_v30  ;;  %v284_v40 = vpop.xlane.xlu1 %283  ;;  %v6001_v30 = vld [vmem:[%s12811_s1 + $0x5a4] ss:$24 sps:$4 sm:$0xff]  }
  0x93   :  { %v593_v45 = vmul.f32 0.001953125, %v284_v40 }
  0x94   :  { %v7130_v53 = vsub.f32 %v6604_v0, %v591_v37  ;;  %v7133_v54 = vsub.f32 %v6609_v1, %v591_v37  ;;  %v7136_v55 = vsub.f32 %v6614_v2, %v591_v37  ;;  %v7141_v61 = vsub.f32 %v6631_v6, %v591_v37  ;;  %v5997_v1 = vld [vmem:[%s12811_s1 + $0x2d0] ss:$24 sps:$4 sm:$0xff]  }
  0x95   :  { %v279_v60 = vpop.xlane.xlu0 %278  ;;  %v7144_v62 = vsub.f32 %v6621_v4, %v593_v45  ;;  %v7147_v63 = vsub.f32 %v6626_v5, %v593_v45  ;;  %v7150_v0 = vsub.f32 %v6636_v7, %v593_v45  ;;  %v5998_v2 = vld [vmem:[%s12811_s1 + $0x5d0] ss:$24 sps:$4 sm:$0xff]   ;;  %v7163_v7 = vsub.f32 %v6649_v11, %v593_v45  ;;  %3264 = vmatpush2.bf16.msra.mxu0 %v5997_v1 }
  0x96   :  { %v592_v6 = vmul.f32 0.001953125, %v279_v60  ;;  %v289_v8 = vpop.xlane.xlu1 %288  ;;  %v911_v4 = vmul.f32 %v7130_v53, %v7130_v53  ;;  %v912_v5 = vmul.f32 %v7133_v54, %v7133_v54  ;;  %v913_v25 = vmul.f32 %v7136_v55, %v7136_v55  ;;  %3617 = vmatpush2.bf16.msra.mxu1 %v5998_v2  ;;  %3265 = vmatprep.subr.bf16.mxu0 %v5999_v21 }
  0x97   :  { %13199 = vst [vmem:[#allocation2_spill] sm:$0xff] %v7144_v62  ;;  %13200 = vst [vmem:[#allocation3_spill] sm:$0xff] %v7147_v63  ;;  %v594_v24 = vmul.f32 0.001953125, %v289_v8  ;;  %v919_v11 = vmul.f32 %v7144_v62, %v7144_v62  ;;  %v920_v28 = vmul.f32 %v7147_v63, %v7147_v63  ;;  %v914_v8 = vmul.f32 %v7141_v61, %v7141_v61 }
  0x98   :  { %13201 = vst [vmem:[#allocation4_spill] sm:$0xff] %v7150_v0  ;;  %v1167_v37 = vadd.f32 %v912_v5, %v911_v4  ;;  %v7184_v40 = vsub.f32 %v6643_v9, %v592_v6  ;;  %v7187_v45 = vsub.f32 %v6654_v12, %v592_v6  ;;  %v7190_v60 = vsub.f32 %v6659_v13, %v592_v6 }
  0x99   :  { %v294_v34 = vpop.xlane.xlu0 %293  ;;  %v7195_v35 = vsub.f32 %v6683_v20, %v592_v6  ;;  %v921_v4 = vmul.f32 %v7150_v0, %v7150_v0  ;;  %v1177_v5 = vadd.f32 %v920_v28, %v919_v11  ;;  %v922_v20 = vmul.f32 %v7163_v7, %v7163_v7  ;;  %3618 = vmatprep.subr.bf16.mxu1 %v6001_v30 }
  0x9a   :  { %13202 = vst [vmem:[#allocation5_spill] sm:$0xff] %v7190_v60  ;;  %v1168_v9 = vadd.f32 %v1167_v37, %v913_v25  ;;  %v299_v62 = vpop.xlane.xlu1 %298  ;;  %v595_v12 = vmul.f32 0.001953125, %v294_v34  ;;  %v915_v13 = vmul.f32 %v7184_v40, %v7184_v40  ;;  %v916_v42 = vmul.f32 %v7187_v45, %v7187_v45 }
  0x9b   :  { %v917_v63 = vmul.f32 %v7190_v60, %v7190_v60  ;;  %v400_v6 = vadd.f32 %v119_v15, %v118_v10  ;;  %v7208_v25 = vsub.f32 %v6667_v16, %v594_v24  ;;  %v7211_v28 = vsub.f32 %v6672_v17, %v594_v24  ;;  %v120_v16 = vld [vmem:[%s12810_s0 + $0x350] sm:$0xff] }
  0x9c   :  { %v1169_v11 = vadd.f32 %v1168_v9, %v914_v8  ;;  %v1172_v52 = vadd.f32 %v916_v42, %v915_v13  ;;  %v596_v37 = vmul.f32 0.001953125, %v299_v62  ;;  %v918_v34 = vmul.f32 %v7195_v35, %v7195_v35 }
  0x9d   :  { %v304_v0 = vpop.xlane.xlu0 %303  ;;  %v7216_v60 = vsub.f32 %v6677_v18, %v594_v24  ;;  %v7219_v1 = vsub.f32 %v6714_v29, %v595_v12  ;;  %v1178_v2 = vadd.f32 %v1177_v5, %v921_v4  ;;  %v923_v62 = vmul.f32 %v7208_v25, %v7208_v25 }
  0x9e   :  { %1170 = vadd.xlane.f32.xlu0 %v1169_v11  ;;  %v1173_v17 = vadd.f32 %v1172_v52, %v917_v63  ;;  %v924_v10 = vmul.f32 %v7211_v28, %v7211_v28  ;;  %v597_v15 = vmul.f32 0.001953125, %v304_v0  ;;  %v7229_v18 = vsub.f32 %v6702_v26, %v594_v24  ;;  %v309_v8 = vpop.xlane.xlu1 %308  ;;  %v113_v63 = vld [vmem:[%s12810_s0 + $0x318] sm:$0xff]  ;;  %v122_v26 = vld [vmem:[%s12810_s0 + $0x360] sm:$0xff] }
  0x9f   :  { %v925_v29 = vmul.f32 %v7216_v60, %v7216_v60  ;;  %v7234_v21 = vsub.f32 %v6725_v32, %v595_v12  ;;  %v7240_v5 = vsub.f32 %v6730_v33, %v595_v12  ;;  %v7243_v0 = vsub.f32 %v6737_v36, %v595_v12  ;;  %v123_v32 = vld [vmem:[%s12810_s0 + $0x368] sm:$0xff] }
  0xa0   :  { %v1174_v30 = vadd.f32 %v1173_v17, %v918_v34  ;;  %v1182_v4 = vadd.f32 %v924_v10, %v923_v62  ;;  %v927_v24 = vmul.f32 %v7219_v1, %v7219_v1  ;;  %v7256_v33 = vsub.f32 %v6690_v22, %v596_v37  ;;  %v117_v22 = vld [vmem:[%s12810_s0 + $0x338] sm:$0xff]  ;;  %v124_v10 = vld [vmem:[%s12810_s0 + $0x370] sm:$0xff] }
  0xa1   :  { %v928_v9 = vmul.f32 %v7234_v21, %v7234_v21  ;;  %v7259_v36 = vsub.f32 %v6695_v23, %v596_v37  ;;  %v1179_v12 = vadd.f32 %v1178_v2, %v922_v20  ;;  %v929_v13 = vmul.f32 %v7240_v5, %v7240_v5  ;;  %v314_v23 = vpop.xlane.xlu0 %313 }
  0xa2   :  { %383 = vadd.xlane.f32.xlu0 %v7120_v47  ;;  %1175 = vadd.xlane.f32.xlu1 %v1174_v30  ;;  %v401_v42 = vadd.f32 %v400_v6, %v120_v16  ;;  %v7264_v11 = vmul.f32 0.001953125, %v309_v8  ;;  %v926_v52 = vmul.f32 %v7229_v18, %v7229_v18  ;;  %v7272_v17 = vsub.f32 %v6707_v27, %v596_v37  ;;  %v121_v47 = vld [vmem:[%s12810_s0 + $0x358] sm:$0xff] }
  0xa3   :  { %v1187_v34 = vadd.f32 %v928_v9, %v927_v24  ;;  %v1183_v20 = vadd.f32 %v1182_v4, %v925_v29  ;;  %v931_v6 = vmul.f32 %v7256_v33, %v7256_v33  ;;  %v932_v16 = vmul.f32 %v7259_v36, %v7259_v36 }
  0xa4   :  { %v7282_v2 = vsub.f32 %v6762_v43, %v597_v15  ;;  %v392_v62 = vadd.f32 %v7124_v49, %v113_v63  ;;  %v930_v27 = vmul.f32 %v7243_v0, %v7243_v0  ;;  %v405_v30 = vadd.f32 %v123_v32, %v122_v26  ;;  %v126_v63 = vld [vmem:[%s12810_s0 + $0x380] sm:$0xff] }
  0xa5   :  { %v7291_v29 = vsub.f32 %v6767_v44, %v597_v15  ;;  %v1188_v8 = vadd.f32 %v1187_v34, %v929_v13  ;;  %v7294_v4 = vmul.f32 0.001953125, %v314_v23  ;;  %v7297_v43 = vsub.f32 %v6720_v31, %v596_v37  ;;  %v127_v44 = vld [vmem:[%s12810_s0 + $0x388] sm:$0xff]  ;;  %v6004_v37 = vld [vmem:[%s12811_s1 + $0x5a0] ss:$24 sps:$4 sm:$0xff]  }
  0xa6   :  { %13203 = vst [vmem:[#allocation6_spill] sm:$0xff] %v7282_v2  ;;  %1180 = vadd.xlane.f32.xlu0 %v1179_v12  ;;  %388 = vadd.xlane.f32.xlu1 %v7122_v48  ;;  %v7300_v49 = vsub.f32 %v6773_v46, %v597_v15  ;;  %v933_v48 = vmul.f32 %v7272_v17, %v7272_v17  ;;  %v6003_v46 = vld [vmem:[%s12811_s1 + $0x2a0] ss:$24 sps:$4 sm:$0xff]   ;;  %v319_v12 = vpop.xlane.xlu1 %318 }
  0xa7   :  { %13204 = vst [vmem:[#allocation7_spill] sm:$0xff] %v7291_v29  ;;  %v1192_v26 = vadd.f32 %v932_v16, %v931_v6  ;;  %v935_v32 = vmul.f32 %v7282_v2, %v7282_v2  ;;  %v936_v31 = vmul.f32 %v7291_v29, %v7291_v29  ;;  %v1184_v24 = vadd.f32 %v1183_v20, %v926_v52  ;;  %v130_v23 = vld [vmem:[%s12810_s0 + $0x3a0] sm:$0xff]  ;;  %v131_v6 = vld [vmem:[%s12810_s0 + $0x3a8] sm:$0xff]  ;;  %v324_v20 = vpop.xlane.xlu0 %323  ;;  %v248_v29 = vld [vmem:[%s12810_s0 + $0x750] sm:$0xff] }
  0xa8   :  { %13205 = vst [vmem:[#allocation8_spill] sm:$0xff] %v7300_v49  ;;  %v397_v9 = vadd.f32 %v7138_v56, %v117_v22  ;;  %v7321_v13 = vadd.f32 %v401_v42, %v121_v47  ;;  %v7325_v34 = vsub.f32 %v6744_v38, %v7264_v11  ;;  %v7334_v16 = vsub.f32 %v6789_v51, %v597_v15  ;;  %v125_v22 = vld [vmem:[%s12810_s0 + $0x378] sm:$0xff]  ;;  %v128_v51 = vld [vmem:[%s12810_s0 + $0x390] sm:$0xff] }
  0xa9   :  { %v937_v56 = vmul.f32 %v7300_v49, %v7300_v49  ;;  %v1197_v42 = vadd.f32 %v936_v31, %v935_v32  ;;  %v7340_v52 = vsub.f32 %v6749_v39, %v7264_v11  ;;  %3266 = vmatpush2.bf16.msra.mxu0 %v6003_v46  ;;  %v1189_v38 = vadd.f32 %v1188_v8, %v930_v27  ;;  %v6005_v39 = vld [vmem:[%s12811_s1 + $0x274] ss:$24 sps:$4 sm:$0xff]   ;;  %v6010_v32 = vld [vmem:[%s12811_s1 + $0x570] ss:$24 sps:$4 sm:$0xff]  }
  0xaa   :  { %13206 = vst [vmem:[#allocation9_spill] sm:$0xff] %v7325_v34  ;;  %13207 = vst [vmem:[#allocation10_spill] sm:$0xff] %v7334_v16  ;;  %393 = vadd.xlane.f32.xlu0 %v392_v62  ;;  %1185 = vadd.xlane.f32.xlu1 %v1184_v24  ;;  %v406_v47 = vadd.f32 %v405_v30, %v124_v10  ;;  %v7350_v15 = vsub.f32 %v6800_v57, %v7294_v4  ;;  %v6007_v62 = vld [vmem:[%s12811_s1 + $0x574] ss:$24 sps:$4 sm:$0xff]   ;;  %v7358_v27 = vmul.f32 0.001953125, %v319_v12 }
  0xab   :  { %13208 = vst [vmem:[#allocation11_spill] sm:$0xff] %v7340_v52  ;;  %v934_v10 = vmul.f32 %v7297_v43, %v7297_v43  ;;  %v1193_v30 = vadd.f32 %v1192_v26, %v933_v48  ;;  %v410_v8 = vadd.f32 %v127_v44, %v126_v63  ;;  %3619 = vmatpush2.bf16.msra.mxu1 %v6004_v37  ;;  %v6009_v57 = vld [vmem:[%s12811_s1 + $0x270] ss:$24 sps:$4 sm:$0xff]   ;;  %v7385_v37 = vmul.f32 0.001953125, %v324_v20 }
  0xac   :  { %13209 = vst [vmem:[#allocation12_spill] sm:$0xff] %v7350_v15  ;;  %v7370_v31 = vsub.f32 %v6755_v41, %v7264_v11  ;;  %v939_v46 = vmul.f32 %v7325_v34, %v7325_v34  ;;  %v940_v48 = vmul.f32 %v7340_v52, %v7340_v52  ;;  %v132_v63 = vld [vmem:[%s12810_s0 + $0x3b0] sm:$0xff]  ;;  %v7381_v44 = vsub.f32 %v6805_v58, %v7294_v4 }
  0xad   :  { %3267 = vmatprep.subr.bf16.mxu0 %v6005_v39  ;;  %v938_v26 = vmul.f32 %v7334_v16, %v7334_v16  ;;  %v1198_v41 = vadd.f32 %v1197_v42, %v937_v56  ;;  %v415_v24 = vadd.f32 %v131_v6, %v130_v23  ;;  %3620 = vmatprep.subr.bf16.mxu1 %v6007_v62  ;;  %v134_v56 = vld [vmem:[%s12810_s0 + $0x3c0] sm:$0xff]  ;;  %v135_v23 = vld [vmem:[%s12810_s0 + $0x3c8] sm:$0xff]  ;;  %v233_v16 = vld [vmem:[%s12810_s0 + $0x6d8] sm:$0xff] }
  0xae   :  { %13210 = vst [vmem:[#allocation13_spill] sm:$0xff] %v7370_v31  ;;  %13211 = vst [vmem:[#allocation14_spill] sm:$0xff] %v7381_v44  ;;  %3268 = vmatpush2.bf16.msra.mxu0 %v6009_v57  ;;  %398 = vadd.xlane.f32.xlu1 %v397_v9  ;;  %v7389_v12 = vsub.f32 %v6810_v59, %v7294_v4  ;;  %v943_v58 = vmul.f32 %v7350_v15, %v7350_v15  ;;  %v6011_v9 = vld [vmem:[%s12811_s1 + $0x244] ss:$24 sps:$4 sm:$0xff]   ;;  %v6015_v62 = vld [vmem:[%s12811_s1 + $0x240] ss:$24 sps:$4 sm:$0xff]   ;;  %v329_v15 = vpop.xlane.xlu1 %328 }
  0xaf   :  { %1190 = vadd.xlane.f32.xlu0 %v1189_v38  ;;  %v944_v39 = vmul.f32 %v7381_v44, %v7381_v44  ;;  %v6013_v59 = vld [vmem:[%s12811_s1 + $0x544] ss:$24 sps:$4 sm:$0xff]   ;;  %v1194_v6 = vadd.f32 %v1193_v30, %v934_v10  ;;  %v407_v42 = vadd.f32 %v406_v47, %v125_v22  ;;  %v7409_v38 = vsub.f32 %v6784_v50, %v7264_v11  ;;  %v6016_v57 = vld [vmem:[%s12811_s1 + $0x540] ss:$24 sps:$4 sm:$0xff]   ;;  %v6362_v47 = vld [vmem:[%s12810_s0 + $0x128] sm:$0xff] }
  0xb0   :  { %13212 = vst [vmem:[#allocation15_spill] sm:$0xff] %v7389_v12  ;;  %v411_v20 = vadd.f32 %v410_v8, %v128_v51  ;;  %3621 = vmatpush2.bf16.msra.mxu1 %v6010_v32  ;;  %v941_v44 = vmul.f32 %v7370_v31, %v7370_v31  ;;  %v1202_v10 = vadd.f32 %v940_v48, %v939_v46  ;;  %v129_v50 = vld [vmem:[%s12810_s0 + $0x398] sm:$0xff]  ;;  %v6361_v11 = vld [vmem:[%s12810_s0 + $0x120] sm:$0xff] }
  0xb1   :  { %13213 = vst [vmem:[#allocation16_spill] sm:$0xff] %v7409_v38  ;;  %v7426_v22 = vsub.f32 %v6361_v11, %v7358_v27  ;;  %v7432_v51 = vsub.f32 %v6362_v47, %v7358_v27  ;;  %3269 = vmatprep.subr.bf16.mxu0 %v6011_v9  ;;  %v133_v30 = vld [vmem:[%s12810_s0 + $0x3b8] sm:$0xff]  ;;  %v416_v8 = vadd.f32 %v415_v24, %v132_v63 }
  0xb2   :  { %v7439_v32 = vsub.f32 %v6835_v14, %v7294_v4  ;;  %v7443_v46 = vsub.f32 %v6826_v3, %v7385_v37  ;;  %v7447_v48 = vsub.f32 %v6841_v19, %v7385_v37  ;;  %3622 = vmatprep.subr.bf16.mxu1 %v6013_v59  ;;  %1195 = vadd.xlane.f32.xlu1 %v1194_v6  ;;  %v136_v14 = vld [vmem:[%s12810_s0 + $0x3d0] sm:$0xff]  ;;  %v138_v3 = vld [vmem:[%s12810_s0 + $0x3e0] sm:$0xff]  ;;  %v139_v19 = vld [vmem:[%s12810_s0 + $0x3e8] sm:$0xff] }
  0xb3   :  { %13214 = vst [vmem:[#allocation17_spill] sm:$0xff] %v7426_v22  ;;  %13215 = vst [vmem:[#allocation18_spill] sm:$0xff] %v7432_v51  ;;  %403 = vadd.xlane.f32.xlu0 %v7321_v13  ;;  %v1199_v9 = vadd.f32 %v1198_v41, %v938_v26  ;;  %v945_v63 = vmul.f32 %v7389_v12, %v7389_v12  ;;  %v1207_v24 = vadd.f32 %v944_v39, %v943_v58  ;;  %v6017_v4 = vld [vmem:[%s12811_s1 + $0x214] ss:$24 sps:$4 sm:$0xff]   ;;  %v334_v58 = vpop.xlane.xlu0 %333  ;;  %v6021_v59 = vld [vmem:[%s12811_s1 + $0x210] ss:$24 sps:$4 sm:$0xff]  }
  0xb4   :  { %13216 = vst [vmem:[#allocation19_spill] sm:$0xff] %v7439_v32  ;;  %13217 = vst [vmem:[#allocation20_spill] sm:$0xff] %v7443_v46  ;;  %v6019_v13 = vld [vmem:[%s12811_s1 + $0x514] ss:$24 sps:$4 sm:$0xff]   ;;  %v7467_v26 = vmul.f32 0.001953125, %v329_v15  ;;  %v942_v41 = vmul.f32 %v7409_v38, %v7409_v38  ;;  %v420_v39 = vadd.f32 %v135_v23, %v134_v56  ;;  %3270 = vmatpush2.bf16.msra.mxu0 %v6015_v62  ;;  %3623 = vmatpush2.bf16.msra.mxu1 %v6016_v57 }
  0xb5   :  { %13218 = vst [vmem:[#allocation21_spill] sm:$0xff] %v7447_v48  ;;  %v6022_v6 = vld [vmem:[%s12811_s1 + $0x510] ss:$24 sps:$4 sm:$0xff]   ;;  %v1203_v11 = vadd.f32 %v1202_v10, %v941_v44  ;;  %v947_v56 = vmul.f32 %v7426_v22, %v7426_v22  ;;  %v948_v23 = vmul.f32 %v7432_v51, %v7432_v51  ;;  %v412_v62 = vadd.f32 %v411_v20, %v129_v50 }
  0xb6   :  { %v6363_v15 = vld [vmem:[%s12810_s0 + $0x130] sm:$0xff]  ;;  %v951_v10 = vmul.f32 %v7443_v46, %v7443_v46  ;;  %3271 = vmatprep.subr.bf16.mxu0 %v6017_v4  ;;  %408 = vadd.xlane.f32.xlu1 %v407_v42  ;;  %v417_v22 = vadd.f32 %v416_v8, %v133_v30  ;;  %v946_v20 = vmul.f32 %v7439_v32, %v7439_v32  ;;  %v7499_v50 = vmul.f32 0.001953125, %v334_v58  ;;  %v6023_v46 = vld [vmem:[%s12811_s1 + $0x1e4] ss:$24 sps:$4 sm:$0xff]  }
  0xb7   :  { %v7481_v47 = vsub.f32 %v6363_v15, %v7358_v27  ;;  %v6364_v12 = vld [vmem:[%s12810_s0 + $0x150] sm:$0xff]  ;;  %v952_v15 = vmul.f32 %v7447_v48, %v7447_v48  ;;  %1200 = vadd.xlane.f32.xlu0 %v1199_v9  ;;  %v1208_v57 = vadd.f32 %v1207_v24, %v945_v63  ;;  %v421_v51 = vadd.f32 %v420_v39, %v136_v14  ;;  %v6365_v8 = vld [vmem:[%s12810_s0 + $0x160] sm:$0xff]  ;;  %v6366_v63 = vld [vmem:[%s12810_s0 + $0x168] sm:$0xff] }
  0xb8   :  { %v7491_v44 = vsub.f32 %v6364_v12, %v7385_v37  ;;  %v137_v12 = vld [vmem:[%s12810_s0 + $0x3d8] sm:$0xff]  ;;  %v140_v42 = vld [vmem:[%s12810_s0 + $0x3f0] sm:$0xff]  ;;  %v425_v30 = vadd.f32 %v139_v19, %v138_v3  ;;  %v7514_v9 = vsub.f32 %v6365_v8, %v7467_v26  ;;  %v7520_v24 = vsub.f32 %v6366_v63, %v7467_v26  ;;  %3624 = vmatprep.subr.bf16.mxu1 %v6019_v13  ;;  %v339_v63 = vpop.xlane.xlu1 %338  ;;  %v143_v48 = vld [vmem:[%s12810_s0 + $0x408] sm:$0xff] }
  0xb9   :  { %13219 = vst [vmem:[#allocation22_spill] sm:$0xff] %v7481_v47  ;;  %v6025_v14 = vld [vmem:[%s12811_s1 + $0x4e4] ss:$24 sps:$4 sm:$0xff]   ;;  %v6027_v3 = vld [vmem:[%s12811_s1 + $0x1e0] ss:$24 sps:$4 sm:$0xff]   ;;  %v1204_v19 = vadd.f32 %v1203_v11, %v942_v41  ;;  %v949_v39 = vmul.f32 %v7481_v47, %v7481_v47  ;;  %v1212_v13 = vadd.f32 %v948_v23, %v947_v56  ;;  %3272 = vmatpush2.bf16.msra.mxu0 %v6021_v59  ;;  %v344_v56 = vpop.xlane.xlu0 %343 }
  0xba   :  { %13220 = vst [vmem:[#allocation23_spill] sm:$0xff] %v7491_v44  ;;  %13221 = vst [vmem:[#allocation24_spill] sm:$0xff] %v7514_v9  ;;  %v6367_v4 = vld [vmem:[%s12810_s0 + $0x138] sm:$0xff]  ;;  %3625 = vmatpush2.bf16.msra.mxu1 %v6022_v6  ;;  %3273 = vmatprep.subr.bf16.mxu0 %v6023_v46  ;;  %v1209_v59 = vadd.f32 %v1208_v57, %v946_v20  ;;  %v142_v23 = vld [vmem:[%s12810_s0 + $0x400] sm:$0xff] }
  0xbb   :  { %13222 = vst [vmem:[#allocation25_spill] sm:$0xff] %v7520_v24  ;;  %v7532_v58 = vsub.f32 %v6367_v4, %v7358_v27  ;;  %v6028_v8 = vld [vmem:[%s12811_s1 + $0x4e0] ss:$24 sps:$4 sm:$0xff]   ;;  %v953_v27 = vmul.f32 %v7491_v44, %v7491_v44  ;;  %v1217_v4 = vadd.f32 %v952_v15, %v951_v10  ;;  %1205 = vadd.xlane.f32.xlu1 %v1204_v19  ;;  %v6370_v46 = vld [vmem:[%s12810_s0 + $0x188] sm:$0xff]  ;;  %v6371_v20 = vld [vmem:[%s12810_s0 + $0x170] sm:$0xff] }
  0xbc   :  { %v6368_v41 = vld [vmem:[%s12810_s0 + $0x158] sm:$0xff]  ;;  %413 = vadd.xlane.f32.xlu0 %v412_v62  ;;  %v7563_v6 = vsub.f32 %v6370_v46, %v7499_v50  ;;  %v422_v62 = vadd.f32 %v421_v51, %v137_v12  ;;  %v7572_v57 = vsub.f32 %v6371_v20, %v7467_v26  ;;  %v955_v19 = vmul.f32 %v7514_v9, %v7514_v9  ;;  %v146_v51 = vld [vmem:[%s12810_s0 + $0x420] sm:$0xff]  ;;  %v147_v12 = vld [vmem:[%s12810_s0 + $0x428] sm:$0xff] }
  0xbd   :  { %13223 = vst [vmem:[#allocation26_spill] sm:$0xff] %v7532_v58  ;;  %v7543_v11 = vsub.f32 %v6368_v41, %v7385_v37  ;;  %v6369_v37 = vld [vmem:[%s12810_s0 + $0x180] sm:$0xff]  ;;  %v141_v15 = vld [vmem:[%s12810_s0 + $0x3f8] sm:$0xff]  ;;  %v956_v41 = vmul.f32 %v7520_v24, %v7520_v24  ;;  %3626 = vmatprep.subr.bf16.mxu1 %v6025_v14  ;;  %v7587_v46 = vmul.f32 0.001953125, %v339_v63  ;;  %v950_v20 = vmul.f32 %v7532_v58, %v7532_v58  ;;  %v144_v24 = vld [vmem:[%s12810_s0 + $0x410] sm:$0xff] }
  0xbe   :  { %v7557_v10 = vsub.f32 %v6369_v37, %v7499_v50  ;;  %13226 = vst [vmem:[#allocation29_spill] sm:$0xff] %v7563_v6  ;;  %13227 = vst [vmem:[#allocation30_spill] sm:$0xff] %v7572_v57  ;;  %v6029_v37 = vld [vmem:[%s12811_s1 + $0x1b4] ss:$24 sps:$4 sm:$0xff]   ;;  %v1213_v44 = vadd.f32 %v1212_v13, %v949_v39  ;;  %v426_v9 = vadd.f32 %v425_v30, %v140_v42  ;;  %3274 = vmatpush2.bf16.msra.mxu0 %v6027_v3  ;;  %v6033_v47 = vld [vmem:[%s12811_s1 + $0x1b0] ss:$24 sps:$4 sm:$0xff]  }
  0xbf   :  { %13224 = vst [vmem:[#allocation27_spill] sm:$0xff] %v7543_v11  ;;  %v6031_v14 = vld [vmem:[%s12811_s1 + $0x4b4] ss:$24 sps:$4 sm:$0xff]   ;;  %v954_v63 = vmul.f32 %v7543_v11, %v7543_v11  ;;  %v1218_v32 = vadd.f32 %v1217_v4, %v953_v27  ;;  %v7602_v58 = vmul.f32 0.001953125, %v344_v56  ;;  %v430_v42 = vadd.f32 %v143_v48, %v142_v23  ;;  %3627 = vmatpush2.bf16.msra.mxu1 %v6028_v8  ;;  %v6034_v27 = vld [vmem:[%s12811_s1 + $0x4b0] ss:$24 sps:$4 sm:$0xff]  }
  0xc0   :  { %13225 = vst [vmem:[#allocation28_spill] sm:$0xff] %v7557_v10  ;;  %418 = vadd.xlane.f32.xlu1 %v417_v22  ;;  %1210 = vadd.xlane.f32.xlu0 %v1209_v59  ;;  %v148_v30 = vld [vmem:[%s12810_s0 + $0x430] sm:$0xff]  ;;  %v959_v13 = vmul.f32 %v7557_v10, %v7557_v10  ;;  %v960_v48 = vmul.f32 %v7563_v6, %v7563_v6  ;;  %v150_v22 = vld [vmem:[%s12810_s0 + $0x440] sm:$0xff]  ;;  %v151_v8 = vld [vmem:[%s12810_s0 + $0x448] sm:$0xff] }
  0xc1   :  { %v6372_v3 = vld [vmem:[%s12810_s0 + $0x190] sm:$0xff]  ;;  %v6373_v4 = vld [vmem:[%s12810_s0 + $0x178] sm:$0xff]  ;;  %v957_v56 = vmul.f32 %v7572_v57, %v7572_v57  ;;  %v1222_v23 = vadd.f32 %v956_v41, %v955_v19  ;;  %3275 = vmatprep.subr.bf16.mxu0 %v6029_v37  ;;  %v1214_v11 = vadd.f32 %v1213_v44, %v950_v20  ;;  %v427_v31 = vadd.f32 %v426_v9, %v141_v15  ;;  %v6375_v19 = vld [vmem:[%s12810_s0 + $0x1a8] sm:$0xff] }
  0xc2   :  { %v7611_v39 = vsub.f32 %v6372_v3, %v7499_v50  ;;  %v7630_v59 = vsub.f32 %v6373_v4, %v7467_v26  ;;  %v435_v3 = vadd.f32 %v147_v12, %v146_v51  ;;  %v6035_v10 = vld [vmem:[%s12811_s1 + $0x184] ss:$24 sps:$4 sm:$0xff]   ;;  %v7650_v41 = vsub.f32 %v6375_v19, %v7587_v46  ;;  %3628 = vmatprep.subr.bf16.mxu1 %v6031_v14  ;;  %v349_v51 = vpop.xlane.xlu1 %348  ;;  %v6378_v14 = vld [vmem:[%s12810_s0 + $0x1c8] sm:$0xff] }
  0xc3   :  { %v6037_v6 = vld [vmem:[%s12811_s1 + $0x484] ss:$24 sps:$4 sm:$0xff]   ;;  %v431_v9 = vadd.f32 %v430_v42, %v144_v24  ;;  %v7671_v24 = vsub.f32 %v6378_v14, %v7602_v58  ;;  %3276 = vmatpush2.bf16.msra.mxu0 %v6033_v47  ;;  %v1219_v42 = vadd.f32 %v1218_v32, %v954_v63  ;;  %v1223_v14 = vadd.f32 %v1222_v23, %v957_v56  ;;  %v6379_v63 = vld [vmem:[%s12810_s0 + $0x1b0] sm:$0xff] }
  0xc4   :  { %13228 = vst [vmem:[#allocation31_spill] sm:$0xff] %v7611_v39  ;;  %13229 = vst [vmem:[#allocation32_spill] sm:$0xff] %v7630_v59  ;;  %v6374_v26 = vld [vmem:[%s12810_s0 + $0x1a0] sm:$0xff]  ;;  %v145_v44 = vld [vmem:[%s12810_s0 + $0x418] sm:$0xff]  ;;  %1215 = vadd.xlane.f32.xlu1 %v1214_v11  ;;  %423 = vadd.xlane.f32.xlu0 %v422_v62  ;;  %v961_v19 = vmul.f32 %v7611_v39, %v7611_v39  ;;  %v958_v47 = vmul.f32 %v7630_v59, %v7630_v59  ;;  %v354_v11 = vpop.xlane.xlu0 %353  ;;  %v7686_v32 = vmul.f32 0.001953125, %v349_v51 }
  0xc5   :  { %v7644_v4 = vsub.f32 %v6374_v26, %v7587_v46  ;;  %13231 = vst [vmem:[#allocation34_spill] sm:$0xff] %v7650_v41  ;;  %v6376_v15 = vld [vmem:[%s12810_s0 + $0x198] sm:$0xff]  ;;  %v6377_v37 = vld [vmem:[%s12810_s0 + $0x1c0] sm:$0xff]  ;;  %13234 = vst [vmem:[#allocation37_spill] sm:$0xff] %v7671_v24  ;;  %v436_v57 = vadd.f32 %v435_v3, %v148_v30  ;;  %v440_v62 = vadd.f32 %v151_v8, %v150_v22  ;;  %3629 = vmatpush2.bf16.msra.mxu1 %v6034_v27 }
  0xc6   :  { %v7659_v12 = vsub.f32 %v6376_v15, %v7499_v50  ;;  %v7665_v20 = vsub.f32 %v6377_v37, %v7602_v58  ;;  %v6039_v50 = vld [vmem:[%s12811_s1 + $0x180] ss:$24 sps:$4 sm:$0xff]   ;;  %v1227_v15 = vadd.f32 %v960_v48, %v959_v13  ;;  %v152_v37 = vld [vmem:[%s12810_s0 + $0x450] sm:$0xff]  ;;  %v7692_v13 = vsub.f32 %v6379_v63, %v7587_v46  ;;  %3277 = vmatprep.subr.bf16.mxu0 %v6035_v10  ;;  %v243_v59 = vld [vmem:[%s12810_s0 + $0x728] sm:$0xff] }
  0xc7   :  { %13230 = vst [vmem:[#allocation33_spill] sm:$0xff] %v7644_v4  ;;  %v149_v26 = vld [vmem:[%s12810_s0 + $0x438] sm:$0xff]  ;;  %v963_v48 = vmul.f32 %v7644_v4, %v7644_v4  ;;  %v964_v39 = vmul.f32 %v7650_v41, %v7650_v41  ;;  %v154_v30 = vld [vmem:[%s12810_s0 + $0x460] sm:$0xff]  ;;  %v6380_v8 = vld [vmem:[%s12810_s0 + $0x1d0] sm:$0xff]  ;;  %v968_v23 = vmul.f32 %v7671_v24, %v7671_v24  ;;  %3630 = vmatprep.subr.bf16.mxu1 %v6037_v6  ;;  %v7716_v63 = vmul.f32 0.001953125, %v354_v11 }
  0xc8   :  { %13232 = vst [vmem:[#allocation35_spill] sm:$0xff] %v7659_v12  ;;  %13233 = vst [vmem:[#allocation36_spill] sm:$0xff] %v7665_v20  ;;  %v6040_v22 = vld [vmem:[%s12811_s1 + $0x480] ss:$24 sps:$4 sm:$0xff]   ;;  %v7708_v27 = vsub.f32 %v6380_v8, %v7602_v58  ;;  %v967_v56 = vmul.f32 %v7665_v20, %v7665_v20  ;;  %428 = vadd.xlane.f32.xlu1 %v427_v31  ;;  %1220 = vadd.xlane.f32.xlu0 %v1219_v42  ;;  %v155_v20 = vld [vmem:[%s12810_s0 + $0x468] sm:$0xff] }
  0xc9   :  { %13235 = vst [vmem:[#allocation38_spill] sm:$0xff] %v7692_v13  ;;  %v432_v10 = vadd.f32 %v431_v9, %v145_v44  ;;  %v962_v3 = vmul.f32 %v7659_v12, %v7659_v12  ;;  %v1228_v51 = vadd.f32 %v1227_v15, %v961_v19  ;;  %v153_v8 = vld [vmem:[%s12810_s0 + $0x458] sm:$0xff]  ;;  %v1224_v4 = vadd.f32 %v1223_v14, %v958_v47  ;;  %v359_v9 = vpop.xlane.xlu1 %358  ;;  %v156_v15 = vld [vmem:[%s12810_s0 + $0x470] sm:$0xff]  ;;  %v242_v41 = vld [vmem:[%s12810_s0 + $0x720] sm:$0xff] }
  0xca   :  { %13236 = vst [vmem:[#allocation39_spill] sm:$0xff] %v7708_v27  ;;  %v437_v24 = vadd.f32 %v436_v57, %v149_v26  ;;  %v6381_v31 = vld [vmem:[%s12810_s0 + $0x1b8] sm:$0xff]  ;;  %v441_v44 = vadd.f32 %v440_v62, %v152_v37  ;;  %3278 = vmatpush2.bf16.msra.mxu0 %v6039_v50  ;;  %v965_v42 = vmul.f32 %v7692_v13, %v7692_v13  ;;  %v6382_v57 = vld [vmem:[%s12810_s0 + $0x1e0] sm:$0xff]  ;;  %v159_v37 = vld [vmem:[%s12810_s0 + $0x488] sm:$0xff] }
  0xcb   :  { %v7728_v6 = vsub.f32 %v6381_v31, %v7587_v46  ;;  %v1232_v19 = vadd.f32 %v964_v39, %v963_v48  ;;  %v7739_v26 = vsub.f32 %v6382_v57, %v7686_v32  ;;  %v6383_v46 = vld [vmem:[%s12810_s0 + $0x1e8] sm:$0xff]  ;;  %v158_v39 = vld [vmem:[%s12810_s0 + $0x480] sm:$0xff]  ;;  %3631 = vmatpush2.bf16.msra.mxu1 %v6040_v22  ;;  %v445_v47 = vadd.f32 %v155_v20, %v154_v30  ;;  %v6384_v14 = vld [vmem:[%s12810_s0 + $0x1d8] sm:$0xff]  ;;  %v364_v57 = vpop.xlane.xlu0 %363 }
  0xcc   :  { %v7745_v50 = vsub.f32 %v6383_v46, %v7686_v32  ;;  %v7757_v11 = vsub.f32 %v6384_v14, %v7602_v58  ;;  %v969_v62 = vmul.f32 %v7708_v27, %v7708_v27  ;;  %v1237_v48 = vadd.f32 %v968_v23, %v967_v56  ;;  %1225 = vadd.xlane.f32.xlu1 %v1224_v4  ;;  %v160_v22 = vld [vmem:[%s12810_s0 + $0x490] sm:$0xff]  ;;  %v162_v20 = vld [vmem:[%s12810_s0 + $0x4a0] sm:$0xff]  ;;  %v6386_v4 = vld [vmem:[%s12810_s0 + $0x208] sm:$0xff] }
  0xcd   :  { %13237 = vst [vmem:[#allocation40_spill] sm:$0xff] %v7728_v6  ;;  %13238 = vst [vmem:[#allocation41_spill] sm:$0xff] %v7739_v26  ;;  %433 = vadd.xlane.f32.xlu0 %v432_v10  ;;  %v1229_v31 = vadd.f32 %v1228_v51, %v962_v3  ;;  %v6385_v58 = vld [vmem:[%s12810_s0 + $0x200] sm:$0xff]  ;;  %v7777_v56 = vsub.f32 %v6386_v4, %v7716_v63  ;;  %v7779_v23 = vmul.f32 0.001953125, %v359_v9  ;;  %v157_v14 = vld [vmem:[%s12810_s0 + $0x478] sm:$0xff] }
  0xce   :  { %13239 = vst [vmem:[#allocation42_spill] sm:$0xff] %v7745_v50  ;;  %13240 = vst [vmem:[#allocation43_spill] sm:$0xff] %v7757_v11  ;;  %v7771_v30 = vsub.f32 %v6385_v58, %v7716_v63  ;;  %v966_v10 = vmul.f32 %v7728_v6, %v7728_v6  ;;  %v442_v3 = vadd.f32 %v441_v44, %v153_v8  ;;  %v6387_v58 = vld [vmem:[%s12810_s0 + $0x1f0] sm:$0xff]  ;;  %v163_v8 = vld [vmem:[%s12810_s0 + $0x4a8] sm:$0xff] }
  0xcf   :  { %13242 = vst [vmem:[#allocation45_spill] sm:$0xff] %v7777_v56  ;;  %v450_v51 = vadd.f32 %v159_v37, %v158_v39  ;;  %v1233_v46 = vadd.f32 %v1232_v19, %v965_v42  ;;  %v7790_v27 = vsub.f32 %v6387_v58, %v7686_v32  ;;  %v971_v9 = vmul.f32 %v7739_v26, %v7739_v26  ;;  %v161_v37 = vld [vmem:[%s12810_s0 + $0x498] sm:$0xff]  ;;  %v6388_v58 = vld [vmem:[%s12810_s0 + $0x210] sm:$0xff] }
  0xd0   :  { %13241 = vst [vmem:[#allocation44_spill] sm:$0xff] %v7771_v30  ;;  %v972_v4 = vmul.f32 %v7745_v50, %v7745_v50  ;;  %v446_v44 = vadd.f32 %v445_v47, %v156_v15  ;;  %v970_v42 = vmul.f32 %v7757_v11, %v7757_v11  ;;  %v1238_v19 = vadd.f32 %v1237_v48, %v969_v62  ;;  %v6389_v48 = vld [vmem:[%s12810_s0 + $0x220] sm:$0xff]  ;;  %v164_v11 = vld [vmem:[%s12810_s0 + $0x4b0] sm:$0xff]  ;;  %v173_v6 = vld [vmem:[%s12810_s0 + $0x4f8] sm:$0xff] }
  0xd1   :  { %13243 = vst [vmem:[#allocation46_spill] sm:$0xff] %v7790_v27  ;;  %v7801_v39 = vmul.f32 0.001953125, %v364_v57  ;;  %438 = vadd.xlane.f32.xlu1 %v437_v24  ;;  %1230 = vadd.xlane.f32.xlu0 %v1229_v31  ;;  %v7810_v26 = vsub.f32 %v6388_v58, %v7716_v63  ;;  %v975_v15 = vmul.f32 %v7771_v30, %v7771_v30  ;;  %v6390_v57 = vld [vmem:[%s12810_s0 + $0x228] sm:$0xff] }
  0xd2   :  { %v976_v47 = vmul.f32 %v7777_v56, %v7777_v56  ;;  %v451_v62 = vadd.f32 %v450_v51, %v160_v22  ;;  %v455_v24 = vadd.f32 %v163_v8, %v162_v20  ;;  %v7820_v31 = vsub.f32 %v6389_v48, %v7779_v23  ;;  %v6391_v22 = vld [vmem:[%s12810_s0 + $0x1f8] sm:$0xff]  ;;  %v369_v56 = vpop.xlane.xlu1 %368 }
  0xd3   :  { %13244 = vst [vmem:[#allocation47_spill] sm:$0xff] %v7810_v26  ;;  %v7826_v58 = vsub.f32 %v6390_v57, %v7779_v23  ;;  %v1234_v30 = vadd.f32 %v1233_v46, %v966_v10  ;;  %v7832_v20 = vsub.f32 %v6391_v22, %v7686_v32  ;;  %v973_v51 = vmul.f32 %v7790_v27, %v7790_v27  ;;  %v6392_v10 = vld [vmem:[%s12810_s0 + $0x218] sm:$0xff]  ;;  %v6393_v32 = vld [vmem:[%s12810_s0 + $0x240] sm:$0xff]  ;;  %v374_v22 = vpop.xlane.xlu0 %373 }
  0xd4   :  { %13245 = vst [vmem:[#allocation48_spill] sm:$0xff] %v7820_v31  ;;  %v1242_v8 = vadd.f32 %v972_v4, %v971_v9  ;;  %v447_v48 = vadd.f32 %v446_v44, %v157_v14  ;;  %v7843_v46 = vsub.f32 %v6392_v10, %v7716_v63  ;;  %v7849_v57 = vsub.f32 %v6393_v32, %v7801_v39  ;;  %v6394_v14 = vld [vmem:[%s12810_s0 + $0x248] sm:$0xff]  ;;  %v6395_v32 = vld [vmem:[%s12810_s0 + $0x230] sm:$0xff] }
  0xd5   :  { %13246 = vst [vmem:[#allocation49_spill] sm:$0xff] %v7826_v58  ;;  %13247 = vst [vmem:[#allocation50_spill] sm:$0xff] %v7832_v20  ;;  %v7855_v9 = vsub.f32 %v6394_v14, %v7801_v39  ;;  %1235 = vadd.xlane.f32.xlu1 %v1234_v30  ;;  %443 = vadd.xlane.f32.xlu0 %v442_v3  ;;  %v1239_v4 = vadd.f32 %v1238_v19, %v970_v42  ;;  %v166_v3 = vld [vmem:[%s12810_s0 + $0x4c0] sm:$0xff]  ;;  %v167_v42 = vld [vmem:[%s12810_s0 + $0x4c8] sm:$0xff]  ;;  %v7875_v19 = vmul.f32 0.001953125, %v369_v56 }
  0xd6   :  { %13248 = vst [vmem:[#allocation51_spill] sm:$0xff] %v7843_v46  ;;  %13249 = vst [vmem:[#allocation52_spill] sm:$0xff] %v7849_v57  ;;  %v977_v63 = vmul.f32 %v7810_v26, %v7810_v26  ;;  %v1247_v44 = vadd.f32 %v976_v47, %v975_v15  ;;  %v452_v10 = vadd.f32 %v451_v62, %v161_v37  ;;  %v170_v62 = vld [vmem:[%s12810_s0 + $0x4e0] sm:$0xff]  ;;  %v7885_v26 = vmul.f32 0.001953125, %v374_v22  ;;  %v6396_v56 = vld [vmem:[%s12810_s0 + $0x250] sm:$0xff] }
  0xd7   :  { %13250 = vst [vmem:[#allocation53_spill] sm:$0xff] %v7855_v9  ;;  %v7863_v27 = vsub.f32 %v6395_v32, %v7779_v23  ;;  %v979_v14 = vmul.f32 %v7820_v31, %v7820_v31  ;;  %v980_v30 = vmul.f32 %v7826_v58, %v7826_v58  ;;  %v974_v37 = vmul.f32 %v7832_v20, %v7832_v20  ;;  %v171_v32 = vld [vmem:[%s12810_s0 + $0x4e8] sm:$0xff]  ;;  %v165_v58 = vld [vmem:[%s12810_s0 + $0x4b8] sm:$0xff] }
  0xd8   :  { %v1243_v15 = vadd.f32 %v1242_v8, %v973_v51  ;;  %v456_v47 = vadd.f32 %v455_v24, %v164_v11  ;;  %v7891_v31 = vsub.f32 %v6396_v56, %v7801_v39  ;;  %v983_v11 = vmul.f32 %v7849_v57, %v7849_v57  ;;  %v6397_v56 = vld [vmem:[%s12810_s0 + $0x238] sm:$0xff] }
  0xd9   :  { %13251 = vst [vmem:[#allocation54_spill] sm:$0xff] %v7863_v27  ;;  %v984_v24 = vmul.f32 %v7855_v9, %v7855_v9  ;;  %448 = vadd.xlane.f32.xlu1 %v447_v48  ;;  %1240 = vadd.xlane.f32.xlu0 %v1239_v4  ;;  %v978_v51 = vmul.f32 %v7843_v46, %v7843_v46  ;;  %v172_v9 = vld [vmem:[%s12810_s0 + $0x4f0] sm:$0xff] }
  0xda   :  { %13252 = vst [vmem:[#allocation55_spill] sm:$0xff] %v7891_v31  ;;  %v1248_v8 = vadd.f32 %v1247_v44, %v977_v63  ;;  %v460_v22 = vadd.f32 %v167_v42, %v166_v3  ;;  %v7906_v57 = vsub.f32 %v6397_v56, %v7779_v23  ;;  %v981_v48 = vmul.f32 %v7863_v27, %v7863_v27  ;;  %v168_v63 = vld [vmem:[%s12810_s0 + $0x4d0] sm:$0xff]  ;;  %v379_v44 = vpop.xlane.xlu1 %378  ;;  %v6398_v23 = vld [vmem:[%s12810_s0 + $0x258] sm:$0xff] }
  0xdb   :  { %v1252_v4 = vadd.f32 %v980_v30, %v979_v14  ;;  %v465_v3 = vadd.f32 %v171_v32, %v170_v62  ;;  %v1244_v42 = vadd.f32 %v1243_v15, %v974_v37  ;;  %v7920_v56 = vsub.f32 %v6398_v23, %v7801_v39  ;;  %v6399_v14 = vld [vmem:[%s12810_s0 + $0x260] sm:$0xff]  ;;  %v6400_v37 = vld [vmem:[%s12810_s0 + $0x268] sm:$0xff] }
  0xdc   :  { %13253 = vst [vmem:[#allocation56_spill] sm:$0xff] %v7906_v57  ;;  %v7926_v30 = vsub.f32 %v6399_v14, %v7875_v19  ;;  %v7932_v15 = vsub.f32 %v6400_v37, %v7875_v19  ;;  %v174_v62 = vld [vmem:[%s12810_s0 + $0x500] sm:$0xff]  ;;  %v175_v39 = vld [vmem:[%s12810_s0 + $0x508] sm:$0xff]  ;;  %v985_v32 = vmul.f32 %v7891_v31, %v7891_v31  ;;  %v1257_v23 = vadd.f32 %v984_v24, %v983_v11 }
  0xdd   :  { %13254 = vst [vmem:[#allocation57_spill] sm:$0xff] %v7920_v56  ;;  %v6401_v14 = vld [vmem:[%s12810_s0 + $0x280] sm:$0xff]  ;;  %v6402_v37 = vld [vmem:[%s12810_s0 + $0x288] sm:$0xff]  ;;  %1245 = vadd.xlane.f32.xlu1 %v1244_v42  ;;  %453 = vadd.xlane.f32.xlu0 %v452_v10  ;;  %v457_v20 = vadd.f32 %v456_v47, %v165_v58  ;;  %v1249_v50 = vadd.f32 %v1248_v8, %v978_v51  ;;  %v612_v11 = vmul.f32 0.001953125, %v379_v44  ;;  %v6403_v10 = vld [vmem:[%s12810_s0 + $0x270] sm:$0xff] }
  0xde   :  { %13255 = vst [vmem:[#allocation58_spill] sm:$0xff] %v7926_v30  ;;  %13256 = vst [vmem:[#allocation59_spill] sm:$0xff] %v7932_v15  ;;  %v7946_v27 = vsub.f32 %v6401_v14, %v7885_v26  ;;  %v7952_v46 = vsub.f32 %v6402_v37, %v7885_v26  ;;  %v461_v31 = vadd.f32 %v460_v22, %v168_v63  ;;  %v169_v14 = vld [vmem:[%s12810_s0 + $0x4d8] sm:$0xff]  ;;  %v178_v22 = vld [vmem:[%s12810_s0 + $0x520] sm:$0xff] }
  0xdf   :  { %v982_v24 = vmul.f32 %v7906_v57, %v7906_v57  ;;  %v1253_v13 = vadd.f32 %v1252_v4, %v981_v48  ;;  %v466_v37 = vadd.f32 %v465_v3, %v172_v9  ;;  %v470_v12 = vadd.f32 %v175_v39, %v174_v62  ;;  %v176_v9 = vld [vmem:[%s12810_s0 + $0x510] sm:$0xff]  ;;  %v179_v48 = vld [vmem:[%s12810_s0 + $0x528] sm:$0xff]  ;;  %v6405_v39 = vld [vmem:[%s12810_s0 + $0x2a0] sm:$0xff] }
  0xe0   :  { %13257 = vst [vmem:[#allocation60_spill] sm:$0xff] %v7946_v27  ;;  %13258 = vst [vmem:[#allocation61_spill] sm:$0xff] %v7952_v46  ;;  %v986_v58 = vmul.f32 %v7920_v56, %v7920_v56  ;;  %v7968_v47 = vsub.f32 %v6403_v10, %v7875_v19  ;;  %v987_v51 = vmul.f32 %v7926_v30, %v7926_v30  ;;  %v6404_v63 = vld [vmem:[%s12810_s0 + $0x290] sm:$0xff]  ;;  %v239_v57 = vld [vmem:[%s12810_s0 + $0x708] sm:$0xff] }
  0xe1   :  { %v988_v8 = vmul.f32 %v7932_v15, %v7932_v15  ;;  %v1258_v4 = vadd.f32 %v1257_v23, %v985_v32  ;;  %v7987_v44 = vsub.f32 %v6404_v63, %v7885_v26  ;;  %v991_v3 = vmul.f32 %v7946_v27, %v7946_v27  ;;  %458 = vadd.xlane.f32.xlu1 %v457_v20  ;;  %v6406_v23 = vld [vmem:[%s12810_s0 + $0x2a8] sm:$0xff]  ;;  %v228_v15 = vld [vmem:[%s12810_s0 + $0x6b0] sm:$0xff] }
  0xe2   :  { %13259 = vst [vmem:[#allocation62_spill] sm:$0xff] %v7968_v47  ;;  %v992_v42 = vmul.f32 %v7952_v46, %v7952_v46  ;;  %1250 = vadd.xlane.f32.xlu0 %v1249_v50  ;;  %v462_v62 = vadd.f32 %v461_v31, %v169_v14  ;;  %v7996_v32 = vsub.f32 %v6405_v39, %v612_v11  ;;  %v6407_v50 = vld [vmem:[%s12810_s0 + $0x278] sm:$0xff] }
  0xe3   :  { %13260 = vst [vmem:[#allocation63_spill] sm:$0xff] %v7987_v44  ;;  %v8001_v10 = vsub.f32 %v6406_v23, %v612_v11  ;;  %v467_v63 = vadd.f32 %v466_v37, %v173_v6  ;;  %v471_v27 = vadd.f32 %v470_v12, %v176_v9  ;;  %v475_v30 = vadd.f32 %v179_v48, %v178_v22  ;;  %v177_v23 = vld [vmem:[%s12810_s0 + $0x518] sm:$0xff]  ;;  %v6409_v37 = vld [vmem:[%s12810_s0 + $0x2b0] sm:$0xff] }
  0xe4   :  { %13261 = vst [vmem:[#allocation64_spill] sm:$0xff] %v7996_v32  ;;  %v1254_v56 = vadd.f32 %v1253_v13, %v982_v24  ;;  %v8007_v31 = vsub.f32 %v6407_v50, %v7875_v19  ;;  %v989_v20 = vmul.f32 %v7968_v47, %v7968_v47  ;;  %v1262_v14 = vadd.f32 %v988_v8, %v987_v51  ;;  %v6408_v12 = vld [vmem:[%s12810_s0 + $0x298] sm:$0xff]  ;;  %v180_v24 = vld [vmem:[%s12810_s0 + $0x530] sm:$0xff]  ;;  %v183_v8 = vld [vmem:[%s12810_s0 + $0x548] sm:$0xff] }
  0xe5   :  { %13262 = vst [vmem:[#allocation65_spill] sm:$0xff] %v8001_v10  ;;  %v1259_v39 = vadd.f32 %v1258_v4, %v986_v58  ;;  %v8018_v13 = vsub.f32 %v6408_v12, %v7885_v26  ;;  %v993_v6 = vmul.f32 %v7987_v44, %v7987_v44  ;;  %v1267_v19 = vadd.f32 %v992_v42, %v991_v3  ;;  %v181_v4 = vld [vmem:[%s12810_s0 + $0x538] sm:$0xff] }
  0xe6   :  { %13263 = vst [vmem:[#allocation66_spill] sm:$0xff] %v8007_v31  ;;  %1255 = vadd.xlane.f32.xlu1 %v1254_v56  ;;  %463 = vadd.xlane.f32.xlu0 %v462_v62  ;;  %v8028_v58 = vsub.f32 %v6409_v37, %v612_v11  ;;  %v995_v26 = vmul.f32 %v7996_v32, %v7996_v32  ;;  %v182_v56 = vld [vmem:[%s12810_s0 + $0x540] sm:$0xff]  ;;  %v6410_v62 = vld [vmem:[%s12810_s0 + $0x2b8] sm:$0xff] }
  0xe7   :  { %13264 = vst [vmem:[#allocation67_spill] sm:$0xff] %v8018_v13  ;;  %v996_v51 = vmul.f32 %v8001_v10, %v8001_v10  ;;  %v990_v9 = vmul.f32 %v8007_v31, %v8007_v31  ;;  %v1263_v22 = vadd.f32 %v1262_v14, %v989_v20  ;;  %v472_v48 = vadd.f32 %v471_v27, %v177_v23  ;;  %v186_v14 = vld [vmem:[%s12810_s0 + $0x560] sm:$0xff]  ;;  %v201_v44 = vld [vmem:[%s12810_s0 + $0x5d8] sm:$0xff] }
  0xe8   :  { %13265 = vst [vmem:[#allocation68_spill] sm:$0xff] %v8028_v58  ;;  %v476_v3 = vadd.f32 %v475_v30, %v180_v24  ;;  %v994_v42 = vmul.f32 %v8018_v13, %v8018_v13  ;;  %v8050_v50 = vsub.f32 %v6410_v62, %v612_v11  ;;  %v480_v12 = vadd.f32 %v183_v8, %v182_v56  ;;  %v184_v30 = vld [vmem:[%s12810_s0 + $0x550] sm:$0xff]  ;;  %v187_v11 = vld [vmem:[%s12810_s0 + $0x568] sm:$0xff]  ;;  %v194_v62 = vld [vmem:[%s12810_s0 + $0x5a0] sm:$0xff] }
  0xe9   :  { %v1268_v37 = vadd.f32 %v1267_v19, %v993_v6  ;;  %v997_v27 = vmul.f32 %v8028_v58, %v8028_v58  ;;  %v1272_v20 = vadd.f32 %v996_v51, %v995_v26  ;;  %v1264_v23 = vadd.f32 %v1263_v22, %v990_v9  ;;  %v185_v51 = vld [vmem:[%s12810_s0 + $0x558] sm:$0xff]  ;;  %v188_v56 = vld [vmem:[%s12810_s0 + $0x570] sm:$0xff]  ;;  %v230_v13 = vld [vmem:[%s12810_s0 + $0x6c0] sm:$0xff] }
  0xea   :  { %13266 = vst [vmem:[#allocation69_spill] sm:$0xff] %v8050_v50  ;;  %468 = vadd.xlane.f32.xlu1 %v467_v63  ;;  %1260 = vadd.xlane.f32.xlu0 %v1259_v39  ;;  %v477_v63 = vadd.f32 %v476_v3, %v181_v4  ;;  %v481_v39 = vadd.f32 %v480_v12, %v184_v30  ;;  %v190_v3 = vld [vmem:[%s12810_s0 + $0x580] sm:$0xff]  ;;  %v195_v12 = vld [vmem:[%s12810_s0 + $0x5a8] sm:$0xff]  ;;  %v205_v46 = vld [vmem:[%s12810_s0 + $0x5f8] sm:$0xff] }
  0xeb   :  { %v485_v6 = vadd.f32 %v187_v11, %v186_v14  ;;  %v1269_v19 = vadd.f32 %v1268_v37, %v994_v42  ;;  %v998_v24 = vmul.f32 %v8050_v50, %v8050_v50  ;;  %v1273_v26 = vadd.f32 %v1272_v20, %v997_v27  ;;  %v191_v42 = vld [vmem:[%s12810_s0 + $0x588] sm:$0xff]  ;;  %v198_v37 = vld [vmem:[%s12810_s0 + $0x5c0] sm:$0xff]  ;;  %v192_v20 = vld [vmem:[%s12810_s0 + $0x590] sm:$0xff] }
  0xec   :  { %v482_v9 = vadd.f32 %v481_v39, %v185_v51  ;;  %v199_v27 = vld [vmem:[%s12810_s0 + $0x5c8] sm:$0xff]  ;;  %v202_v30 = vld [vmem:[%s12810_s0 + $0x5e0] sm:$0xff]  ;;  %v490_v11 = vadd.f32 %v191_v42, %v190_v3  ;;  %v193_v3 = vld [vmem:[%s12810_s0 + $0x598] sm:$0xff] }
  0xed   :  { %v1274_v8 = vadd.f32 %v1273_v26, %v998_v24  ;;  %v486_v22 = vadd.f32 %v485_v6, %v188_v56  ;;  %v203_v14 = vld [vmem:[%s12810_s0 + $0x5e8] sm:$0xff]  ;;  %v206_v39 = vld [vmem:[%s12810_s0 + $0x600] sm:$0xff]  ;;  %v500_v24 = vadd.f32 %v199_v27, %v198_v37  ;;  %v204_v26 = vld [vmem:[%s12810_s0 + $0x5f0] sm:$0xff] }
  0xee   :  { %1265 = vadd.xlane.f32.xlu1 %v1264_v23  ;;  %473 = vadd.xlane.f32.xlu0 %v472_v48  ;;  %v189_v48 = vld [vmem:[%s12810_s0 + $0x578] sm:$0xff]  ;;  %v196_v23 = vld [vmem:[%s12810_s0 + $0x5b0] sm:$0xff]  ;;  %v207_v6 = vld [vmem:[%s12810_s0 + $0x608] sm:$0xff] }
  0xef   :  { %v487_v4 = vadd.f32 %v486_v22, %v189_v48  ;;  %v210_v51 = vld [vmem:[%s12810_s0 + $0x620] sm:$0xff]  ;;  %v211_v56 = vld [vmem:[%s12810_s0 + $0x628] sm:$0xff]  ;;  %v208_v42 = vld [vmem:[%s12810_s0 + $0x610] sm:$0xff]  ;;  %v510_v58 = vadd.f32 %v207_v6, %v206_v39 }
  0xf0   :  { %v215_v22 = vld [vmem:[%s12810_s0 + $0x648] sm:$0xff]  ;;  %v218_v48 = vld [vmem:[%s12810_s0 + $0x660] sm:$0xff]  ;;  %v515_v32 = vadd.f32 %v211_v56, %v210_v51  ;;  %v216_v39 = vld [vmem:[%s12810_s0 + $0x650] sm:$0xff] }
  0xf1   :  { %v223_v37 = vld [vmem:[%s12810_s0 + $0x688] sm:$0xff]  ;;  %v226_v27 = vld [vmem:[%s12810_s0 + $0x6a0] sm:$0xff]  ;;  %v220_v6 = vld [vmem:[%s12810_s0 + $0x670] sm:$0xff]  ;;  %v511_v49 = vadd.f32 %v510_v58, %v208_v42 }
  0xf2   :  { %478 = vadd.xlane.f32.xlu1 %v477_v63  ;;  %1270 = vadd.xlane.f32.xlu0 %v1269_v19  ;;  %v200_v63 = vld [vmem:[%s12810_s0 + $0x5d0] sm:$0xff]  ;;  %v495_v19 = vadd.f32 %v195_v12, %v194_v62  ;;  %v222_v12 = vld [vmem:[%s12810_s0 + $0x680] sm:$0xff]  ;;  %v227_v50 = vld [vmem:[%s12810_s0 + $0x6a8] sm:$0xff] }
  0xf3   :  { %v212_v62 = vld [vmem:[%s12810_s0 + $0x630] sm:$0xff]  ;;  %v501_v10 = vadd.f32 %v500_v24, %v200_v63  ;;  %v235_v63 = vld [vmem:[%s12810_s0 + $0x6e8] sm:$0xff]  ;;  %v530_v31 = vadd.f32 %v223_v37, %v222_v12  ;;  %v246_v12 = vld [vmem:[%s12810_s0 + $0x740] sm:$0xff] }
  0xf4   :  { %v224_v51 = vld [vmem:[%s12810_s0 + $0x690] sm:$0xff]  ;;  %v516_v34 = vadd.f32 %v515_v32, %v212_v62  ;;  %v217_v32 = vld [vmem:[%s12810_s0 + $0x658] sm:$0xff]  ;;  %v555_v62 = vadd.f32 %v243_v59, %v242_v41  ;;  %v259_v59 = vld [vmem:[%s12810_s0 + $0x7a8] sm:$0xff] }
  0xf5   :  { %v8228_v38 = vadd.f32 %v501_v10, %v201_v44  ;;  %v240_v58 = vld [vmem:[%s12810_s0 + $0x710] sm:$0xff] }
  0xf6   :  { %1275 = vadd.xlane.f32.xlu1 %v1274_v8  ;;  %483 = vadd.xlane.f32.xlu0 %v482_v9  ;;  %v214_v8 = vld [vmem:[%s12810_s0 + $0x640] sm:$0xff]  ;;  %v505_v9 = vadd.f32 %v203_v14, %v202_v30  ;;  %v491_v30 = vadd.f32 %v490_v11, %v192_v20  ;;  %v197_v14 = vld [vmem:[%s12810_s0 + $0x5b8] sm:$0xff]  ;;  %v231_v20 = vld [vmem:[%s12810_s0 + $0x6c8] sm:$0xff]  ;;  %v496_v11 = vadd.f32 %v495_v19, %v196_v23 }
  0xf7   :  { %v234_v23 = vld [vmem:[%s12810_s0 + $0x6e0] sm:$0xff]  ;;  %v520_v56 = vadd.f32 %v215_v22, %v214_v8  ;;  %v213_v8 = vld [vmem:[%s12810_s0 + $0x638] sm:$0xff]  ;;  %v232_v22 = vld [vmem:[%s12810_s0 + $0x6d0] sm:$0xff] }
  0xf8   :  { %v238_v19 = vld [vmem:[%s12810_s0 + $0x700] sm:$0xff]  ;;  %v506_v24 = vadd.f32 %v505_v9, %v204_v26  ;;  %v209_v26 = vld [vmem:[%s12810_s0 + $0x618] sm:$0xff]  ;;  %v535_v9 = vadd.f32 %v227_v50, %v226_v27  ;;  %v8215_v37 = vadd.f32 %v491_v30, %v193_v3  ;;  %v545_v2 = vadd.f32 %v235_v63, %v234_v23  ;;  %v247_v50 = vld [vmem:[%s12810_s0 + $0x748] sm:$0xff] }
  0xf9   :  { %v251_v27 = vld [vmem:[%s12810_s0 + $0x768] sm:$0xff]  ;;  %v550_v3 = vadd.f32 %v239_v57, %v238_v19  ;;  %v244_v42 = vld [vmem:[%s12810_s0 + $0x730] sm:$0xff]  ;;  %v254_v30 = vld [vmem:[%s12810_s0 + $0x780] sm:$0xff]  ;;  %v521_v10 = vadd.f32 %v520_v56, %v216_v39  ;;  %v8264_v56 = vadd.f32 %v516_v34, %v213_v8 }
  0xfa   :  { %488 = vadd.xlane.f32.xlu1 %v487_v4  ;;  %v219_v4 = vld [vmem:[%s12810_s0 + $0x668] sm:$0xff]  ;;  %v8242_v44 = vadd.f32 %v506_v24, %v205_v46  ;;  %v258_v57 = vld [vmem:[%s12810_s0 + $0x7a0] sm:$0xff]  ;;  %v221_v46 = vld [vmem:[%s12810_s0 + $0x678] sm:$0xff]  ;;  %v536_v39 = vadd.f32 %v535_v9, %v228_v15  ;;  %v8262_v24 = vadd.f32 %v511_v49, %v209_v26  ;;  %v556_v8 = vadd.f32 %v555_v62, %v244_v42 }
  0xfb   :  { %v525_v47 = vadd.f32 %v219_v4, %v218_v48  ;;  %v540_v48 = vadd.f32 %v231_v20, %v230_v13  ;;  %v236_v4 = vld [vmem:[%s12810_s0 + $0x6f0] sm:$0xff]  ;;  %v250_v13 = vld [vmem:[%s12810_s0 + $0x760] sm:$0xff]  ;;  %v8226_v20 = vadd.f32 %v496_v11, %v197_v14  ;;  %v531_v11 = vadd.f32 %v530_v31, %v224_v51  ;;  %v255_v23 = vld [vmem:[%s12810_s0 + $0x788] sm:$0xff] }
  0xfc   :  { %v229_v31 = vld [vmem:[%s12810_s0 + $0x6b8] sm:$0xff]  ;;  %v560_v51 = vadd.f32 %v247_v50, %v246_v12  ;;  %v565_v63 = vadd.f32 %v251_v27, %v250_v13  ;;  %v546_v52 = vadd.f32 %v545_v2, %v236_v4  ;;  %v252_v15 = vld [vmem:[%s12810_s0 + $0x770] sm:$0xff]  ;;  %v551_v26 = vadd.f32 %v550_v3, %v240_v58 }
  0xfd   :  { %v526_v14 = vadd.f32 %v525_v47, %v220_v6  ;;  %v225_v47 = vld [vmem:[%s12810_s0 + $0x698] sm:$0xff]  ;;  %v541_v6 = vadd.f32 %v540_v48, %v232_v22  ;;  %v570_v9 = vadd.f32 %v255_v23, %v254_v30  ;;  %v575_v2 = vadd.f32 %v259_v59, %v258_v57  ;;  %v256_v13 = vld [vmem:[%s12810_s0 + $0x790] sm:$0xff]  ;;  %v263_v59 = vld [vmem:[%s12810_s0 + $0x7c8] sm:$0xff] }
  0xfe   :  { %v237_v49 = vld [vmem:[%s12810_s0 + $0x6f8] sm:$0xff]  ;;  %v8281_v48 = vadd.f32 %v521_v10, %v217_v32  ;;  %v8285_v12 = vadd.f32 %v531_v11, %v225_v47  ;;  %v260_v27 = vld [vmem:[%s12810_s0 + $0x7b0] sm:$0xff]  ;;  %v8296_v32 = vadd.f32 %v536_v39, %v229_v31  ;;  %v561_v30 = vadd.f32 %v560_v51, %v248_v29  ;;  %v6411_v31 = vld [vmem:[%s12810_s0 + $0x2c0] sm:$0xff] }
  0xff   :  { %v241_v34 = vld [vmem:[%s12810_s0 + $0x718] sm:$0xff]  ;;  %v8283_v4 = vadd.f32 %v526_v14, %v221_v46  ;;  %v8298_v42 = vadd.f32 %v541_v6, %v233_v16  ;;  %v566_v10 = vadd.f32 %v565_v63, %v252_v15  ;;  %v8303_v23 = vadd.f32 %v546_v52, %v237_v49  ;;  %v262_v16 = vld [vmem:[%s12810_s0 + $0x7c0] sm:$0xff]  ;;  %v6412_v6 = vld [vmem:[%s12810_s0 + $0x2c8] sm:$0xff] }
 0x100   :  { %v245_v50 = vld [vmem:[%s12810_s0 + $0x738] sm:$0xff]  ;;  %v571_v46 = vadd.f32 %v570_v9, %v256_v13  ;;  %v576_v47 = vadd.f32 %v575_v2, %v260_v27  ;;  %v6413_v63 = vld [vmem:[%s12810_s0 + $0x2d0] sm:$0xff]  ;;  %v266_v49 = vld [vmem:[%s12810_s0 + $0x7e0] sm:$0xff]  ;;  %v580_v27 = vadd.f32 %v263_v59, %v262_v16 }
 0x101   :  { %v249_v62 = vld [vmem:[%s12810_s0 + $0x758] sm:$0xff]  ;;  %v8316_v29 = vadd.f32 %v556_v8, %v245_v50  ;;  %v6415_v59 = vld [vmem:[%s12810_s0 + $0x2e0] sm:$0xff] }
 0x102   :  { %v253_v57 = vld [vmem:[%s12810_s0 + $0x778] sm:$0xff] }
 0x103   :  { %v257_v15 = vld [vmem:[%s12810_s0 + $0x798] sm:$0xff]  ;;  %v8349_v50 = vadd.f32 %v566_v10, %v253_v57 }
 0x104   :  { %v6414_v9 = vld [vmem:[%s12810_s0 + $0x2d8] sm:$0xff]  ;;  %v8363_v10 = vadd.f32 %v571_v46, %v257_v15  ;;  %v268_v46 = vld [vmem:[%s12810_s0 + $0x7f0] sm:$0xff] }
 0x105   :  { %v261_v13 = vld [vmem:[%s12810_s0 + $0x7b8] sm:$0xff] }
 0x127   :  { %v1171_v41 = vpop.xlane.xlu0 %1170 }
 0x128   :  { %v1487_v19 = vmul.f32 0.001953125, %v1171_v41  ;;  %v8314_v41 = vadd.f32 %v551_v26, %v241_v34  ;;  %v267_v34 = vld [vmem:[%s12810_s0 + $0x7e8] sm:$0xff] }
 0x129   :  { %v585_v57 = vadd.f32 %v267_v34, %v266_v49 }
 0x12a   :  { %v1551_v22 = vadd.f32 1e-05, %v1487_v19 }
 0x12b   :  { %v1176_v58 = vpop.xlane.xlu1 %1175  ;;  %v384_v3 = vpop.xlane.xlu0 %383 }
 0x12c   :  { %6233 = vrsqrt.f32 %v1551_v22  ;;  %v1488_v14 = vmul.f32 0.001953125, %v1176_v58  ;;  %v613_v11 = vmul.f32 0.001953125, %v384_v3  ;;  %v8347_v22 = vadd.f32 %v561_v30, %v249_v62 }
 0x12e   :  { %v1552_v52 = vadd.f32 1e-05, %v1488_v14  ;;  %v8321_v39 = vsub.f32 %v6411_v31, %v613_v11  ;;  %v8326_v51 = vsub.f32 %v6412_v6, %v613_v11  ;;  %v8331_v19 = vsub.f32 %v6413_v63, %v613_v11  ;;  %v6416_v31 = vld [vmem:[%s12810_s0 + $0x2e8] sm:$0xff] }
 0x12f   :  { %v389_v26 = vpop.xlane.xlu1 %388  ;;  %v1181_v8 = vpop.xlane.xlu0 %1180  ;;  %v8345_v2 = vsub.f32 %v6414_v9, %v613_v11  ;;  %v264_v11 = vld [vmem:[%s12810_s0 + $0x7d0] sm:$0xff]  ;;  %v8375_v63 = vadd.f32 %v576_v47, %v261_v13  ;;  %v6418_v13 = vld [vmem:[%s12810_s0 + $0x2f8] sm:$0xff] }
 0x130   :  { %13267 = vst [vmem:[#allocation70_spill] sm:$0xff] %v8321_v39  ;;  %13268 = vst [vmem:[#allocation71_spill] sm:$0xff] %v8326_v51  ;;  %6235 = vrsqrt.f32 %v1552_v52  ;;  %v614_v58 = vmul.f32 0.001953125, %v389_v26  ;;  %v1489_v3 = vmul.f32 0.001953125, %v1181_v8  ;;  %v999_v14 = vmul.f32 %v8321_v39, %v8321_v39  ;;  %v6417_v8 = vld [vmem:[%s12810_s0 + $0x2f0] sm:$0xff] }
 0x131   :  { %13269 = vst [vmem:[#allocation72_spill] sm:$0xff] %v8331_v19  ;;  %13270 = vst [vmem:[#allocation73_spill] sm:$0xff] %v8345_v2  ;;  %v1000_v62 = vmul.f32 %v8326_v51, %v8326_v51  ;;  %v1001_v30 = vmul.f32 %v8331_v19, %v8331_v19  ;;  %v1002_v34 = vmul.f32 %v8345_v2, %v8345_v2 }
 0x132   :  { %v1553_v16 = vadd.f32 1e-05, %v1489_v3  ;;  %v8368_v52 = vsub.f32 %v6415_v59, %v614_v58  ;;  %v8373_v6 = vsub.f32 %v6416_v31, %v614_v58  ;;  %v8385_v9 = vsub.f32 %v6417_v8, %v614_v58 }
 0x133   :  { %v1186_v15 = vpop.xlane.xlu1 %1185  ;;  %v394_v49 = vpop.xlane.xlu0 %393  ;;  %v1277_v26 = vadd.f32 %v1000_v62, %v999_v14  ;;  %v581_v3 = vadd.f32 %v580_v27, %v264_v11  ;;  %v8390_v31 = vsub.f32 %v6418_v13, %v614_v58  ;;  %v586_v39 = vadd.f32 %v585_v57, %v268_v46  ;;  %v6419_v27 = vld [vmem:[%s12810_s0 + $0x300] sm:$0xff]  ;;  %v6420_v58 = vld [vmem:[%s12810_s0 + $0x308] sm:$0xff]  ;;  %v6422_v13 = vld [vmem:[%s12810_s0 + $0x318] sm:$0xff] }
 0x134   :  { %13271 = vst [vmem:[#allocation74_spill] sm:$0xff] %v8368_v52  ;;  %13272 = vst [vmem:[#allocation75_spill] sm:$0xff] %v8373_v6  ;;  %v1490_v59 = vmul.f32 0.001953125, %v1186_v15  ;;  %v615_v47 = vmul.f32 0.001953125, %v394_v49  ;;  %v1003_v19 = vmul.f32 %v8368_v52, %v8368_v52  ;;  %6237 = vrsqrt.f32 %v1553_v16 }
 0x135   :  { %13273 = vst [vmem:[#allocation76_spill] sm:$0xff] %v8385_v9  ;;  %13274 = vst [vmem:[#allocation77_spill] sm:$0xff] %v8390_v31  ;;  %v1278_v14 = vadd.f32 %v1277_v26, %v1001_v30  ;;  %v1004_v62 = vmul.f32 %v8373_v6, %v8373_v6  ;;  %v6421_v30 = vld [vmem:[%s12810_s0 + $0x310] sm:$0xff]  ;;  %v1005_v26 = vmul.f32 %v8385_v9, %v8385_v9 }
 0x136   :  { %v1554_v8 = vadd.f32 1e-05, %v1490_v59  ;;  %v8399_v11 = vsub.f32 %v6419_v27, %v615_v47  ;;  %v8404_v15 = vsub.f32 %v6420_v58, %v615_v47  ;;  %v8409_v16 = vsub.f32 %v6421_v30, %v615_v47  ;;  %v265_v58 = vld [vmem:[%s12810_s0 + $0x7d8] sm:$0xff] }
 0x137   :  { %v399_v57 = vpop.xlane.xlu1 %398  ;;  %v1279_v49 = vadd.f32 %v1278_v14, %v1002_v34  ;;  %v1282_v59 = vadd.f32 %v1004_v62, %v1003_v19  ;;  %v8416_v27 = vsub.f32 %v6422_v13, %v615_v47  ;;  %v269_v30 = vld [vmem:[%s12810_s0 + $0x7f8] sm:$0xff]  ;;  %v1006_v14 = vmul.f32 %v8390_v31, %v8390_v31 }
 0x138   :  { %13275 = vst [vmem:[#allocation78_spill] sm:$0xff] %v8399_v11  ;;  %13276 = vst [vmem:[#allocation79_spill] sm:$0xff] %v8404_v15  ;;  %v1191_v46 = vpop.xlane.xlu0 %1190  ;;  %6239 = vrsqrt.f32 %v1554_v8  ;;  %v616_v34 = vmul.f32 0.001953125, %v399_v57  ;;  %v1007_v19 = vmul.f32 %v8399_v11, %v8399_v11  ;;  %v1008_v13 = vmul.f32 %v8404_v15, %v8404_v15 }
 0x139   :  { %13277 = vst [vmem:[#allocation80_spill] sm:$0xff] %v8409_v16  ;;  %v6234_v62 = vpop.eup %6233  ;;  %v1491_v9 = vmul.f32 0.001953125, %v1191_v46  ;;  %1280 = vadd.xlane.f32.xlu0 %v1279_v49  ;;  %v1283_v47 = vadd.f32 %v1282_v59, %v1005_v26  ;;  %v1009_v52 = vmul.f32 %v8409_v16, %v8409_v16  ;;  %v1010_v8 = vmul.f32 %v8416_v27, %v8416_v27 }
 0x13a   :  { %v1680_v57 = vmul.f32 %v6234_v62, %v7133_v54  ;;  %v8435_v6 = vadd.f32 %v581_v3, %v265_v58  ;;  %v8437_v31 = vadd.f32 %v586_v39, %v269_v30  ;;  %v1287_v49 = vadd.f32 %v1008_v13, %v1007_v19  ;;  %v6423_v54 = vld [vmem:[%s12810_s0 + $0x320] sm:$0xff] }
 0x13b   :  { %v1196_v11 = vpop.xlane.xlu1 %1195  ;;  %v1284_v46 = vadd.f32 %v1283_v47, %v1006_v14  ;;  %v1682_v26 = vmul.f32 %v6234_v62, %v7141_v61  ;;  %v1679_v59 = vmul.f32 %v6234_v62, %v7130_v53  ;;  %v1681_v16 = vmul.f32 %v6234_v62, %v7136_v55  ;;  %v6424_v53 = vld [vmem:[%s12810_s0 + $0x328] sm:$0xff]  ;;  %v6425_v55 = vld [vmem:[%s12810_s0 + $0x330] sm:$0xff] }
 0x13c   :  { %v404_v2 = vpop.xlane.xlu0 %403  ;;  %v1492_v15 = vmul.f32 0.001953125, %v1196_v11  ;;  %v8445_v3 = vsub.f32 %v6423_v54, %v616_v34  ;;  %v1555_v58 = vadd.f32 1e-05, %v1491_v9  ;;  %v1288_v30 = vadd.f32 %v1287_v49, %v1009_v52  ;;  %v6426_v9 = vld [vmem:[%s12810_s0 + $0x340] sm:$0xff]  ;;  %v6427_v52 = vld [vmem:[%s12810_s0 + $0x338] sm:$0xff] }
 0x13d   :  { %v617_v51 = vmul.f32 0.001953125, %v404_v2  ;;  %v6236_v39 = vpop.eup %6235  ;;  %1285 = vadd.xlane.f32.xlu1 %v1284_v46  ;;  %493 = vadd.xlane.f32.xlu0 %v8215_v37  ;;  %v8451_v61 = vsub.f32 %v6424_v53, %v616_v34  ;;  %v8456_v2 = vsub.f32 %v6425_v55, %v616_v34  ;;  %v8467_v19 = vsub.f32 %v6427_v52, %v616_v34  ;;  %v13279_v49 = vld [vmem:[#allocation5_spill] sm:$0xff]  ;;  %v6428_v53 = vld [vmem:[%s12810_s0 + $0x348] sm:$0xff] }
 0x13e   :  { %v1556_v11 = vadd.f32 1e-05, %v1492_v15  ;;  %v1684_v37 = vmul.f32 %v6236_v39, %v7187_v45  ;;  %v1289_v13 = vadd.f32 %v1288_v30, %v1010_v8  ;;  %v1686_v46 = vmul.f32 %v6236_v39, %v7195_v35  ;;  %v6429_v30 = vld [vmem:[%s12810_s0 + $0x360] sm:$0xff] }
 0x13f   :  { %v8461_v14 = vsub.f32 %v6426_v9, %v617_v51  ;;  %v409_v62 = vpop.xlane.xlu1 %408  ;;  %v1683_v15 = vmul.f32 %v6236_v39, %v7184_v40  ;;  %v1685_v54 = vmul.f32 %v6236_v39, %v13279_v49  ;;  %v8475_v45 = vsub.f32 %v6428_v53, %v617_v51  ;;  %v6432_v53 = vld [vmem:[%s12810_s0 + $0x358] sm:$0xff] }
 0x140   :  { %v1201_v47 = vpop.xlane.xlu0 %1200  ;;  %v8477_v55 = vmul.f32 0.001953125, %v409_v62  ;;  %v8479_v34 = vpack.c.bf16 %v1684_v37, %v1680_v57  ;;  %v8482_v8 = vpack.c.bf16 %v1686_v46, %v1682_v26  ;;  %6241 = vrsqrt.f32 %v1555_v58  ;;  %v6431_v46 = vld [vmem:[%s12810_s0 + $0x350] sm:$0xff] }
 0x141   :  { %13278 = vst [vmem:[#allocation81_spill] sm:$0xff] %v8461_v14  ;;  %13280 = vst [vmem:[#allocation5_spill] sm:$0xff] %v8475_v45  ;;  %v1493_v9 = vmul.f32 0.001953125, %v1201_v47  ;;  %498 = vadd.xlane.f32.xlu1 %v8226_v20  ;;  %1290 = vadd.xlane.f32.xlu0 %v1289_v13  ;;  %v8484_v35 = vpack.c.bf16 %v1683_v15, %v1679_v59  ;;  %v8486_v40 = vpack.c.bf16 %v1685_v54, %v1681_v16  ;;  %v8488_v39 = vpop.eup %6237  ;;  %v6430_v16 = vld [vmem:[%s12810_s0 + $0x368] sm:$0xff] }
 0x142   :  { %13281 = vst [vmem:[#allocation82_spill] sm:$0xff] %v8479_v34  ;;  %13282 = vst [vmem:[#allocation83_spill] sm:$0xff] %v8482_v8  ;;  %v8494_v52 = vsub.f32 %v6429_v30, %v8477_v55  ;;  %3279 = vmatprep.mubr.bf16.mxu0 %v8479_v34  ;;  %v1011_v20 = vmul.f32 %v8445_v3, %v8445_v3  ;;  %6243 = vrsqrt.f32 %v1556_v11  ;;  %3632 = vmatprep.mubr.bf16.mxu1 %v8482_v8  ;;  %v13288_v8 = vld [vmem:[#allocation3_spill] sm:$0xff] }
 0x143   :  { %13283 = vst [vmem:[#allocation84_spill] sm:$0xff] %v8484_v35  ;;  %13284 = vst [vmem:[#allocation85_spill] sm:$0xff] %v8486_v40  ;;  %v1557_v57 = vadd.f32 1e-05, %v1493_v9  ;;  %v8503_v26 = vsub.f32 %v6430_v16, %v8477_v55  ;;  %3280 = vmatmul.mubr.bf16.vlgmr.msra.gmra.mxu0 %v8484_v35  ;;  %v1012_v37 = vmul.f32 %v8451_v61, %v8451_v61  ;;  %3633 = vmatmul.mubr.bf16.vlgmr.msra.gmra.mxu1 %v8486_v40 }
 0x144   :  { %v1206_v59 = vpop.xlane.xlu1 %1205  ;;  %v1013_v62 = vmul.f32 %v8456_v2, %v8456_v2  ;;  %v1014_v13 = vmul.f32 %v8467_v19, %v8467_v19  ;;  %v8519_v15 = vsub.f32 %v6431_v46, %v617_v51  ;;  %v8525_v9 = vsub.f32 %v6432_v53, %v617_v51  ;;  %v6434_v51 = vld [vmem:[%s12810_s0 + $0x388] sm:$0xff] }
 0x145   :  { %v414_v58 = vpop.xlane.xlu0 %413  ;;  %v1494_v11 = vmul.f32 0.001953125, %v1206_v59  ;;  %v6240_v49 = vpop.eup %6239  ;;  %v1292_v54 = vadd.f32 %v1012_v37, %v1011_v20  ;;  %503 = vadd.xlane.f32.xlu0 %v8228_v38  ;;  %v1015_v30 = vmul.f32 %v8461_v14, %v8461_v14  ;;  %v1016_v16 = vmul.f32 %v8475_v45, %v8475_v45  ;;  %v6433_v20 = vld [vmem:[%s12810_s0 + $0x380] sm:$0xff] }
 0x146   :  { %v8512_v47 = vmul.f32 0.001953125, %v414_v58  ;;  %13285 = vst [vmem:[#allocation86_spill] sm:$0xff] %v8519_v15  ;;  %6245 = vrsqrt.f32 %v1557_v57  ;;  %v1017_v58 = vmul.f32 %v8519_v15, %v8519_v15  ;;  %v1018_v53 = vmul.f32 %v8525_v9, %v8525_v9 }
 0x147   :  { %v1558_v59 = vadd.f32 1e-05, %v1494_v11  ;;  %v1293_v46 = vadd.f32 %v1292_v54, %v1013_v62  ;;  %v1297_v40 = vadd.f32 %v1016_v16, %v1015_v30  ;;  %v1688_v34 = vmul.f32 %v8488_v39, %v13288_v8  ;;  %v6435_v54 = vld [vmem:[%s12810_s0 + $0x3a0] sm:$0xff] }
 0x148   :  { %v8535_v38 = vsub.f32 %v6433_v20, %v8512_v47  ;;  %v8543_v37 = vsub.f32 %v6434_v51, %v8512_v47  ;;  %v1692_v15 = vmul.f32 %v6240_v49, %v7211_v28  ;;  %v1690_v51 = vmul.f32 %v8488_v39, %v7163_v7 }
 0x149   :  { %v419_v57 = vpop.xlane.xlu1 %418  ;;  %v1211_v11 = vpop.xlane.xlu0 %1210  ;;  %v1294_v14 = vadd.f32 %v1293_v46, %v1014_v13  ;;  %v1298_v45 = vadd.f32 %v1297_v40, %v1017_v58  ;;  %v1694_v62 = vmul.f32 %v6240_v49, %v7229_v18  ;;  %6247 = vrsqrt.f32 %v1558_v59  ;;  %v13292_v13 = vld [vmem:[#allocation2_spill] sm:$0xff]  ;;  %v6043_v58 = vld [vmem:[%s12811_s1 + $0x15c] ss:$24 sps:$4 sm:$0xff]  }
 0x14a   :  { %13286 = vst [vmem:[#allocation87_spill] sm:$0xff] %v8535_v38  ;;  %13287 = vst [vmem:[#allocation88_spill] sm:$0xff] %v8543_v37  ;;  %v8547_v35 = vmul.f32 0.001953125, %v419_v57  ;;  %v1495_v20 = vmul.f32 0.001953125, %v1211_v11  ;;  %v8561_v57 = vpack.c.bf16 %v1692_v15, %v1688_v34  ;;  %v1687_v7 = vmul.f32 %v8488_v39, %v13292_v13  ;;  %v6436_v34 = vld [vmem:[%s12810_s0 + $0x3a8] sm:$0xff]  ;;  %v13293_v15 = vld [vmem:[#allocation4_spill] sm:$0xff]  ;;  %3953 = vmatprep.subr.bf16.mxu0 %v6043_v58 }
 0x14b   :  { %1295 = vadd.xlane.f32.xlu1 %v1294_v14  ;;  %v1299_v28 = vadd.f32 %v1298_v45, %v1018_v53  ;;  %v8563_v8 = vpack.c.bf16 %v1694_v62, %v1690_v51  ;;  %v1691_v18 = vmul.f32 %v6240_v49, %v7208_v25  ;;  %v1689_v46 = vmul.f32 %v8488_v39, %v13293_v15  ;;  %v6041_v11 = vld [vmem:[%s12811_s1 + $0x158] ss:$24 sps:$4 sm:$0xff]   ;;  %v6046_v53 = vld [vmem:[%s12811_s1 + $0x45c] ss:$24 sps:$4 sm:$0xff]  }
 0x14c   :  { %v8559_v30 = vsub.f32 %v6435_v54, %v8547_v35  ;;  %v1559_v16 = vadd.f32 1e-05, %v1495_v20  ;;  %13290 = vst [vmem:[#allocation89_spill] sm:$0xff] %v8561_v57  ;;  %v8575_v14 = vsub.f32 %v6436_v34, %v8547_v35  ;;  %3289 = vmatprep.mubr.bf16.mxu0 %v8561_v57  ;;  %v1693_v25 = vmul.f32 %v6240_v49, %v7216_v60  ;;  %v6437_v39 = vld [vmem:[%s12810_s0 + $0x370] sm:$0xff]  ;;  %v6438_v49 = vld [vmem:[%s12810_s0 + $0x378] sm:$0xff]  ;;  %v6440_v34 = vld [vmem:[%s12810_s0 + $0x3c8] sm:$0xff] }
 0x14d   :  { %13291 = vst [vmem:[#allocation90_spill] sm:$0xff] %v8563_v8  ;;  %v1216_v40 = vpop.xlane.xlu1 %1215  ;;  %v424_v59 = vpop.xlane.xlu0 %423  ;;  %1300 = vadd.xlane.f32.xlu0 %v1299_v28  ;;  %3642 = vmatprep.mubr.bf16.mxu1 %v8563_v8  ;;  %v8588_v20 = vpack.c.bf16 %v1691_v18, %v1687_v7  ;;  %v8596_v60 = vsub.f32 %v6437_v39, %v8477_v55  ;;  %v6044_v54 = vld [vmem:[%s12811_s1 + $0x458] ss:$24 sps:$4 sm:$0xff]  }
 0x14e   :  { %13289 = vst [vmem:[#allocation3_spill] sm:$0xff] %v8559_v30  ;;  %v1496_v45 = vmul.f32 0.001953125, %v1216_v40  ;;  %v8590_v51 = vmul.f32 0.001953125, %v424_v59  ;;  %v8602_v62 = vsub.f32 %v6438_v49, %v8477_v55  ;;  %v8607_v40 = vpack.c.bf16 %v1693_v25, %v1689_v46  ;;  %4306 = vmatprep.subr.bf16.mxu1 %v6046_v53  ;;  %v6242_v18 = vpop.eup %6241  ;;  %v6439_v55 = vld [vmem:[%s12810_s0 + $0x3c0] sm:$0xff]  ;;  %3954 = vmatpush1.bf16.msra.mxu0 %v6041_v11  ;;  %v6441_v49 = vld [vmem:[%s12810_s0 + $0x390] sm:$0xff] }
 0x14f   :  { %13294 = vst [vmem:[#allocation2_spill] sm:$0xff] %v8588_v20  ;;  %13295 = vst [vmem:[#allocation4_spill] sm:$0xff] %v8596_v60  ;;  %v1019_v13 = vmul.f32 %v8494_v52, %v8494_v52  ;;  %v1020_v7 = vmul.f32 %v8503_v26, %v8503_v26  ;;  %6249 = vrsqrt.f32 %v1559_v16  ;;  %508 = vadd.xlane.f32.xlu1 %v8242_v44  ;;  %3290 = vmatmul.mubr.bf16.gmra.mxu0 %v8588_v20  ;;  %v6244_v15 = vpop.eup %6243 }
 0x150   :  { %v1560_v28 = vadd.f32 1e-05, %v1496_v45  ;;  %13296 = vst [vmem:[#allocation91_spill] sm:$0xff] %v8607_v40  ;;  %v8619_v59 = vsub.f32 %v6439_v55, %v8590_v51  ;;  %v8625_v58 = vsub.f32 %v6440_v34, %v8590_v51  ;;  %v1021_v16 = vmul.f32 %v8596_v60, %v8596_v60  ;;  %3643 = vmatmul.mubr.bf16.gmra.mxu1 %v8607_v40 }
 0x151   :  { %v429_v44 = vpop.xlane.xlu1 %428  ;;  %v1221_v45 = vpop.xlane.xlu0 %1220  ;;  %v1022_v46 = vmul.f32 %v8602_v62, %v8602_v62  ;;  %v1302_v25 = vadd.f32 %v1020_v7, %v1019_v13  ;;  %513 = vadd.xlane.f32.xlu0 %v8262_v24  ;;  %v8639_v55 = vsub.f32 %v6441_v49, %v8512_v47  ;;  %v1023_v11 = vmul.f32 %v8535_v38, %v8535_v38  ;;  %v6443_v13 = vld [vmem:[%s12810_s0 + $0x3e0] sm:$0xff] }
 0x152   :  { %13297 = vst [vmem:[#allocation92_spill] sm:$0xff] %v8619_v59  ;;  %13298 = vst [vmem:[#allocation93_spill] sm:$0xff] %v8625_v58  ;;  %6251 = vrsqrt.f32 %v1560_v28  ;;  %v8632_v53 = vmul.f32 0.001953125, %v429_v44  ;;  %v1497_v39 = vmul.f32 0.001953125, %v1221_v45  ;;  %v6442_v28 = vld [vmem:[%s12810_s0 + $0x398] sm:$0xff]  ;;  %4307 = vmatpush1.bf16.msra.mxu1 %v6044_v54  ;;  %v6444_v44 = vld [vmem:[%s12810_s0 + $0x3e8] sm:$0xff]  ;;  %v1698_v57 = vmul.f32 %v6242_v18, %v7243_v0 }
 0x153   :  { %13299 = vst [vmem:[#allocation94_spill] sm:$0xff] %v8639_v55  ;;  %v8645_v34 = vsub.f32 %v6442_v28, %v8512_v47  ;;  %v1303_v24 = vadd.f32 %v1302_v25, %v1021_v16  ;;  %v1024_v47 = vmul.f32 %v8543_v37, %v8543_v37  ;;  %v8663_v49 = vpop.eup %6245  ;;  %v1025_v16 = vmul.f32 %v8639_v55, %v8639_v55 }
 0x154   :  { %v8653_v7 = vsub.f32 %v6443_v13, %v8632_v53  ;;  %v8659_v45 = vsub.f32 %v6444_v44, %v8632_v53  ;;  %v1561_v54 = vadd.f32 1e-05, %v1497_v39  ;;  %v1696_v28 = vmul.f32 %v6242_v18, %v7234_v21 }
 0x155   :  { %13300 = vst [vmem:[#allocation95_spill] sm:$0xff] %v8645_v34  ;;  %v1026_v25 = vmul.f32 %v8645_v34, %v8645_v34  ;;  %v1226_v13 = vpop.xlane.xlu1 %1225  ;;  %v1304_v20 = vadd.f32 %v1303_v24, %v1022_v46  ;;  %v1307_v8 = vadd.f32 %v1024_v47, %v1023_v11  ;;  %v1700_v44 = vmul.f32 %v6244_v15, %v7259_v36 }
 0x156   :  { %13301 = vst [vmem:[#allocation96_spill] sm:$0xff] %v8653_v7  ;;  %v434_v40 = vpop.xlane.xlu0 %433  ;;  %6253 = vrsqrt.f32 %v1561_v54  ;;  %v1702_v38 = vmul.f32 %v6244_v15, %v7297_v43  ;;  %v1498_v39 = vmul.f32 0.001953125, %v1226_v13  ;;  %v1695_v37 = vmul.f32 %v6242_v18, %v7219_v1  ;;  %v8678_v46 = vpop.eup %6247 }
 0x157   :  { %1305 = vadd.xlane.f32.xlu1 %v1304_v20  ;;  %v1308_v55 = vadd.f32 %v1307_v8, %v1025_v16  ;;  %v8674_v60 = vpack.c.bf16 %v1700_v44, %v1696_v28  ;;  %v1699_v21 = vmul.f32 %v6244_v15, %v7256_v33  ;;  %v1697_v34 = vmul.f32 %v6242_v18, %v7240_v5  ;;  %v6445_v5 = vld [vmem:[%s12810_s0 + $0x3b0] sm:$0xff]  ;;  %v6450_v28 = vld [vmem:[%s12810_s0 + $0x3d8] sm:$0xff] }
 0x158   :  { %v8680_v11 = vpack.c.bf16 %v1702_v38, %v1698_v57  ;;  %v1562_v36 = vadd.f32 1e-05, %v1498_v39  ;;  %v1701_v0 = vmul.f32 %v6244_v15, %v7272_v17  ;;  %v8683_v24 = vmul.f32 0.001953125, %v434_v40  ;;  %v6446_v17 = vld [vmem:[%s12810_s0 + $0x3b8] sm:$0xff]  ;;  %v6448_v40 = vld [vmem:[%s12810_s0 + $0x408] sm:$0xff]  ;;  %v6449_v16 = vld [vmem:[%s12810_s0 + $0x3d0] sm:$0xff] }
 0x159   :  { %13302 = vst [vmem:[#allocation97_spill] sm:$0xff] %v8674_v60  ;;  %v1309_v1 = vadd.f32 %v1308_v55, %v1026_v25  ;;  %3299 = vmatprep.mubr.bf16.mxu0 %v8674_v60  ;;  %v8686_v8 = vpack.c.bf16 %v1699_v21, %v1695_v37  ;;  %v8692_v33 = vsub.f32 %v6445_v5, %v8547_v35  ;;  %v6447_v37 = vld [vmem:[%s12810_s0 + $0x400] sm:$0xff] }
 0x15a   :  { %13303 = vst [vmem:[#allocation98_spill] sm:$0xff] %v8680_v11  ;;  %v439_v43 = vpop.xlane.xlu1 %438  ;;  %v1231_v47 = vpop.xlane.xlu0 %1230  ;;  %v8698_v38 = vsub.f32 %v6446_v17, %v8547_v35  ;;  %3652 = vmatprep.mubr.bf16.mxu1 %v8680_v11  ;;  %6255 = vrsqrt.f32 %v1562_v36  ;;  %v8701_v57 = vpack.c.bf16 %v1701_v0, %v1697_v34  ;;  %v8707_v20 = vsub.f32 %v6447_v37, %v8683_v24  ;;  %v6451_v0 = vld [vmem:[%s12810_s0 + $0x420] sm:$0xff]  ;;  %v13314_v11 = vld [vmem:[#allocation16_spill] sm:$0xff] }
 0x15b   :  { %13304 = vst [vmem:[#allocation99_spill] sm:$0xff] %v8686_v8  ;;  %13305 = vst [vmem:[#allocation100_spill] sm:$0xff] %v8692_v33  ;;  %v8713_v18 = vsub.f32 %v6448_v40, %v8683_v24  ;;  %518 = vadd.xlane.f32.xlu1 %v8264_v56  ;;  %1310 = vadd.xlane.f32.xlu0 %v1309_v1  ;;  %v1027_v35 = vmul.f32 %v8559_v30, %v8559_v30  ;;  %v8722_v34 = vmul.f32 0.001953125, %v439_v43 }
 0x15c   :  { %13306 = vst [vmem:[#allocation101_spill] sm:$0xff] %v8701_v57  ;;  %13307 = vst [vmem:[#allocation102_spill] sm:$0xff] %v8707_v20  ;;  %v1028_v15 = vmul.f32 %v8575_v14, %v8575_v14  ;;  %v1029_v55 = vmul.f32 %v8692_v33, %v8692_v33  ;;  %3300 = vmatmul.mubr.bf16.gmra.mxu0 %v8686_v8  ;;  %3653 = vmatmul.mubr.bf16.gmra.mxu1 %v8701_v57  ;;  %v1499_v56 = vmul.f32 0.001953125, %v1231_v47  ;;  %v8740_v21 = vpop.eup %6249  ;;  %v6452_v47 = vld [vmem:[%s12810_s0 + $0x428] sm:$0xff]  ;;  %v13313_v57 = vld [vmem:[#allocation10_spill] sm:$0xff] }
 0x15d   :  { %13308 = vst [vmem:[#allocation103_spill] sm:$0xff] %v8713_v18  ;;  %v1030_v54 = vmul.f32 %v8698_v38, %v8698_v38  ;;  %v8732_v25 = vsub.f32 %v6449_v16, %v8590_v51  ;;  %v8738_v13 = vsub.f32 %v6450_v28, %v8590_v51  ;;  %v8746_v43 = vsub.f32 %v6451_v0, %v8722_v34  ;;  %v13311_v16 = vld [vmem:[#allocation7_spill] sm:$0xff] }
 0x15e   :  { %v1236_v44 = vpop.xlane.xlu1 %1235  ;;  %v444_v39 = vpop.xlane.xlu0 %443  ;;  %v1312_v36 = vadd.f32 %v1028_v15, %v1027_v35  ;;  %v8752_v1 = vsub.f32 %v6452_v47, %v8722_v34  ;;  %v1031_v51 = vmul.f32 %v8619_v59, %v8619_v59  ;;  %v1563_v17 = vadd.f32 1e-05, %v1499_v56  ;;  %v13312_v0 = vld [vmem:[#allocation11_spill] sm:$0xff] }
 0x15f   :  { %13309 = vst [vmem:[#allocation104_spill] sm:$0xff] %v8732_v25  ;;  %13310 = vst [vmem:[#allocation105_spill] sm:$0xff] %v8738_v13  ;;  %v8756_v5 = vpop.eup %6251  ;;  %v1032_v37 = vmul.f32 %v8625_v58, %v8625_v58  ;;  %v1033_v40 = vmul.f32 %v8732_v25, %v8732_v25  ;;  %v1034_v35 = vmul.f32 %v8738_v13, %v8738_v13  ;;  %523 = vadd.xlane.f32.xlu0 %v8281_v48  ;;  %v13316_v48 = vld [vmem:[#allocation6_spill] sm:$0xff]  ;;  %v13317_v58 = vld [vmem:[#allocation9_spill] sm:$0xff] }
 0x160   :  { %v1313_v15 = vadd.f32 %v1312_v36, %v1029_v55  ;;  %v1704_v28 = vmul.f32 %v8663_v49, %v13311_v16  ;;  %v1708_v47 = vmul.f32 %v8678_v46, %v13312_v0  ;;  %v1706_v56 = vmul.f32 %v8663_v49, %v13313_v57 }
 0x161   :  { %6257 = vrsqrt.f32 %v1563_v17  ;;  %v1317_v8 = vadd.f32 %v1032_v37, %v1031_v51  ;;  %v1710_v60 = vmul.f32 %v8678_v46, %v13314_v11  ;;  %v1500_v25 = vmul.f32 0.001953125, %v1236_v44  ;;  %v13319_v51 = vld [vmem:[#allocation8_spill] sm:$0xff]  ;;  %v13321_v44 = vld [vmem:[#allocation13_spill] sm:$0xff] }
 0x162   :  { %v449_v59 = vpop.xlane.xlu1 %448  ;;  %v1241_v13 = vpop.xlane.xlu0 %1240  ;;  %v1314_v55 = vadd.f32 %v1313_v15, %v1030_v54  ;;  %v8773_v36 = vpack.c.bf16 %v1708_v47, %v1704_v28  ;;  %v1703_v16 = vmul.f32 %v8663_v49, %v13316_v48  ;;  %v1707_v0 = vmul.f32 %v8678_v46, %v13317_v58 }
 0x163   :  { %v1318_v33 = vadd.f32 %v1317_v8, %v1033_v40  ;;  %v8779_v30 = vpack.c.bf16 %v1710_v60, %v1706_v56  ;;  %v1564_v57 = vadd.f32 1e-05, %v1500_v25  ;;  %v1705_v17 = vmul.f32 %v8663_v49, %v13319_v51  ;;  %v8783_v11 = vpop.eup %6253  ;;  %v6453_v60 = vld [vmem:[%s12810_s0 + $0x3f0] sm:$0xff]  ;;  %v6454_v8 = vld [vmem:[%s12810_s0 + $0x3f8] sm:$0xff]  ;;  %v6047_v56 = vld [vmem:[%s12811_s1 + $0x128] ss:$24 sps:$4 sm:$0xff]  }
 0x164   :  { %13315 = vst [vmem:[#allocation7_spill] sm:$0xff] %v8773_v36  ;;  %1315 = vadd.xlane.f32.xlu1 %v1314_v55  ;;  %3309 = vmatprep.mubr.bf16.mxu0 %v8773_v36  ;;  %v8786_v54 = vpack.c.bf16 %v1707_v0, %v1703_v16  ;;  %v1709_v37 = vmul.f32 %v8678_v46, %v13321_v44  ;;  %v8790_v15 = vmul.f32 0.001953125, %v444_v39  ;;  %v6049_v55 = vld [vmem:[%s12811_s1 + $0x12c] ss:$24 sps:$4 sm:$0xff]   ;;  %v8834_v0 = vmul.f32 0.001953125, %v449_v59  ;;  %v6457_v59 = vld [vmem:[%s12810_s0 + $0x410] sm:$0xff] }
 0x165   :  { %13318 = vst [vmem:[#allocation11_spill] sm:$0xff] %v8779_v30  ;;  %v8796_v58 = vsub.f32 %v6453_v60, %v8632_v53  ;;  %v1319_v49 = vadd.f32 %v1318_v33, %v1034_v35  ;;  %3662 = vmatprep.mubr.bf16.mxu1 %v8779_v30  ;;  %6259 = vrsqrt.f32 %v1564_v57  ;;  %v8803_v25 = vsub.f32 %v6454_v8, %v8632_v53  ;;  %v6455_v33 = vld [vmem:[%s12810_s0 + $0x440] sm:$0xff]  ;;  %v6456_v53 = vld [vmem:[%s12810_s0 + $0x448] sm:$0xff] }
 0x166   :  { %13320 = vst [vmem:[#allocation10_spill] sm:$0xff] %v8786_v54  ;;  %v1035_v46 = vmul.f32 %v8653_v7, %v8653_v7  ;;  %v1246_v39 = vpop.xlane.xlu1 %1245  ;;  %3310 = vmatmul.mubr.bf16.gmra.mxu0 %v8786_v54  ;;  %v8808_v40 = vpack.c.bf16 %v1709_v37, %v1705_v17  ;;  %v8814_v35 = vsub.f32 %v6455_v33, %v8790_v15  ;;  %v1501_v57 = vmul.f32 0.001953125, %v1241_v13  ;;  %v454_v51 = vpop.xlane.xlu0 %453  ;;  %v6050_v17 = vld [vmem:[%s12811_s1 + $0x428] ss:$24 sps:$4 sm:$0xff]   ;;  %v6052_v44 = vld [vmem:[%s12811_s1 + $0x42c] ss:$24 sps:$4 sm:$0xff]  }
 0x167   :  { %13322 = vst [vmem:[#allocation16_spill] sm:$0xff] %v8796_v58  ;;  %v8820_v28 = vsub.f32 %v6456_v53, %v8790_v15  ;;  %v1036_v47 = vmul.f32 %v8659_v45, %v8659_v45  ;;  %1320 = vadd.xlane.f32.xlu0 %v1319_v49  ;;  %v1037_v48 = vmul.f32 %v8796_v58, %v8796_v58  ;;  %v8842_v37 = vpop.eup %6255  ;;  %v6458_v49 = vld [vmem:[%s12810_s0 + $0x418] sm:$0xff]  ;;  %v1502_v33 = vmul.f32 0.001953125, %v1246_v39  ;;  %v6460_v53 = vld [vmem:[%s12810_s0 + $0x468] sm:$0xff]  ;;  %v13331_v54 = vld [vmem:[#allocation18_spill] sm:$0xff] }
 0x168   :  { %13323 = vst [vmem:[#allocation6_spill] sm:$0xff] %v8808_v40  ;;  %13324 = vst [vmem:[#allocation9_spill] sm:$0xff] %v8814_v35  ;;  %v1038_v16 = vmul.f32 %v8803_v25, %v8803_v25  ;;  %528 = vadd.xlane.f32.xlu1 %v8283_v4  ;;  %3663 = vmatmul.mubr.bf16.gmra.mxu1 %v8808_v40  ;;  %v8850_v13 = vsub.f32 %v6457_v59, %v8683_v24  ;;  %v6459_v4 = vld [vmem:[%s12810_s0 + $0x460] sm:$0xff]  ;;  %v1565_v59 = vadd.f32 1e-05, %v1501_v57 }
 0x169   :  { %13325 = vst [vmem:[#allocation8_spill] sm:$0xff] %v8820_v28  ;;  %v1322_v60 = vadd.f32 %v1036_v47, %v1035_v46  ;;  %v8856_v8 = vsub.f32 %v6458_v49, %v8683_v24  ;;  %v8862_v46 = vsub.f32 %v6459_v4, %v8834_v0  ;;  %v8868_v47 = vsub.f32 %v6460_v53, %v8834_v0  ;;  %v13330_v57 = vld [vmem:[#allocation14_spill] sm:$0xff] }
 0x16a   :  { %13326 = vst [vmem:[#allocation13_spill] sm:$0xff] %v8850_v13  ;;  %v1039_v24 = vmul.f32 %v8707_v20, %v8707_v20  ;;  %3955 = vmatprep.subr.bf16.mxu0 %v6049_v55  ;;  %4308 = vmatprep.subr.bf16.mxu1 %v6052_v44  ;;  %v1040_v49 = vmul.f32 %v8713_v18, %v8713_v18  ;;  %6261 = vrsqrt.f32 %v1565_v59 }
 0x16b   :  { %13327 = vst [vmem:[#allocation106_spill] sm:$0xff] %v8856_v8  ;;  %13328 = vst [vmem:[#allocation107_spill] sm:$0xff] %v8862_v46  ;;  %v1323_v39 = vadd.f32 %v1322_v60, %v1037_v48  ;;  %v1041_v4 = vmul.f32 %v8850_v13, %v8850_v13  ;;  %v1042_v40 = vmul.f32 %v8856_v8, %v8856_v8  ;;  %3956 = vmatpush1.bf16.msra.mxu0 %v6047_v56  ;;  %v13332_v48 = vld [vmem:[#allocation19_spill] sm:$0xff]  ;;  %v459_v60 = vpop.xlane.xlu1 %458  ;;  %v13333_v13 = vld [vmem:[#allocation26_spill] sm:$0xff] }
 0x16c   :  { %13329 = vst [vmem:[#allocation108_spill] sm:$0xff] %v8868_v47  ;;  %533 = vadd.xlane.f32.xlu0 %v8285_v12  ;;  %v1712_v53 = vmul.f32 %v8740_v21, %v13330_v57  ;;  %v1716_v55 = vmul.f32 %v8756_v5, %v13331_v54  ;;  %v1714_v44 = vmul.f32 %v8740_v21, %v13332_v48  ;;  %v1566_v56 = vadd.f32 1e-05, %v1502_v33  ;;  %v13335_v12 = vld [vmem:[#allocation12_spill] sm:$0xff]  ;;  %v13336_v57 = vld [vmem:[#allocation17_spill] sm:$0xff]  ;;  %v13337_v54 = vld [vmem:[#allocation15_spill] sm:$0xff]  ;;  %v1251_v48 = vpop.xlane.xlu0 %1250 }
 0x16d   :  { %4309 = vmatpush1.bf16.msra.mxu1 %v6050_v17  ;;  %v1324_v30 = vadd.f32 %v1323_v39, %v1038_v16  ;;  %v1327_v36 = vadd.f32 %v1040_v49, %v1039_v24  ;;  %v1718_v20 = vmul.f32 %v8756_v5, %v13333_v13  ;;  %v1711_v59 = vmul.f32 %v8740_v21, %v13335_v12  ;;  %v13339_v13 = vld [vmem:[#allocation22_spill] sm:$0xff] }
 0x16e   :  { %v8887_v8 = vpack.c.bf16 %v1716_v55, %v1712_v53  ;;  %v1715_v18 = vmul.f32 %v8756_v5, %v13336_v57  ;;  %v1713_v58 = vmul.f32 %v8740_v21, %v13337_v54  ;;  %v8895_v7 = vpop.eup %6257  ;;  %6263 = vrsqrt.f32 %v1566_v56  ;;  %v6461_v21 = vld [vmem:[%s12810_s0 + $0x430] sm:$0xff] }
 0x16f   :  { %1325 = vadd.xlane.f32.xlu1 %v1324_v30  ;;  %v1328_v16 = vadd.f32 %v1327_v36, %v1041_v4  ;;  %v8897_v17 = vpack.c.bf16 %v1718_v20, %v1714_v44  ;;  %v1717_v33 = vmul.f32 %v8756_v5, %v13339_v13  ;;  %v8904_v39 = vmul.f32 0.001953125, %v454_v51  ;;  %v6462_v30 = vld [vmem:[%s12810_s0 + $0x438] sm:$0xff]  ;;  %v6463_v4 = vld [vmem:[%s12810_s0 + $0x480] sm:$0xff]  ;;  %v1256_v44 = vpop.xlane.xlu1 %1255  ;;  %v6465_v54 = vld [vmem:[%s12810_s0 + $0x450] sm:$0xff] }
 0x170   :  { %13334 = vst [vmem:[#allocation14_spill] sm:$0xff] %v8887_v8  ;;  %3319 = vmatprep.mubr.bf16.mxu0 %v8887_v8  ;;  %v8902_v24 = vpack.c.bf16 %v1715_v18, %v1711_v59  ;;  %v8910_v49 = vsub.f32 %v6461_v21, %v8722_v34  ;;  %v8916_v20 = vsub.f32 %v6462_v30, %v8722_v34  ;;  %v8945_v59 = vmul.f32 0.001953125, %v459_v60  ;;  %v6466_v13 = vld [vmem:[%s12810_s0 + $0x458] sm:$0xff]  ;;  %v464_v30 = vpop.xlane.xlu0 %463 }
 0x171   :  { %13338 = vst [vmem:[#allocation18_spill] sm:$0xff] %v8897_v17  ;;  %v1329_v5 = vadd.f32 %v1328_v16, %v1042_v40  ;;  %3672 = vmatprep.mubr.bf16.mxu1 %v8897_v17  ;;  %v8919_v18 = vpack.c.bf16 %v1717_v33, %v1713_v58  ;;  %v1043_v36 = vmul.f32 %v8746_v43, %v8746_v43  ;;  %v6464_v58 = vld [vmem:[%s12810_s0 + $0x488] sm:$0xff]  ;;  %v1503_v57 = vmul.f32 0.001953125, %v1251_v48  ;;  %v13347_v33 = vld [vmem:[#allocation21_spill] sm:$0xff] }
 0x172   :  { %13340 = vst [vmem:[#allocation19_spill] sm:$0xff] %v8902_v24  ;;  %13341 = vst [vmem:[#allocation26_spill] sm:$0xff] %v8910_v49  ;;  %v1044_v51 = vmul.f32 %v8752_v1, %v8752_v1  ;;  %3320 = vmatmul.mubr.bf16.gmra.mxu0 %v8902_v24  ;;  %v8930_v34 = vsub.f32 %v6463_v4, %v8904_v39  ;;  %v8936_v40 = vsub.f32 %v6464_v58, %v8904_v39  ;;  %v8942_v56 = vpop.eup %6259 }
 0x173   :  { %13342 = vst [vmem:[#allocation12_spill] sm:$0xff] %v8919_v18  ;;  %v1045_v53 = vmul.f32 %v8910_v49, %v8910_v49  ;;  %v1046_v55 = vmul.f32 %v8916_v20, %v8916_v20  ;;  %538 = vadd.xlane.f32.xlu1 %v8296_v32  ;;  %1330 = vadd.xlane.f32.xlu0 %v1329_v5  ;;  %v1567_v58 = vadd.f32 1e-05, %v1503_v57 }
 0x174   :  { %13343 = vst [vmem:[#allocation17_spill] sm:$0xff] %v8930_v34  ;;  %13344 = vst [vmem:[#allocation15_spill] sm:$0xff] %v8936_v40  ;;  %v1332_v12 = vadd.f32 %v1044_v51, %v1043_v36  ;;  %v8951_v16 = vsub.f32 %v6465_v54, %v8790_v15  ;;  %3673 = vmatmul.mubr.bf16.gmra.mxu1 %v8919_v18  ;;  %v8958_v32 = vsub.f32 %v6466_v13, %v8790_v15  ;;  %v6467_v36 = vld [vmem:[%s12810_s0 + $0x4a0] sm:$0xff]  ;;  %v6468_v15 = vld [vmem:[%s12810_s0 + $0x4a8] sm:$0xff] }
 0x175   :  { %v1047_v60 = vmul.f32 %v8814_v35, %v8814_v35  ;;  %v1048_v48 = vmul.f32 %v8820_v28, %v8820_v28  ;;  %v1720_v21 = vmul.f32 %v8783_v11, %v13347_v33  ;;  %v8970_v51 = vsub.f32 %v6467_v36, %v8945_v59  ;;  %v13348_v13 = vld [vmem:[#allocation25_spill] sm:$0xff]  ;;  %v13349_v18 = vld [vmem:[#allocation27_spill] sm:$0xff]  ;;  %v13352_v35 = vld [vmem:[#allocation20_spill] sm:$0xff] }
 0x176   :  { %13345 = vst [vmem:[#allocation22_spill] sm:$0xff] %v8951_v16  ;;  %13346 = vst [vmem:[#allocation109_spill] sm:$0xff] %v8958_v32  ;;  %v1333_v5 = vadd.f32 %v1332_v12, %v1045_v53  ;;  %v8976_v4 = vsub.f32 %v6468_v15, %v8945_v59  ;;  %v1049_v54 = vmul.f32 %v8951_v16, %v8951_v16  ;;  %6265 = vrsqrt.f32 %v1567_v58  ;;  %v13350_v15 = vld [vmem:[#allocation32_spill] sm:$0xff] }
 0x177   :  { %v1050_v53 = vmul.f32 %v8958_v32, %v8958_v32  ;;  %v1337_v12 = vadd.f32 %v1048_v48, %v1047_v60  ;;  %v1724_v33 = vmul.f32 %v8842_v37, %v13348_v13  ;;  %543 = vadd.xlane.f32.xlu0 %v8298_v42  ;;  %v1722_v24 = vmul.f32 %v8783_v11, %v13349_v18  ;;  %v469_v48 = vpop.xlane.xlu1 %468  ;;  %v8993_v32 = vpop.eup %6261  ;;  %v13354_v42 = vld [vmem:[#allocation24_spill] sm:$0xff]  ;;  %v13355_v18 = vld [vmem:[#allocation23_spill] sm:$0xff]  ;;  %v13356_v13 = vld [vmem:[#allocation30_spill] sm:$0xff] }
 0x178   :  { %v1334_v36 = vadd.f32 %v1333_v5, %v1046_v55  ;;  %v1726_v57 = vmul.f32 %v8842_v37, %v13350_v15  ;;  %v1504_v16 = vmul.f32 0.001953125, %v1256_v44  ;;  %v1719_v60 = vmul.f32 %v8783_v11, %v13352_v35 }
 0x179   :  { %v1338_v17 = vadd.f32 %v1337_v12, %v1049_v54  ;;  %v8989_v8 = vpack.c.bf16 %v1724_v33, %v1720_v21  ;;  %v1723_v5 = vmul.f32 %v8842_v37, %v13354_v42  ;;  %v1721_v58 = vmul.f32 %v8783_v11, %v13355_v18  ;;  %v1261_v33 = vpop.xlane.xlu0 %1260 }
 0x17a   :  { %1335 = vadd.xlane.f32.xlu1 %v1334_v36  ;;  %v8995_v55 = vpack.c.bf16 %v1726_v57, %v1722_v24  ;;  %v1725_v21 = vmul.f32 %v8842_v37, %v13356_v13  ;;  %v1568_v44 = vadd.f32 1e-05, %v1504_v16  ;;  %v9004_v35 = vmul.f32 0.001953125, %v464_v30  ;;  %v6469_v24 = vld [vmem:[%s12810_s0 + $0x470] sm:$0xff]  ;;  %v6470_v37 = vld [vmem:[%s12810_s0 + $0x478] sm:$0xff]  ;;  %v6472_v57 = vld [vmem:[%s12810_s0 + $0x4c8] sm:$0xff] }
 0x17b   :  { %13351 = vst [vmem:[#allocation21_spill] sm:$0xff] %v8989_v8  ;;  %v1339_v54 = vadd.f32 %v1338_v17, %v1050_v53  ;;  %3329 = vmatprep.mubr.bf16.mxu0 %v8989_v8  ;;  %v9010_v12 = vsub.f32 %v6469_v24, %v8834_v0  ;;  %v9013_v11 = vpack.c.bf16 %v1723_v5, %v1719_v60  ;;  %v9025_v30 = vpop.eup %6263  ;;  %v6471_v53 = vld [vmem:[%s12810_s0 + $0x4c0] sm:$0xff]  ;;  %v6473_v60 = vld [vmem:[%s12810_s0 + $0x4d0] sm:$0xff]  ;;  %v9053_v13 = vmul.f32 0.001953125, %v469_v48  ;;  %v6475_v48 = vld [vmem:[%s12810_s0 + $0x498] sm:$0xff] }
 0x17c   :  { %13353 = vst [vmem:[#allocation25_spill] sm:$0xff] %v8995_v55  ;;  %3682 = vmatprep.mubr.bf16.mxu1 %v8995_v55  ;;  %v9015_v36 = vpack.c.bf16 %v1725_v21, %v1721_v58  ;;  %v9021_v17 = vsub.f32 %v6470_v37, %v8834_v0  ;;  %v1051_v16 = vmul.f32 %v8862_v46, %v8862_v46  ;;  %6267 = vrsqrt.f32 %v1568_v44  ;;  %v6053_v21 = vld [vmem:[%s12811_s1 + $0xf8] ss:$24 sps:$4 sm:$0xff]  }
 0x17d   :  { %13357 = vst [vmem:[#allocation27_spill] sm:$0xff] %v9010_v12  ;;  %13358 = vst [vmem:[#allocation32_spill] sm:$0xff] %v9013_v11  ;;  %1340 = vadd.xlane.f32.xlu0 %v1339_v54  ;;  %v9031_v15 = vsub.f32 %v6471_v53, %v9004_v35  ;;  %v9037_v0 = vsub.f32 %v6472_v57, %v9004_v35  ;;  %v9043_v42 = vsub.f32 %v6473_v60, %v9004_v35  ;;  %v6474_v44 = vld [vmem:[%s12810_s0 + $0x490] sm:$0xff]  ;;  %v1266_v57 = vpop.xlane.xlu1 %1265  ;;  %v13367_v46 = vld [vmem:[#allocation29_spill] sm:$0xff] }
 0x17e   :  { %13359 = vst [vmem:[#allocation20_spill] sm:$0xff] %v9015_v36  ;;  %13360 = vst [vmem:[#allocation24_spill] sm:$0xff] %v9021_v17  ;;  %548 = vadd.xlane.f32.xlu1 %v8303_v23  ;;  %3330 = vmatmul.mubr.bf16.gmra.mxu0 %v9013_v11  ;;  %v1052_v5 = vmul.f32 %v8868_v47, %v8868_v47  ;;  %v1053_v18 = vmul.f32 %v9010_v12, %v9010_v12  ;;  %v6055_v23 = vld [vmem:[%s12811_s1 + $0xfc] ss:$24 sps:$4 sm:$0xff]   ;;  %v1505_v54 = vmul.f32 0.001953125, %v1261_v33 }
 0x17f   :  { %13361 = vst [vmem:[#allocation23_spill] sm:$0xff] %v9031_v15  ;;  %13362 = vst [vmem:[#allocation30_spill] sm:$0xff] %v9037_v0  ;;  %v1054_v58 = vmul.f32 %v9021_v17, %v9021_v17  ;;  %3683 = vmatmul.mubr.bf16.gmra.mxu1 %v9015_v36  ;;  %v9066_v24 = vsub.f32 %v6474_v44, %v8904_v39  ;;  %v9072_v37 = vsub.f32 %v6475_v48, %v8904_v39  ;;  %v6056_v33 = vld [vmem:[%s12811_s1 + $0x3f8] ss:$24 sps:$4 sm:$0xff]   ;;  %v6058_v60 = vld [vmem:[%s12811_s1 + $0x3fc] ss:$24 sps:$4 sm:$0xff]  }
 0x180   :  { %13363 = vst [vmem:[#allocation110_spill] sm:$0xff] %v9043_v42  ;;  %v1055_v53 = vmul.f32 %v8930_v34, %v8930_v34  ;;  %v1342_v44 = vadd.f32 %v1052_v5, %v1051_v16  ;;  %v6476_v36 = vld [vmem:[%s12810_s0 + $0x4e0] sm:$0xff]  ;;  %v6477_v48 = vld [vmem:[%s12810_s0 + $0x4e8] sm:$0xff]  ;;  %v6478_v55 = vld [vmem:[%s12810_s0 + $0x4f0] sm:$0xff]  ;;  %3957 = vmatprep.subr.bf16.mxu0 %v6055_v23  ;;  %v1569_v5 = vadd.f32 1e-05, %v1505_v54  ;;  %v474_v34 = vpop.xlane.xlu0 %473  ;;  %4310 = vmatprep.subr.bf16.mxu1 %v6058_v60 }
 0x181   :  { %13364 = vst [vmem:[#allocation111_spill] sm:$0xff] %v9066_v24  ;;  %13365 = vst [vmem:[#allocation112_spill] sm:$0xff] %v9072_v37  ;;  %v9086_v39 = vsub.f32 %v6476_v36, %v9053_v13  ;;  %v9092_v11 = vsub.f32 %v6477_v48, %v9053_v13  ;;  %v9098_v16 = vsub.f32 %v6478_v55, %v9053_v13  ;;  %553 = vadd.xlane.f32.xlu0 %v8314_v41  ;;  %v13368_v17 = vld [vmem:[#allocation34_spill] sm:$0xff]  ;;  %v13369_v41 = vld [vmem:[#allocation35_spill] sm:$0xff] }
 0x182   :  { %v1056_v36 = vmul.f32 %v8936_v40, %v8936_v40  ;;  %v1057_v8 = vmul.f32 %v9066_v24, %v9066_v24  ;;  %v1058_v48 = vmul.f32 %v9072_v37, %v9072_v37  ;;  %3958 = vmatpush1.bf16.msra.mxu0 %v6053_v21  ;;  %v1343_v12 = vadd.f32 %v1342_v44, %v1053_v18  ;;  %v13370_v47 = vld [vmem:[#allocation40_spill] sm:$0xff]  ;;  %v13373_v44 = vld [vmem:[#allocation33_spill] sm:$0xff] }
 0x183   :  { %13366 = vst [vmem:[#allocation113_spill] sm:$0xff] %v9098_v16  ;;  %v1728_v55 = vmul.f32 %v8895_v7, %v13367_v46  ;;  %v1732_v23 = vmul.f32 %v8942_v56, %v13368_v17  ;;  %v1730_v54 = vmul.f32 %v8895_v7, %v13369_v41  ;;  %6269 = vrsqrt.f32 %v1569_v5  ;;  %4311 = vmatpush1.bf16.msra.mxu1 %v6056_v33  ;;  %v13372_v18 = vld [vmem:[#allocation28_spill] sm:$0xff]  ;;  %v9121_v49 = vpop.eup %6265  ;;  %v13375_v5 = vld [vmem:[#allocation31_spill] sm:$0xff] }
 0x184   :  { %v1347_v40 = vadd.f32 %v1056_v36, %v1055_v53  ;;  %v1734_v24 = vmul.f32 %v8942_v56, %v13370_v47  ;;  %v1506_v28 = vmul.f32 0.001953125, %v1266_v57  ;;  %v1344_v37 = vadd.f32 %v1343_v12, %v1054_v58  ;;  %v479_v57 = vpop.xlane.xlu1 %478  ;;  %v13377_v58 = vld [vmem:[#allocation38_spill] sm:$0xff] }
 0x185   :  { %v9115_v21 = vpack.c.bf16 %v1732_v23, %v1728_v55  ;;  %v1727_v46 = vmul.f32 %v8895_v7, %v13372_v18  ;;  %v1731_v17 = vmul.f32 %v8942_v56, %v13373_v44  ;;  %v1729_v47 = vmul.f32 %v8895_v7, %v13375_v5  ;;  %v6480_v7 = vld [vmem:[%s12810_s0 + $0x4b8] sm:$0xff] }
 0x186   :  { %v1348_v41 = vadd.f32 %v1347_v40, %v1057_v8  ;;  %v9123_v60 = vpack.c.bf16 %v1734_v24, %v1730_v54  ;;  %v1570_v53 = vadd.f32 1e-05, %v1506_v28  ;;  %1345 = vadd.xlane.f32.xlu1 %v1344_v37  ;;  %v1733_v33 = vmul.f32 %v8942_v56, %v13377_v58  ;;  %v6479_v8 = vld [vmem:[%s12810_s0 + $0x4b0] sm:$0xff]  ;;  %v1271_v56 = vpop.xlane.xlu0 %1270 }
 0x187   :  { %13371 = vst [vmem:[#allocation29_spill] sm:$0xff] %v9115_v21  ;;  %3339 = vmatprep.mubr.bf16.mxu0 %v9115_v21  ;;  %v9128_v12 = vpack.c.bf16 %v1731_v17, %v1727_v46  ;;  %v9132_v36 = vmul.f32 0.001953125, %v474_v34  ;;  %v9138_v28 = vsub.f32 %v6479_v8, %v8945_v59  ;;  %v9145_v24 = vsub.f32 %v6480_v7, %v8945_v59  ;;  %v6482_v59 = vld [vmem:[%s12810_s0 + $0x508] sm:$0xff]  ;;  %v6483_v54 = vld [vmem:[%s12810_s0 + $0x510] sm:$0xff] }
 0x188   :  { %13374 = vst [vmem:[#allocation34_spill] sm:$0xff] %v9123_v60  ;;  %v1349_v40 = vadd.f32 %v1348_v41, %v1058_v48  ;;  %3692 = vmatprep.mubr.bf16.mxu1 %v9123_v60  ;;  %6271 = vrsqrt.f32 %v1570_v53  ;;  %v1059_v34 = vmul.f32 %v8970_v51, %v8970_v51  ;;  %v9150_v37 = vpack.c.bf16 %v1733_v33, %v1729_v47  ;;  %v6481_v48 = vld [vmem:[%s12810_s0 + $0x500] sm:$0xff]  ;;  %v6484_v47 = vld [vmem:[%s12810_s0 + $0x4d8] sm:$0xff]  ;;  %v6486_v7 = vld [vmem:[%s12810_s0 + $0x528] sm:$0xff] }
 0x189   :  { %13376 = vst [vmem:[#allocation35_spill] sm:$0xff] %v9128_v12  ;;  %13378 = vst [vmem:[#allocation40_spill] sm:$0xff] %v9138_v28  ;;  %3340 = vmatmul.mubr.bf16.gmra.mxu0 %v9128_v12  ;;  %v9156_v55 = vsub.f32 %v6481_v48, %v9132_v36  ;;  %v9162_v23 = vsub.f32 %v6482_v59, %v9132_v36  ;;  %v9168_v18 = vsub.f32 %v6483_v54, %v9132_v36  ;;  %v9178_v53 = vpop.eup %6267  ;;  %v1276_v48 = vpop.xlane.xlu1 %1275  ;;  %v13385_v12 = vld [vmem:[#allocation42_spill] sm:$0xff] }
 0x18a   :  { %13379 = vst [vmem:[#allocation28_spill] sm:$0xff] %v9150_v37  ;;  %1350 = vadd.xlane.f32.xlu0 %v1349_v40  ;;  %v1060_v46 = vmul.f32 %v8976_v4, %v8976_v4  ;;  %v1061_v44 = vmul.f32 %v9138_v28, %v9138_v28  ;;  %v1062_v17 = vmul.f32 %v9145_v24, %v9145_v24  ;;  %v9176_v41 = vmul.f32 0.001953125, %v479_v57 }
 0x18b   :  { %13380 = vst [vmem:[#allocation33_spill] sm:$0xff] %v9156_v55  ;;  %13381 = vst [vmem:[#allocation31_spill] sm:$0xff] %v9162_v23  ;;  %558 = vadd.xlane.f32.xlu1 %v8316_v29  ;;  %3693 = vmatmul.mubr.bf16.gmra.mxu1 %v9150_v37  ;;  %v1507_v5 = vmul.f32 0.001953125, %v1271_v56  ;;  %v9186_v58 = vsub.f32 %v6484_v47, %v9004_v35  ;;  %v1063_v33 = vmul.f32 %v9031_v15, %v9031_v15  ;;  %v6485_v29 = vld [vmem:[%s12810_s0 + $0x520] sm:$0xff]  ;;  %v6487_v56 = vld [vmem:[%s12810_s0 + $0x530] sm:$0xff] }
 0x18c   :  { %13382 = vst [vmem:[#allocation38_spill] sm:$0xff] %v9168_v18  ;;  %v1064_v57 = vmul.f32 %v9037_v0, %v9037_v0  ;;  %v1352_v8 = vadd.f32 %v1060_v46, %v1059_v34  ;;  %v9196_v40 = vsub.f32 %v6485_v29, %v9176_v41  ;;  %v9202_v35 = vsub.f32 %v6486_v7, %v9176_v41  ;;  %v13384_v7 = vld [vmem:[#allocation37_spill] sm:$0xff]  ;;  %v13387_v15 = vld [vmem:[#allocation50_spill] sm:$0xff] }
 0x18d   :  { %13383 = vst [vmem:[#allocation114_spill] sm:$0xff] %v9186_v58  ;;  %v9208_v34 = vsub.f32 %v6487_v56, %v9176_v41  ;;  %v1571_v59 = vadd.f32 1e-05, %v1507_v5  ;;  %v1065_v54 = vmul.f32 %v9043_v42, %v9043_v42  ;;  %v1066_v46 = vmul.f32 %v9186_v58, %v9186_v58  ;;  %v13386_v56 = vld [vmem:[#allocation43_spill] sm:$0xff]  ;;  %v484_v58 = vpop.xlane.xlu0 %483 }
 0x18e   :  { %v1357_v47 = vadd.f32 %v1064_v57, %v1063_v33  ;;  %v1353_v29 = vadd.f32 %v1352_v8, %v1061_v44  ;;  %563 = vadd.xlane.f32.xlu0 %v8347_v22  ;;  %v1736_v37 = vmul.f32 %v8993_v32, %v13384_v7  ;;  %v1740_v60 = vmul.f32 %v9025_v30, %v13385_v12  ;;  %v13389_v22 = vld [vmem:[#allocation36_spill] sm:$0xff]  ;;  %v13390_v8 = vld [vmem:[#allocation41_spill] sm:$0xff] }
 0x18f   :  { %v1738_v21 = vmul.f32 %v8993_v32, %v13386_v56  ;;  %6273 = vrsqrt.f32 %v1571_v59  ;;  %v1742_v42 = vmul.f32 %v9025_v30, %v13387_v15  ;;  %v1508_v0 = vmul.f32 0.001953125, %v1276_v48 }
 0x190   :  { %v1358_v5 = vadd.f32 %v1357_v47, %v1065_v54  ;;  %v1354_v33 = vadd.f32 %v1353_v29, %v1062_v17  ;;  %v9223_v44 = vpack.c.bf16 %v1740_v60, %v1736_v37  ;;  %v1735_v57 = vmul.f32 %v8993_v32, %v13389_v22  ;;  %v9229_v12 = vpop.eup %6269  ;;  %v13392_v54 = vld [vmem:[#allocation39_spill] sm:$0xff]  ;;  %v13394_v37 = vld [vmem:[#allocation46_spill] sm:$0xff] }
 0x191   :  { %v1739_v7 = vmul.f32 %v9025_v30, %v13390_v8  ;;  %v9231_v56 = vpack.c.bf16 %v1742_v42, %v1738_v21  ;;  %v1572_v59 = vadd.f32 1e-05, %v1508_v0  ;;  %v1737_v15 = vmul.f32 %v8993_v32, %v13392_v54  ;;  %v489_v0 = vpop.xlane.xlu1 %488  ;;  %v6490_v47 = vld [vmem:[%s12810_s0 + $0x548] sm:$0xff] }
 0x192   :  { %13388 = vst [vmem:[#allocation37_spill] sm:$0xff] %v9223_v44  ;;  %v1359_v28 = vadd.f32 %v1358_v5, %v1066_v46  ;;  %1355 = vadd.xlane.f32.xlu1 %v1354_v33  ;;  %3349 = vmatprep.mubr.bf16.mxu0 %v9223_v44  ;;  %v1741_v17 = vmul.f32 %v9025_v30, %v13394_v37  ;;  %v9240_v48 = vmul.f32 0.001953125, %v484_v58  ;;  %v6488_v46 = vld [vmem:[%s12810_s0 + $0x4f8] sm:$0xff]  ;;  %v6491_v5 = vld [vmem:[%s12810_s0 + $0x550] sm:$0xff]  ;;  %v6061_v37 = vld [vmem:[%s12811_s1 + $0xcc] ss:$24 sps:$4 sm:$0xff]  }
 0x193   :  { %13391 = vst [vmem:[#allocation42_spill] sm:$0xff] %v9231_v56  ;;  %v9236_v60 = vpack.c.bf16 %v1739_v7, %v1735_v57  ;;  %v9246_v42 = vsub.f32 %v6488_v46, %v9053_v13  ;;  %3702 = vmatprep.mubr.bf16.mxu1 %v9231_v56  ;;  %6275 = vrsqrt.f32 %v1572_v59  ;;  %v1067_v32 = vmul.f32 %v9086_v39, %v9086_v39  ;;  %v6489_v13 = vld [vmem:[%s12810_s0 + $0x540] sm:$0xff]  ;;  %v6492_v59 = vld [vmem:[%s12810_s0 + $0x518] sm:$0xff]  ;;  %v13401_v56 = vld [vmem:[#allocation51_spill] sm:$0xff] }
 0x194   :  { %1360 = vadd.xlane.f32.xlu0 %v1359_v28  ;;  %v1068_v30 = vmul.f32 %v9092_v11, %v9092_v11  ;;  %v1069_v21 = vmul.f32 %v9098_v16, %v9098_v16  ;;  %v9256_v58 = vpack.c.bf16 %v1741_v17, %v1737_v15  ;;  %v9262_v28 = vsub.f32 %v6489_v13, %v9240_v48  ;;  %v6059_v15 = vld [vmem:[%s12811_s1 + $0xc8] ss:$24 sps:$4 sm:$0xff]  }
 0x195   :  { %13393 = vst [vmem:[#allocation43_spill] sm:$0xff] %v9236_v60  ;;  %3350 = vmatmul.mubr.bf16.gmra.mxu0 %v9236_v60  ;;  %v9268_v29 = vsub.f32 %v6490_v47, %v9240_v48  ;;  %v9274_v33 = vsub.f32 %v6491_v5, %v9240_v48  ;;  %v9276_v22 = vpop.eup %6271  ;;  %v1070_v57 = vmul.f32 %v9246_v42, %v9246_v42  ;;  %v9280_v7 = vmul.f32 0.001953125, %v489_v0  ;;  %v6064_v0 = vld [vmem:[%s12811_s1 + $0x3cc] ss:$24 sps:$4 sm:$0xff]  }
 0x196   :  { %13395 = vst [vmem:[#allocation50_spill] sm:$0xff] %v9256_v58  ;;  %v1362_v8 = vadd.f32 %v1068_v30, %v1067_v32  ;;  %v9286_v54 = vsub.f32 %v6492_v59, %v9132_v36  ;;  %568 = vadd.xlane.f32.xlu1 %v8349_v50  ;;  %3703 = vmatmul.mubr.bf16.gmra.mxu1 %v9256_v58  ;;  %v6493_v50 = vld [vmem:[%s12810_s0 + $0x560] sm:$0xff]  ;;  %v6494_v13 = vld [vmem:[%s12810_s0 + $0x568] sm:$0xff]  ;;  %v13399_v59 = vld [vmem:[#allocation45_spill] sm:$0xff] }
 0x197   :  { %13396 = vst [vmem:[#allocation36_spill] sm:$0xff] %v9274_v33  ;;  %v1071_v17 = vmul.f32 %v9156_v55, %v9156_v55  ;;  %v1072_v46 = vmul.f32 %v9162_v23, %v9162_v23  ;;  %v1073_v36 = vmul.f32 %v9168_v18, %v9168_v18  ;;  %v9310_v30 = vsub.f32 %v6493_v50, %v9280_v7  ;;  %v13400_v58 = vld [vmem:[#allocation49_spill] sm:$0xff]  ;;  %v13402_v18 = vld [vmem:[#allocation56_spill] sm:$0xff]  ;;  %v13406_v16 = vld [vmem:[#allocation47_spill] sm:$0xff] }
 0x198   :  { %13397 = vst [vmem:[#allocation41_spill] sm:$0xff] %v9286_v54  ;;  %v1363_v32 = vadd.f32 %v1362_v8, %v1069_v21  ;;  %573 = vadd.xlane.f32.xlu0 %v8363_v10  ;;  %v9316_v47 = vsub.f32 %v6494_v13, %v9280_v7  ;;  %v6495_v21 = vld [vmem:[%s12810_s0 + $0x570] sm:$0xff]  ;;  %v1074_v5 = vmul.f32 %v9286_v54, %v9286_v54 }
 0x199   :  { %v9322_v10 = vsub.f32 %v6495_v21, %v9280_v7  ;;  %v1367_v8 = vadd.f32 %v1072_v46, %v1071_v17  ;;  %v1744_v50 = vmul.f32 %v9121_v49, %v13399_v59  ;;  %v1748_v60 = vmul.f32 %v9178_v53, %v13400_v58  ;;  %3959 = vmatprep.subr.bf16.mxu0 %v6061_v37  ;;  %v13403_v21 = vld [vmem:[#allocation44_spill] sm:$0xff] }
 0x19a   :  { %v1364_v13 = vadd.f32 %v1363_v32, %v1070_v57  ;;  %v1746_v44 = vmul.f32 %v9121_v49, %v13401_v56  ;;  %v1750_v55 = vmul.f32 %v9178_v53, %v13402_v18  ;;  %v1743_v23 = vmul.f32 %v9121_v49, %v13403_v21  ;;  %3960 = vmatpush1.bf16.msra.mxu0 %v6059_v15  ;;  %v13405_v46 = vld [vmem:[#allocation48_spill] sm:$0xff]  ;;  %v13408_v56 = vld [vmem:[#allocation54_spill] sm:$0xff]  ;;  %v6496_v15 = vld [vmem:[%s12810_s0 + $0x538] sm:$0xff] }
 0x19b   :  { %13398 = vst [vmem:[#allocation39_spill] sm:$0xff] %v9322_v10  ;;  %v1368_v54 = vadd.f32 %v1367_v8, %v1073_v36  ;;  %v9336_v17 = vpack.c.bf16 %v1748_v60, %v1744_v50  ;;  %v1747_v59 = vmul.f32 %v9178_v53, %v13405_v46  ;;  %v1745_v58 = vmul.f32 %v9121_v49, %v13406_v16  ;;  %v13412_v46 = vld [vmem:[#allocation59_spill] sm:$0xff] }
 0x19c   :  { %4312 = vmatprep.subr.bf16.mxu1 %v6064_v0  ;;  %1365 = vadd.xlane.f32.xlu1 %v1364_v13  ;;  %v9342_v57 = vpack.c.bf16 %v1750_v55, %v1746_v44  ;;  %v1749_v18 = vmul.f32 %v9178_v53, %v13408_v56  ;;  %v9350_v60 = vsub.f32 %v6496_v15, %v9176_v41  ;;  %v9354_v36 = vpop.eup %6273  ;;  %v6062_v41 = vld [vmem:[%s12811_s1 + $0x3c8] ss:$24 sps:$4 sm:$0xff]   ;;  %v13411_v13 = vld [vmem:[#allocation53_spill] sm:$0xff] }
 0x19d   :  { %13404 = vst [vmem:[#allocation46_spill] sm:$0xff] %v9336_v17  ;;  %v1075_v37 = vmul.f32 %v9196_v40, %v9196_v40  ;;  %v1369_v49 = vadd.f32 %v1368_v54, %v1074_v5  ;;  %3359 = vmatprep.mubr.bf16.mxu0 %v9336_v17  ;;  %v9357_v16 = vpack.c.bf16 %v1747_v59, %v1743_v23  ;;  %v6497_v23 = vld [vmem:[%s12810_s0 + $0x558] sm:$0xff] }
 0x19e   :  { %13407 = vst [vmem:[#allocation45_spill] sm:$0xff] %v9342_v57  ;;  %v1076_v55 = vmul.f32 %v9202_v35, %v9202_v35  ;;  %v1077_v53 = vmul.f32 %v9208_v34, %v9208_v34  ;;  %3712 = vmatprep.mubr.bf16.mxu1 %v9342_v57  ;;  %v9367_v44 = vpack.c.bf16 %v1749_v18, %v1745_v58  ;;  %v13413_v15 = vld [vmem:[#allocation57_spill] sm:$0xff]  ;;  %v13418_v57 = vld [vmem:[#allocation55_spill] sm:$0xff] }
 0x19f   :  { %13409 = vst [vmem:[#allocation49_spill] sm:$0xff] %v9357_v16  ;;  %v1078_v54 = vmul.f32 %v9350_v60, %v9350_v60  ;;  %v9375_v0 = vsub.f32 %v6497_v23, %v9240_v48  ;;  %v1079_v32 = vmul.f32 %v9262_v28, %v9262_v28  ;;  %1370 = vadd.xlane.f32.xlu0 %v1369_v49  ;;  %v13414_v49 = vld [vmem:[#allocation66_spill] sm:$0xff]  ;;  %v13416_v23 = vld [vmem:[#allocation52_spill] sm:$0xff] }
 0x1a0   :  { %13410 = vst [vmem:[#allocation51_spill] sm:$0xff] %v9367_v44  ;;  %3360 = vmatmul.mubr.bf16.gmra.mxu0 %v9357_v16  ;;  %v1372_v5 = vadd.f32 %v1076_v55, %v1075_v37  ;;  %v1080_v8 = vmul.f32 %v9268_v29, %v9268_v29  ;;  %v1081_v50 = vmul.f32 %v9274_v33, %v9274_v33  ;;  %v6276_v58 = vpop.eup %6275  ;;  %v13417_v16 = vld [vmem:[#allocation58_spill] sm:$0xff] }
 0x1a1   :  { %578 = vadd.xlane.f32.xlu1 %v8375_v63  ;;  %3713 = vmatmul.mubr.bf16.gmra.mxu1 %v9367_v44  ;;  %v1082_v48 = vmul.f32 %v9375_v0, %v9375_v0  ;;  %v1752_v21 = vmul.f32 %v9229_v12, %v13411_v13  ;;  %v1756_v59 = vmul.f32 %v9276_v22, %v13412_v46 }
 0x1a2   :  { %v1373_v56 = vadd.f32 %v1372_v5, %v1077_v53  ;;  %v1377_v18 = vadd.f32 %v1080_v8, %v1079_v32  ;;  %v1754_v37 = vmul.f32 %v9229_v12, %v13413_v15  ;;  %v1758_v63 = vmul.f32 %v9276_v22, %v13414_v49  ;;  %4313 = vmatpush1.bf16.msra.mxu1 %v6062_v41  ;;  %v13420_v8 = vld [vmem:[#allocation62_spill] sm:$0xff]  ;;  %v13426_v49 = vld [vmem:[#allocation69_spill] sm:$0xff] }
 0x1a3   :  { %v9396_v55 = vpack.c.bf16 %v1756_v59, %v1752_v21  ;;  %v1751_v44 = vmul.f32 %v9229_v12, %v13416_v23  ;;  %v1755_v13 = vmul.f32 %v9276_v22, %v13417_v16  ;;  %v1753_v46 = vmul.f32 %v9229_v12, %v13418_v57  ;;  %583 = vadd.xlane.f32.xlu0 %v8435_v6  ;;  %v6498_v16 = vld [vmem:[%s12810_s0 + $0x578] sm:$0xff] }
 0x1a4   :  { %v1374_v53 = vadd.f32 %v1373_v56, %v1078_v54  ;;  %v1378_v32 = vadd.f32 %v1377_v18, %v1081_v50  ;;  %v9405_v5 = vpack.c.bf16 %v1758_v63, %v1754_v37  ;;  %v1757_v41 = vmul.f32 %v9276_v22, %v13420_v8  ;;  %v13423_v50 = vld [vmem:[#allocation61_spill] sm:$0xff]  ;;  %v13430_v8 = vld [vmem:[#allocation60_spill] sm:$0xff] }
 0x1a5   :  { %13415 = vst [vmem:[#allocation56_spill] sm:$0xff] %v9396_v55  ;;  %3369 = vmatprep.mubr.bf16.mxu0 %v9396_v55  ;;  %v9410_v21 = vpack.c.bf16 %v1755_v13, %v1751_v44  ;;  %v9416_v59 = vsub.f32 %v6498_v16, %v9280_v7  ;;  %v1083_v6 = vmul.f32 %v9310_v30, %v9310_v30  ;;  %v13424_v18 = vld [vmem:[#allocation65_spill] sm:$0xff]  ;;  %v13431_v16 = vld [vmem:[#allocation68_spill] sm:$0xff] }
 0x1a6   :  { %13419 = vst [vmem:[#allocation44_spill] sm:$0xff] %v9405_v5  ;;  %v1084_v12 = vmul.f32 %v9316_v47, %v9316_v47  ;;  %1375 = vadd.xlane.f32.xlu1 %v1374_v53  ;;  %v1379_v57 = vadd.f32 %v1378_v32, %v1082_v48  ;;  %3722 = vmatprep.mubr.bf16.mxu1 %v9405_v5  ;;  %v13425_v48 = vld [vmem:[#allocation67_spill] sm:$0xff] }
 0x1a7   :  { %13421 = vst [vmem:[#allocation48_spill] sm:$0xff] %v9410_v21  ;;  %v9423_v22 = vpack.c.bf16 %v1757_v41, %v1753_v46  ;;  %v1085_v44 = vmul.f32 %v9322_v10, %v9322_v10  ;;  %v1086_v54 = vmul.f32 %v9416_v59, %v9416_v59  ;;  %v1760_v56 = vmul.f32 %v9354_v36, %v13423_v50  ;;  %v13428_v46 = vld [vmem:[#allocation64_spill] sm:$0xff] }
 0x1a8   :  { %v1382_v7 = vadd.f32 %v1084_v12, %v1083_v6  ;;  %v1764_v15 = vmul.f32 %v6276_v58, %v13424_v18  ;;  %1380 = vadd.xlane.f32.xlu0 %v1379_v57  ;;  %3370 = vmatmul.mubr.bf16.gmra.mxu0 %v9410_v21  ;;  %v1762_v37 = vmul.f32 %v9354_v36, %v13425_v48  ;;  %v13432_v57 = vld [vmem:[#allocation63_spill] sm:$0xff] }
 0x1a9   :  { %13422 = vst [vmem:[#allocation47_spill] sm:$0xff] %v9423_v22  ;;  %v1766_v63 = vmul.f32 %v6276_v58, %v13426_v49  ;;  %3723 = vmatmul.mubr.bf16.gmra.mxu1 %v9423_v22  ;;  %v1763_v53 = vmul.f32 %v6276_v58, %v13428_v46  ;;  %v1759_v41 = vmul.f32 %v9354_v36, %v13430_v8  ;;  %v6073_v18 = vld [vmem:[%s12811_s1 + $0x6c] ss:$24 sps:$4 sm:$0xff]  }
 0x1aa   :  { %v1383_v23 = vadd.f32 %v1382_v7, %v1085_v44  ;;  %v9437_v13 = vpack.c.bf16 %v1764_v15, %v1760_v56  ;;  %588 = vadd.xlane.f32.xlu1 %v8437_v31  ;;  %v1765_v6 = vmul.f32 %v6276_v58, %v13431_v16  ;;  %v1761_v50 = vmul.f32 %v9354_v36, %v13432_v57  ;;  %v6065_v44 = vld [vmem:[%s12811_s1 + $0x98] ss:$24 sps:$4 sm:$0xff]   ;;  %v6067_v31 = vld [vmem:[%s12811_s1 + $0x9c] ss:$24 sps:$4 sm:$0xff]   ;;  %v6071_v56 = vld [vmem:[%s12811_s1 + $0x68] ss:$24 sps:$4 sm:$0xff]  }
 0x1ab   :  { %v9441_v32 = vpack.c.bf16 %v1766_v63, %v1762_v37  ;;  %v9456_v7 = vpack.c.bf16 %v1763_v53, %v1759_v41  ;;  %v6068_v58 = vld [vmem:[%s12811_s1 + $0x398] ss:$24 sps:$4 sm:$0xff]   ;;  %v6070_v36 = vld [vmem:[%s12811_s1 + $0x39c] ss:$24 sps:$4 sm:$0xff]   ;;  %3961 = vmatprep.subr.bf16.mxu0 %v6067_v31  ;;  %v6074_v15 = vld [vmem:[%s12811_s1 + $0x368] ss:$24 sps:$4 sm:$0xff]  }
 0x1ac   :  { %13427 = vst [vmem:[#allocation54_spill] sm:$0xff] %v9437_v13  ;;  %v1384_v12 = vadd.f32 %v1383_v23, %v1086_v54  ;;  %3379 = vmatprep.mubr.bf16.mxu0 %v9437_v13  ;;  %v9464_v54 = vpack.c.bf16 %v1765_v6, %v1761_v50  ;;  %3962 = vmatpush1.bf16.msra.mxu0 %v6065_v44  ;;  %v6076_v48 = vld [vmem:[%s12811_s1 + $0x36c] ss:$24 sps:$4 sm:$0xff]   ;;  %v6077_v41 = vld [vmem:[%s12811_s1 + $0x38] ss:$24 sps:$4 sm:$0xff]  }
 0x1ad   :  { %13429 = vst [vmem:[#allocation53_spill] sm:$0xff] %v9441_v32  ;;  %3732 = vmatprep.mubr.bf16.mxu1 %v9441_v32  ;;  %13433 = vst [vmem:[#allocation59_spill] sm:$0xff] %v9456_v7  ;;  %4314 = vmatprep.subr.bf16.mxu1 %v6070_v36  ;;  %v6079_v16 = vld [vmem:[%s12811_s1 + $0x3c] ss:$24 sps:$4 sm:$0xff]   ;;  %v6080_v6 = vld [vmem:[%s12811_s1 + $0x338] ss:$24 sps:$4 sm:$0xff]  }
 0x1ae   :  { %13434 = vst [vmem:[#allocation57_spill] sm:$0xff] %v9464_v54  ;;  %1385 = vadd.xlane.f32.xlu1 %v1384_v12  ;;  %4315 = vmatpush1.bf16.msra.mxu1 %v6068_v58  ;;  %v6082_v12 = vld [vmem:[%s12811_s1 + $0x33c] ss:$24 sps:$4 sm:$0xff]   ;;  %v6499_v50 = vld [vmem:[%s12810_s0 + $0x580] sm:$0xff]  ;;  %v6500_v31 = vld [vmem:[%s12810_s0 + $0x588] sm:$0xff] }
 0x1af   :  { %3963 = vmatprep.subr.bf16.mxu0 %v6073_v18  ;;  %4316 = vmatprep.subr.bf16.mxu1 %v6076_v48  ;;  %v6501_v36 = vld [vmem:[%s12810_s0 + $0x590] sm:$0xff]  ;;  %v6502_v48 = vld [vmem:[%s12810_s0 + $0x598] sm:$0xff] }
 0x1b0   :  { %3380 = vmatmul.mubr.bf16.gmra.mxu0 %v9456_v7  ;;  %v6507_v7 = vld [vmem:[%s12810_s0 + $0x5c0] sm:$0xff] }
 0x1b1   :  { %3733 = vmatmul.mubr.bf16.gmra.mxu1 %v9464_v54  ;;  %3964 = vmatpush1.bf16.msra.mxu0 %v6071_v56 }
 0x1b2   :  { %4317 = vmatpush1.bf16.msra.mxu1 %v6074_v15  ;;  %3965 = vmatprep.subr.bf16.mxu0 %v6079_v16 }
 0x1b3   :  { %4318 = vmatprep.subr.bf16.mxu1 %v6082_v12 }
 0x1b5   :  { %3966 = vmatpush1.bf16.msra.mxu0 %v6077_v41  ;;  %v6504_v41 = vld [vmem:[%s12810_s0 + $0x5a8] sm:$0xff] }
 0x1b6   :  { %4319 = vmatpush1.bf16.msra.mxu1 %v6080_v6  ;;  %v6505_v6 = vld [vmem:[%s12810_s0 + $0x5b0] sm:$0xff] }
 0x1c2   :  { %v1281_v37 = vpop.xlane.xlu0 %1280 }
 0x1c3   :  { %v1509_v49 = vmul.f32 0.001953125, %v1281_v37 }
 0x1c5   :  { %v1573_v63 = vadd.f32 1e-05, %v1509_v49 }
 0x1c6   :  { %v1286_v23 = vpop.xlane.xlu1 %1285  ;;  %v494_v46 = vpop.xlane.xlu0 %493 }
 0x1c7   :  { %v1510_v53 = vmul.f32 0.001953125, %v1286_v23  ;;  %v635_v8 = vmul.f32 0.001953125, %v494_v46  ;;  %6277 = vrsqrt.f32 %v1573_v63 }
 0x1c9   :  { %v1574_v57 = vadd.f32 1e-05, %v1510_v53  ;;  %v9495_v44 = vsub.f32 %v6499_v50, %v635_v8  ;;  %v9500_v58 = vsub.f32 %v6500_v31, %v635_v8  ;;  %v9505_v56 = vsub.f32 %v6501_v36, %v635_v8 }
 0x1ca   :  { %v499_v18 = vpop.xlane.xlu1 %498  ;;  %v1291_v15 = vpop.xlane.xlu0 %1290  ;;  %v9510_v37 = vsub.f32 %v6502_v48, %v635_v8  ;;  %v6503_v8 = vld [vmem:[%s12810_s0 + $0x5a0] sm:$0xff] }
 0x1cb   :  { %13435 = vst [vmem:[#allocation66_spill] sm:$0xff] %v9495_v44  ;;  %13436 = vst [vmem:[#allocation52_spill] sm:$0xff] %v9500_v58  ;;  %6279 = vrsqrt.f32 %v1574_v57  ;;  %v636_v49 = vmul.f32 0.001953125, %v499_v18  ;;  %v1087_v63 = vmul.f32 %v9495_v44, %v9495_v44  ;;  %v1511_v23 = vmul.f32 0.001953125, %v1291_v15  ;;  %v6506_v18 = vld [vmem:[%s12810_s0 + $0x5b8] sm:$0xff] }
 0x1cc   :  { %13437 = vst [vmem:[#allocation58_spill] sm:$0xff] %v9505_v56  ;;  %13438 = vst [vmem:[#allocation55_spill] sm:$0xff] %v9510_v37  ;;  %v1088_v46 = vmul.f32 %v9500_v58, %v9500_v58  ;;  %v1089_v53 = vmul.f32 %v9505_v56, %v9505_v56  ;;  %v1090_v31 = vmul.f32 %v9510_v37, %v9510_v37  ;;  %v13449_v56 = vld [vmem:[#allocation70_spill] sm:$0xff] }
 0x1cd   :  { %v9521_v16 = vsub.f32 %v6503_v8, %v636_v49  ;;  %v9526_v12 = vsub.f32 %v6504_v41, %v636_v49  ;;  %v9531_v57 = vsub.f32 %v6505_v6, %v636_v49  ;;  %v9538_v15 = vsub.f32 %v6506_v18, %v636_v49  ;;  %v6083_v6 = vld [vmem:[%s12811_s1 + $0x8] ss:$24 sps:$4 sm:$0xff]   ;;  %v6088_v18 = vld [vmem:[%s12811_s1 + $0x30c] ss:$24 sps:$4 sm:$0xff]  }
 0x1ce   :  { %v504_v50 = vpop.xlane.xlu0 %503  ;;  %v1387_v36 = vadd.f32 %v1088_v46, %v1087_v63  ;;  %v6085_v63 = vld [vmem:[%s12811_s1 + $0xc] ss:$24 sps:$4 sm:$0xff]   ;;  %v1575_v46 = vadd.f32 1e-05, %v1511_v23  ;;  %4320 = vmatprep.subr.bf16.mxu1 %v6088_v18 }
 0x1cf   :  { %13439 = vst [vmem:[#allocation62_spill] sm:$0xff] %v9521_v16  ;;  %13440 = vst [vmem:[#allocation61_spill] sm:$0xff] %v9526_v12  ;;  %v637_v48 = vmul.f32 0.001953125, %v504_v50  ;;  %v1091_v8 = vmul.f32 %v9521_v16, %v9521_v16  ;;  %v1092_v41 = vmul.f32 %v9526_v12, %v9526_v12  ;;  %v1093_v49 = vmul.f32 %v9531_v57, %v9531_v57  ;;  %v6086_v50 = vld [vmem:[%s12811_s1 + $0x308] ss:$24 sps:$4 sm:$0xff]  }
 0x1d0   :  { %13441 = vst [vmem:[#allocation65_spill] sm:$0xff] %v9531_v57  ;;  %13442 = vst [vmem:[#allocation67_spill] sm:$0xff] %v9538_v15  ;;  %v1388_v54 = vadd.f32 %v1387_v36, %v1089_v53  ;;  %v6508_v23 = vld [vmem:[%s12810_s0 + $0x5c8] sm:$0xff]  ;;  %v6509_v36 = vld [vmem:[%s12810_s0 + $0x5d0] sm:$0xff]  ;;  %3967 = vmatprep.subr.bf16.mxu0 %v6085_v63  ;;  %v1094_v5 = vmul.f32 %v9538_v15, %v9538_v15  ;;  %4321 = vmatpush1.bf16.msra.mxu1 %v6086_v50  ;;  %6281 = vrsqrt.f32 %v1575_v46 }
 0x1d1   :  { %v9561_v32 = vsub.f32 %v6507_v7, %v637_v48  ;;  %v9566_v53 = vsub.f32 %v6508_v23, %v637_v48  ;;  %v9571_v13 = vsub.f32 %v6509_v36, %v637_v48  ;;  %v1392_v22 = vadd.f32 %v1092_v41, %v1091_v8  ;;  %v6510_v7 = vld [vmem:[%s12810_s0 + $0x5d8] sm:$0xff]  ;;  %3968 = vmatpush1.bf16.msra.mxu0 %v6083_v6  ;;  %v13447_v57 = vld [vmem:[#allocation71_spill] sm:$0xff]  ;;  %v13567_v58 = vld [vmem:[#allocation22_spill] sm:$0xff] }
 0x1d2   :  { %v1389_v21 = vadd.f32 %v1388_v54, %v1090_v31  ;;  %v9578_v55 = vsub.f32 %v6510_v7, %v637_v48  ;;  %v13448_v50 = vld [vmem:[#allocation73_spill] sm:$0xff] }
 0x1d3   :  { %13443 = vst [vmem:[#allocation69_spill] sm:$0xff] %v9561_v32  ;;  %13444 = vst [vmem:[#allocation64_spill] sm:$0xff] %v9566_v53  ;;  %v1393_v23 = vadd.f32 %v1392_v22, %v1093_v49  ;;  %v1095_v17 = vmul.f32 %v9561_v32, %v9561_v32  ;;  %v1096_v8 = vmul.f32 %v9566_v53, %v9566_v53 }
 0x1d4   :  { %13445 = vst [vmem:[#allocation60_spill] sm:$0xff] %v9571_v13  ;;  %13446 = vst [vmem:[#allocation68_spill] sm:$0xff] %v9578_v55  ;;  %v1097_v54 = vmul.f32 %v9571_v13, %v9571_v13  ;;  %v1296_v31 = vpop.xlane.xlu1 %1295  ;;  %1390 = vadd.xlane.f32.xlu0 %v1389_v21  ;;  %v6278_v41 = vpop.eup %6277  ;;  %v1098_v6 = vmul.f32 %v9578_v55, %v9578_v55 }
 0x1d5   :  { %v1512_v63 = vmul.f32 0.001953125, %v1296_v31  ;;  %v1394_v48 = vadd.f32 %v1393_v23, %v1094_v5  ;;  %v1397_v22 = vadd.f32 %v1096_v8, %v1095_v17  ;;  %v1768_v13 = vmul.f32 %v6278_v41, %v13447_v57  ;;  %v13450_v23 = vld [vmem:[#allocation72_spill] sm:$0xff]  ;;  %v13451_v17 = vld [vmem:[#allocation75_spill] sm:$0xff]  ;;  %v6511_v57 = vld [vmem:[%s12810_s0 + $0x5e0] sm:$0xff] }
 0x1d6   :  { %v1301_v49 = vpop.xlane.xlu0 %1300  ;;  %v1770_v46 = vmul.f32 %v6278_v41, %v13448_v50  ;;  %v1767_v21 = vmul.f32 %v6278_v41, %v13449_v56  ;;  %v1769_v16 = vmul.f32 %v6278_v41, %v13450_v23  ;;  %v6512_v56 = vld [vmem:[%s12810_s0 + $0x5e8] sm:$0xff]  ;;  %v6513_v41 = vld [vmem:[%s12810_s0 + $0x5f0] sm:$0xff] }
 0x1d7   :  { %v1576_v18 = vadd.f32 1e-05, %v1512_v63  ;;  %v1513_v36 = vmul.f32 0.001953125, %v1301_v49  ;;  %1395 = vadd.xlane.f32.xlu1 %v1394_v48  ;;  %v1398_v7 = vadd.f32 %v1397_v22, %v1097_v54  ;;  %v13452_v63 = vld [vmem:[#allocation77_spill] sm:$0xff]  ;;  %v13453_v48 = vld [vmem:[#allocation74_spill] sm:$0xff]  ;;  %v13454_v22 = vld [vmem:[#allocation76_spill] sm:$0xff] }
 0x1d8   :  { %v6280_v32 = vpop.eup %6279  ;;  %v509_v53 = vpop.xlane.xlu1 %508 }
 0x1d9   :  { %6283 = vrsqrt.f32 %v1576_v18  ;;  %v638_v31 = vmul.f32 0.001953125, %v509_v53  ;;  %v1399_v5 = vadd.f32 %v1398_v7, %v1098_v6  ;;  %v1772_v8 = vmul.f32 %v6280_v32, %v13451_v17 }
 0x1da   :  { %v514_v55 = vpop.xlane.xlu0 %513  ;;  %v1774_v49 = vmul.f32 %v6280_v32, %v13452_v63  ;;  %v1771_v54 = vmul.f32 %v6280_v32, %v13453_v48  ;;  %v1773_v44 = vmul.f32 %v6280_v32, %v13454_v22  ;;  %v1577_v18 = vadd.f32 1e-05, %v1513_v36  ;;  %v6514_v48 = vld [vmem:[%s12810_s0 + $0x5f8] sm:$0xff] }
 0x1db   :  { %v9599_v50 = vsub.f32 %v6511_v57, %v638_v31  ;;  %v9604_v53 = vsub.f32 %v6512_v56, %v638_v31  ;;  %v9609_v6 = vsub.f32 %v6513_v41, %v638_v31  ;;  %1400 = vadd.xlane.f32.xlu0 %v1399_v5  ;;  %v639_v32 = vmul.f32 0.001953125, %v514_v55 }
 0x1dc   :  { %v9611_v7 = vpack.c.bf16 %v1772_v8, %v1768_v13  ;;  %v9613_v23 = vpack.c.bf16 %v1774_v49, %v1770_v46  ;;  %v9615_v17 = vpack.c.bf16 %v1771_v54, %v1767_v21  ;;  %v9617_v63 = vpack.c.bf16 %v1773_v44, %v1769_v16  ;;  %v6515_v13 = vld [vmem:[%s12810_s0 + $0x600] sm:$0xff]  ;;  %v6516_v44 = vld [vmem:[%s12810_s0 + $0x608] sm:$0xff]  ;;  %v6517_v46 = vld [vmem:[%s12810_s0 + $0x610] sm:$0xff] }
 0x1dd   :  { %13455 = vst [vmem:[#allocation63_spill] sm:$0xff] %v9599_v50  ;;  %13456 = vst [vmem:[#allocation71_spill] sm:$0xff] %v9604_v53  ;;  %v9622_v22 = vsub.f32 %v6514_v48, %v638_v31  ;;  %v1099_v57 = vmul.f32 %v9599_v50, %v9599_v50  ;;  %v1100_v55 = vmul.f32 %v9604_v53, %v9604_v53  ;;  %6285 = vrsqrt.f32 %v1577_v18  ;;  %v6518_v54 = vld [vmem:[%s12810_s0 + $0x618] sm:$0xff]  ;;  %v13532_v50 = vld [vmem:[#allocation16_spill] sm:$0xff] }
 0x1de   :  { %13457 = vst [vmem:[#allocation73_spill] sm:$0xff] %v9609_v6  ;;  %13458 = vst [vmem:[#allocation70_spill] sm:$0xff] %v9611_v7  ;;  %v9631_v36 = vsub.f32 %v6515_v13, %v639_v32  ;;  %v9636_v16 = vsub.f32 %v6516_v44, %v639_v32  ;;  %v9641_v21 = vsub.f32 %v6517_v46, %v639_v32  ;;  %3389 = vmatprep.mubr.bf16.mxu0 %v9611_v7  ;;  %v6089_v48 = vld [vmem:[%s12811_s1 + $0x2d8] ss:$24 sps:$4 sm:$0xff]   ;;  %v2257_v46 = vlaneseq }
 0x1df   :  { %13459 = vst [vmem:[#allocation72_spill] sm:$0xff] %v9613_v23  ;;  %13460 = vst [vmem:[#allocation75_spill] sm:$0xff] %v9615_v17  ;;  %3742 = vmatprep.mubr.bf16.mxu1 %v9613_v23  ;;  %3390 = vmatmul.mubr.bf16.gmra.mxu0 %v9615_v17  ;;  %v1101_v5 = vmul.f32 %v9609_v6, %v9609_v6  ;;  %v1402_v8 = vadd.f32 %v1100_v55, %v1099_v57  ;;  %v6091_v57 = vld [vmem:[%s12811_s1 + $0x2dc] ss:$24 sps:$4 sm:$0xff]   ;;  %v6282_v55 = vpop.eup %6281 }
 0x1e0   :  { %13461 = vst [vmem:[#allocation77_spill] sm:$0xff] %v9617_v63  ;;  %13462 = vst [vmem:[#allocation74_spill] sm:$0xff] %v9622_v22  ;;  %v1306_v31 = vpop.xlane.xlu1 %1305  ;;  %3743 = vmatmul.mubr.bf16.gmra.mxu1 %v9617_v63  ;;  %v9652_v56 = vsub.f32 %v6518_v54, %v639_v32  ;;  %v1103_v41 = vmul.f32 %v9631_v36, %v9631_v36  ;;  %v1104_v18 = vmul.f32 %v9636_v16, %v9636_v16  ;;  %v6092_v63 = vld [vmem:[%s12811_s1 + $0x5d8] ss:$24 sps:$4 sm:$0xff]   ;;  %v6094_v17 = vld [vmem:[%s12811_s1 + $0x5dc] ss:$24 sps:$4 sm:$0xff]  }
 0x1e1   :  { %13463 = vst [vmem:[#allocation76_spill] sm:$0xff] %v9631_v36  ;;  %13464 = vst [vmem:[#allocation115_spill] sm:$0xff] %v9636_v16  ;;  %v1514_v49 = vmul.f32 0.001953125, %v1306_v31  ;;  %v1102_v13 = vmul.f32 %v9622_v22, %v9622_v22  ;;  %v1403_v32 = vadd.f32 %v1402_v8, %v1101_v5  ;;  %v1105_v44 = vmul.f32 %v9641_v21, %v9641_v21 }
 0x1e2   :  { %13465 = vst [vmem:[#allocation116_spill] sm:$0xff] %v9641_v21  ;;  %13466 = vst [vmem:[#allocation117_spill] sm:$0xff] %v9652_v56  ;;  %v1407_v54 = vadd.f32 %v1104_v18, %v1103_v41  ;;  %3969 = vmatprep.subr.bf16.mxu0 %v6091_v57  ;;  %v1106_v5 = vmul.f32 %v9652_v56, %v9652_v56  ;;  %4322 = vmatprep.subr.bf16.mxu1 %v6094_v17  ;;  %v13467_v18 = vld [vmem:[#allocation79_spill] sm:$0xff]  ;;  %v9678_v16 = vshrl.u32 %v2257_v46, 7 }
 0x1e3   :  { %v1578_v31 = vadd.f32 1e-05, %v1514_v49  ;;  %v1404_v36 = vadd.f32 %v1403_v32, %v1102_v13  ;;  %3970 = vmatpush2.bf16.msra.mxu0 %v6089_v48  ;;  %v1776_v57 = vmul.f32 %v6282_v55, %v13467_v18  ;;  %v1778_v21 = vmul.f32 %v6282_v55, %v8416_v27  ;;  %4323 = vmatpush2.bf16.msra.mxu1 %v6092_v63  ;;  %v6519_v13 = vld [vmem:[%s12810_s0 + $0x620] sm:$0xff] }
 0x1e4   :  { %v519_v23 = vpop.xlane.xlu1 %518  ;;  %v1311_v7 = vpop.xlane.xlu0 %1310  ;;  %v1408_v41 = vadd.f32 %v1407_v54, %v1105_v44  ;;  %13468 = vst [vmem:[#allocation79_spill] sm:$0xff] %v9678_v16  ;;  %v6521_v54 = vld [vmem:[%s12810_s0 + $0x630] sm:$0xff] }
 0x1e5   :  { %6287 = vrsqrt.f32 %v1578_v31  ;;  %v640_v8 = vmul.f32 0.001953125, %v519_v23  ;;  %v1515_v49 = vmul.f32 0.001953125, %v1311_v7  ;;  %1405 = vadd.xlane.f32.xlu1 %v1404_v36  ;;  %v6520_v7 = vld [vmem:[%s12810_s0 + $0x628] sm:$0xff]  ;;  %v13471_v36 = vld [vmem:[#allocation78_spill] sm:$0xff] }
 0x1e6   :  { %v6284_v6 = vpop.eup %6283  ;;  %v1775_v48 = vmul.f32 %v6282_v55, %v13471_v36  ;;  %v1409_v44 = vadd.f32 %v1408_v41, %v1106_v5 }
 0x1e7   :  { %v9683_v32 = vsub.f32 %v6519_v13, %v640_v8  ;;  %v9688_v23 = vsub.f32 %v6520_v7, %v640_v8  ;;  %v1579_v17 = vadd.f32 1e-05, %v1515_v49  ;;  %v1780_v63 = vmul.f32 %v6284_v6, %v8451_v61  ;;  %v13473_v7 = vld [vmem:[#allocation80_spill] sm:$0xff] }
 0x1e8   :  { %v524_v27 = vpop.xlane.xlu0 %523  ;;  %v1782_v46 = vmul.f32 %v6284_v6, %v8467_v19  ;;  %v1779_v31 = vmul.f32 %v6284_v6, %v8445_v3  ;;  %v9697_v18 = vsub.f32 %v6521_v54, %v640_v8  ;;  %v1777_v56 = vmul.f32 %v6282_v55, %v13473_v7  ;;  %1410 = vadd.xlane.f32.xlu0 %v1409_v44  ;;  %v6522_v19 = vld [vmem:[%s12810_s0 + $0x640] sm:$0xff] }
 0x1e9   :  { %13469 = vst [vmem:[#allocation118_spill] sm:$0xff] %v9683_v32  ;;  %13470 = vst [vmem:[#allocation119_spill] sm:$0xff] %v9688_v23  ;;  %v641_v13 = vmul.f32 0.001953125, %v524_v27  ;;  %v1781_v49 = vmul.f32 %v6284_v6, %v8456_v2  ;;  %v9701_v36 = vpack.c.bf16 %v1780_v63, %v1776_v57  ;;  %v1107_v3 = vmul.f32 %v9683_v32, %v9683_v32  ;;  %v6523_v2 = vld [vmem:[%s12810_s0 + $0x648] sm:$0xff]  ;;  %v6525_v27 = vld [vmem:[%s12810_s0 + $0x638] sm:$0xff] }
 0x1ea   :  { %13472 = vst [vmem:[#allocation78_spill] sm:$0xff] %v9697_v18  ;;  %v9703_v5 = vpack.c.bf16 %v1782_v46, %v1778_v21  ;;  %v9705_v61 = vpack.c.bf16 %v1779_v31, %v1775_v48  ;;  %v6524_v21 = vld [vmem:[%s12810_s0 + $0x650] sm:$0xff]  ;;  %6289 = vrsqrt.f32 %v1579_v17  ;;  %v9731_v44 = vsub.f32 %v6525_v27, %v640_v8  ;;  %v6286_v46 = vpop.eup %6285  ;;  %v13503_v32 = vld [vmem:[#allocation87_spill] sm:$0xff] }
 0x1eb   :  { %13474 = vst [vmem:[#allocation80_spill] sm:$0xff] %v9701_v36  ;;  %v9712_v41 = vsub.f32 %v6522_v19, %v641_v13  ;;  %v9717_v6 = vsub.f32 %v6523_v2, %v641_v13  ;;  %v9722_v55 = vsub.f32 %v6524_v21, %v641_v13  ;;  %v9724_v57 = vpack.c.bf16 %v1781_v49, %v1777_v56  ;;  %v6526_v56 = vld [vmem:[%s12810_s0 + $0x658] sm:$0xff]  ;;  %v6095_v2 = vld [vmem:[%s12811_s1 + $0x2a8] ss:$24 sps:$4 sm:$0xff]  }
 0x1ec   :  { %13475 = vst [vmem:[#allocation120_spill] sm:$0xff] %v9703_v5  ;;  %13476 = vst [vmem:[#allocation121_spill] sm:$0xff] %v9705_v61  ;;  %3399 = vmatprep.mubr.bf16.mxu0 %v9701_v36  ;;  %3752 = vmatprep.mubr.bf16.mxu1 %v9703_v5  ;;  %v1108_v63 = vmul.f32 %v9688_v23, %v9688_v23  ;;  %v9740_v17 = vsub.f32 %v6526_v56, %v641_v13 }
 0x1ed   :  { %13477 = vst [vmem:[#allocation122_spill] sm:$0xff] %v9712_v41  ;;  %13478 = vst [vmem:[#allocation123_spill] sm:$0xff] %v9717_v6  ;;  %v1316_v48 = vpop.xlane.xlu1 %1315  ;;  %3400 = vmatmul.mubr.bf16.gmra.mxu0 %v9705_v61  ;;  %3753 = vmatmul.mubr.bf16.gmra.mxu1 %v9724_v57  ;;  %v1111_v54 = vmul.f32 %v9712_v41, %v9712_v41  ;;  %v1112_v8 = vmul.f32 %v9717_v6, %v9717_v6 }
 0x1ee   :  { %13479 = vst [vmem:[#allocation124_spill] sm:$0xff] %v9722_v55  ;;  %13480 = vst [vmem:[#allocation125_spill] sm:$0xff] %v9724_v57  ;;  %v1516_v31 = vmul.f32 0.001953125, %v1316_v48  ;;  %v1109_v7 = vmul.f32 %v9697_v18, %v9697_v18  ;;  %v1412_v49 = vadd.f32 %v1108_v63, %v1107_v3  ;;  %v1113_v19 = vmul.f32 %v9722_v55, %v9722_v55  ;;  %v13483_v3 = vld [vmem:[#allocation5_spill] sm:$0xff] }
 0x1ef   :  { %13481 = vst [vmem:[#allocation126_spill] sm:$0xff] %v9731_v44  ;;  %13482 = vst [vmem:[#allocation127_spill] sm:$0xff] %v9740_v17  ;;  %v1114_v13 = vmul.f32 %v9740_v17, %v9740_v17  ;;  %v1417_v27 = vadd.f32 %v1112_v8, %v1111_v54  ;;  %v1110_v5 = vmul.f32 %v9731_v44, %v9731_v44  ;;  %v6097_v54 = vld [vmem:[%s12811_s1 + $0x2ac] ss:$24 sps:$4 sm:$0xff]   ;;  %v13484_v17 = vld [vmem:[#allocation81_spill] sm:$0xff] }
 0x1f0   :  { %v1580_v21 = vadd.f32 1e-05, %v1516_v31  ;;  %v1321_v48 = vpop.xlane.xlu0 %1320  ;;  %v1413_v36 = vadd.f32 %v1412_v49, %v1109_v7  ;;  %v1784_v63 = vmul.f32 %v6286_v46, %v13483_v3  ;;  %v1786_v31 = vmul.f32 %v6286_v46, %v8525_v9  ;;  %v13485_v49 = vld [vmem:[#allocation86_spill] sm:$0xff]  ;;  %3971 = vmatprep.subr.bf16.mxu0 %v6097_v54 }
 0x1f1   :  { %v529_v57 = vpop.xlane.xlu1 %528  ;;  %v1517_v61 = vmul.f32 0.001953125, %v1321_v48  ;;  %v1418_v41 = vadd.f32 %v1417_v27, %v1113_v19  ;;  %v1783_v7 = vmul.f32 %v6286_v46, %v13484_v17  ;;  %v1785_v3 = vmul.f32 %v6286_v46, %v13485_v49  ;;  %v6528_v19 = vld [vmem:[%s12810_s0 + $0x668] sm:$0xff]  ;;  %3972 = vmatpush2.bf16.msra.mxu0 %v6095_v2  ;;  %v6531_v2 = vld [vmem:[%s12810_s0 + $0x680] sm:$0xff] }
 0x1f2   :  { %6291 = vrsqrt.f32 %v1580_v21  ;;  %v642_v55 = vmul.f32 0.001953125, %v529_v57  ;;  %v6288_v8 = vpop.eup %6287  ;;  %v1414_v56 = vadd.f32 %v1413_v36, %v1110_v5  ;;  %v6527_v57 = vld [vmem:[%s12810_s0 + $0x660] sm:$0xff]  ;;  %v6529_v36 = vld [vmem:[%s12810_s0 + $0x670] sm:$0xff] }
 0x1f3   :  { %v1581_v48 = vadd.f32 1e-05, %v1517_v61  ;;  %v1419_v46 = vadd.f32 %v1418_v41, %v1114_v13  ;;  %v6098_v17 = vld [vmem:[%s12811_s1 + $0x5a8] ss:$24 sps:$4 sm:$0xff]   ;;  %v6100_v27 = vld [vmem:[%s12811_s1 + $0x5ac] ss:$24 sps:$4 sm:$0xff]   ;;  %v1787_v41 = vmul.f32 %v6288_v8, %v8494_v52 }
 0x1f4   :  { %v9769_v9 = vsub.f32 %v6527_v57, %v642_v55  ;;  %v9774_v21 = vsub.f32 %v6528_v19, %v642_v55  ;;  %v9779_v5 = vsub.f32 %v6529_v36, %v642_v55  ;;  %1415 = vadd.xlane.f32.xlu1 %v1414_v56  ;;  %v1788_v57 = vmul.f32 %v6288_v8, %v8503_v26  ;;  %v13489_v13 = vld [vmem:[#allocation4_spill] sm:$0xff]  ;;  %v6530_v36 = vld [vmem:[%s12810_s0 + $0x678] sm:$0xff]  ;;  %v2255_v26 = vld [vmem:[%s12812_s2] sm:$0x3f] }
 0x1f5   :  { %v534_v61 = vpop.xlane.xlu0 %533  ;;  %6293 = vrsqrt.f32 %v1581_v48  ;;  %v1790_v19 = vmul.f32 %v6288_v8, %v8602_v62  ;;  %1420 = vadd.xlane.f32.xlu0 %v1419_v46  ;;  %v1789_v54 = vmul.f32 %v6288_v8, %v13489_v13  ;;  %v9794_v6 = vsub.f32 %v6530_v36, %v642_v55  ;;  %v6103_v62 = vld [vmem:[%s12811_s1 + $0x27c] ss:$24 sps:$4 sm:$0xff]   ;;  %v6532_v55 = vld [vmem:[%s12810_s0 + $0x688] sm:$0xff]  ;;  %4324 = vmatprep.subr.bf16.mxu1 %v6100_v27 }
 0x1f6   :  { %13486 = vst [vmem:[#allocation5_spill] sm:$0xff] %v9769_v9  ;;  %13487 = vst [vmem:[#allocation81_spill] sm:$0xff] %v9774_v21  ;;  %v643_v49 = vmul.f32 0.001953125, %v534_v61  ;;  %v1115_v48 = vmul.f32 %v9769_v9, %v9769_v9  ;;  %v6533_v61 = vld [vmem:[%s12810_s0 + $0x690] sm:$0xff]  ;;  %v9819_v13 = vpack.c.bf16 %v1788_v57, %v1784_v63  ;;  %4325 = vmatpush2.bf16.msra.mxu1 %v6098_v17  ;;  %3973 = vmatprep.subr.bf16.mxu0 %v6103_v62 }
 0x1f7   :  { %13488 = vst [vmem:[#allocation86_spill] sm:$0xff] %v9779_v5  ;;  %13490 = vst [vmem:[#allocation4_spill] sm:$0xff] %v9794_v6  ;;  %v9821_v9 = vpack.c.bf16 %v1790_v19, %v1786_v31  ;;  %v9825_v18 = vpack.c.bf16 %v1789_v54, %v1785_v3  ;;  %v1116_v63 = vmul.f32 %v9774_v21, %v9774_v21  ;;  %v6534_v31 = vld [vmem:[%s12810_s0 + $0x698] sm:$0xff]  ;;  %v13499_v3 = vsub.s32 0, %v9678_v16 }
 0x1f8   :  { %v1326_v52 = vpop.xlane.xlu1 %1325  ;;  %v9807_v56 = vsub.f32 %v6531_v2, %v643_v49  ;;  %v9812_v8 = vsub.f32 %v6532_v55, %v643_v49  ;;  %v9817_v46 = vsub.f32 %v6533_v61, %v643_v49  ;;  %13494 = vst [vmem:[#allocation131_spill] sm:$0xff] %v9819_v13  ;;  %v9823_v2 = vpack.c.bf16 %v1787_v41, %v1783_v7  ;;  %v6101_v55 = vld [vmem:[%s12811_s1 + $0x278] ss:$24 sps:$4 sm:$0xff]   ;;  %v6106_v61 = vld [vmem:[%s12811_s1 + $0x57c] ss:$24 sps:$4 sm:$0xff]   ;;  %v6290_v41 = vpop.eup %6289 }
 0x1f9   :  { %v1518_v36 = vmul.f32 0.001953125, %v1326_v52  ;;  %13495 = vst [vmem:[#allocation132_spill] sm:$0xff] %v9821_v9  ;;  %13497 = vst [vmem:[#allocation134_spill] sm:$0xff] %v9825_v18  ;;  %3409 = vmatprep.mubr.bf16.mxu0 %v9819_v13  ;;  %v9839_v7 = vsub.f32 %v6534_v31, %v643_v49  ;;  %v9843_v17 = vrot.slane %v2255_v26, %v13499_v3  ;;  %v13500_v27 = vsub.s32 1, %v9678_v16  ;;  %v6104_v19 = vld [vmem:[%s12811_s1 + $0x578] ss:$24 sps:$4 sm:$0xff]  }
 0x1fa   :  { %13491 = vst [vmem:[#allocation128_spill] sm:$0xff] %v9807_v56  ;;  %13492 = vst [vmem:[#allocation129_spill] sm:$0xff] %v9812_v8  ;;  %3762 = vmatprep.mubr.bf16.mxu1 %v9821_v9  ;;  %3410 = vmatmul.mubr.bf16.gmra.mxu0 %v9823_v2  ;;  %v1117_v49 = vmul.f32 %v9779_v5, %v9779_v5  ;;  %v1119_v62 = vmul.f32 %v9807_v56, %v9807_v56 }
 0x1fb   :  { %13493 = vst [vmem:[#allocation130_spill] sm:$0xff] %v9817_v46  ;;  %13496 = vst [vmem:[#allocation133_spill] sm:$0xff] %v9823_v2  ;;  %v9847_v57 = vrot.slane %v2255_v26, %v13500_v27  ;;  %v1582_v54 = vadd.f32 1e-05, %v1518_v36  ;;  %v1120_v26 = vmul.f32 %v9812_v8, %v9812_v8  ;;  %3763 = vmatmul.mubr.bf16.gmra.mxu1 %v9825_v18  ;;  %3974 = vmatpush2.bf16.msra.mxu0 %v6101_v55  ;;  %v13501_v8 = vld [vmem:[#allocation88_spill] sm:$0xff]  ;;  %v13502_v18 = vld [vmem:[#allocation95_spill] sm:$0xff] }
 0x1fc   :  { %13498 = vst [vmem:[#allocation135_spill] sm:$0xff] %v9839_v7  ;;  %v539_v52 = vpop.xlane.xlu1 %538  ;;  %v1331_v31 = vpop.xlane.xlu0 %1330  ;;  %v1118_v36 = vmul.f32 %v9794_v6, %v9794_v6  ;;  %v1422_v3 = vadd.f32 %v1116_v63, %v1115_v48  ;;  %v1121_v27 = vmul.f32 %v9817_v46, %v9817_v46  ;;  %v1122_v16 = vmul.f32 %v9839_v7, %v9839_v7  ;;  %v6535_v48 = vld [vmem:[%s12810_s0 + $0x6a0] sm:$0xff]  ;;  %v13510_v7 = vld [vmem:[#allocation100_spill] sm:$0xff] }
 0x1fd   :  { %6295 = vrsqrt.f32 %v1582_v54  ;;  %v644_v2 = vmul.f32 0.001953125, %v539_v52  ;;  %v1519_v9 = vmul.f32 0.001953125, %v1331_v31  ;;  %v1427_v13 = vadd.f32 %v1120_v26, %v1119_v62  ;;  %4326 = vmatprep.subr.bf16.mxu1 %v6106_v61  ;;  %v6536_v54 = vld [vmem:[%s12810_s0 + $0x6a8] sm:$0xff]  ;;  %v6538_v31 = vld [vmem:[%s12810_s0 + $0x6b8] sm:$0xff] }
 0x1fe   :  { %v1423_v56 = vadd.f32 %v1422_v3, %v1117_v49  ;;  %v1792_v5 = vmul.f32 %v6290_v41, %v13501_v8  ;;  %v1794_v21 = vmul.f32 %v6290_v41, %v13502_v18  ;;  %v1791_v6 = vmul.f32 %v6290_v41, %v13503_v32  ;;  %4327 = vmatpush2.bf16.msra.mxu1 %v6104_v19  ;;  %v13506_v49 = vld [vmem:[#allocation94_spill] sm:$0xff]  ;;  %v6537_v32 = vld [vmem:[%s12810_s0 + $0x6b0] sm:$0xff] }
 0x1ff   :  { %v9873_v63 = vsub.f32 %v6535_v48, %v644_v2  ;;  %v9878_v55 = vsub.f32 %v6536_v54, %v644_v2  ;;  %v1583_v61 = vadd.f32 1e-05, %v1519_v9  ;;  %v1793_v8 = vmul.f32 %v6290_v41, %v13506_v49  ;;  %v6292_v62 = vpop.eup %6291 }
 0x200   :  { %v9884_v18 = vsub.f32 %v6537_v32, %v644_v2  ;;  %v544_v19 = vpop.xlane.xlu0 %543  ;;  %v1424_v26 = vadd.f32 %v1423_v56, %v1118_v36  ;;  %v1428_v52 = vadd.f32 %v1427_v13, %v1121_v27  ;;  %v9889_v3 = vsub.f32 %v6538_v31, %v644_v2  ;;  %v13509_v32 = vld [vmem:[#allocation3_spill] sm:$0xff]  ;;  %v6539_v27 = vld [vmem:[%s12810_s0 + $0x6c0] sm:$0xff] }
 0x201   :  { %13504 = vst [vmem:[#allocation88_spill] sm:$0xff] %v9873_v63  ;;  %13505 = vst [vmem:[#allocation95_spill] sm:$0xff] %v9878_v55  ;;  %6297 = vrsqrt.f32 %v1583_v61  ;;  %v645_v9 = vmul.f32 0.001953125, %v544_v19  ;;  %v1796_v41 = vmul.f32 %v6292_v62, %v8575_v14  ;;  %v1798_v48 = vmul.f32 %v6292_v62, %v8698_v38  ;;  %v6540_v38 = vld [vmem:[%s12810_s0 + $0x6c8] sm:$0xff] }
 0x202   :  { %13507 = vst [vmem:[#allocation87_spill] sm:$0xff] %v9884_v18  ;;  %13508 = vst [vmem:[#allocation94_spill] sm:$0xff] %v9889_v3  ;;  %1425 = vadd.xlane.f32.xlu1 %v1424_v26  ;;  %v1429_v49 = vadd.f32 %v1428_v52, %v1122_v16  ;;  %v1795_v46 = vmul.f32 %v6292_v62, %v13509_v32  ;;  %v1797_v56 = vmul.f32 %v6292_v62, %v13510_v7  ;;  %v9897_v36 = vpop.eup %6293  ;;  %v6541_v7 = vld [vmem:[%s12810_s0 + $0x6d0] sm:$0xff] }
 0x203   :  { %v1336_v54 = vpop.xlane.xlu1 %1335  ;;  %v1123_v13 = vmul.f32 %v9873_v63, %v9873_v63  ;;  %v9902_v14 = vsub.f32 %v6539_v27, %v645_v9  ;;  %v9907_v16 = vsub.f32 %v6540_v38, %v645_v9  ;;  %v9912_v61 = vsub.f32 %v6541_v7, %v645_v9 }
 0x204   :  { %v1520_v2 = vmul.f32 0.001953125, %v1336_v54  ;;  %1430 = vadd.xlane.f32.xlu0 %v1429_v49  ;;  %v9914_v62 = vpack.c.bf16 %v1796_v41, %v1792_v5  ;;  %v9916_v19 = vpack.c.bf16 %v1798_v48, %v1794_v21  ;;  %v9918_v26 = vpack.c.bf16 %v1795_v46, %v1791_v6  ;;  %v6107_v21 = vld [vmem:[%s12811_s1 + $0x248] ss:$24 sps:$4 sm:$0xff]   ;;  %v6109_v6 = vld [vmem:[%s12811_s1 + $0x24c] ss:$24 sps:$4 sm:$0xff]  }
 0x205   :  { %13511 = vst [vmem:[#allocation3_spill] sm:$0xff] %v9902_v14  ;;  %13512 = vst [vmem:[#allocation100_spill] sm:$0xff] %v9907_v16  ;;  %v9920_v52 = vpack.c.bf16 %v1797_v56, %v1793_v8  ;;  %v1124_v32 = vmul.f32 %v9878_v55, %v9878_v55  ;;  %v1125_v27 = vmul.f32 %v9884_v18, %v9884_v18  ;;  %v6542_v8 = vld [vmem:[%s12810_s0 + $0x6d8] sm:$0xff]  ;;  %v9945_v56 = vpop.f32.mrf.mxu0  ;;  %3975 = vmatprep.subr.bf16.mxu0 %v6109_v6  ;;  %v13524_v55 = vld [vmem:[#allocation92_spill] sm:$0xff] }
 0x206   :  { %13513 = vst [vmem:[#allocation136_spill] sm:$0xff] %v9912_v61  ;;  %13514 = vst [vmem:[#allocation137_spill] sm:$0xff] %v9914_v62  ;;  %v1584_v31 = vadd.f32 1e-05, %v1520_v2  ;;  %v1341_v54 = vpop.xlane.xlu0 %1340  ;;  %v1126_v38 = vmul.f32 %v9889_v3, %v9889_v3  ;;  %3419 = vmatprep.mubr.bf16.mxu0 %v9914_v62  ;;  %3772 = vmatprep.mubr.bf16.mxu1 %v9916_v19  ;;  %v9939_v41 = vsub.f32 %v6542_v8, %v645_v9  ;;  %v9951_v9 = vpop.f32.mrf.mxu1 }
 0x207   :  { %13515 = vst [vmem:[#allocation138_spill] sm:$0xff] %v9916_v19  ;;  %13516 = vst [vmem:[#allocation139_spill] sm:$0xff] %v9918_v26  ;;  %v549_v5 = vpop.xlane.xlu1 %548  ;;  %v1521_v46 = vmul.f32 0.001953125, %v1341_v54  ;;  %v1127_v48 = vmul.f32 %v9902_v14, %v9902_v14  ;;  %v1128_v49 = vmul.f32 %v9907_v16, %v9907_v16  ;;  %3420 = vmatmul.mubr.bf16.gmra.mxu0 %v9918_v26  ;;  %3773 = vmatmul.mubr.bf16.gmra.mxu1 %v9920_v52  ;;  %v13519_v14 = vld [vmem:[#allocation93_spill] sm:$0xff] }
 0x208   :  { %13517 = vst [vmem:[#allocation140_spill] sm:$0xff] %v9920_v52  ;;  %13518 = vst [vmem:[#allocation141_spill] sm:$0xff] %v9939_v41  ;;  %6299 = vrsqrt.f32 %v1584_v31  ;;  %v646_v2 = vmul.f32 0.001953125, %v549_v5  ;;  %v1432_v7 = vadd.f32 %v1124_v32, %v1123_v13  ;;  %v1129_v54 = vmul.f32 %v9912_v61, %v9912_v61  ;;  %v9957_v31 = vpop.f32.mrf.mxu0  ;;  %v6543_v13 = vld [vmem:[%s12810_s0 + $0x6e0] sm:$0xff]  ;;  %v6544_v5 = vld [vmem:[%s12810_s0 + $0x6e8] sm:$0xff]  ;;  %v9974_v52 = vpop.f32.mrf.mxu1  ;;  %3976 = vmatpush2.bf16.msra.mxu0 %v6107_v21 }
 0x209   :  { %v1585_v8 = vadd.f32 1e-05, %v1521_v46  ;;  %v1130_v19 = vmul.f32 %v9939_v41, %v9939_v41  ;;  %v1437_v62 = vadd.f32 %v1128_v49, %v1127_v48  ;;  %v1800_v16 = vmul.f32 %v9897_v36, %v13519_v14  ;;  %v6545_v48 = vld [vmem:[%s12810_s0 + $0x6f0] sm:$0xff]  ;;  %v13523_v41 = vld [vmem:[#allocation105_spill] sm:$0xff]  ;;  %v6546_v21 = vld [vmem:[%s12810_s0 + $0x700] sm:$0xff] }
 0x20a   :  { %v9962_v32 = vsub.f32 %v6543_v13, %v646_v2  ;;  %v9967_v46 = vsub.f32 %v6544_v5, %v646_v2  ;;  %v9972_v14 = vsub.f32 %v6545_v48, %v646_v2  ;;  %v554_v49 = vpop.xlane.xlu0 %553  ;;  %v1433_v6 = vadd.f32 %v1432_v7, %v1125_v27  ;;  %v6296_v26 = vpop.eup %6295 }
 0x20b   :  { %6301 = vrsqrt.f32 %v1585_v8  ;;  %v647_v13 = vmul.f32 0.001953125, %v554_v49  ;;  %v1438_v61 = vadd.f32 %v1437_v62, %v1129_v54  ;;  %v1802_v18 = vmul.f32 %v9897_v36, %v13523_v41  ;;  %v9978_v5 = vpop.f32.mrf.mxu0  ;;  %v9984_v7 = vpop.f32.mrf.mxu1  ;;  %v6547_v41 = vld [vmem:[%s12810_s0 + $0x708] sm:$0xff]  ;;  %v13530_v49 = vld [vmem:[#allocation96_spill] sm:$0xff] }
 0x20c   :  { %13520 = vst [vmem:[#allocation93_spill] sm:$0xff] %v9962_v32  ;;  %13521 = vst [vmem:[#allocation142_spill] sm:$0xff] %v9967_v46  ;;  %v1434_v63 = vadd.f32 %v1433_v6, %v1126_v38  ;;  %v1804_v3 = vmul.f32 %v6296_v26, %v8659_v45  ;;  %v1806_v48 = vmul.f32 %v6296_v26, %v8803_v25  ;;  %v6548_v45 = vld [vmem:[%s12810_s0 + $0x710] sm:$0xff] }
 0x20d   :  { %13522 = vst [vmem:[#allocation143_spill] sm:$0xff] %v9972_v14  ;;  %v1799_v27 = vmul.f32 %v9897_v36, %v13524_v55  ;;  %v9989_v62 = vsub.f32 %v6546_v21, %v647_v13  ;;  %v9994_v38 = vsub.f32 %v6547_v41, %v647_v13  ;;  %v9999_v25 = vsub.f32 %v6548_v45, %v647_v13  ;;  %v13531_v21 = vld [vmem:[#allocation104_spill] sm:$0xff] }
 0x20e   :  { %v1439_v55 = vadd.f32 %v1438_v61, %v1130_v19  ;;  %1435 = vadd.xlane.f32.xlu1 %v1434_v63  ;;  %v10001_v54 = vpack.c.bf16 %v1804_v3, %v1800_v16  ;;  %v10003_v8 = vpack.c.bf16 %v1806_v48, %v1802_v18  ;;  %v1803_v6 = vmul.f32 %v6296_v26, %v13530_v49  ;;  %v10008_v23 = vpop.eup %6297  ;;  %v6549_v61 = vld [vmem:[%s12810_s0 + $0x6f8] sm:$0xff]  ;;  %v10020_v16 = vpop.f32.mrf.mxu0 }
 0x20f   :  { %13525 = vst [vmem:[#allocation105_spill] sm:$0xff] %v9989_v62  ;;  %13526 = vst [vmem:[#allocation92_spill] sm:$0xff] %v9994_v38  ;;  %v1801_v44 = vmul.f32 %v9897_v36, %v13531_v21  ;;  %v1346_v41 = vpop.xlane.xlu1 %1345  ;;  %v1805_v22 = vmul.f32 %v6296_v26, %v13532_v50  ;;  %v10014_v63 = vsub.f32 %v6549_v61, %v646_v2  ;;  %v6550_v26 = vld [vmem:[%s12810_s0 + $0x718] sm:$0xff]  ;;  %v10033_v48 = vpop.f32.mrf.mxu1 }
 0x210   :  { %13527 = vst [vmem:[#allocation144_spill] sm:$0xff] %v9999_v25  ;;  %13528 = vst [vmem:[#allocation145_spill] sm:$0xff] %v10001_v54  ;;  %1440 = vadd.xlane.f32.xlu0 %v1439_v55  ;;  %v1131_v18 = vmul.f32 %v9962_v32, %v9962_v32  ;;  %v1132_v3 = vmul.f32 %v9967_v46, %v9967_v46  ;;  %v1522_v36 = vmul.f32 0.001953125, %v1346_v41  ;;  %3429 = vmatprep.mubr.bf16.mxu0 %v10001_v54  ;;  %v10059_v54 = vpop.f32.mrf.mxu0  ;;  %v13550_v32 = vld [vmem:[#allocation26_spill] sm:$0xff] }
 0x211   :  { %13529 = vst [vmem:[#allocation146_spill] sm:$0xff] %v10003_v8  ;;  %13533 = vst [vmem:[#allocation96_spill] sm:$0xff] %v10014_v63  ;;  %3782 = vmatprep.mubr.bf16.mxu1 %v10003_v8  ;;  %v10024_v50 = vpack.c.bf16 %v1803_v6, %v1799_v27  ;;  %v1133_v19 = vmul.f32 %v9972_v14, %v9972_v14  ;;  %v10031_v2 = vsub.f32 %v6550_v26, %v647_v13  ;;  %v6110_v6 = vld [vmem:[%s12811_s1 + $0x548] ss:$24 sps:$4 sm:$0xff]   ;;  %v6112_v13 = vld [vmem:[%s12811_s1 + $0x54c] ss:$24 sps:$4 sm:$0xff]   ;;  %v10063_v14 = vpop.f32.mrf.mxu1 }
 0x212   :  { %v10035_v45 = vpack.c.bf16 %v1805_v22, %v1801_v44  ;;  %v1134_v55 = vmul.f32 %v10014_v63, %v10014_v63  ;;  %v1442_v49 = vadd.f32 %v1132_v3, %v1131_v18  ;;  %v1135_v27 = vmul.f32 %v9989_v62, %v9989_v62  ;;  %v13537_v8 = vld [vmem:[#allocation103_spill] sm:$0xff]  ;;  %4328 = vmatprep.subr.bf16.mxu1 %v6112_v13 }
 0x213   :  { %13534 = vst [vmem:[#allocation104_spill] sm:$0xff] %v10024_v50  ;;  %13535 = vst [vmem:[#allocation16_spill] sm:$0xff] %v10031_v2  ;;  %v1586_v21 = vadd.f32 1e-05, %v1522_v36  ;;  %v1351_v41 = vpop.xlane.xlu0 %1350  ;;  %3430 = vmatmul.mubr.bf16.gmra.mxu0 %v10024_v50  ;;  %v1136_v22 = vmul.f32 %v9994_v38, %v9994_v38  ;;  %v1137_v44 = vmul.f32 %v9999_v25, %v9999_v25  ;;  %v13538_v38 = vld [vmem:[#allocation106_spill] sm:$0xff]  ;;  %4329 = vmatpush2.bf16.msra.mxu1 %v6110_v6 }
 0x214   :  { %13536 = vst [vmem:[#allocation147_spill] sm:$0xff] %v10035_v45  ;;  %v1138_v61 = vmul.f32 %v10031_v2, %v10031_v2  ;;  %v559_v18 = vpop.xlane.xlu1 %558  ;;  %v1523_v3 = vmul.f32 0.001953125, %v1351_v41  ;;  %3783 = vmatmul.mubr.bf16.gmra.mxu1 %v10035_v45  ;;  %v1443_v26 = vadd.f32 %v1442_v49, %v1133_v19  ;;  %v3282_v36 = vadd.f32 %v9945_v56, %v9843_v17  ;;  %v10068_v45 = vpop.f32.mrf.mxu0 }
 0x215   :  { %v1808_v50 = vmul.f32 %v10008_v23, %v13537_v8  ;;  %6303 = vrsqrt.f32 %v1586_v21  ;;  %v648_v62 = vmul.f32 0.001953125, %v559_v18  ;;  %v1447_v25 = vadd.f32 %v1136_v22, %v1135_v27  ;;  %v6300_v41 = vpop.eup %6299  ;;  %v6551_v27 = vld [vmem:[%s12810_s0 + $0x720] sm:$0xff]  ;;  %v10085_v22 = vpop.f32.mrf.mxu1 }
 0x216   :  { %v1810_v2 = vmul.f32 %v10008_v23, %v13538_v38  ;;  %v1587_v19 = vadd.f32 1e-05, %v1523_v3  ;;  %v1444_v49 = vadd.f32 %v1443_v26, %v1134_v55  ;;  %v3635_v56 = vadd.f32 %v9951_v9, %v3282_v36  ;;  %v6552_v38 = vld [vmem:[%s12810_s0 + $0x728] sm:$0xff]  ;;  %v6553_v9 = vld [vmem:[%s12810_s0 + $0x730] sm:$0xff]  ;;  %v10092_v36 = vpop.f32.mrf.mxu0 }
 0x217   :  { %v3284_v8 = vadd.f32 %v9957_v31, %v9847_v57  ;;  %v10073_v13 = vsub.f32 %v6551_v27, %v648_v62  ;;  %v10078_v6 = vsub.f32 %v6552_v38, %v648_v62  ;;  %v10083_v55 = vsub.f32 %v6553_v9, %v648_v62  ;;  %v564_v31 = vpop.xlane.xlu0 %563  ;;  %v13542_v9 = vld [vmem:[#allocation102_spill] sm:$0xff] }
 0x218   :  { %v1448_v21 = vadd.f32 %v1447_v25, %v1137_v44  ;;  %6305 = vrsqrt.f32 %v1587_v19  ;;  %v649_v18 = vmul.f32 0.001953125, %v564_v31  ;;  %1445 = vadd.xlane.f32.xlu1 %v1444_v49  ;;  %5365 = vst [vmem:[%s12813_s3] sm:$0xff] %v3635_v56  ;;  %v1812_v3 = vmul.f32 %v6300_v41, %v8752_v1  ;;  %v10094_v27 = vpop.eup %6301  ;;  %v10100_v49 = vpop.f32.mrf.mxu1  ;;  %v6554_v1 = vld [vmem:[%s12810_s0 + $0x740] sm:$0xff] }
 0x219   :  { %13539 = vst [vmem:[#allocation103_spill] sm:$0xff] %v10073_v13  ;;  %13540 = vst [vmem:[#allocation106_spill] sm:$0xff] %v10078_v6  ;;  %v1814_v26 = vmul.f32 %v6300_v41, %v8916_v20  ;;  %v1807_v25 = vmul.f32 %v10008_v23, %v13542_v9  ;;  %v1811_v44 = vmul.f32 %v6300_v41, %v8746_v43  ;;  %v6555_v20 = vld [vmem:[%s12810_s0 + $0x748] sm:$0xff]  ;;  %v6556_v43 = vld [vmem:[%s12810_s0 + $0x750] sm:$0xff] }
 0x21a   :  { %13541 = vst [vmem:[#allocation148_spill] sm:$0xff] %v10083_v55  ;;  %v1449_v38 = vadd.f32 %v1448_v21, %v1138_v61  ;;  %v3637_v19 = vadd.f32 %v9974_v52, %v3284_v8  ;;  %v10105_v56 = vsub.f32 %v6554_v1, %v649_v18  ;;  %v10110_v61 = vsub.f32 %v6555_v20, %v649_v18  ;;  %v13549_v1 = vld [vmem:[#allocation13_spill] sm:$0xff] }
 0x21b   :  { %v10115_v31 = vsub.f32 %v6556_v43, %v649_v18  ;;  %v10117_v52 = vpack.c.bf16 %v1812_v3, %v1808_v50  ;;  %v1356_v8 = vpop.xlane.xlu1 %1355  ;;  %v10119_v21 = vpack.c.bf16 %v1814_v26, %v1810_v2  ;;  %v10121_v9 = vpack.c.bf16 %v1811_v44, %v1807_v25  ;;  %v6557_v50 = vld [vmem:[%s12810_s0 + $0x738] sm:$0xff]  ;;  %v10149_v25 = vpop.f32.mrf.mxu1 }
 0x21c   :  { %13543 = vst [vmem:[#allocation102_spill] sm:$0xff] %v10105_v56  ;;  %13544 = vst [vmem:[#allocation149_spill] sm:$0xff] %v10110_v61  ;;  %1450 = vadd.xlane.f32.xlu0 %v1449_v38  ;;  %v1809_v20 = vmul.f32 %v10008_v23, %v13549_v1  ;;  %v1813_v63 = vmul.f32 %v6300_v41, %v13550_v32  ;;  %v1524_v46 = vmul.f32 0.001953125, %v1356_v8  ;;  %v10139_v38 = vpop.f32.mrf.mxu0 }
 0x21d   :  { %13545 = vst [vmem:[#allocation150_spill] sm:$0xff] %v10115_v31  ;;  %13546 = vst [vmem:[#allocation151_spill] sm:$0xff] %v10117_v52  ;;  %v1361_v43 = vpop.xlane.xlu0 %1360  ;;  %3439 = vmatprep.mubr.bf16.mxu0 %v10117_v52  ;;  %v10133_v2 = vsub.f32 %v6557_v50, %v648_v62  ;;  %v1139_v3 = vmul.f32 %v10073_v13, %v10073_v13  ;;  %v1140_v26 = vmul.f32 %v10078_v6, %v10078_v6  ;;  %v6558_v50 = vld [vmem:[%s12810_s0 + $0x758] sm:$0xff]  ;;  %v13562_v6 = vld [vmem:[#allocation24_spill] sm:$0xff] }
 0x21e   :  { %13547 = vst [vmem:[#allocation152_spill] sm:$0xff] %v10119_v21  ;;  %13548 = vst [vmem:[#allocation153_spill] sm:$0xff] %v10121_v9  ;;  %v1525_v23 = vmul.f32 0.001953125, %v1361_v43  ;;  %3792 = vmatprep.mubr.bf16.mxu1 %v10119_v21  ;;  %3440 = vmatmul.mubr.bf16.gmra.mxu0 %v10121_v9  ;;  %v10143_v32 = vpack.c.bf16 %v1813_v63, %v1809_v20  ;;  %v1141_v41 = vmul.f32 %v10083_v55, %v10083_v55  ;;  %v6113_v63 = vld [vmem:[%s12811_s1 + $0x218] ss:$24 sps:$4 sm:$0xff]   ;;  %v10173_v52 = vpop.f32.mrf.mxu0 }
 0x21f   :  { %5366 = vst [vmem:[%s12813_s3 + $0x8] sm:$0xff] %v3637_v19  ;;  %13551 = vst [vmem:[#allocation13_spill] sm:$0xff] %v10133_v2  ;;  %v3286_v62 = vadd.f32 %v9978_v5, %v9843_v17  ;;  %v1588_v44 = vadd.f32 1e-05, %v1524_v46  ;;  %v1142_v19 = vmul.f32 %v10133_v2, %v10133_v2  ;;  %v1452_v8 = vadd.f32 %v1140_v26, %v1139_v3  ;;  %v6115_v20 = vld [vmem:[%s12811_s1 + $0x21c] ss:$24 sps:$4 sm:$0xff]   ;;  %v569_v43 = vpop.xlane.xlu1 %568 }
 0x220   :  { %13552 = vst [vmem:[#allocation26_spill] sm:$0xff] %v10143_v32  ;;  %v3288_v1 = vadd.f32 %v10020_v16, %v9847_v57  ;;  %v1589_v5 = vadd.f32 1e-05, %v1525_v23  ;;  %3793 = vmatmul.mubr.bf16.gmra.mxu1 %v10143_v32  ;;  %v10166_v3 = vsub.f32 %v6558_v50, %v649_v18  ;;  %v1143_v16 = vmul.f32 %v10105_v56, %v10105_v56  ;;  %v13560_v56 = vld [vmem:[#allocation108_spill] sm:$0xff]  ;;  %v13561_v2 = vld [vmem:[#allocation109_spill] sm:$0xff] }
 0x221   :  { %v3639_v46 = vadd.f32 %v9984_v7, %v3286_v62  ;;  %6307 = vrsqrt.f32 %v1588_v44  ;;  %v10170_v26 = vmul.f32 0.001953125, %v569_v43  ;;  %v574_v9 = vpop.xlane.xlu0 %573  ;;  %v1453_v21 = vadd.f32 %v1452_v8, %v1141_v41  ;;  %3977 = vmatprep.subr.bf16.mxu0 %v6115_v20  ;;  %v10182_v62 = vpop.f32.mrf.mxu1  ;;  %v6561_v43 = vld [vmem:[%s12810_s0 + $0x770] sm:$0xff] }
 0x222   :  { %13553 = vst [vmem:[#allocation154_spill] sm:$0xff] %v10166_v3  ;;  %v3641_v23 = vadd.f32 %v10033_v48, %v3288_v1  ;;  %6309 = vrsqrt.f32 %v1589_v5  ;;  %v10175_v7 = vmul.f32 0.001953125, %v574_v9  ;;  %v1144_v18 = vmul.f32 %v10110_v61, %v10110_v61  ;;  %3978 = vmatpush2.bf16.msra.mxu0 %v6113_v63  ;;  %v6304_v44 = vpop.eup %6303  ;;  %v6559_v48 = vld [vmem:[%s12810_s0 + $0x760] sm:$0xff]  ;;  %v6560_v9 = vld [vmem:[%s12810_s0 + $0x768] sm:$0xff]  ;;  %v10201_v20 = vpop.f32.mrf.mxu0 }
 0x223   :  { %5371 = vst [vmem:[%s12813_s3 + $0x30] sm:$0xff] %v3639_v46  ;;  %v10188_v41 = vsub.f32 %v6559_v48, %v10170_v26  ;;  %v10194_v8 = vsub.f32 %v6560_v9, %v10170_v26  ;;  %v1454_v1 = vadd.f32 %v1453_v21, %v1142_v19  ;;  %v1145_v63 = vmul.f32 %v10115_v31, %v10115_v31  ;;  %v6562_v21 = vld [vmem:[%s12810_s0 + $0x780] sm:$0xff]  ;;  %v6563_v46 = vld [vmem:[%s12810_s0 + $0x788] sm:$0xff]  ;;  %v10223_v48 = vpop.f32.mrf.mxu1 }
 0x224   :  { %5372 = vst [vmem:[%s12813_s3 + $0x38] sm:$0xff] %v3641_v23  ;;  %v10207_v5 = vsub.f32 %v6561_v43, %v10170_v26  ;;  %v10213_v19 = vsub.f32 %v6562_v21, %v10175_v7  ;;  %v10219_v50 = vsub.f32 %v6563_v46, %v10175_v7  ;;  %v1146_v23 = vmul.f32 %v10166_v3, %v10166_v3  ;;  %v13559_v21 = vld [vmem:[#allocation8_spill] sm:$0xff]  ;;  %v10230_v55 = vpop.f32.mrf.mxu0 }
 0x225   :  { %13554 = vst [vmem:[#allocation155_spill] sm:$0xff] %v10188_v41  ;;  %13555 = vst [vmem:[#allocation156_spill] sm:$0xff] %v10194_v8  ;;  %v1366_v9 = vpop.xlane.xlu1 %1365  ;;  %1455 = vadd.xlane.f32.xlu1 %v1454_v1  ;;  %v1457_v43 = vadd.f32 %v1144_v18, %v1143_v16  ;;  %v3292_v32 = vadd.f32 %v10059_v54, %v9843_v17  ;;  %v1816_v31 = vmul.f32 %v10094_v27, %v13559_v21  ;;  %v10232_v46 = vpop.eup %6305 }
 0x226   :  { %13556 = vst [vmem:[#allocation157_spill] sm:$0xff] %v10207_v5  ;;  %13557 = vst [vmem:[#allocation158_spill] sm:$0xff] %v10213_v19  ;;  %v1820_v61 = vmul.f32 %v6304_v44, %v13560_v56  ;;  %v1526_v13 = vmul.f32 0.001953125, %v1366_v9  ;;  %v1818_v3 = vmul.f32 %v10094_v27, %v13561_v2  ;;  %v1822_v53 = vmul.f32 %v6304_v44, %v13562_v6  ;;  %v10239_v18 = vpop.f32.mrf.mxu1  ;;  %v13564_v56 = vld [vmem:[#allocation9_spill] sm:$0xff]  ;;  %v10246_v37 = vpop.f32.mrf.mxu0 }
 0x227   :  { %13558 = vst [vmem:[#allocation159_spill] sm:$0xff] %v10219_v50  ;;  %v3294_v16 = vadd.f32 %v10068_v45, %v9847_v57  ;;  %v1458_v54 = vadd.f32 %v1457_v43, %v1145_v63  ;;  %v3645_v1 = vadd.f32 %v10063_v14, %v3292_v32  ;;  %v1815_v15 = vmul.f32 %v10094_v27, %v13564_v56  ;;  %v6116_v2 = vld [vmem:[%s12811_s1 + $0x518] ss:$24 sps:$4 sm:$0xff]   ;;  %v6118_v45 = vld [vmem:[%s12811_s1 + $0x51c] ss:$24 sps:$4 sm:$0xff]   ;;  %v13566_v14 = vld [vmem:[#allocation107_spill] sm:$0xff] }
 0x228   :  { %v10242_v21 = vpack.c.bf16 %v1820_v61, %v1816_v31  ;;  %v1590_v6 = vadd.f32 1e-05, %v1526_v13  ;;  %v1371_v9 = vpop.xlane.xlu0 %1370  ;;  %v10254_v63 = vpack.c.bf16 %v1822_v53, %v1818_v3  ;;  %v1819_v61 = vmul.f32 %v6304_v44, %v13566_v14  ;;  %v10258_v32 = vpop.f32.mrf.mxu1  ;;  %v13568_v53 = vld [vmem:[#allocation27_spill] sm:$0xff]  ;;  %4330 = vmatprep.subr.bf16.mxu1 %v6118_v45  ;;  %v6566_v14 = vld [vmem:[%s12810_s0 + $0x7a0] sm:$0xff] }
 0x229   :  { %v3647_v31 = vadd.f32 %v10085_v22, %v3294_v16  ;;  %v1527_v56 = vmul.f32 0.001953125, %v1371_v9  ;;  %v1459_v12 = vadd.f32 %v1458_v54, %v1146_v23  ;;  %5377 = vst [vmem:[%s12813_s3 + $0x60] sm:$0xff] %v3645_v1  ;;  %v1817_v13 = vmul.f32 %v10094_v27, %v13567_v58  ;;  %v6564_v22 = vld [vmem:[%s12810_s0 + $0x790] sm:$0xff]  ;;  %v6565_v58 = vld [vmem:[%s12810_s0 + $0x778] sm:$0xff]  ;;  %4331 = vmatpush2.bf16.msra.mxu1 %v6116_v2 }
 0x22a   :  { %13563 = vst [vmem:[#allocation8_spill] sm:$0xff] %v10242_v21  ;;  %13565 = vst [vmem:[#allocation108_spill] sm:$0xff] %v10254_v63  ;;  %v579_v43 = vpop.xlane.xlu1 %578  ;;  %3449 = vmatprep.mubr.bf16.mxu0 %v10242_v21  ;;  %v1821_v3 = vmul.f32 %v6304_v44, %v13568_v53  ;;  %v10271_v16 = vsub.f32 %v6564_v22, %v10175_v7  ;;  %3802 = vmatprep.mubr.bf16.mxu1 %v10254_v63  ;;  %v10287_v44 = vpop.f32.mrf.mxu0  ;;  %6311 = vrsqrt.f32 %v1590_v6 }
 0x22b   :  { %v10273_v23 = vmul.f32 0.001953125, %v579_v43  ;;  %v10276_v54 = vpack.c.bf16 %v1819_v61, %v1815_v15  ;;  %5378 = vst [vmem:[%s12813_s3 + $0x68] sm:$0xff] %v3647_v31  ;;  %v10285_v27 = vsub.f32 %v6565_v58, %v10170_v26  ;;  %v1591_v1 = vadd.f32 1e-05, %v1527_v56  ;;  %1460 = vadd.xlane.f32.xlu0 %v1459_v12  ;;  %v6567_v12 = vld [vmem:[%s12810_s0 + $0x7a8] sm:$0xff]  ;;  %v6568_v61 = vld [vmem:[%s12810_s0 + $0x7b0] sm:$0xff]  ;;  %v10314_v43 = vpop.f32.mrf.mxu1 }
 0x22c   :  { %13569 = vst [vmem:[#allocation109_spill] sm:$0xff] %v10271_v16  ;;  %v10289_v45 = vpack.c.bf16 %v1821_v3, %v1817_v13  ;;  %v1147_v15 = vmul.f32 %v10188_v41, %v10188_v41  ;;  %v1148_v9 = vmul.f32 %v10194_v8, %v10194_v8  ;;  %v584_v31 = vpop.xlane.xlu0 %583  ;;  %v1149_v13 = vmul.f32 %v10207_v5, %v10207_v5  ;;  %v10321_v3 = vpop.f32.mrf.mxu0 }
 0x22d   :  { %13570 = vst [vmem:[#allocation24_spill] sm:$0xff] %v10276_v54  ;;  %13571 = vst [vmem:[#allocation9_spill] sm:$0xff] %v10285_v27  ;;  %v10299_v26 = vsub.f32 %v6566_v14, %v10273_v23  ;;  %v10305_v2 = vsub.f32 %v6567_v12, %v10273_v23  ;;  %v10311_v6 = vsub.f32 %v6568_v61, %v10273_v23  ;;  %3450 = vmatmul.mubr.bf16.gmra.mxu0 %v10276_v54 }
 0x22e   :  { %13572 = vst [vmem:[#allocation107_spill] sm:$0xff] %v10289_v45  ;;  %6313 = vrsqrt.f32 %v1591_v1  ;;  %3803 = vmatmul.mubr.bf16.gmra.mxu1 %v10289_v45  ;;  %v10317_v56 = vmul.f32 0.001953125, %v584_v31  ;;  %v1462_v53 = vadd.f32 %v1148_v9, %v1147_v15  ;;  %v10323_v22 = vpop.eup %6307  ;;  %v3296_v14 = vadd.f32 %v10092_v36, %v9843_v17  ;;  %v6569_v1 = vld [vmem:[%s12810_s0 + $0x798] sm:$0xff]  ;;  %v10337_v9 = vpop.f32.mrf.mxu1  ;;  %v6570_v36 = vld [vmem:[%s12810_s0 + $0x7c0] sm:$0xff] }
 0x22f   :  { %v1376_v58 = vpop.xlane.xlu1 %1375  ;;  %v3298_v12 = vadd.f32 %v10139_v38, %v9847_v57  ;;  %v10333_v61 = vsub.f32 %v6569_v1, %v10175_v7  ;;  %v1151_v15 = vmul.f32 %v10213_v19, %v10213_v19  ;;  %v10339_v31 = vpop.eup %6309  ;;  %v6571_v7 = vld [vmem:[%s12810_s0 + $0x7c8] sm:$0xff]  ;;  %v1150_v54 = vmul.f32 %v10285_v27, %v10285_v27 }
 0x230   :  { %v1528_v45 = vmul.f32 0.001953125, %v1376_v58  ;;  %v10345_v38 = vsub.f32 %v6570_v36, %v10317_v56  ;;  %v10351_v1 = vsub.f32 %v6571_v7, %v10317_v56  ;;  %v10355_v63 = vpop.f32.mrf.mxu0  ;;  %v1463_v58 = vadd.f32 %v1462_v53, %v1149_v13  ;;  %v10361_v41 = vpop.f32.mrf.mxu1  ;;  %v6572_v7 = vld [vmem:[%s12810_s0 + $0x7d0] sm:$0xff] }
 0x231   :  { %13573 = vst [vmem:[#allocation22_spill] sm:$0xff] %v10333_v61  ;;  %v3649_v21 = vadd.f32 %v10100_v49, %v3296_v14  ;;  %v3651_v19 = vadd.f32 %v10149_v25, %v3298_v12  ;;  %v1381_v5 = vpop.xlane.xlu0 %1380  ;;  %v1152_v36 = vmul.f32 %v10219_v50, %v10219_v50  ;;  %v10367_v27 = vsub.f32 %v6572_v7, %v10317_v56 }
 0x232   :  { %v1592_v8 = vadd.f32 1e-05, %v1528_v45  ;;  %v1529_v33 = vmul.f32 0.001953125, %v1381_v5  ;;  %v1153_v49 = vmul.f32 %v10271_v16, %v10271_v16  ;;  %v10371_v13 = vpop.f32.mrf.mxu0  ;;  %v1464_v25 = vadd.f32 %v1463_v58, %v1150_v54  ;;  %v13574_v54 = vld [vmem:[#allocation15_spill] sm:$0xff]  ;;  %v10389_v16 = vpop.f32.mrf.mxu1 }
 0x233   :  { %5383 = vst [vmem:[%s12813_s3 + $0x90] sm:$0xff] %v3649_v21  ;;  %v589_v53 = vpop.xlane.xlu1 %588  ;;  %5384 = vst [vmem:[%s12813_s3 + $0x98] sm:$0xff] %v3651_v19  ;;  %v1154_v45 = vmul.f32 %v10333_v61, %v10333_v61  ;;  %v1467_v14 = vadd.f32 %v1152_v36, %v1151_v15  ;;  %v3302_v5 = vadd.f32 %v10173_v52, %v9843_v17  ;;  %v13575_v61 = vld [vmem:[#allocation112_spill] sm:$0xff] }
 0x234   :  { %v10383_v12 = vmul.f32 0.001953125, %v589_v53  ;;  %v1593_v7 = vadd.f32 1e-05, %v1529_v33  ;;  %v1824_v58 = vmul.f32 %v10232_v46, %v13574_v54  ;;  %v1828_v21 = vmul.f32 %v10323_v22, %v8976_v4  ;;  %1465 = vadd.xlane.f32.xlu1 %v1464_v25  ;;  %v6573_v33 = vld [vmem:[%s12810_s0 + $0x7e0] sm:$0xff]  ;;  %v6574_v4 = vld [vmem:[%s12810_s0 + $0x7e8] sm:$0xff]  ;;  %v10431_v10 = vpop.f32.mrf.mxu1 }
 0x235   :  { %v1468_v19 = vadd.f32 %v1467_v14, %v1153_v49  ;;  %v3655_v50 = vadd.f32 %v10182_v62, %v3302_v5  ;;  %v1826_v15 = vmul.f32 %v10232_v46, %v13575_v61  ;;  %v1830_v52 = vmul.f32 %v10323_v22, %v9145_v24  ;;  %v6575_v61 = vld [vmem:[%s12810_s0 + $0x7f0] sm:$0xff] }
 0x236   :  { %6315 = vrsqrt.f32 %v1592_v8  ;;  %v10400_v36 = vsub.f32 %v6573_v33, %v10383_v12  ;;  %v10406_v62 = vsub.f32 %v6574_v4, %v10383_v12  ;;  %v10412_v24 = vsub.f32 %v6575_v61, %v10383_v12  ;;  %v10414_v8 = vpop.f32.mrf.mxu0  ;;  %v13577_v33 = vld [vmem:[#allocation17_spill] sm:$0xff] }
 0x237   :  { %v1469_v49 = vadd.f32 %v1468_v19, %v1154_v45  ;;  %5389 = vst [vmem:[%s12813_s3 + $0xc0] sm:$0xff] %v3655_v50  ;;  %v10419_v25 = vpack.c.bf16 %v1828_v21, %v1824_v58  ;;  %v10421_v53 = vpack.c.bf16 %v1830_v52, %v1826_v15  ;;  %v1386_v14 = vpop.xlane.xlu1 %1385  ;;  %v3304_v5 = vadd.f32 %v10201_v20, %v9847_v57  ;;  %v13578_v45 = vld [vmem:[#allocation111_spill] sm:$0xff]  ;;  %v13579_v58 = vld [vmem:[#allocation40_spill] sm:$0xff] }
 0x238   :  { %v1530_v54 = vmul.f32 0.001953125, %v1386_v14  ;;  %v1823_v4 = vmul.f32 %v10232_v46, %v13577_v33  ;;  %v1827_v61 = vmul.f32 %v10323_v22, %v8970_v51  ;;  %v1825_v19 = vmul.f32 %v10232_v46, %v13578_v45  ;;  %v10433_v50 = vpop.f32.mrf.mxu0  ;;  %v6576_v51 = vld [vmem:[%s12810_s0 + $0x7b8] sm:$0xff]  ;;  %v6312_v46 = vpop.eup %6311 }
 0x239   :  { %13576 = vst [vmem:[#allocation27_spill] sm:$0xff] %v10421_v53  ;;  %6317 = vrsqrt.f32 %v1593_v7  ;;  %1470 = vadd.xlane.f32.xlu0 %v1469_v49  ;;  %3459 = vmatprep.mubr.bf16.mxu0 %v10419_v25  ;;  %v3657_v20 = vadd.f32 %v10223_v48, %v3304_v5  ;;  %v1829_v21 = vmul.f32 %v10323_v22, %v13579_v58  ;;  %v10452_v22 = vpop.f32.mrf.mxu1  ;;  %v6121_v5 = vld [vmem:[%s12811_s1 + $0x1ec] ss:$24 sps:$4 sm:$0xff]  }
 0x23a   :  { %v10443_v15 = vsub.f32 %v6576_v51, %v10273_v23  ;;  %3812 = vmatprep.mubr.bf16.mxu1 %v10421_v53  ;;  %v1594_v52 = vadd.f32 1e-05, %v1530_v54  ;;  %v10446_v7 = vpack.c.bf16 %v1827_v61, %v1823_v4  ;;  %v1155_v49 = vmul.f32 %v10299_v26, %v10299_v26  ;;  %v10454_v14 = vpop.f32.mrf.mxu0  ;;  %v6119_v23 = vld [vmem:[%s12811_s1 + $0x1e8] ss:$24 sps:$4 sm:$0xff]   ;;  %3979 = vmatprep.subr.bf16.mxu0 %v6121_v5 }
 0x23b   :  { %v1156_v48 = vmul.f32 %v10305_v2, %v10305_v2  ;;  %v10462_v54 = vpop.eup %6313  ;;  %5390 = vst [vmem:[%s12813_s3 + $0xc8] sm:$0xff] %v3657_v20  ;;  %v10467_v33 = vpack.c.bf16 %v1829_v21, %v1825_v19  ;;  %v1157_v4 = vmul.f32 %v10311_v6, %v10311_v6  ;;  %v3306_v45 = vadd.f32 %v10230_v55, %v9843_v17  ;;  %v6577_v19 = vld [vmem:[%s12810_s0 + $0x7d8] sm:$0xff]  ;;  %v10484_v21 = vpop.f32.mrf.mxu1 }
 0x23c   :  { %13580 = vst [vmem:[#allocation15_spill] sm:$0xff] %v10446_v7  ;;  %v1158_v61 = vmul.f32 %v10443_v15, %v10443_v15  ;;  %6319 = vrsqrt.f32 %v1594_v52  ;;  %3460 = vmatmul.mubr.bf16.gmra.mxu0 %v10446_v7  ;;  %v3308_v51 = vadd.f32 %v10246_v37, %v9847_v57  ;;  %v10482_v20 = vsub.f32 %v6577_v19, %v10317_v56  ;;  %v13582_v7 = vld [vmem:[#allocation30_spill] sm:$0xff] }
 0x23d   :  { %13581 = vst [vmem:[#allocation112_spill] sm:$0xff] %v10467_v33  ;;  %v1472_v58 = vadd.f32 %v1156_v48, %v1155_v49  ;;  %3813 = vmatmul.mubr.bf16.gmra.mxu1 %v10467_v33  ;;  %v3659_v55 = vadd.f32 %v10239_v18, %v3306_v45  ;;  %v1159_v52 = vmul.f32 %v10345_v38, %v10345_v38  ;;  %v10494_v48 = vpop.f32.mrf.mxu0  ;;  %v10501_v45 = vpop.f32.mrf.mxu1 }
 0x23e   :  { %v1160_v37 = vmul.f32 %v10351_v1, %v10351_v1  ;;  %v1161_v49 = vmul.f32 %v10367_v27, %v10367_v27  ;;  %v3661_v19 = vadd.f32 %v10258_v32, %v3308_v51  ;;  %v1162_v5 = vmul.f32 %v10482_v20, %v10482_v20  ;;  %3980 = vmatpush2.bf16.msra.mxu0 %v6119_v23  ;;  %v13583_v32 = vld [vmem:[#allocation114_spill] sm:$0xff] }
 0x23f   :  { %v1473_v56 = vadd.f32 %v1472_v58, %v1157_v4  ;;  %v3312_v18 = vadd.f32 %v10287_v44, %v9843_v17  ;;  %5395 = vst [vmem:[%s12813_s3 + $0xf0] sm:$0xff] %v3659_v55  ;;  %v1832_v53 = vmul.f32 %v10339_v31, %v13582_v7  ;;  %v1836_v4 = vmul.f32 %v6312_v46, %v9092_v11  ;;  %v13585_v7 = vld [vmem:[#allocation23_spill] sm:$0xff] }
 0x240   :  { %v1477_v33 = vadd.f32 %v1160_v37, %v1159_v52  ;;  %v1834_v58 = vmul.f32 %v10339_v31, %v13583_v32  ;;  %5396 = vst [vmem:[%s12813_s3 + $0xf8] sm:$0xff] %v3661_v19  ;;  %v1838_v23 = vmul.f32 %v6312_v46, %v9246_v42  ;;  %v3314_v55 = vadd.f32 %v10321_v3, %v9847_v57  ;;  %v13587_v3 = vld [vmem:[#allocation110_spill] sm:$0xff] }
 0x241   :  { %v1474_v51 = vadd.f32 %v1473_v56, %v1158_v61  ;;  %v3665_v44 = vadd.f32 %v10314_v43, %v3312_v18  ;;  %v10518_v37 = vpack.c.bf16 %v1836_v4, %v1832_v53  ;;  %v1831_v11 = vmul.f32 %v10339_v31, %v13585_v7  ;;  %v10523_v61 = vpop.f32.mrf.mxu0  ;;  %v10534_v56 = vpop.f32.mrf.mxu1  ;;  %v6578_v4 = vld [vmem:[%s12810_s0 + $0x7f8] sm:$0xff] }
 0x242   :  { %v1478_v52 = vadd.f32 %v1477_v33, %v1161_v49  ;;  %v1835_v32 = vmul.f32 %v6312_v46, %v9086_v39  ;;  %v10528_v43 = vpack.c.bf16 %v1838_v23, %v1834_v58  ;;  %v3667_v42 = vadd.f32 %v10337_v9, %v3314_v55  ;;  %v13588_v33 = vld [vmem:[#allocation113_spill] sm:$0xff]  ;;  %v6122_v55 = vld [vmem:[%s12811_s1 + $0x4e8] ss:$24 sps:$4 sm:$0xff]  }
 0x243   :  { %13584 = vst [vmem:[#allocation17_spill] sm:$0xff] %v10518_v37  ;;  %1475 = vadd.xlane.f32.xlu1 %v1474_v51  ;;  %5401 = vst [vmem:[%s12813_s3 + $0x120] sm:$0xff] %v3665_v44  ;;  %v1833_v53 = vmul.f32 %v10339_v31, %v13587_v3  ;;  %v1837_v49 = vmul.f32 %v6312_v46, %v13588_v33  ;;  %v6316_v19 = vpop.eup %6315  ;;  %3469 = vmatprep.mubr.bf16.mxu0 %v10518_v37  ;;  %v10547_v31 = vpop.f32.mrf.mxu0  ;;  %v6124_v46 = vld [vmem:[%s12811_s1 + $0x4ec] ss:$24 sps:$4 sm:$0xff]  }
 0x244   :  { %13586 = vst [vmem:[#allocation111_spill] sm:$0xff] %v10528_v43  ;;  %v1479_v39 = vadd.f32 %v1478_v52, %v1162_v5  ;;  %v10537_v18 = vpack.c.bf16 %v1835_v32, %v1831_v11  ;;  %v10543_v58 = vsub.f32 %v6578_v4, %v10383_v12  ;;  %v1163_v9 = vmul.f32 %v10400_v36, %v10400_v36  ;;  %v10564_v23 = vpop.f32.mrf.mxu1 }
 0x245   :  { %3822 = vmatprep.mubr.bf16.mxu1 %v10528_v43  ;;  %5402 = vst [vmem:[%s12813_s3 + $0x128] sm:$0xff] %v3667_v42  ;;  %v10556_v5 = vpack.c.bf16 %v1837_v49, %v1833_v53  ;;  %v1164_v12 = vmul.f32 %v10406_v62, %v10406_v62  ;;  %v1165_v51 = vmul.f32 %v10412_v24, %v10412_v24  ;;  %v3335_v32 = vpop.f32.mrf.mxu0  ;;  %v13591_v53 = vld [vmem:[#allocation31_spill] sm:$0xff] }
 0x246   :  { %13589 = vst [vmem:[#allocation40_spill] sm:$0xff] %v10537_v18  ;;  %v3316_v44 = vadd.f32 %v10355_v63, %v9843_v17  ;;  %1480 = vadd.xlane.f32.xlu0 %v1479_v39  ;;  %3470 = vmatmul.mubr.bf16.gmra.mxu0 %v10537_v18  ;;  %v1166_v52 = vmul.f32 %v10543_v58, %v10543_v58  ;;  %v10576_v63 = vpop.eup %6317  ;;  %v10583_v39 = vpop.f32.mrf.mxu1 }
 0x247   :  { %13590 = vst [vmem:[#allocation30_spill] sm:$0xff] %v10556_v5  ;;  %v3318_v7 = vadd.f32 %v10371_v13, %v9847_v57  ;;  %v3322_v11 = vadd.f32 %v10414_v8, %v9843_v17  ;;  %3823 = vmatmul.mubr.bf16.gmra.mxu1 %v10556_v5  ;;  %v1482_v42 = vadd.f32 %v1164_v12, %v1163_v9  ;;  %v13592_v8 = vld [vmem:[#allocation41_spill] sm:$0xff]  ;;  %v3337_v5 = vpop.f32.mrf.mxu0 }
 0x248   :  { %v3669_v3 = vadd.f32 %v10361_v41, %v3316_v44  ;;  %v1840_v33 = vmul.f32 %v10462_v54, %v13591_v53  ;;  %v1844_v49 = vmul.f32 %v6316_v19, %v9202_v35  ;;  %v1842_v18 = vmul.f32 %v10462_v54, %v13592_v8  ;;  %4332 = vmatprep.subr.bf16.mxu1 %v6124_v46 }
 0x249   :  { %v3671_v13 = vadd.f32 %v10389_v16, %v3318_v7  ;;  %v3675_v4 = vadd.f32 %v10431_v10, %v3322_v11  ;;  %v1846_v43 = vmul.f32 %v6316_v19, %v9350_v60  ;;  %v1483_v9 = vadd.f32 %v1482_v42, %v1165_v51  ;;  %v13593_v16 = vld [vmem:[#allocation33_spill] sm:$0xff]  ;;  %4333 = vmatpush2.bf16.msra.mxu1 %v6122_v55  ;;  %v6320_v12 = vpop.eup %6319  ;;  %v13594_v51 = vld [vmem:[#allocation38_spill] sm:$0xff]  ;;  %v3690_v7 = vpop.f32.mrf.mxu1 }
 0x24a   :  { %5407 = vst [vmem:[%s12813_s3 + $0x150] sm:$0xff] %v3669_v3  ;;  %v10593_v41 = vpack.c.bf16 %v1844_v49, %v1840_v33  ;;  %v3324_v35 = vadd.f32 %v10433_v50, %v9847_v57  ;;  %v1839_v10 = vmul.f32 %v10462_v54, %v13593_v16  ;;  %v1843_v46 = vmul.f32 %v6316_v19, %v9196_v40 }
 0x24b   :  { %5408 = vst [vmem:[%s12813_s3 + $0x158] sm:$0xff] %v3671_v13  ;;  %5413 = vst [vmem:[%s12813_s3 + $0x180] sm:$0xff] %v3675_v4  ;;  %v10605_v60 = vpack.c.bf16 %v1846_v43, %v1842_v18  ;;  %v1841_v50 = vmul.f32 %v10462_v54, %v13594_v51  ;;  %v1845_v44 = vmul.f32 %v6316_v19, %v9208_v34  ;;  %v3341_v54 = vpop.f32.mrf.mxu0 }
 0x24c   :  { %v1484_v55 = vadd.f32 %v1483_v9, %v1166_v52  ;;  %3479 = vmatprep.mubr.bf16.mxu0 %v10593_v41  ;;  %v3677_v11 = vadd.f32 %v10452_v22, %v3324_v35  ;;  %v3326_v42 = vadd.f32 %v10454_v14, %v9843_v17  ;;  %v3328_v43 = vadd.f32 %v10494_v48, %v9847_v57 }
 0x24d   :  { %3832 = vmatprep.mubr.bf16.mxu1 %v10605_v60  ;;  %v10618_v40 = vpack.c.bf16 %v1843_v46, %v1839_v10  ;;  %v10620_v18 = vpack.c.bf16 %v1845_v44, %v1841_v50  ;;  %v3332_v34 = vadd.f32 %v10523_v61, %v9843_v17  ;;  %v1848_v48 = vmul.f32 %v10576_v63, %v9268_v29  ;;  %v3343_v33 = vpop.f32.mrf.mxu0 }
 0x24e   :  { %1485 = vadd.xlane.f32.xlu1 %v1484_v55  ;;  %5414 = vst [vmem:[%s12813_s3 + $0x188] sm:$0xff] %v3677_v11  ;;  %v3679_v22 = vadd.f32 %v10484_v21, %v3326_v42  ;;  %v3681_v14 = vadd.f32 %v10501_v45, %v3328_v43  ;;  %v1852_v19 = vmul.f32 %v6320_v12, %v9316_v47  ;;  %v3694_v21 = vpop.f32.mrf.mxu1  ;;  %v6127_v55 = vld [vmem:[%s12811_s1 + $0x1bc] ss:$24 sps:$4 sm:$0xff]  }
 0x24f   :  { %3480 = vmatmul.mubr.bf16.gmra.mxu0 %v10618_v40  ;;  %v3685_v52 = vadd.f32 %v10534_v56, %v3332_v34  ;;  %v1850_v61 = vmul.f32 %v10576_v63, %v9375_v0  ;;  %v1854_v3 = vmul.f32 %v6320_v12, %v9416_v59  ;;  %v3334_v53 = vadd.f32 %v10547_v31, %v9847_v57  ;;  %v13595_v59 = vld [vmem:[#allocation39_spill] sm:$0xff]  ;;  %v3345_v8 = vpop.f32.mrf.mxu0 }
 0x250   :  { %3833 = vmatmul.mubr.bf16.gmra.mxu1 %v10620_v18  ;;  %5419 = vst [vmem:[%s12813_s3 + $0x1b0] sm:$0xff] %v3679_v22  ;;  %5420 = vst [vmem:[%s12813_s3 + $0x1b8] sm:$0xff] %v3681_v14  ;;  %v10646_v29 = vpack.c.bf16 %v1852_v19, %v1848_v48  ;;  %v1847_v47 = vmul.f32 %v10576_v63, %v9262_v28  ;;  %v1851_v0 = vmul.f32 %v6320_v12, %v9310_v30  ;;  %v3696_v4 = vpop.f32.mrf.mxu1  ;;  %v13596_v28 = vld [vmem:[#allocation36_spill] sm:$0xff] }
 0x251   :  { %v1853_v45 = vmul.f32 %v6320_v12, %v13595_v59  ;;  %5425 = vst [vmem:[%s12813_s3 + $0x1e0] sm:$0xff] %v3685_v52  ;;  %v10655_v56 = vpack.c.bf16 %v1854_v3, %v1850_v61  ;;  %v3687_v31 = vadd.f32 %v10564_v23, %v3334_v53  ;;  %v3336_v49 = vadd.f32 %v3335_v32, %v9843_v17  ;;  %v3347_v12 = vpop.f32.mrf.mxu0  ;;  %v6128_v52 = vld [vmem:[%s12811_s1 + $0x4b8] ss:$24 sps:$4 sm:$0xff]   ;;  %v6130_v61 = vld [vmem:[%s12811_s1 + $0x4bc] ss:$24 sps:$4 sm:$0xff]  }
 0x252   :  { %v3338_v13 = vadd.f32 %v3337_v5, %v9847_v57  ;;  %3489 = vmatprep.mubr.bf16.mxu0 %v10646_v29  ;;  %v1849_v30 = vmul.f32 %v10576_v63, %v13596_v28  ;;  %v3342_v9 = vadd.f32 %v3341_v54, %v9843_v17  ;;  %v3344_v35 = vadd.f32 %v3343_v33, %v9847_v57  ;;  %v3698_v10 = vpop.f32.mrf.mxu1  ;;  %v6133_v28 = vld [vmem:[%s12811_s1 + $0x18c] ss:$24 sps:$4 sm:$0xff]  }
 0x253   :  { %3842 = vmatprep.mubr.bf16.mxu1 %v10655_v56  ;;  %v10666_v16 = vpack.c.bf16 %v1851_v0, %v1847_v47  ;;  %5426 = vst [vmem:[%s12813_s3 + $0x1e8] sm:$0xff] %v3687_v31  ;;  %v3689_v5 = vadd.f32 %v10583_v39, %v3336_v49  ;;  %v3346_v32 = vadd.f32 %v3345_v8, %v9843_v17  ;;  %v6131_v8 = vld [vmem:[%s12811_s1 + $0x188] ss:$24 sps:$4 sm:$0xff]  }
 0x254   :  { %v3691_v23 = vadd.f32 %v3690_v7, %v3338_v13  ;;  %v10673_v63 = vpack.c.bf16 %v1853_v45, %v1849_v30  ;;  %v3695_v46 = vadd.f32 %v3694_v21, %v3342_v9  ;;  %v3697_v51 = vadd.f32 %v3696_v4, %v3344_v35  ;;  %v3700_v44 = vpop.f32.mrf.mxu1  ;;  %v6125_v7 = vld [vmem:[%s12811_s1 + $0x1b8] ss:$24 sps:$4 sm:$0xff]   ;;  %3981 = vmatprep.subr.bf16.mxu0 %v6127_v55 }
 0x255   :  { %v3348_v50 = vadd.f32 %v3347_v12, %v9847_v57  ;;  %5431 = vst [vmem:[%s12813_s3 + $0x210] sm:$0xff] %v3689_v5  ;;  %v3699_v39 = vadd.f32 %v3698_v10, %v3346_v32  ;;  %v3351_v42 = vpop.f32.mrf.mxu0  ;;  %3982 = vmatpush2.bf16.msra.mxu0 %v6125_v7  ;;  %4334 = vmatprep.subr.bf16.mxu1 %v6130_v61  ;;  %v6134_v5 = vld [vmem:[%s12811_s1 + $0x488] ss:$24 sps:$4 sm:$0xff]  }
 0x256   :  { %5432 = vst [vmem:[%s12813_s3 + $0x218] sm:$0xff] %v3691_v23  ;;  %5437 = vst [vmem:[%s12813_s3 + $0x240] sm:$0xff] %v3695_v46  ;;  %v3352_v43 = vadd.f32 %v3351_v42, %v9843_v17  ;;  %v3704_v34 = vpop.f32.mrf.mxu1  ;;  %4335 = vmatpush2.bf16.msra.mxu1 %v6128_v52  ;;  %v6136_v23 = vld [vmem:[%s12811_s1 + $0x48c] ss:$24 sps:$4 sm:$0xff]   ;;  %3983 = vmatprep.subr.bf16.mxu0 %v6133_v28 }
 0x257   :  { %5438 = vst [vmem:[%s12813_s3 + $0x248] sm:$0xff] %v3697_v51  ;;  %v3701_v11 = vadd.f32 %v3700_v44, %v3348_v50  ;;  %3490 = vmatmul.mubr.bf16.gmra.mxu0 %v10666_v16  ;;  %5443 = vst [vmem:[%s12813_s3 + $0x270] sm:$0xff] %v3699_v39  ;;  %v3353_v54 = vpop.f32.mrf.mxu0  ;;  %4336 = vmatprep.subr.bf16.mxu1 %v6136_v23 }
 0x258   :  { %3843 = vmatmul.mubr.bf16.gmra.mxu1 %v10673_v63  ;;  %v3705_v22 = vadd.f32 %v3704_v34, %v3352_v43  ;;  %v3354_v14 = vadd.f32 %v3353_v54, %v9847_v57  ;;  %v3706_v48 = vpop.f32.mrf.mxu1 }
 0x259   :  { %5444 = vst [vmem:[%s12813_s3 + $0x278] sm:$0xff] %v3701_v11  ;;  %v3355_v19 = vpop.f32.mrf.mxu0  ;;  %3984 = vmatpush2.bf16.msra.mxu0 %v6131_v8 }
 0x25a   :  { %5449 = vst [vmem:[%s12813_s3 + $0x2a0] sm:$0xff] %v3705_v22  ;;  %v3707_v3 = vadd.f32 %v3706_v48, %v3354_v14  ;;  %v3356_v53 = vadd.f32 %v3355_v19, %v9843_v17  ;;  %v3708_v21 = vpop.f32.mrf.mxu1  ;;  %4337 = vmatpush2.bf16.msra.mxu1 %v6134_v5 }
 0x25b   :  { %v3357_v33 = vpop.f32.mrf.mxu0 }
 0x25c   :  { %5450 = vst [vmem:[%s12813_s3 + $0x2a8] sm:$0xff] %v3707_v3  ;;  %v3709_v47 = vadd.f32 %v3708_v21, %v3356_v53  ;;  %v3358_v0 = vadd.f32 %v3357_v33, %v9847_v57  ;;  %v3710_v59 = vpop.f32.mrf.mxu1 }
 0x25d   :  { %v1391_v10 = vpop.xlane.xlu0 %1390 }
 0x25e   :  { %5455 = vst [vmem:[%s12813_s3 + $0x2d0] sm:$0xff] %v3709_v47  ;;  %v3711_v45 = vadd.f32 %v3710_v59, %v3358_v0  ;;  %v1531_v50 = vmul.f32 0.001953125, %v1391_v10 }
 0x260   :  { %v3361_v31 = vpop.f32.mrf.mxu0  ;;  %5456 = vst [vmem:[%s12813_s3 + $0x2d8] sm:$0xff] %v3711_v45  ;;  %v1595_v11 = vadd.f32 1e-05, %v1531_v50  ;;  %v1396_v42 = vpop.xlane.xlu1 %1395  ;;  %v6139_v45 = vld [vmem:[%s12811_s1 + $0x164] ss:$24 sps:$4 sm:$0xff]  }
 0x261   :  { %v3362_v49 = vadd.f32 %v3361_v31, %v9843_v17  ;;  %v3714_v13 = vpop.f32.mrf.mxu1  ;;  %v1532_v34 = vmul.f32 0.001953125, %v1396_v42  ;;  %4659 = vmatprep.subr.bf16.mxu0 %v6139_v45  ;;  %v13602_v45 = vld [vmem:[#allocation62_spill] sm:$0xff] }
 0x262   :  { %v3363_v4 = vpop.f32.mrf.mxu0  ;;  %6321 = vrsqrt.f32 %v1595_v11 }
 0x263   :  { %v3715_v30 = vadd.f32 %v3714_v13, %v3362_v49  ;;  %v3364_v9 = vadd.f32 %v3363_v4, %v9847_v57  ;;  %v3716_v35 = vpop.f32.mrf.mxu1  ;;  %v1596_v19 = vadd.f32 1e-05, %v1532_v34 }
 0x264   :  { %v3365_v32 = vpop.f32.mrf.mxu0  ;;  %v1401_v21 = vpop.xlane.xlu0 %1400 }
 0x265   :  { %5461 = vst [vmem:[%s12813_s3 + $0x300] sm:$0xff] %v3715_v30  ;;  %v3717_v12 = vadd.f32 %v3716_v35, %v3364_v9  ;;  %v3366_v46 = vadd.f32 %v3365_v32, %v9843_v17  ;;  %v3718_v51 = vpop.f32.mrf.mxu1  ;;  %6323 = vrsqrt.f32 %v1596_v19  ;;  %v1533_v4 = vmul.f32 0.001953125, %v1401_v21 }
 0x266   :  { %v3367_v39 = vpop.f32.mrf.mxu0 }
 0x267   :  { %5462 = vst [vmem:[%s12813_s3 + $0x308] sm:$0xff] %v3717_v12  ;;  %v3719_v44 = vadd.f32 %v3718_v51, %v3366_v46  ;;  %v3368_v7 = vadd.f32 %v3367_v39, %v9847_v57  ;;  %v3720_v55 = vpop.f32.mrf.mxu1  ;;  %v1597_v10 = vadd.f32 1e-05, %v1533_v4  ;;  %v13604_v4 = vld [vmem:[#allocation65_spill] sm:$0xff] }
 0x268   :  { %v3371_v43 = vpop.f32.mrf.mxu0 }
 0x269   :  { %5467 = vst [vmem:[%s12813_s3 + $0x330] sm:$0xff] %v3719_v44  ;;  %v3721_v54 = vadd.f32 %v3720_v55, %v3368_v7  ;;  %v3372_v22 = vadd.f32 %v3371_v43, %v9843_v17  ;;  %v3724_v14 = vpop.f32.mrf.mxu1  ;;  %6325 = vrsqrt.f32 %v1597_v10  ;;  %v6142_v43 = vld [vmem:[%s12811_s1 + $0x464] ss:$24 sps:$4 sm:$0xff]  }
 0x26a   :  { %v3373_v48 = vpop.f32.mrf.mxu0  ;;  %5012 = vmatprep.subr.bf16.mxu1 %v6142_v43  ;;  %v13608_v43 = vld [vmem:[#allocation71_spill] sm:$0xff] }
 0x26b   :  { %5468 = vst [vmem:[%s12813_s3 + $0x338] sm:$0xff] %v3721_v54  ;;  %v3725_v52 = vadd.f32 %v3724_v14, %v3372_v22  ;;  %v3374_v61 = vadd.f32 %v3373_v48, %v9847_v57  ;;  %v3726_v3 = vpop.f32.mrf.mxu1  ;;  %v13597_v48 = vld [vmem:[#allocation52_spill] sm:$0xff] }
 0x26c   :  { %v3375_v53 = vpop.f32.mrf.mxu0 }
 0x26d   :  { %5473 = vst [vmem:[%s12813_s3 + $0x360] sm:$0xff] %v3725_v52  ;;  %v3727_v33 = vadd.f32 %v3726_v3, %v3374_v61  ;;  %v3376_v47 = vadd.f32 %v3375_v53, %v9843_v17  ;;  %v3728_v0 = vpop.f32.mrf.mxu1  ;;  %v13598_v61 = vld [vmem:[#allocation61_spill] sm:$0xff]  ;;  %v13599_v53 = vld [vmem:[#allocation55_spill] sm:$0xff] }
 0x26e   :  { %v3377_v59 = vpop.f32.mrf.mxu0  ;;  %v1406_v39 = vpop.xlane.xlu1 %1405 }
 0x26f   :  { %5474 = vst [vmem:[%s12813_s3 + $0x368] sm:$0xff] %v3727_v33  ;;  %v3729_v31 = vadd.f32 %v3728_v0, %v3376_v47  ;;  %v3378_v49 = vadd.f32 %v3377_v59, %v9847_v57  ;;  %v3730_v13 = vpop.f32.mrf.mxu1  ;;  %v6322_v44 = vpop.eup %6321  ;;  %v1534_v55 = vmul.f32 0.001953125, %v1406_v39  ;;  %v13600_v33 = vld [vmem:[#allocation67_spill] sm:$0xff]  ;;  %v13601_v0 = vld [vmem:[#allocation66_spill] sm:$0xff]  ;;  %v13605_v39 = vld [vmem:[#allocation64_spill] sm:$0xff] }
 0x270   :  { %v3381_v8 = vpop.f32.mrf.mxu0  ;;  %v1856_v19 = vmul.f32 %v6322_v44, %v13597_v48  ;;  %v1858_v21 = vmul.f32 %v6322_v44, %v13599_v53  ;;  %v1855_v59 = vmul.f32 %v6322_v44, %v13601_v0 }
 0x271   :  { %5479 = vst [vmem:[%s12813_s3 + $0x390] sm:$0xff] %v3729_v31  ;;  %v3731_v28 = vadd.f32 %v3730_v13, %v3378_v49  ;;  %v3382_v30 = vadd.f32 %v3381_v8, %v9843_v17  ;;  %v3734_v9 = vpop.f32.mrf.mxu1  ;;  %v1598_v54 = vadd.f32 1e-05, %v1534_v55  ;;  %v1411_v52 = vpop.xlane.xlu0 %1410  ;;  %v13603_v49 = vld [vmem:[#allocation58_spill] sm:$0xff] }
 0x272   :  { %v3383_v35 = vpop.f32.mrf.mxu0  ;;  %v6324_v22 = vpop.eup %6323  ;;  %v1857_v13 = vmul.f32 %v6322_v44, %v13603_v49 }
 0x273   :  { %5480 = vst [vmem:[%s12813_s3 + $0x398] sm:$0xff] %v3731_v28  ;;  %v3735_v5 = vadd.f32 %v3734_v9, %v3382_v30  ;;  %v3384_v23 = vadd.f32 %v3383_v35, %v9847_v57  ;;  %v3736_v32 = vpop.f32.mrf.mxu1  ;;  %6327 = vrsqrt.f32 %v1598_v54  ;;  %v1860_v3 = vmul.f32 %v6324_v22, %v13598_v61  ;;  %v13609_v54 = vld [vmem:[#allocation74_spill] sm:$0xff] }
 0x274   :  { %v3385_v12 = vpop.f32.mrf.mxu0  ;;  %v1862_v47 = vmul.f32 %v6324_v22, %v13600_v33  ;;  %v1859_v31 = vmul.f32 %v6324_v22, %v13602_v45  ;;  %v1861_v8 = vmul.f32 %v6324_v22, %v13604_v4  ;;  %v1535_v9 = vmul.f32 0.001953125, %v1411_v52  ;;  %v13611_v52 = vld [vmem:[#allocation60_spill] sm:$0xff] }
 0x275   :  { %5485 = vst [vmem:[%s12813_s3 + $0x3c0] sm:$0xff] %v3735_v5  ;;  %v3737_v46 = vadd.f32 %v3736_v32, %v3384_v23  ;;  %v3386_v51 = vadd.f32 %v3385_v12, %v9843_v17  ;;  %v3738_v50 = vpop.f32.mrf.mxu1  ;;  %v10798_v28 = vpack.c.bf16 %v1860_v3, %v1856_v19  ;;  %v13612_v3 = vld [vmem:[#allocation73_spill] sm:$0xff] }
 0x276   :  { %v3387_v7 = vpop.f32.mrf.mxu0  ;;  %v10800_v30 = vpack.c.bf16 %v1862_v47, %v1858_v21  ;;  %v10802_v35 = vpack.c.bf16 %v1859_v31, %v1855_v59  ;;  %v10804_v5 = vpack.c.bf16 %v1861_v8, %v1857_v13  ;;  %v1599_v23 = vadd.f32 1e-05, %v1535_v9  ;;  %v6326_v10 = vpop.eup %6325 }
 0x277   :  { %5486 = vst [vmem:[%s12813_s3 + $0x3c8] sm:$0xff] %v3737_v46  ;;  %v3739_v11 = vadd.f32 %v3738_v50, %v3386_v51  ;;  %v3388_v42 = vadd.f32 %v3387_v7, %v9847_v57  ;;  %v3740_v34 = vpop.f32.mrf.mxu1  ;;  %3499 = vmatprep.mubr.bf16.mxu0 %v10798_v28  ;;  %v1864_v44 = vmul.f32 %v6326_v10, %v13605_v39  ;;  %v13606_v7 = vld [vmem:[#allocation68_spill] sm:$0xff] }
 0x278   :  { %3852 = vmatprep.mubr.bf16.mxu1 %v10800_v30  ;;  %3500 = vmatmul.mubr.bf16.gmra.mxu0 %v10802_v35  ;;  %6329 = vrsqrt.f32 %v1599_v23  ;;  %v1866_v55 = vmul.f32 %v6326_v10, %v13606_v7  ;;  %v1865_v61 = vmul.f32 %v6326_v10, %v13611_v52  ;;  %v13615_v23 = vld [vmem:[#allocation115_spill] sm:$0xff] }
 0x279   :  { %5491 = vst [vmem:[%s12813_s3 + $0x3f0] sm:$0xff] %v3739_v11  ;;  %v3741_v14 = vadd.f32 %v3740_v34, %v3388_v42  ;;  %3853 = vmatmul.mubr.bf16.gmra.mxu1 %v10804_v5  ;;  %v13607_v11 = vld [vmem:[#allocation69_spill] sm:$0xff] }
 0x27a   :  { %v1863_v42 = vmul.f32 %v6326_v10, %v13607_v11  ;;  %v13616_v10 = vld [vmem:[#allocation117_spill] sm:$0xff] }
 0x27b   :  { %5492 = vst [vmem:[%s12813_s3 + $0x3f8] sm:$0xff] %v3741_v14  ;;  %v13610_v14 = vld [vmem:[#allocation63_spill] sm:$0xff] }
 0x27d   :  { %v1416_v32 = vpop.xlane.xlu1 %1415 }
 0x27e   :  { %v1536_v12 = vmul.f32 0.001953125, %v1416_v32  ;;  %v1421_v51 = vpop.xlane.xlu0 %1420 }
 0x27f   :  { %v1537_v19 = vmul.f32 0.001953125, %v1421_v51 }
 0x280   :  { %v1600_v46 = vadd.f32 1e-05, %v1536_v12  ;;  %v6328_v50 = vpop.eup %6327 }
 0x281   :  { %v1868_v34 = vmul.f32 %v6328_v50, %v13608_v43  ;;  %v1870_v22 = vmul.f32 %v6328_v50, %v13609_v54  ;;  %v1867_v48 = vmul.f32 %v6328_v50, %v13610_v14  ;;  %v1869_v53 = vmul.f32 %v6328_v50, %v13612_v3  ;;  %v13618_v50 = vld [vmem:[#allocation126_spill] sm:$0xff]  ;;  %v13621_v43 = vld [vmem:[#allocation116_spill] sm:$0xff] }
 0x282   :  { %6331 = vrsqrt.f32 %v1600_v46  ;;  %v1601_v59 = vadd.f32 1e-05, %v1537_v19  ;;  %v13617_v46 = vld [vmem:[#allocation119_spill] sm:$0xff]  ;;  %v13622_v54 = vld [vmem:[#allocation78_spill] sm:$0xff] }
 0x283   :  { %v10818_v21 = vpack.c.bf16 %v1868_v34, %v1864_v44  ;;  %v10820_v33 = vpack.c.bf16 %v1870_v22, %v1866_v55  ;;  %v10822_v47 = vpack.c.bf16 %v1867_v48, %v1863_v42  ;;  %v10824_v0 = vpack.c.bf16 %v1869_v53, %v1865_v61  ;;  %v13619_v44 = vld [vmem:[#allocation76_spill] sm:$0xff]  ;;  %v13620_v55 = vld [vmem:[#allocation118_spill] sm:$0xff] }
 0x284   :  { %6333 = vrsqrt.f32 %v1601_v59 }
 0x285   :  { %13613 = vst [vmem:[#allocation114_spill] sm:$0xff] %v10818_v21  ;;  %13614 = vst [vmem:[#allocation23_spill] sm:$0xff] %v10820_v33  ;;  %3509 = vmatprep.mubr.bf16.mxu0 %v10818_v21  ;;  %3862 = vmatprep.mubr.bf16.mxu1 %v10820_v33  ;;  %v6330_v13 = vpop.eup %6329 }
 0x286   :  { %3510 = vmatmul.mubr.bf16.gmra.mxu0 %v10822_v47  ;;  %3863 = vmatmul.mubr.bf16.gmra.mxu1 %v10824_v0  ;;  %v1872_v32 = vmul.f32 %v6330_v13, %v13615_v23  ;;  %v1874_v12 = vmul.f32 %v6330_v13, %v13616_v10  ;;  %v1871_v7 = vmul.f32 %v6330_v13, %v13619_v44 }
 0x287   :  { %v1873_v34 = vmul.f32 %v6330_v13, %v13621_v43 }
 0x28b   :  { %v1426_v45 = vpop.xlane.xlu1 %1425 }
 0x28c   :  { %v1538_v31 = vmul.f32 0.001953125, %v1426_v45 }
 0x28d   :  { %v1431_v49 = vpop.xlane.xlu0 %1430 }
 0x28e   :  { %v1602_v4 = vadd.f32 1e-05, %v1538_v31  ;;  %v1539_v8 = vmul.f32 0.001953125, %v1431_v49 }
 0x28f   :  { %v6332_v9 = vpop.eup %6331 }
 0x290   :  { %6335 = vrsqrt.f32 %v1602_v4  ;;  %v1876_v51 = vmul.f32 %v6332_v9, %v13617_v46  ;;  %v1878_v39 = vmul.f32 %v6332_v9, %v13618_v50  ;;  %v1875_v11 = vmul.f32 %v6332_v9, %v13620_v55  ;;  %v13625_v4 = vld [vmem:[#allocation123_spill] sm:$0xff] }
 0x291   :  { %v1603_v42 = vadd.f32 1e-05, %v1539_v8  ;;  %v1877_v22 = vmul.f32 %v6332_v9, %v13622_v54  ;;  %v6334_v31 = vpop.eup %6333  ;;  %v13626_v9 = vld [vmem:[#allocation127_spill] sm:$0xff] }
 0x292   :  { %v10838_v14 = vpack.c.bf16 %v1876_v51, %v1872_v32  ;;  %v10840_v48 = vpack.c.bf16 %v1878_v39, %v1874_v12  ;;  %v10842_v19 = vpack.c.bf16 %v1875_v11, %v1871_v7  ;;  %v1880_v8 = vmul.f32 %v6334_v31, %v13625_v4  ;;  %v13627_v32 = vld [vmem:[#allocation122_spill] sm:$0xff]  ;;  %v13628_v12 = vld [vmem:[#allocation81_spill] sm:$0xff]  ;;  %v13629_v51 = vld [vmem:[#allocation4_spill] sm:$0xff] }
 0x293   :  { %v10844_v52 = vpack.c.bf16 %v1877_v22, %v1873_v34  ;;  %6337 = vrsqrt.f32 %v1603_v42  ;;  %v1882_v23 = vmul.f32 %v6334_v31, %v13626_v9  ;;  %v1879_v10 = vmul.f32 %v6334_v31, %v13627_v32  ;;  %v13630_v39 = vld [vmem:[#allocation5_spill] sm:$0xff]  ;;  %v13631_v7 = vld [vmem:[#allocation86_spill] sm:$0xff]  ;;  %v13632_v42 = vld [vmem:[#allocation124_spill] sm:$0xff] }
 0x294   :  { %13623 = vst [vmem:[#allocation110_spill] sm:$0xff] %v10838_v14  ;;  %13624 = vst [vmem:[#allocation113_spill] sm:$0xff] %v10840_v48  ;;  %3519 = vmatprep.mubr.bf16.mxu0 %v10838_v14  ;;  %3872 = vmatprep.mubr.bf16.mxu1 %v10840_v48  ;;  %v1881_v43 = vmul.f32 %v6334_v31, %v13632_v42 }
 0x295   :  { %3520 = vmatmul.mubr.bf16.gmra.mxu0 %v10842_v19  ;;  %3873 = vmatmul.mubr.bf16.gmra.mxu1 %v10844_v52 }
 0x297   :  { %v1436_v61 = vpop.xlane.xlu1 %1435 }
 0x298   :  { %v1540_v3 = vmul.f32 0.001953125, %v1436_v61 }
 0x299   :  { %v1441_v53 = vpop.xlane.xlu0 %1440 }
 0x29a   :  { %v1604_v59 = vadd.f32 1e-05, %v1540_v3  ;;  %v1541_v45 = vmul.f32 0.001953125, %v1441_v53 }
 0x29c   :  { %6339 = vrsqrt.f32 %v1604_v59  ;;  %v1605_v13 = vadd.f32 1e-05, %v1541_v45 }
 0x29d   :  { %v6336_v49 = vpop.eup %6335 }
 0x29e   :  { %v1884_v46 = vmul.f32 %v6336_v49, %v13628_v12  ;;  %v1886_v50 = vmul.f32 %v6336_v49, %v13629_v51  ;;  %v1883_v44 = vmul.f32 %v6336_v49, %v13630_v39  ;;  %v1885_v55 = vmul.f32 %v6336_v49, %v13631_v7  ;;  %v13636_v12 = vld [vmem:[#allocation129_spill] sm:$0xff]  ;;  %v13637_v51 = vld [vmem:[#allocation135_spill] sm:$0xff] }
 0x29f   :  { %6341 = vrsqrt.f32 %v1605_v13  ;;  %v3391_v45 = vpop.f32.mrf.mxu0 }
 0x2a0   :  { %v10858_v54 = vpack.c.bf16 %v1884_v46, %v1880_v8  ;;  %v10860_v22 = vpack.c.bf16 %v1886_v50, %v1882_v23  ;;  %v10862_v61 = vpack.c.bf16 %v1883_v44, %v1879_v10  ;;  %v10864_v3 = vpack.c.bf16 %v1885_v55, %v1881_v43  ;;  %v3744_v49 = vpop.f32.mrf.mxu1  ;;  %v6338_v4 = vpop.eup %6337  ;;  %v13639_v43 = vld [vmem:[#allocation130_spill] sm:$0xff] }
 0x2a1   :  { %v1446_v11 = vpop.xlane.xlu1 %1445  ;;  %v3392_v31 = vadd.f32 %v3391_v45, %v9843_v17  ;;  %v3393_v13 = vpop.f32.mrf.mxu0  ;;  %v1888_v46 = vmul.f32 %v6338_v4, %v13636_v12  ;;  %v1890_v50 = vmul.f32 %v6338_v4, %v13637_v51  ;;  %v13643_v51 = vld [vmem:[#allocation87_spill] sm:$0xff] }
 0x2a2   :  { %v1542_v34 = vmul.f32 0.001953125, %v1446_v11  ;;  %13633 = vst [vmem:[#allocation31_spill] sm:$0xff] %v10860_v22  ;;  %13634 = vst [vmem:[#allocation41_spill] sm:$0xff] %v10862_v61  ;;  %3529 = vmatprep.mubr.bf16.mxu0 %v10858_v54  ;;  %3882 = vmatprep.mubr.bf16.mxu1 %v10860_v22  ;;  %v3394_v23 = vadd.f32 %v3393_v13, %v9847_v57  ;;  %v3746_v32 = vpop.f32.mrf.mxu1  ;;  %v13638_v11 = vld [vmem:[#allocation128_spill] sm:$0xff] }
 0x2a3   :  { %13635 = vst [vmem:[#allocation33_spill] sm:$0xff] %v10864_v3  ;;  %3530 = vmatmul.mubr.bf16.gmra.mxu0 %v10862_v61  ;;  %3883 = vmatmul.mubr.bf16.gmra.mxu1 %v10864_v3  ;;  %v3745_v9 = vadd.f32 %v3744_v49, %v3392_v31  ;;  %v3395_v10 = vpop.f32.mrf.mxu0  ;;  %v1887_v42 = vmul.f32 %v6338_v4, %v13638_v11  ;;  %v13641_v31 = vld [vmem:[#allocation94_spill] sm:$0xff]  ;;  %v13642_v13 = vld [vmem:[#allocation88_spill] sm:$0xff] }
 0x2a4   :  { %v1606_v53 = vadd.f32 1e-05, %v1542_v34  ;;  %v3747_v39 = vadd.f32 %v3746_v32, %v3394_v23  ;;  %v3748_v44 = vpop.f32.mrf.mxu1  ;;  %v1889_v34 = vmul.f32 %v6338_v4, %v13639_v43 }
 0x2a5   :  { %v1451_v59 = vpop.xlane.xlu0 %1450  ;;  %5497 = vst [vmem:[%s12813_s3 + $0x420] sm:$0xff] %v3745_v9  ;;  %v3397_v9 = vpop.f32.mrf.mxu0 }
 0x2a6   :  { %6343 = vrsqrt.f32 %v1606_v53  ;;  %v1543_v8 = vmul.f32 0.001953125, %v1451_v59  ;;  %v3396_v53 = vadd.f32 %v3395_v10, %v9843_v17  ;;  %v13640_v59 = vld [vmem:[#allocation95_spill] sm:$0xff]  ;;  %5498 = vst [vmem:[%s12813_s3 + $0x428] sm:$0xff] %v3747_v39  ;;  %v3750_v11 = vpop.f32.mrf.mxu1 }
 0x2a8   :  { %v1607_v55 = vadd.f32 1e-05, %v1543_v8 }
 0x2a9   :  { %v6340_v7 = vpop.eup %6339 }
 0x2aa   :  { %v1892_v45 = vmul.f32 %v6340_v7, %v13640_v59  ;;  %v1894_v49 = vmul.f32 %v6340_v7, %v13641_v31  ;;  %v1891_v12 = vmul.f32 %v6340_v7, %v13642_v13  ;;  %v1893_v3 = vmul.f32 %v6340_v7, %v13643_v51  ;;  %v13650_v13 = vld [vmem:[#allocation3_spill] sm:$0xff] }
 0x2ab   :  { %6345 = vrsqrt.f32 %v1607_v55  ;;  %v3749_v59 = vadd.f32 %v3748_v44, %v3396_v53  ;;  %v3398_v7 = vadd.f32 %v3397_v9, %v9847_v57  ;;  %v13651_v9 = vld [vmem:[#allocation142_spill] sm:$0xff] }
 0x2ac   :  { %v10887_v23 = vpack.c.bf16 %v1892_v45, %v1888_v46  ;;  %v10889_v32 = vpack.c.bf16 %v1894_v49, %v1890_v50  ;;  %v10891_v4 = vpack.c.bf16 %v1891_v12, %v1887_v42  ;;  %v10893_v10 = vpack.c.bf16 %v1893_v3, %v1889_v34  ;;  %v6342_v39 = vpop.eup %6341  ;;  %v13648_v34 = vld [vmem:[#allocation100_spill] sm:$0xff]  ;;  %v13649_v45 = vld [vmem:[#allocation141_spill] sm:$0xff] }
 0x2ad   :  { %5503 = vst [vmem:[%s12813_s3 + $0x450] sm:$0xff] %v3749_v59  ;;  %v3751_v3 = vadd.f32 %v3750_v11, %v3398_v7  ;;  %v3401_v46 = vpop.f32.mrf.mxu0  ;;  %v3754_v50 = vpop.f32.mrf.mxu1  ;;  %v1896_v53 = vmul.f32 %v6342_v39, %v13648_v34  ;;  %v1898_v49 = vmul.f32 %v6342_v39, %v13649_v45  ;;  %v1895_v12 = vmul.f32 %v6342_v39, %v13650_v13  ;;  %v13652_v11 = vld [vmem:[#allocation96_spill] sm:$0xff]  ;;  %v13653_v59 = vld [vmem:[#allocation93_spill] sm:$0xff] }
 0x2ae   :  { %v1456_v8 = vpop.xlane.xlu1 %1455  ;;  %13644 = vst [vmem:[#allocation38_spill] sm:$0xff] %v10887_v23  ;;  %13645 = vst [vmem:[#allocation39_spill] sm:$0xff] %v10889_v32  ;;  %3539 = vmatprep.mubr.bf16.mxu0 %v10887_v23  ;;  %3892 = vmatprep.mubr.bf16.mxu1 %v10889_v32  ;;  %v3402_v44 = vadd.f32 %v3401_v46, %v9843_v17  ;;  %v13655_v46 = vld [vmem:[#allocation143_spill] sm:$0xff] }
 0x2af   :  { %13646 = vst [vmem:[#allocation36_spill] sm:$0xff] %v10891_v4  ;;  %13647 = vst [vmem:[#allocation52_spill] sm:$0xff] %v10893_v10  ;;  %v1544_v43 = vmul.f32 0.001953125, %v1456_v8  ;;  %3540 = vmatmul.mubr.bf16.gmra.mxu0 %v10891_v4  ;;  %3893 = vmatmul.mubr.bf16.gmra.mxu1 %v10893_v10  ;;  %v3403_v51 = vpop.f32.mrf.mxu0 }
 0x2b0   :  { %5504 = vst [vmem:[%s12813_s3 + $0x458] sm:$0xff] %v3751_v3  ;;  %v3756_v3 = vpop.f32.mrf.mxu1  ;;  %v3755_v23 = vadd.f32 %v3754_v50, %v3402_v44  ;;  %v3404_v34 = vadd.f32 %v3403_v51, %v9847_v57 }
 0x2b1   :  { %v1608_v31 = vadd.f32 1e-05, %v1544_v43  ;;  %v3405_v61 = vpop.f32.mrf.mxu0 }
 0x2b2   :  { %5509 = vst [vmem:[%s12813_s3 + $0x480] sm:$0xff] %v3755_v23  ;;  %v3757_v50 = vadd.f32 %v3756_v3, %v3404_v34  ;;  %v3406_v44 = vadd.f32 %v3405_v61, %v9843_v17 }
 0x2b3   :  { %6347 = vrsqrt.f32 %v1608_v31  ;;  %v6344_v55 = vpop.eup %6343  ;;  %v13654_v31 = vld [vmem:[#allocation136_spill] sm:$0xff] }
 0x2b4   :  { %v1461_v42 = vpop.xlane.xlu0 %1460  ;;  %v1900_v8 = vmul.f32 %v6344_v55, %v13651_v9  ;;  %v1902_v43 = vmul.f32 %v6344_v55, %v13652_v11  ;;  %v1899_v7 = vmul.f32 %v6344_v55, %v13653_v59  ;;  %v1897_v10 = vmul.f32 %v6342_v39, %v13654_v31  ;;  %v3758_v9 = vpop.f32.mrf.mxu1  ;;  %5510 = vst [vmem:[%s12813_s3 + $0x488] sm:$0xff] %v3757_v50  ;;  %v13661_v31 = vld [vmem:[#allocation16_spill] sm:$0xff] }
 0x2b5   :  { %v1545_v4 = vmul.f32 0.001953125, %v1461_v42  ;;  %v1901_v32 = vmul.f32 %v6344_v55, %v13655_v46  ;;  %v3407_v39 = vpop.f32.mrf.mxu0  ;;  %v3759_v23 = vadd.f32 %v3758_v9, %v3406_v44  ;;  %v13662_v46 = vld [vmem:[#allocation105_spill] sm:$0xff]  ;;  %v13663_v9 = vld [vmem:[#allocation144_spill] sm:$0xff] }
 0x2b6   :  { %v10916_v45 = vpack.c.bf16 %v1900_v8, %v1896_v53  ;;  %v10918_v13 = vpack.c.bf16 %v1902_v43, %v1898_v49  ;;  %v10920_v22 = vpack.c.bf16 %v1899_v7, %v1895_v12  ;;  %v13660_v12 = vld [vmem:[#allocation92_spill] sm:$0xff] }
 0x2b7   :  { %v10922_v11 = vpack.c.bf16 %v1901_v32, %v1897_v10  ;;  %v1609_v55 = vadd.f32 1e-05, %v1545_v4  ;;  %v3408_v32 = vadd.f32 %v3407_v39, %v9847_v57  ;;  %v3760_v10 = vpop.f32.mrf.mxu1  ;;  %5515 = vst [vmem:[%s12813_s3 + $0x4b0] sm:$0xff] %v3759_v23  ;;  %v13665_v23 = vld [vmem:[#allocation13_spill] sm:$0xff] }
 0x2b8   :  { %13656 = vst [vmem:[#allocation61_spill] sm:$0xff] %v10916_v45  ;;  %13657 = vst [vmem:[#allocation55_spill] sm:$0xff] %v10918_v13  ;;  %3549 = vmatprep.mubr.bf16.mxu0 %v10916_v45  ;;  %3902 = vmatprep.mubr.bf16.mxu1 %v10918_v13  ;;  %v6346_v42 = vpop.eup %6345 }
 0x2b9   :  { %13658 = vst [vmem:[#allocation67_spill] sm:$0xff] %v10920_v22  ;;  %13659 = vst [vmem:[#allocation66_spill] sm:$0xff] %v10922_v11  ;;  %3550 = vmatmul.mubr.bf16.gmra.mxu0 %v10920_v22  ;;  %3903 = vmatmul.mubr.bf16.gmra.mxu1 %v10922_v11  ;;  %v3761_v53 = vadd.f32 %v3760_v10, %v3408_v32  ;;  %6349 = vrsqrt.f32 %v1609_v55  ;;  %v1904_v51 = vmul.f32 %v6346_v42, %v13660_v12  ;;  %v13664_v55 = vld [vmem:[#allocation106_spill] sm:$0xff]  ;;  %v13667_v12 = vld [vmem:[#allocation148_spill] sm:$0xff] }
 0x2ba   :  { %v3411_v4 = vpop.f32.mrf.mxu0  ;;  %v1906_v3 = vmul.f32 %v6346_v42, %v13661_v31  ;;  %v1903_v34 = vmul.f32 %v6346_v42, %v13662_v46  ;;  %v1905_v39 = vmul.f32 %v6346_v42, %v13663_v9 }
 0x2bb   :  { %5516 = vst [vmem:[%s12813_s3 + $0x4b8] sm:$0xff] %v3761_v53  ;;  %v3412_v8 = vadd.f32 %v3411_v4, %v9843_v17  ;;  %v3764_v43 = vpop.f32.mrf.mxu1  ;;  %v13666_v53 = vld [vmem:[#allocation103_spill] sm:$0xff] }
 0x2bc   :  { %v3413_v50 = vpop.f32.mrf.mxu0 }
 0x2bd   :  { %v1466_v49 = vpop.xlane.xlu1 %1465  ;;  %v3766_v4 = vpop.f32.mrf.mxu1  ;;  %v3765_v22 = vadd.f32 %v3764_v43, %v3412_v8 }
 0x2be   :  { %v1546_v61 = vmul.f32 0.001953125, %v1466_v49  ;;  %v3415_v31 = vpop.f32.mrf.mxu0 }
 0x2bf   :  { %5521 = vst [vmem:[%s12813_s3 + $0x4e0] sm:$0xff] %v3765_v22  ;;  %v3416_v8 = vadd.f32 %v3415_v31, %v9843_v17 }
 0x2c0   :  { %v6348_v59 = vpop.eup %6347  ;;  %v1610_v7 = vadd.f32 1e-05, %v1546_v61  ;;  %v3414_v61 = vadd.f32 %v3413_v50, %v9847_v57  ;;  %v3417_v43 = vpop.f32.mrf.mxu0 }
 0x2c1   :  { %v1908_v32 = vmul.f32 %v6348_v59, %v13664_v55  ;;  %v1910_v10 = vmul.f32 %v6348_v59, %v13665_v23  ;;  %v1907_v49 = vmul.f32 %v6348_v59, %v13666_v53  ;;  %v1909_v11 = vmul.f32 %v6348_v59, %v13667_v12  ;;  %v3768_v55 = vpop.f32.mrf.mxu1 }
 0x2c2   :  { %v1471_v44 = vpop.xlane.xlu0 %1470  ;;  %6351 = vrsqrt.f32 %v1610_v7  ;;  %v3767_v59 = vadd.f32 %v3766_v4, %v3414_v61 }
 0x2c3   :  { %v10952_v13 = vpack.c.bf16 %v1908_v32, %v1904_v51  ;;  %v10954_v46 = vpack.c.bf16 %v1910_v10, %v1906_v3  ;;  %v10956_v42 = vpack.c.bf16 %v1907_v49, %v1903_v34  ;;  %v10958_v9 = vpack.c.bf16 %v1909_v11, %v1905_v39  ;;  %v3770_v22 = vpop.f32.mrf.mxu1 }
 0x2c4   :  { %v1547_v23 = vmul.f32 0.001953125, %v1471_v44  ;;  %v3418_v51 = vadd.f32 %v3417_v43, %v9847_v57  ;;  %5522 = vst [vmem:[%s12813_s3 + $0x4e8] sm:$0xff] %v3767_v59  ;;  %v3769_v11 = vadd.f32 %v3768_v55, %v3416_v8 }
 0x2c5   :  { %13668 = vst [vmem:[#allocation62_spill] sm:$0xff] %v10952_v13  ;;  %13669 = vst [vmem:[#allocation58_spill] sm:$0xff] %v10954_v46  ;;  %3559 = vmatprep.mubr.bf16.mxu0 %v10952_v13  ;;  %3912 = vmatprep.mubr.bf16.mxu1 %v10954_v46 }
 0x2c6   :  { %13670 = vst [vmem:[#allocation65_spill] sm:$0xff] %v10956_v42  ;;  %13671 = vst [vmem:[#allocation64_spill] sm:$0xff] %v10958_v9  ;;  %3560 = vmatmul.mubr.bf16.gmra.mxu0 %v10956_v42  ;;  %3913 = vmatmul.mubr.bf16.gmra.mxu1 %v10958_v9  ;;  %v1611_v7 = vadd.f32 1e-05, %v1547_v23  ;;  %v3771_v3 = vadd.f32 %v3770_v22, %v3418_v51  ;;  %v6350_v50 = vpop.eup %6349  ;;  %v13672_v23 = vld [vmem:[#allocation149_spill] sm:$0xff]  ;;  %v13673_v51 = vld [vmem:[#allocation154_spill] sm:$0xff] }
 0x2c7   :  { %5527 = vst [vmem:[%s12813_s3 + $0x510] sm:$0xff] %v3769_v11  ;;  %v3421_v39 = vpop.f32.mrf.mxu0  ;;  %v3774_v10 = vpop.f32.mrf.mxu1  ;;  %v1912_v59 = vmul.f32 %v6350_v50, %v13672_v23  ;;  %v1914_v11 = vmul.f32 %v6350_v50, %v13673_v51  ;;  %v13679_v51 = vld [vmem:[#allocation157_spill] sm:$0xff] }
 0x2c8   :  { %5528 = vst [vmem:[%s12813_s3 + $0x518] sm:$0xff] %v3771_v3  ;;  %v3422_v32 = vadd.f32 %v3421_v39, %v9843_v17  ;;  %6353 = vrsqrt.f32 %v1611_v7 }
 0x2c9   :  { %v3423_v53 = vpop.f32.mrf.mxu0  ;;  %v3776_v31 = vpop.f32.mrf.mxu1 }
 0x2ca   :  { %v3775_v4 = vadd.f32 %v3774_v10, %v3422_v32  ;;  %v3424_v61 = vadd.f32 %v3423_v53, %v9847_v57  ;;  %v13676_v10 = vld [vmem:[#allocation102_spill] sm:$0xff] }
 0x2cb   :  { %v3425_v8 = vpop.f32.mrf.mxu0  ;;  %v3778_v3 = vpop.f32.mrf.mxu1  ;;  %v1911_v53 = vmul.f32 %v6350_v50, %v13676_v10 }
 0x2cc   :  { %v1476_v34 = vpop.xlane.xlu1 %1475  ;;  %5533 = vst [vmem:[%s12813_s3 + $0x540] sm:$0xff] %v3775_v4  ;;  %v3777_v22 = vadd.f32 %v3776_v31, %v3424_v61  ;;  %v3426_v7 = vadd.f32 %v3425_v8, %v9843_v17 }
 0x2cd   :  { %v1548_v44 = vmul.f32 0.001953125, %v1476_v34  ;;  %v13674_v34 = vld [vmem:[#allocation156_spill] sm:$0xff]  ;;  %v3427_v9 = vpop.f32.mrf.mxu0  ;;  %v3780_v31 = vpop.f32.mrf.mxu1 }
 0x2ce   :  { %5534 = vst [vmem:[%s12813_s3 + $0x548] sm:$0xff] %v3777_v22  ;;  %v3779_v4 = vadd.f32 %v3778_v3, %v3426_v7  ;;  %v3428_v61 = vadd.f32 %v3427_v9, %v9847_v57 }
 0x2cf   :  { %v1612_v49 = vadd.f32 1e-05, %v1548_v44  ;;  %v1481_v12 = vpop.xlane.xlu0 %1480  ;;  %v6352_v43 = vpop.eup %6351  ;;  %v13675_v44 = vld [vmem:[#allocation9_spill] sm:$0xff] }
 0x2d0   :  { %v1549_v55 = vmul.f32 0.001953125, %v1481_v12  ;;  %v1916_v39 = vmul.f32 %v6352_v43, %v13674_v34  ;;  %v1918_v32 = vmul.f32 %v6352_v43, %v13675_v44  ;;  %v13677_v12 = vld [vmem:[#allocation155_spill] sm:$0xff]  ;;  %v1917_v46 = vmul.f32 %v6352_v43, %v13679_v51  ;;  %5539 = vst [vmem:[%s12813_s3 + $0x570] sm:$0xff] %v3779_v4 }
 0x2d1   :  { %6355 = vrsqrt.f32 %v1612_v49  ;;  %v1915_v23 = vmul.f32 %v6352_v43, %v13677_v12  ;;  %v13678_v49 = vld [vmem:[#allocation150_spill] sm:$0xff] }
 0x2d2   :  { %v1913_v42 = vmul.f32 %v6350_v50, %v13678_v49  ;;  %v1613_v8 = vadd.f32 1e-05, %v1549_v55  ;;  %v10996_v34 = vpack.c.bf16 %v1916_v39, %v1912_v59  ;;  %v10998_v44 = vpack.c.bf16 %v1918_v32, %v1914_v11 }
 0x2d3   :  { %v11000_v10 = vpack.c.bf16 %v1915_v23, %v1911_v53  ;;  %v3781_v50 = vadd.f32 %v3780_v31, %v3428_v61  ;;  %v3431_v9 = vpop.f32.mrf.mxu0 }
 0x2d4   :  { %13680 = vst [vmem:[#allocation68_spill] sm:$0xff] %v10998_v44  ;;  %v11002_v12 = vpack.c.bf16 %v1917_v46, %v1913_v42  ;;  %3569 = vmatprep.mubr.bf16.mxu0 %v10996_v34  ;;  %3922 = vmatprep.mubr.bf16.mxu1 %v10998_v44  ;;  %v3432_v46 = vadd.f32 %v3431_v9, %v9843_v17  ;;  %v3784_v42 = vpop.f32.mrf.mxu1  ;;  %6357 = vrsqrt.f32 %v1613_v8  ;;  %v13681_v8 = vld [vmem:[#allocation159_spill] sm:$0xff] }
 0x2d5   :  { %3570 = vmatmul.mubr.bf16.gmra.mxu0 %v11000_v10  ;;  %5540 = vst [vmem:[%s12813_s3 + $0x578] sm:$0xff] %v3781_v50  ;;  %v3433_v59 = vpop.f32.mrf.mxu0  ;;  %v6354_v32 = vpop.eup %6353 }
 0x2d6   :  { %3923 = vmatmul.mubr.bf16.gmra.mxu1 %v11002_v12  ;;  %v3785_v22 = vadd.f32 %v3784_v42, %v3432_v46  ;;  %v3434_v7 = vadd.f32 %v3433_v59, %v9847_v57  ;;  %v3786_v3 = vpop.f32.mrf.mxu1  ;;  %v1920_v50 = vmul.f32 %v6354_v32, %v13681_v8  ;;  %v13684_v42 = vld [vmem:[#allocation109_spill] sm:$0xff] }
 0x2d7   :  { %v1486_v43 = vpop.xlane.xlu1 %1485  ;;  %v3435_v39 = vpop.f32.mrf.mxu0  ;;  %v1921_v59 = vmul.f32 %v6354_v32, %v13684_v42 }
 0x2d8   :  { %v1550_v55 = vmul.f32 0.001953125, %v1486_v43  ;;  %5545 = vst [vmem:[%s12813_s3 + $0x5a0] sm:$0xff] %v3785_v22  ;;  %v3787_v53 = vadd.f32 %v3786_v3, %v3434_v7  ;;  %v3436_v23 = vadd.f32 %v3435_v39, %v9843_v17  ;;  %v3788_v49 = vpop.f32.mrf.mxu1  ;;  %v13682_v43 = vld [vmem:[#allocation22_spill] sm:$0xff] }
 0x2d9   :  { %v3437_v51 = vpop.f32.mrf.mxu0  ;;  %v1922_v9 = vmul.f32 %v6354_v32, %v13682_v43 }
 0x2da   :  { %v1614_v11 = vadd.f32 1e-05, %v1550_v55  ;;  %5546 = vst [vmem:[%s12813_s3 + $0x5a8] sm:$0xff] %v3787_v53  ;;  %v3789_v4 = vadd.f32 %v3788_v49, %v3436_v23  ;;  %v3438_v61 = vadd.f32 %v3437_v51, %v9847_v57  ;;  %v13683_v55 = vld [vmem:[#allocation158_spill] sm:$0xff] }
 0x2db   :  { %v1919_v46 = vmul.f32 %v6354_v32, %v13683_v55 }
 0x2dc   :  { %6359 = vrsqrt.f32 %v1614_v11  ;;  %v3790_v11 = vpop.f32.mrf.mxu1  ;;  %5551 = vst [vmem:[%s12813_s3 + $0x5d0] sm:$0xff] %v3789_v4 }
 0x2dd   :  { %v3791_v53 = vadd.f32 %v3790_v11, %v3438_v61 }
 0x2de   :  { %v6356_v31 = vpop.eup %6355  ;;  %v3441_v23 = vpop.f32.mrf.mxu0 }
 0x2df   :  { %v1924_v22 = vmul.f32 %v6356_v31, %v10305_v2  ;;  %v1926_v7 = vmul.f32 %v6356_v31, %v10443_v15  ;;  %v1923_v3 = vmul.f32 %v6356_v31, %v10299_v26  ;;  %v1925_v39 = vmul.f32 %v6356_v31, %v10311_v6  ;;  %5552 = vst [vmem:[%s12813_s3 + $0x5d8] sm:$0xff] %v3791_v53 }
 0x2e0   :  { %v3794_v26 = vpop.f32.mrf.mxu1  ;;  %v3443_v2 = vpop.f32.mrf.mxu0  ;;  %v3442_v6 = vadd.f32 %v3441_v23, %v9843_v17 }
 0x2e1   :  { %v11035_v49 = vpack.c.bf16 %v1924_v22, %v1920_v50  ;;  %v11037_v51 = vpack.c.bf16 %v1926_v7, %v1922_v9  ;;  %v11039_v32 = vpack.c.bf16 %v1923_v3, %v1919_v46  ;;  %v11041_v8 = vpack.c.bf16 %v1925_v39, %v1921_v59  ;;  %v6358_v31 = vpop.eup %6357 }
 0x2e2   :  { %v3444_v15 = vadd.f32 %v3443_v2, %v9847_v57  ;;  %v3796_v4 = vpop.f32.mrf.mxu1  ;;  %v3445_v61 = vpop.f32.mrf.mxu0  ;;  %v3795_v50 = vadd.f32 %v3794_v26, %v3442_v6  ;;  %v1928_v22 = vmul.f32 %v6358_v31, %v10351_v1  ;;  %v1930_v7 = vmul.f32 %v6358_v31, %v10482_v20 }
 0x2e3   :  { %3579 = vmatprep.mubr.bf16.mxu0 %v11035_v49  ;;  %3932 = vmatprep.mubr.bf16.mxu1 %v11037_v51  ;;  %v3446_v9 = vadd.f32 %v3445_v61, %v9843_v17  ;;  %v1927_v3 = vmul.f32 %v6358_v31, %v10345_v38  ;;  %v1929_v39 = vmul.f32 %v6358_v31, %v10367_v27 }
 0x2e4   :  { %3580 = vmatmul.mubr.bf16.gmra.mxu0 %v11039_v32  ;;  %3933 = vmatmul.mubr.bf16.gmra.mxu1 %v11041_v8  ;;  %v3797_v43 = vadd.f32 %v3796_v4, %v3444_v15  ;;  %v3798_v55 = vpop.f32.mrf.mxu1  ;;  %v3447_v46 = vpop.f32.mrf.mxu0  ;;  %5557 = vst [vmem:[%s12813_s3 + $0x600] sm:$0xff] %v3795_v50 }
 0x2e5   :  { %v3799_v42 = vadd.f32 %v3798_v55, %v3446_v9  ;;  %v3448_v59 = vadd.f32 %v3447_v46, %v9847_v57  ;;  %v6137_v55 = vld [vmem:[%s12811_s1 + $0x160] ss:$24 sps:$4 sm:$0xff]  }
 0x2e6   :  { %5558 = vst [vmem:[%s12813_s3 + $0x608] sm:$0xff] %v3797_v43  ;;  %v3800_v6 = vpop.f32.mrf.mxu1 }
 0x2e7   :  { %5563 = vst [vmem:[%s12813_s3 + $0x630] sm:$0xff] %v3799_v42  ;;  %v3801_v1 = vadd.f32 %v3800_v6, %v3448_v59  ;;  %v13689_v6 = vld [vmem:[#allocation89_spill] sm:$0xff] }
 0x2e9   :  { %v6360_v11 = vpop.eup %6359  ;;  %5564 = vst [vmem:[%s12813_s3 + $0x638] sm:$0xff] %v3801_v1 }
 0x2ea   :  { %v1932_v53 = vmul.f32 %v6360_v11, %v10406_v62  ;;  %v1934_v23 = vmul.f32 %v6360_v11, %v10543_v58  ;;  %v1931_v26 = vmul.f32 %v6360_v11, %v10400_v36  ;;  %v1933_v2 = vmul.f32 %v6360_v11, %v10412_v24  ;;  %v13685_v62 = vld [vmem:[#allocation82_spill] sm:$0xff]  ;;  %v13686_v24 = vld [vmem:[#allocation83_spill] sm:$0xff] }
 0x2eb   :  { %v6140_v11 = vld [vmem:[%s12811_s1 + $0x460] ss:$24 sps:$4 sm:$0xff]  }
 0x2ec   :  { %v11071_v15 = vpack.c.bf16 %v1932_v53, %v1928_v22  ;;  %v11073_v20 = vpack.c.bf16 %v1934_v23, %v1930_v7  ;;  %v11075_v38 = vpack.c.bf16 %v1931_v26, %v1927_v3  ;;  %v11077_v27 = vpack.c.bf16 %v1933_v2, %v1929_v39  ;;  %v6145_v39 = vld [vmem:[%s12811_s1 + $0x134] ss:$24 sps:$4 sm:$0xff]   ;;  %v13688_v26 = vld [vmem:[#allocation85_spill] sm:$0xff] }
 0x2ed   :  { %v3451_v36 = vpop.f32.mrf.mxu0  ;;  %v6148_v53 = vld [vmem:[%s12811_s1 + $0x434] ss:$24 sps:$4 sm:$0xff]  }
 0x2ee   :  { %3589 = vmatprep.mubr.bf16.mxu0 %v11071_v15  ;;  %3942 = vmatprep.mubr.bf16.mxu1 %v11073_v20  ;;  %v3452_v58 = vadd.f32 %v3451_v36, %v9843_v17  ;;  %v3804_v4 = vpop.f32.mrf.mxu1  ;;  %v13687_v23 = vld [vmem:[#allocation84_spill] sm:$0xff] }
 0x2ef   :  { %3590 = vmatmul.mubr.bf16.gmra.mxu0 %v11075_v38  ;;  %3943 = vmatmul.mubr.bf16.gmra.mxu1 %v11077_v27  ;;  %v3453_v61 = vpop.f32.mrf.mxu0  ;;  %v6143_v36 = vld [vmem:[%s12811_s1 + $0x130] ss:$24 sps:$4 sm:$0xff]  }
 0x2f0   :  { %3985 = vmatprep.mubr.bf16.mxu0 %v13685_v62  ;;  %4338 = vmatprep.mubr.bf16.mxu1 %v13686_v24  ;;  %v3805_v31 = vadd.f32 %v3804_v4, %v3452_v58  ;;  %v3454_v50 = vadd.f32 %v3453_v61, %v9847_v57  ;;  %v3806_v43 = vpop.f32.mrf.mxu1  ;;  %v13690_v58 = vld [vmem:[#allocation90_spill] sm:$0xff]  ;;  %v6146_v4 = vld [vmem:[%s12811_s1 + $0x430] ss:$24 sps:$4 sm:$0xff]  }
 0x2f1   :  { %v3455_v9 = vpop.f32.mrf.mxu0  ;;  %v6151_v61 = vld [vmem:[%s12811_s1 + $0x104] ss:$24 sps:$4 sm:$0xff]  }
 0x2f2   :  { %5569 = vst [vmem:[%s12813_s3 + $0x660] sm:$0xff] %v3805_v31  ;;  %v3807_v46 = vadd.f32 %v3806_v43, %v3454_v50  ;;  %v3456_v42 = vadd.f32 %v3455_v9, %v9843_v17  ;;  %v3808_v59 = vpop.f32.mrf.mxu1  ;;  %v6154_v31 = vld [vmem:[%s12811_s1 + $0x404] ss:$24 sps:$4 sm:$0xff]   ;;  %v6149_v50 = vld [vmem:[%s12811_s1 + $0x100] ss:$24 sps:$4 sm:$0xff]  }
 0x2f3   :  { %v3457_v22 = vpop.f32.mrf.mxu0  ;;  %v6152_v43 = vld [vmem:[%s12811_s1 + $0x400] ss:$24 sps:$4 sm:$0xff]  }
 0x2f4   :  { %5570 = vst [vmem:[%s12813_s3 + $0x668] sm:$0xff] %v3807_v46  ;;  %v3809_v7 = vadd.f32 %v3808_v59, %v3456_v42  ;;  %v3458_v3 = vadd.f32 %v3457_v22, %v9847_v57  ;;  %v3810_v2 = vpop.f32.mrf.mxu1  ;;  %v6160_v46 = vld [vmem:[%s12811_s1 + $0x3d4] ss:$24 sps:$4 sm:$0xff]   ;;  %v13691_v42 = vld [vmem:[#allocation2_spill] sm:$0xff] }
 0x2f5   :  { %v13692_v59 = vld [vmem:[#allocation91_spill] sm:$0xff] }
 0x2f6   :  { %5575 = vst [vmem:[%s12813_s3 + $0x690] sm:$0xff] %v3809_v7  ;;  %v3811_v1 = vadd.f32 %v3810_v2, %v3458_v3  ;;  %v13693_v7 = vld [vmem:[#allocation97_spill] sm:$0xff]  ;;  %v13694_v3 = vld [vmem:[#allocation98_spill] sm:$0xff] }
 0x2f7   :  { %3986 = vmatmul.mubr.bf16.vlgmr.msra.gmra.mxu0 %v13687_v23  ;;  %4339 = vmatmul.mubr.bf16.vlgmr.msra.gmra.mxu1 %v13688_v26 }
 0x2f8   :  { %4660 = vmatpush1.bf16.msra.mxu0 %v6137_v55  ;;  %3995 = vmatprep.mubr.bf16.mxu0 %v13689_v6  ;;  %5576 = vst [vmem:[%s12813_s3 + $0x698] sm:$0xff] %v3811_v1  ;;  %v6157_v55 = vld [vmem:[%s12811_s1 + $0xd4] ss:$24 sps:$4 sm:$0xff]  }
 0x2f9   :  { %4348 = vmatprep.mubr.bf16.mxu1 %v13690_v58  ;;  %5013 = vmatpush1.bf16.msra.mxu1 %v6140_v11 }
 0x2fa   :  { %4661 = vmatprep.subr.bf16.mxu0 %v6145_v39  ;;  %5014 = vmatprep.subr.bf16.mxu1 %v6148_v53 }
 0x2fc   :  { %4662 = vmatpush1.bf16.msra.mxu0 %v6143_v36  ;;  %v3461_v9 = vpop.f32.mrf.mxu0  ;;  %v6155_v36 = vld [vmem:[%s12811_s1 + $0xd0] ss:$24 sps:$4 sm:$0xff]  }
 0x2fd   :  { %5015 = vmatpush1.bf16.msra.mxu1 %v6146_v4  ;;  %4663 = vmatprep.subr.bf16.mxu0 %v6151_v61  ;;  %v3462_v11 = vadd.f32 %v3461_v9, %v9843_v17  ;;  %v3814_v22 = vpop.f32.mrf.mxu1  ;;  %v6158_v4 = vld [vmem:[%s12811_s1 + $0x3d0] ss:$24 sps:$4 sm:$0xff]  }
 0x2fe   :  { %5016 = vmatprep.subr.bf16.mxu1 %v6154_v31  ;;  %v3463_v39 = vpop.f32.mrf.mxu0  ;;  %v6163_v31 = vld [vmem:[%s12811_s1 + $0xa4] ss:$24 sps:$4 sm:$0xff]  }
 0x2ff   :  { %3996 = vmatmul.mubr.bf16.gmra.mxu0 %v13691_v42  ;;  %4349 = vmatmul.mubr.bf16.gmra.mxu1 %v13692_v59  ;;  %v3815_v53 = vadd.f32 %v3814_v22, %v3462_v11  ;;  %v3464_v2 = vadd.f32 %v3463_v39, %v9847_v57  ;;  %v3816_v1 = vpop.f32.mrf.mxu1 }
 0x300   :  { %4005 = vmatprep.mubr.bf16.mxu0 %v13693_v7  ;;  %4358 = vmatprep.mubr.bf16.mxu1 %v13694_v3  ;;  %v3465_v61 = vpop.f32.mrf.mxu0  ;;  %v6161_v3 = vld [vmem:[%s12811_s1 + $0xa0] ss:$24 sps:$4 sm:$0xff]  }
 0x301   :  { %4664 = vmatpush1.bf16.msra.mxu0 %v6149_v50  ;;  %5017 = vmatpush1.bf16.msra.mxu1 %v6152_v43  ;;  %v6166_v50 = vld [vmem:[%s12811_s1 + $0x3a4] ss:$24 sps:$4 sm:$0xff]   ;;  %5581 = vst [vmem:[%s12813_s3 + $0x6c0] sm:$0xff] %v3815_v53  ;;  %v3817_v43 = vadd.f32 %v3816_v1, %v3464_v2  ;;  %v3466_v9 = vadd.f32 %v3465_v61, %v9843_v17  ;;  %v3818_v11 = vpop.f32.mrf.mxu1  ;;  %v6164_v53 = vld [vmem:[%s12811_s1 + $0x3a0] ss:$24 sps:$4 sm:$0xff]  }
 0x302   :  { %4665 = vmatprep.subr.bf16.mxu0 %v6157_v55  ;;  %5018 = vmatprep.subr.bf16.mxu1 %v6160_v46  ;;  %v3467_v22 = vpop.f32.mrf.mxu0  ;;  %v6169_v2 = vld [vmem:[%s12811_s1 + $0x74] ss:$24 sps:$4 sm:$0xff]  }
 0x303   :  { %5582 = vst [vmem:[%s12813_s3 + $0x6c8] sm:$0xff] %v3817_v43  ;;  %v3819_v55 = vadd.f32 %v3818_v11, %v3466_v9  ;;  %v3468_v46 = vadd.f32 %v3467_v22, %v9847_v57  ;;  %v3820_v39 = vpop.f32.mrf.mxu1  ;;  %v6172_v1 = vld [vmem:[%s12811_s1 + $0x374] ss:$24 sps:$4 sm:$0xff]  }
 0x305   :  { %4666 = vmatpush1.bf16.msra.mxu0 %v6155_v36  ;;  %5019 = vmatpush1.bf16.msra.mxu1 %v6158_v4  ;;  %v13695_v36 = vld [vmem:[#allocation99_spill] sm:$0xff]  ;;  %v13696_v4 = vld [vmem:[#allocation101_spill] sm:$0xff]  ;;  %5587 = vst [vmem:[%s12813_s3 + $0x6f0] sm:$0xff] %v3819_v55  ;;  %v3821_v61 = vadd.f32 %v3820_v39, %v3468_v46 }
 0x306   :  { %4667 = vmatprep.subr.bf16.mxu0 %v6163_v31  ;;  %5020 = vmatprep.subr.bf16.mxu1 %v6166_v50  ;;  %v3471_v43 = vpop.f32.mrf.mxu0  ;;  %v13697_v31 = vld [vmem:[#allocation7_spill] sm:$0xff] }
 0x307   :  { %4006 = vmatmul.mubr.bf16.gmra.mxu0 %v13695_v36  ;;  %4359 = vmatmul.mubr.bf16.gmra.mxu1 %v13696_v4  ;;  %v13698_v50 = vld [vmem:[#allocation11_spill] sm:$0xff]  ;;  %v3472_v9 = vadd.f32 %v3471_v43, %v9843_v17  ;;  %v3824_v11 = vpop.f32.mrf.mxu1  ;;  %5588 = vst [vmem:[%s12813_s3 + $0x6f8] sm:$0xff] %v3821_v61  ;;  %v6175_v61 = vld [vmem:[%s12811_s1 + $0x44] ss:$24 sps:$4 sm:$0xff]  }
 0x308   :  { %4015 = vmatprep.mubr.bf16.mxu0 %v13697_v31  ;;  %4368 = vmatprep.mubr.bf16.mxu1 %v13698_v50  ;;  %v3473_v22 = vpop.f32.mrf.mxu0  ;;  %v6167_v55 = vld [vmem:[%s12811_s1 + $0x70] ss:$24 sps:$4 sm:$0xff]   ;;  %v13700_v4 = vld [vmem:[#allocation6_spill] sm:$0xff] }
 0x309   :  { %4668 = vmatpush1.bf16.msra.mxu0 %v6161_v3  ;;  %5021 = vmatpush1.bf16.msra.mxu1 %v6164_v53  ;;  %v6170_v46 = vld [vmem:[%s12811_s1 + $0x370] ss:$24 sps:$4 sm:$0xff]   ;;  %v3825_v39 = vadd.f32 %v3824_v11, %v3472_v9  ;;  %v3474_v50 = vadd.f32 %v3473_v22, %v9847_v57  ;;  %v3826_v43 = vpop.f32.mrf.mxu1  ;;  %v6178_v3 = vld [vmem:[%s12811_s1 + $0x344] ss:$24 sps:$4 sm:$0xff]  }
 0x30a   :  { %4669 = vmatprep.subr.bf16.mxu0 %v6169_v2  ;;  %5022 = vmatprep.subr.bf16.mxu1 %v6172_v1  ;;  %v3475_v53 = vpop.f32.mrf.mxu0  ;;  %v6173_v2 = vld [vmem:[%s12811_s1 + $0x40] ss:$24 sps:$4 sm:$0xff]  }
 0x30b   :  { %5593 = vst [vmem:[%s12813_s3 + $0x720] sm:$0xff] %v3825_v39  ;;  %v3827_v31 = vadd.f32 %v3826_v43, %v3474_v50  ;;  %v3476_v9 = vadd.f32 %v3475_v53, %v9843_v17  ;;  %v3828_v11 = vpop.f32.mrf.mxu1  ;;  %v6176_v1 = vld [vmem:[%s12811_s1 + $0x340] ss:$24 sps:$4 sm:$0xff]  }
 0x30c   :  { %v3477_v22 = vpop.f32.mrf.mxu0  ;;  %v13699_v53 = vld [vmem:[#allocation10_spill] sm:$0xff] }
 0x30d   :  { %4670 = vmatpush1.bf16.msra.mxu0 %v6167_v55  ;;  %5023 = vmatpush1.bf16.msra.mxu1 %v6170_v46  ;;  %5594 = vst [vmem:[%s12813_s3 + $0x728] sm:$0xff] %v3827_v31  ;;  %v3829_v39 = vadd.f32 %v3828_v11, %v3476_v9  ;;  %v3478_v50 = vadd.f32 %v3477_v22, %v9847_v57  ;;  %v3830_v43 = vpop.f32.mrf.mxu1  ;;  %v6181_v55 = vld [vmem:[%s12811_s1 + $0x14] ss:$24 sps:$4 sm:$0xff]   ;;  %v13701_v31 = vld [vmem:[#allocation14_spill] sm:$0xff] }
 0x30e   :  { %4671 = vmatprep.subr.bf16.mxu0 %v6175_v61  ;;  %5024 = vmatprep.subr.bf16.mxu1 %v6178_v3  ;;  %v6184_v46 = vld [vmem:[%s12811_s1 + $0x314] ss:$24 sps:$4 sm:$0xff]   ;;  %v13702_v9 = vld [vmem:[#allocation18_spill] sm:$0xff] }
 0x30f   :  { %4016 = vmatmul.mubr.bf16.gmra.mxu0 %v13699_v53  ;;  %4369 = vmatmul.mubr.bf16.gmra.mxu1 %v13700_v4  ;;  %v3481_v36 = vpop.f32.mrf.mxu0  ;;  %5599 = vst [vmem:[%s12813_s3 + $0x750] sm:$0xff] %v3829_v39  ;;  %v3831_v61 = vadd.f32 %v3830_v43, %v3478_v50  ;;  %v6179_v4 = vld [vmem:[%s12811_s1 + $0x10] ss:$24 sps:$4 sm:$0xff]  }
 0x310   :  { %4025 = vmatprep.mubr.bf16.mxu0 %v13701_v31  ;;  %4378 = vmatprep.mubr.bf16.mxu1 %v13702_v9  ;;  %v3482_v3 = vadd.f32 %v3481_v36, %v9843_v17  ;;  %v3834_v11 = vpop.f32.mrf.mxu1  ;;  %v6182_v31 = vld [vmem:[%s12811_s1 + $0x310] ss:$24 sps:$4 sm:$0xff]  }
 0x311   :  { %v3483_v22 = vpop.f32.mrf.mxu0  ;;  %4672 = vmatpush1.bf16.msra.mxu0 %v6173_v2  ;;  %5025 = vmatpush1.bf16.msra.mxu1 %v6176_v1  ;;  %5600 = vst [vmem:[%s12813_s3 + $0x758] sm:$0xff] %v3831_v61  ;;  %v6187_v2 = vld [vmem:[%s12811_s1 + $0x2e4] ss:$24 sps:$4 sm:$0xff]   ;;  %v13704_v9 = vld [vmem:[#allocation12_spill] sm:$0xff] }
 0x312   :  { %v3835_v39 = vadd.f32 %v3834_v11, %v3482_v3  ;;  %v3484_v50 = vadd.f32 %v3483_v22, %v9847_v57  ;;  %v3836_v36 = vpop.f32.mrf.mxu1  ;;  %4673 = vmatprep.subr.bf16.mxu0 %v6181_v55  ;;  %5026 = vmatprep.subr.bf16.mxu1 %v6184_v46  ;;  %v6190_v1 = vld [vmem:[%s12811_s1 + $0x5e4] ss:$24 sps:$4 sm:$0xff]   ;;  %v6185_v55 = vld [vmem:[%s12811_s1 + $0x2e0] ss:$24 sps:$4 sm:$0xff]  }
 0x313   :  { %v3485_v43 = vpop.f32.mrf.mxu0  ;;  %v6188_v46 = vld [vmem:[%s12811_s1 + $0x5e0] ss:$24 sps:$4 sm:$0xff]  }
 0x314   :  { %5605 = vst [vmem:[%s12813_s3 + $0x780] sm:$0xff] %v3835_v39  ;;  %v3837_v61 = vadd.f32 %v3836_v36, %v3484_v50  ;;  %v3486_v3 = vadd.f32 %v3485_v43, %v9843_v17  ;;  %v3838_v11 = vpop.f32.mrf.mxu1  ;;  %v13703_v43 = vld [vmem:[#allocation19_spill] sm:$0xff] }
 0x315   :  { %v3487_v22 = vpop.f32.mrf.mxu0  ;;  %4674 = vmatpush1.bf16.msra.mxu0 %v6179_v4  ;;  %5027 = vmatpush1.bf16.msra.mxu1 %v6182_v31  ;;  %v6193_v4 = vld [vmem:[%s12811_s1 + $0x2b4] ss:$24 sps:$4 sm:$0xff]  }
 0x316   :  { %5606 = vst [vmem:[%s12813_s3 + $0x788] sm:$0xff] %v3837_v61  ;;  %v3839_v39 = vadd.f32 %v3838_v11, %v3486_v3  ;;  %v3488_v50 = vadd.f32 %v3487_v22, %v9847_v57  ;;  %v3840_v36 = vpop.f32.mrf.mxu1  ;;  %4675 = vmatprep.subr.bf16.mxu0 %v6187_v2  ;;  %5028 = vmatprep.subr.bf16.mxu1 %v6190_v1  ;;  %v6196_v31 = vld [vmem:[%s12811_s1 + $0x5b4] ss:$24 sps:$4 sm:$0xff]   ;;  %v13705_v61 = vld [vmem:[#allocation21_spill] sm:$0xff] }
 0x317   :  { %4026 = vmatmul.mubr.bf16.gmra.mxu0 %v13703_v43  ;;  %4379 = vmatmul.mubr.bf16.gmra.mxu1 %v13704_v9  ;;  %v3491_v53 = vpop.f32.mrf.mxu0  ;;  %v13706_v3 = vld [vmem:[#allocation25_spill] sm:$0xff]  ;;  %v6191_v9 = vld [vmem:[%s12811_s1 + $0x2b0] ss:$24 sps:$4 sm:$0xff]  }
 0x318   :  { %4035 = vmatprep.mubr.bf16.mxu0 %v13705_v61  ;;  %4388 = vmatprep.mubr.bf16.mxu1 %v13706_v3  ;;  %5611 = vst [vmem:[%s12813_s3 + $0x7b0] sm:$0xff] %v3839_v39  ;;  %v3841_v2 = vadd.f32 %v3840_v36, %v3488_v50  ;;  %v3492_v1 = vadd.f32 %v3491_v53, %v9843_v17  ;;  %v3844_v11 = vpop.f32.mrf.mxu1  ;;  %v6194_v61 = vld [vmem:[%s12811_s1 + $0x5b0] ss:$24 sps:$4 sm:$0xff]   ;;  %v13710_v3 = vld [vmem:[#allocation34_spill] sm:$0xff] }
 0x319   :  { %v3493_v22 = vpop.f32.mrf.mxu0  ;;  %4676 = vmatpush2.bf16.msra.mxu0 %v6185_v55  ;;  %5029 = vmatpush2.bf16.msra.mxu1 %v6188_v46  ;;  %v6199_v55 = vld [vmem:[%s12811_s1 + $0x284] ss:$24 sps:$4 sm:$0xff]  }
 0x31a   :  { %5612 = vst [vmem:[%s12813_s3 + $0x7b8] sm:$0xff] %v3841_v2  ;;  %v3845_v39 = vadd.f32 %v3844_v11, %v3492_v1  ;;  %v3494_v50 = vadd.f32 %v3493_v22, %v9847_v57  ;;  %v3846_v53 = vpop.f32.mrf.mxu1  ;;  %4677 = vmatprep.subr.bf16.mxu0 %v6193_v4  ;;  %5030 = vmatprep.subr.bf16.mxu1 %v6196_v31  ;;  %v6202_v46 = vld [vmem:[%s12811_s1 + $0x584] ss:$24 sps:$4 sm:$0xff]   ;;  %v6197_v4 = vld [vmem:[%s12811_s1 + $0x280] ss:$24 sps:$4 sm:$0xff]  }
 0x31b   :  { %v3495_v36 = vpop.f32.mrf.mxu0  ;;  %v6200_v31 = vld [vmem:[%s12811_s1 + $0x580] ss:$24 sps:$4 sm:$0xff]  }
 0x31c   :  { %5617 = vst [vmem:[%s12813_s3 + $0x7e0] sm:$0xff] %v3845_v39  ;;  %v3847_v2 = vadd.f32 %v3846_v53, %v3494_v50  ;;  %v3496_v1 = vadd.f32 %v3495_v36, %v9843_v17  ;;  %v3848_v11 = vpop.f32.mrf.mxu1  ;;  %v13707_v53 = vld [vmem:[#allocation32_spill] sm:$0xff]  ;;  %v13709_v36 = vld [vmem:[#allocation29_spill] sm:$0xff] }
 0x31d   :  { %v3497_v22 = vpop.f32.mrf.mxu0  ;;  %4678 = vmatpush2.bf16.msra.mxu0 %v6191_v9  ;;  %5031 = vmatpush2.bf16.msra.mxu1 %v6194_v61  ;;  %v13708_v9 = vld [vmem:[#allocation20_spill] sm:$0xff] }
 0x31e   :  { %5618 = vst [vmem:[%s12813_s3 + $0x7e8] sm:$0xff] %v3847_v2  ;;  %v3849_v39 = vadd.f32 %v3848_v11, %v3496_v1  ;;  %v3498_v50 = vadd.f32 %v3497_v22, %v9847_v57  ;;  %4679 = vmatprep.subr.bf16.mxu0 %v6199_v55  ;;  %5032 = vmatprep.subr.bf16.mxu1 %v6202_v46  ;;  %v3850_v61 = vpop.f32.mrf.mxu1  ;;  %v6203_v55 = vld [vmem:[%s12811_s1 + $0x250] ss:$24 sps:$4 sm:$0xff]   ;;  %v6205_v46 = vld [vmem:[%s12811_s1 + $0x254] ss:$24 sps:$4 sm:$0xff]   ;;  %v13713_v11 = vld [vmem:[#allocation37_spill] sm:$0xff] }
 0x31f   :  { %4036 = vmatmul.mubr.bf16.gmra.mxu0 %v13707_v53  ;;  %4389 = vmatmul.mubr.bf16.gmra.mxu1 %v13708_v9  ;;  %v13711_v2 = vld [vmem:[#allocation35_spill] sm:$0xff]  ;;  %v13712_v1 = vld [vmem:[#allocation28_spill] sm:$0xff]  ;;  %v13714_v22 = vld [vmem:[#allocation42_spill] sm:$0xff] }
 0x320   :  { %4045 = vmatprep.mubr.bf16.mxu0 %v13709_v36  ;;  %4398 = vmatprep.mubr.bf16.mxu1 %v13710_v3  ;;  %5623 = vst [vmem:[%s12813_s3 + $0x810] sm:$0xff] %v3849_v39  ;;  %v3851_v43 = vadd.f32 %v3850_v61, %v3498_v50  ;;  %v13716_v39 = vld [vmem:[#allocation50_spill] sm:$0xff]  ;;  %v13718_v61 = vld [vmem:[#allocation45_spill] sm:$0xff]  ;;  %v13730_v9 = vld [vmem:[#allocation72_spill] sm:$0xff] }
 0x321   :  { %4680 = vmatpush2.bf16.msra.mxu0 %v6197_v4  ;;  %5033 = vmatpush2.bf16.msra.mxu1 %v6200_v31  ;;  %v6208_v4 = vld [vmem:[%s12811_s1 + $0x554] ss:$24 sps:$4 sm:$0xff]   ;;  %v13717_v50 = vld [vmem:[#allocation46_spill] sm:$0xff] }
 0x322   :  { %5624 = vst [vmem:[%s12813_s3 + $0x818] sm:$0xff] %v3851_v43  ;;  %4681 = vmatprep.subr.bf16.mxu0 %v6205_v46  ;;  %v6206_v43 = vld [vmem:[%s12811_s1 + $0x550] ss:$24 sps:$4 sm:$0xff]   ;;  %5034 = vmatprep.subr.bf16.mxu1 %v6208_v4  ;;  %v6211_v4 = vld [vmem:[%s12811_s1 + $0x224] ss:$24 sps:$4 sm:$0xff]  }
 0x323   :  { %v13715_v31 = vld [vmem:[#allocation43_spill] sm:$0xff] }
 0x324   :  { %v13720_v46 = vld [vmem:[#allocation51_spill] sm:$0xff] }
 0x325   :  { %4682 = vmatpush2.bf16.msra.mxu0 %v6203_v55  ;;  %5035 = vmatpush2.bf16.msra.mxu1 %v6206_v43  ;;  %v13719_v55 = vld [vmem:[#allocation49_spill] sm:$0xff] }
 0x326   :  { %v6209_v43 = vld [vmem:[%s12811_s1 + $0x220] ss:$24 sps:$4 sm:$0xff]   ;;  %4683 = vmatprep.subr.bf16.mxu0 %v6211_v4 }
 0x327   :  { %4046 = vmatmul.mubr.bf16.gmra.mxu0 %v13711_v2  ;;  %4399 = vmatmul.mubr.bf16.gmra.mxu1 %v13712_v1 }
 0x328   :  { %4055 = vmatprep.mubr.bf16.mxu0 %v13713_v11  ;;  %4408 = vmatprep.mubr.bf16.mxu1 %v13714_v22  ;;  %v13721_v22 = vld [vmem:[#allocation56_spill] sm:$0xff] }
 0x329   :  { %v13722_v11 = vld [vmem:[#allocation44_spill] sm:$0xff]  ;;  %4684 = vmatpush2.bf16.msra.mxu0 %v6209_v43 }
 0x32f   :  { %4056 = vmatmul.mubr.bf16.gmra.mxu0 %v13715_v31  ;;  %4409 = vmatmul.mubr.bf16.gmra.mxu1 %v13716_v39 }
 0x330   :  { %4065 = vmatprep.mubr.bf16.mxu0 %v13717_v50  ;;  %4418 = vmatprep.mubr.bf16.mxu1 %v13718_v61  ;;  %v6214_v61 = vld [vmem:[%s12811_s1 + $0x524] ss:$24 sps:$4 sm:$0xff]  }
 0x331   :  { %5036 = vmatprep.subr.bf16.mxu1 %v6214_v61  ;;  %v13726_v50 = vld [vmem:[#allocation53_spill] sm:$0xff] }
 0x337   :  { %4066 = vmatmul.mubr.bf16.gmra.mxu0 %v13719_v55  ;;  %4419 = vmatmul.mubr.bf16.gmra.mxu1 %v13720_v46  ;;  %v13724_v46 = vld [vmem:[#allocation47_spill] sm:$0xff]  ;;  %v13725_v55 = vld [vmem:[#allocation54_spill] sm:$0xff] }
 0x338   :  { %4075 = vmatprep.mubr.bf16.mxu0 %v13721_v22  ;;  %4428 = vmatprep.mubr.bf16.mxu1 %v13722_v11  ;;  %v6212_v22 = vld [vmem:[%s12811_s1 + $0x520] ss:$24 sps:$4 sm:$0xff]   ;;  %v13723_v11 = vld [vmem:[#allocation48_spill] sm:$0xff]  ;;  %v3501_v39 = vpop.f32.mrf.mxu0 }
 0x339   :  { %v3854_v4 = vpop.f32.mrf.mxu1  ;;  %5037 = vmatpush2.bf16.msra.mxu1 %v6212_v22  ;;  %v3502_v31 = vadd.f32 %v3501_v39, %v9843_v17  ;;  %v13729_v39 = vld [vmem:[#allocation70_spill] sm:$0xff] }
 0x33a   :  { %v3503_v1 = vpop.f32.mrf.mxu0 }
 0x33b   :  { %v3856_v43 = vpop.f32.mrf.mxu1  ;;  %v3855_v2 = vadd.f32 %v3854_v4, %v3502_v31  ;;  %v3504_v3 = vadd.f32 %v3503_v1, %v9847_v57  ;;  %v6217_v4 = vld [vmem:[%s12811_s1 + $0x1f4] ss:$24 sps:$4 sm:$0xff]  }
 0x33c   :  { %v3505_v36 = vpop.f32.mrf.mxu0  ;;  %4685 = vmatprep.subr.bf16.mxu0 %v6217_v4 }
 0x33d   :  { %v3858_v61 = vpop.f32.mrf.mxu1  ;;  %5629 = vst [vmem:[%s12813_s3 + $0x840] sm:$0xff] %v3855_v2 }
 0x33e   :  { %v3507_v22 = vpop.f32.mrf.mxu0 }
 0x33f   :  { %4076 = vmatmul.mubr.bf16.gmra.mxu0 %v13723_v11  ;;  %4429 = vmatmul.mubr.bf16.gmra.mxu1 %v13724_v46  ;;  %v3857_v46 = vadd.f32 %v3856_v43, %v3504_v3  ;;  %v13728_v11 = vld [vmem:[#allocation57_spill] sm:$0xff]  ;;  %v3508_v31 = vadd.f32 %v3507_v22, %v9847_v57  ;;  %v3860_v2 = vpop.f32.mrf.mxu1  ;;  %v13731_v43 = vld [vmem:[#allocation75_spill] sm:$0xff] }
 0x340   :  { %4085 = vmatprep.mubr.bf16.mxu0 %v13725_v55  ;;  %4438 = vmatprep.mubr.bf16.mxu1 %v13726_v50  ;;  %v3506_v55 = vadd.f32 %v3505_v36, %v9843_v17  ;;  %v13727_v50 = vld [vmem:[#allocation59_spill] sm:$0xff] }
 0x341   :  { %5630 = vst [vmem:[%s12813_s3 + $0x848] sm:$0xff] %v3857_v46  ;;  %v3861_v3 = vadd.f32 %v3860_v2, %v3508_v31  ;;  %v6215_v36 = vld [vmem:[%s12811_s1 + $0x1f0] ss:$24 sps:$4 sm:$0xff]  }
 0x342   :  { %v3859_v1 = vadd.f32 %v3858_v61, %v3506_v55  ;;  %v6220_v55 = vld [vmem:[%s12811_s1 + $0x4f4] ss:$24 sps:$4 sm:$0xff]   ;;  %4686 = vmatpush2.bf16.msra.mxu0 %v6215_v36  ;;  %v6218_v46 = vld [vmem:[%s12811_s1 + $0x4f0] ss:$24 sps:$4 sm:$0xff]   ;;  %v13732_v61 = vld [vmem:[#allocation77_spill] sm:$0xff] }
 0x343   :  { %5636 = vst [vmem:[%s12813_s3 + $0x878] sm:$0xff] %v3861_v3  ;;  %5038 = vmatprep.subr.bf16.mxu1 %v6220_v55  ;;  %v13733_v31 = vld [vmem:[#allocation80_spill] sm:$0xff] }
 0x344   :  { %5635 = vst [vmem:[%s12813_s3 + $0x870] sm:$0xff] %v3859_v1  ;;  %v13734_v2 = vld [vmem:[#allocation120_spill] sm:$0xff]  ;;  %5039 = vmatpush2.bf16.msra.mxu1 %v6218_v46 }
 0x346   :  { %v3511_v22 = vpop.f32.mrf.mxu0  ;;  %v3864_v1 = vpop.f32.mrf.mxu1 }
 0x347   :  { %4086 = vmatmul.mubr.bf16.gmra.mxu0 %v13727_v50  ;;  %4439 = vmatmul.mubr.bf16.gmra.mxu1 %v13728_v11  ;;  %v3512_v3 = vadd.f32 %v3511_v22, %v9843_v17  ;;  %v13738_v50 = vld [vmem:[#allocation132_spill] sm:$0xff] }
 0x348   :  { %4095 = vmatprep.mubr.bf16.mxu0 %v13729_v39  ;;  %4448 = vmatprep.mubr.bf16.mxu1 %v13730_v9  ;;  %v3513_v4 = vpop.f32.mrf.mxu0  ;;  %v3866_v9 = vpop.f32.mrf.mxu1 }
 0x349   :  { %v3865_v36 = vadd.f32 %v3864_v1, %v3512_v3  ;;  %v3514_v39 = vadd.f32 %v3513_v4, %v9847_v57  ;;  %v13735_v1 = vld [vmem:[#allocation121_spill] sm:$0xff] }
 0x34a   :  { %v3515_v11 = vpop.f32.mrf.mxu0  ;;  %v3868_v55 = vpop.f32.mrf.mxu1  ;;  %v13736_v3 = vld [vmem:[#allocation125_spill] sm:$0xff] }
 0x34b   :  { %5641 = vst [vmem:[%s12813_s3 + $0x8a0] sm:$0xff] %v3865_v36  ;;  %v6224_v36 = vld [vmem:[%s12811_s1 + $0x4c0] ss:$24 sps:$4 sm:$0xff]  }
 0x34c   :  { %v3870_v4 = vpop.f32.mrf.mxu1 }
 0x34f   :  { %4096 = vmatmul.mubr.bf16.gmra.mxu0 %v13731_v43  ;;  %4449 = vmatmul.mubr.bf16.gmra.mxu1 %v13732_v61  ;;  %v3867_v61 = vadd.f32 %v3866_v9, %v3514_v39  ;;  %v3516_v43 = vadd.f32 %v3515_v11, %v9843_v17  ;;  %v6221_v11 = vld [vmem:[%s12811_s1 + $0x1c0] ss:$24 sps:$4 sm:$0xff]   ;;  %v6223_v39 = vld [vmem:[%s12811_s1 + $0x1c4] ss:$24 sps:$4 sm:$0xff]  }
 0x350   :  { %4105 = vmatprep.mubr.bf16.mxu0 %v13733_v31  ;;  %4458 = vmatprep.mubr.bf16.mxu1 %v13734_v2  ;;  %v3517_v31 = vpop.f32.mrf.mxu0  ;;  %v13737_v2 = vld [vmem:[#allocation131_spill] sm:$0xff] }
 0x351   :  { %5642 = vst [vmem:[%s12813_s3 + $0x8a8] sm:$0xff] %v3867_v61  ;;  %v3869_v22 = vadd.f32 %v3868_v55, %v3516_v43  ;;  %v3518_v46 = vadd.f32 %v3517_v31, %v9847_v57  ;;  %4687 = vmatprep.subr.bf16.mxu0 %v6223_v39  ;;  %v6226_v43 = vld [vmem:[%s12811_s1 + $0x4c4] ss:$24 sps:$4 sm:$0xff]  }
 0x352   :  { %4688 = vmatpush2.bf16.msra.mxu0 %v6221_v11  ;;  %5040 = vmatprep.subr.bf16.mxu1 %v6226_v43  ;;  %v13741_v39 = vld [vmem:[#allocation137_spill] sm:$0xff] }
 0x353   :  { %5647 = vst [vmem:[%s12813_s3 + $0x8d0] sm:$0xff] %v3869_v22  ;;  %v3871_v9 = vadd.f32 %v3870_v4, %v3518_v46  ;;  %v13739_v22 = vld [vmem:[#allocation133_spill] sm:$0xff]  ;;  %v13740_v46 = vld [vmem:[#allocation134_spill] sm:$0xff]  ;;  %5041 = vmatpush2.bf16.msra.mxu1 %v6224_v36 }
 0x355   :  { %5648 = vst [vmem:[%s12813_s3 + $0x8d8] sm:$0xff] %v3871_v9  ;;  %v3521_v61 = vpop.f32.mrf.mxu0  ;;  %v3874_v31 = vpop.f32.mrf.mxu1 }
 0x356   :  { %v3522_v55 = vadd.f32 %v3521_v61, %v9843_v17 }
 0x357   :  { %4106 = vmatmul.mubr.bf16.gmra.mxu0 %v13735_v1  ;;  %4459 = vmatmul.mubr.bf16.gmra.mxu1 %v13736_v3  ;;  %v3523_v4 = vpop.f32.mrf.mxu0  ;;  %v3876_v9 = vpop.f32.mrf.mxu1 }
 0x358   :  { %4115 = vmatprep.mubr.bf16.mxu0 %v13737_v2  ;;  %4468 = vmatprep.mubr.bf16.mxu1 %v13738_v50  ;;  %v13742_v50 = vld [vmem:[#allocation138_spill] sm:$0xff]  ;;  %v3875_v2 = vadd.f32 %v3874_v31, %v3522_v55  ;;  %v3524_v11 = vadd.f32 %v3523_v4, %v9847_v57  ;;  %v13743_v4 = vld [vmem:[#allocation139_spill] sm:$0xff] }
 0x359   :  { %v3525_v3 = vpop.f32.mrf.mxu0  ;;  %v3878_v1 = vpop.f32.mrf.mxu1 }
 0x35a   :  { %5653 = vst [vmem:[%s12813_s3 + $0x900] sm:$0xff] %v3875_v2  ;;  %v3877_v43 = vadd.f32 %v3876_v9, %v3524_v11  ;;  %v3526_v61 = vadd.f32 %v3525_v3, %v9843_v17  ;;  %v13744_v2 = vld [vmem:[#allocation140_spill] sm:$0xff]  ;;  %v13745_v9 = vld [vmem:[#allocation145_spill] sm:$0xff]  ;;  %v13746_v3 = vld [vmem:[#allocation146_spill] sm:$0xff] }
 0x35b   :  { %v3880_v55 = vpop.f32.mrf.mxu1 }
 0x35c   :  { %5654 = vst [vmem:[%s12813_s3 + $0x908] sm:$0xff] %v3877_v43  ;;  %v6229_v43 = vld [vmem:[%s12811_s1 + $0x194] ss:$24 sps:$4 sm:$0xff]  }
 0x35d   :  { %4689 = vmatprep.subr.bf16.mxu0 %v6229_v43  ;;  %v13748_v43 = vld [vmem:[#allocation147_spill] sm:$0xff] }
 0x35f   :  { %4116 = vmatmul.mubr.bf16.gmra.mxu0 %v13739_v22  ;;  %4469 = vmatmul.mubr.bf16.gmra.mxu1 %v13740_v46  ;;  %v3527_v46 = vpop.f32.mrf.mxu0 }
 0x360   :  { %4125 = vmatprep.mubr.bf16.mxu0 %v13741_v39  ;;  %4478 = vmatprep.mubr.bf16.mxu1 %v13742_v50  ;;  %v3879_v39 = vadd.f32 %v3878_v1, %v3526_v61  ;;  %v3528_v31 = vadd.f32 %v3527_v46, %v9847_v57  ;;  %v13749_v50 = vld [vmem:[#allocation151_spill] sm:$0xff] }
 0x362   :  { %5659 = vst [vmem:[%s12813_s3 + $0x930] sm:$0xff] %v3879_v39  ;;  %v3881_v36 = vadd.f32 %v3880_v55, %v3528_v31  ;;  %v6227_v39 = vld [vmem:[%s12811_s1 + $0x190] ss:$24 sps:$4 sm:$0xff]  }
 0x363   :  { %v3531_v1 = vpop.f32.mrf.mxu0  ;;  %v3884_v46 = vpop.f32.mrf.mxu1  ;;  %4690 = vmatpush2.bf16.msra.mxu0 %v6227_v39  ;;  %v13750_v39 = vld [vmem:[#allocation152_spill] sm:$0xff] }
 0x364   :  { %5660 = vst [vmem:[%s12813_s3 + $0x938] sm:$0xff] %v3881_v36  ;;  %v3532_v11 = vadd.f32 %v3531_v1, %v9843_v17  ;;  %v6232_v36 = vld [vmem:[%s12811_s1 + $0x494] ss:$24 sps:$4 sm:$0xff]  }
 0x365   :  { %v3533_v61 = vpop.f32.mrf.mxu0  ;;  %v3886_v31 = vpop.f32.mrf.mxu1  ;;  %5042 = vmatprep.subr.bf16.mxu1 %v6232_v36 }
 0x366   :  { %v3885_v55 = vadd.f32 %v3884_v46, %v3532_v11  ;;  %v13747_v11 = vld [vmem:[#allocation104_spill] sm:$0xff] }
 0x367   :  { %4126 = vmatmul.mubr.bf16.gmra.mxu0 %v13743_v4  ;;  %4479 = vmatmul.mubr.bf16.gmra.mxu1 %v13744_v2  ;;  %v3888_v1 = vpop.f32.mrf.mxu1  ;;  %v6230_v2 = vld [vmem:[%s12811_s1 + $0x490] ss:$24 sps:$4 sm:$0xff]  }
 0x368   :  { %4135 = vmatprep.mubr.bf16.mxu0 %v13745_v9  ;;  %4488 = vmatprep.mubr.bf16.mxu1 %v13746_v3  ;;  %v3534_v3 = vadd.f32 %v3533_v61, %v9847_v57  ;;  %v3535_v9 = vpop.f32.mrf.mxu0  ;;  %5665 = vst [vmem:[%s12813_s3 + $0x960] sm:$0xff] %v3885_v55 }
 0x369   :  { %v3536_v46 = vadd.f32 %v3535_v9, %v9843_v17  ;;  %5043 = vmatpush2.bf16.msra.mxu1 %v6230_v2 }
 0x36a   :  { %v3887_v4 = vadd.f32 %v3886_v31, %v3534_v3  ;;  %v3537_v61 = vpop.f32.mrf.mxu0  ;;  %v3890_v3 = vpop.f32.mrf.mxu1 }
 0x36b   :  { %v3889_v22 = vadd.f32 %v3888_v1, %v3536_v46  ;;  %v3538_v55 = vadd.f32 %v3537_v61, %v9847_v57  ;;  %v13751_v1 = vld [vmem:[#allocation153_spill] sm:$0xff]  ;;  %v13752_v46 = vld [vmem:[#allocation26_spill] sm:$0xff] }
 0x36c   :  { %5666 = vst [vmem:[%s12813_s3 + $0x968] sm:$0xff] %v3887_v4 }
 0x36d   :  { %5671 = vst [vmem:[%s12813_s3 + $0x990] sm:$0xff] %v3889_v22  ;;  %v3891_v9 = vadd.f32 %v3890_v3, %v3538_v55  ;;  %v13754_v22 = vld [vmem:[#allocation108_spill] sm:$0xff] }
 0x36f   :  { %4136 = vmatmul.mubr.bf16.gmra.mxu0 %v13747_v11  ;;  %4489 = vmatmul.mubr.bf16.gmra.mxu1 %v13748_v43  ;;  %5672 = vst [vmem:[%s12813_s3 + $0x998] sm:$0xff] %v3891_v9  ;;  %v3541_v31 = vpop.f32.mrf.mxu0  ;;  %v3894_v36 = vpop.f32.mrf.mxu1  ;;  %v13753_v43 = vld [vmem:[#allocation8_spill] sm:$0xff] }
 0x370   :  { %4145 = vmatprep.mubr.bf16.mxu0 %v13749_v50  ;;  %4498 = vmatprep.mubr.bf16.mxu1 %v13750_v39  ;;  %v3542_v39 = vadd.f32 %v3541_v31, %v9843_v17 }
 0x371   :  { %v3543_v50 = vpop.f32.mrf.mxu0  ;;  %v3896_v4 = vpop.f32.mrf.mxu1 }
 0x372   :  { %v3895_v2 = vadd.f32 %v3894_v36, %v3542_v39  ;;  %v3544_v61 = vadd.f32 %v3543_v50, %v9847_v57 }
 0x373   :  { %v3545_v55 = vpop.f32.mrf.mxu0  ;;  %v3898_v3 = vpop.f32.mrf.mxu1 }
 0x374   :  { %5677 = vst [vmem:[%s12813_s3 + $0x9c0] sm:$0xff] %v3895_v2  ;;  %v3897_v9 = vadd.f32 %v3896_v4, %v3544_v61  ;;  %v3546_v31 = vadd.f32 %v3545_v55, %v9843_v17  ;;  %v13755_v2 = vld [vmem:[#allocation24_spill] sm:$0xff]  ;;  %v13756_v61 = vld [vmem:[#allocation107_spill] sm:$0xff] }
 0x375   :  { %v3547_v11 = vpop.f32.mrf.mxu0 }
 0x376   :  { %5678 = vst [vmem:[%s12813_s3 + $0x9c8] sm:$0xff] %v3897_v9  ;;  %v3899_v50 = vadd.f32 %v3898_v3, %v3546_v31  ;;  %v3548_v39 = vadd.f32 %v3547_v11, %v9847_v57  ;;  %v13757_v11 = vld [vmem:[#allocation27_spill] sm:$0xff] }
 0x377   :  { %4146 = vmatmul.mubr.bf16.gmra.mxu0 %v13751_v1  ;;  %4499 = vmatmul.mubr.bf16.gmra.mxu1 %v13752_v46  ;;  %v3900_v1 = vpop.f32.mrf.mxu1 }
 0x378   :  { %4155 = vmatprep.mubr.bf16.mxu0 %v13753_v43  ;;  %4508 = vmatprep.mubr.bf16.mxu1 %v13754_v22  ;;  %5683 = vst [vmem:[%s12813_s3 + $0x9f0] sm:$0xff] %v3899_v50  ;;  %v3901_v36 = vadd.f32 %v3900_v1, %v3548_v39 }
 0x379   :  { %v3551_v22 = vpop.f32.mrf.mxu0  ;;  %v3904_v43 = vpop.f32.mrf.mxu1 }
 0x37a   :  { %v3552_v4 = vadd.f32 %v3551_v22, %v9843_v17  ;;  %5684 = vst [vmem:[%s12813_s3 + $0x9f8] sm:$0xff] %v3901_v36 }
 0x37b   :  { %v3553_v55 = vpop.f32.mrf.mxu0  ;;  %v3906_v3 = vpop.f32.mrf.mxu1 }
 0x37c   :  { %v3905_v9 = vadd.f32 %v3904_v43, %v3552_v4  ;;  %v3554_v1 = vadd.f32 %v3553_v55, %v9847_v57  ;;  %v13758_v55 = vld [vmem:[#allocation15_spill] sm:$0xff] }
 0x37d   :  { %v3555_v31 = vpop.f32.mrf.mxu0  ;;  %v3908_v50 = vpop.f32.mrf.mxu1 }
 0x37e   :  { %5689 = vst [vmem:[%s12813_s3 + $0xa20] sm:$0xff] %v3905_v9  ;;  %v3907_v22 = vadd.f32 %v3906_v3, %v3554_v1  ;;  %v3556_v39 = vadd.f32 %v3555_v31, %v9843_v17  ;;  %v13759_v9 = vld [vmem:[#allocation112_spill] sm:$0xff]  ;;  %v13760_v3 = vld [vmem:[#allocation111_spill] sm:$0xff] }
 0x37f   :  { %4156 = vmatmul.mubr.bf16.gmra.mxu0 %v13755_v2  ;;  %4509 = vmatmul.mubr.bf16.gmra.mxu1 %v13756_v61  ;;  %v3557_v61 = vpop.f32.mrf.mxu0  ;;  %v3910_v43 = vpop.f32.mrf.mxu1 }
 0x380   :  { %4165 = vmatprep.mubr.bf16.mxu0 %v10419_v25  ;;  %4518 = vmatprep.mubr.bf16.mxu1 %v13757_v11  ;;  %5690 = vst [vmem:[%s12813_s3 + $0xa28] sm:$0xff] %v3907_v22  ;;  %v3909_v36 = vadd.f32 %v3908_v50, %v3556_v39  ;;  %v3558_v11 = vadd.f32 %v3557_v61, %v9847_v57 }
 0x382   :  { %5695 = vst [vmem:[%s12813_s3 + $0xa50] sm:$0xff] %v3909_v36  ;;  %v3911_v4 = vadd.f32 %v3910_v43, %v3558_v11 }
 0x384   :  { %5696 = vst [vmem:[%s12813_s3 + $0xa58] sm:$0xff] %v3911_v4  ;;  %v13762_v4 = vld [vmem:[#allocation30_spill] sm:$0xff] }
 0x386   :  { %v3561_v1 = vpop.f32.mrf.mxu0  ;;  %v3914_v61 = vpop.f32.mrf.mxu1 }
 0x387   :  { %4166 = vmatmul.mubr.bf16.gmra.mxu0 %v13758_v55  ;;  %4519 = vmatmul.mubr.bf16.gmra.mxu1 %v13759_v9  ;;  %v3562_v31 = vadd.f32 %v3561_v1, %v9843_v17  ;;  %v13761_v9 = vld [vmem:[#allocation40_spill] sm:$0xff] }
 0x388   :  { %4175 = vmatprep.mubr.bf16.mxu0 %v10518_v37  ;;  %4528 = vmatprep.mubr.bf16.mxu1 %v13760_v3  ;;  %v3563_v50 = vpop.f32.mrf.mxu0  ;;  %v3916_v22 = vpop.f32.mrf.mxu1 }
 0x389   :  { %v3915_v39 = vadd.f32 %v3914_v61, %v3562_v31  ;;  %v3564_v11 = vadd.f32 %v3563_v50, %v9847_v57 }
 0x38a   :  { %v3565_v36 = vpop.f32.mrf.mxu0  ;;  %v3918_v43 = vpop.f32.mrf.mxu1 }
 0x38b   :  { %5701 = vst [vmem:[%s12813_s3 + $0xa80] sm:$0xff] %v3915_v39  ;;  %v3917_v3 = vadd.f32 %v3916_v22, %v3564_v11  ;;  %v3566_v37 = vadd.f32 %v3565_v36, %v9843_v17 }
 0x38c   :  { %v3567_v55 = vpop.f32.mrf.mxu0  ;;  %v3920_v31 = vpop.f32.mrf.mxu1 }
 0x38d   :  { %5702 = vst [vmem:[%s12813_s3 + $0xa88] sm:$0xff] %v3917_v3  ;;  %v3919_v1 = vadd.f32 %v3918_v43, %v3566_v37  ;;  %v3568_v61 = vadd.f32 %v3567_v55, %v9847_v57 }
 0x38f   :  { %4176 = vmatmul.mubr.bf16.gmra.mxu0 %v13761_v9  ;;  %4529 = vmatmul.mubr.bf16.gmra.mxu1 %v13762_v4  ;;  %5707 = vst [vmem:[%s12813_s3 + $0xab0] sm:$0xff] %v3919_v1  ;;  %v3921_v50 = vadd.f32 %v3920_v31, %v3568_v61 }
 0x390   :  { %4185 = vmatprep.mubr.bf16.mxu0 %v10593_v41  ;;  %4538 = vmatprep.mubr.bf16.mxu1 %v10605_v60 }
 0x391   :  { %5708 = vst [vmem:[%s12813_s3 + $0xab8] sm:$0xff] %v3921_v50 }
 0x395   :  { %v3571_v37 = vpop.f32.mrf.mxu0 }
 0x396   :  { %v3924_v55 = vpop.f32.mrf.mxu1  ;;  %v3572_v3 = vadd.f32 %v3571_v37, %v9843_v17 }
 0x397   :  { %4186 = vmatmul.mubr.bf16.gmra.mxu0 %v10618_v40  ;;  %4539 = vmatmul.mubr.bf16.gmra.mxu1 %v10620_v18  ;;  %v3573_v22 = vpop.f32.mrf.mxu0 }
 0x398   :  { %4195 = vmatprep.mubr.bf16.mxu0 %v10646_v29  ;;  %4548 = vmatprep.mubr.bf16.mxu1 %v10655_v56  ;;  %v3926_v39 = vpop.f32.mrf.mxu1  ;;  %v3925_v11 = vadd.f32 %v3924_v55, %v3572_v3  ;;  %v3574_v36 = vadd.f32 %v3573_v22, %v9847_v57 }
 0x399   :  { %v3575_v43 = vpop.f32.mrf.mxu0 }
 0x39a   :  { %v3928_v1 = vpop.f32.mrf.mxu1  ;;  %5713 = vst [vmem:[%s12813_s3 + $0xae0] sm:$0xff] %v3925_v11  ;;  %v3927_v61 = vadd.f32 %v3926_v39, %v3574_v36  ;;  %v3576_v31 = vadd.f32 %v3575_v43, %v9843_v17 }
 0x39b   :  { %v3577_v50 = vpop.f32.mrf.mxu0 }
 0x39c   :  { %5714 = vst [vmem:[%s12813_s3 + $0xae8] sm:$0xff] %v3927_v61  ;;  %v3929_v37 = vadd.f32 %v3928_v1, %v3576_v31  ;;  %v3578_v55 = vadd.f32 %v3577_v50, %v9847_v57  ;;  %v3930_v3 = vpop.f32.mrf.mxu1 }
 0x39e   :  { %5719 = vst [vmem:[%s12813_s3 + $0xb10] sm:$0xff] %v3929_v37  ;;  %v3931_v22 = vadd.f32 %v3930_v3, %v3578_v55 }
 0x39f   :  { %4196 = vmatmul.mubr.bf16.gmra.mxu0 %v10666_v16  ;;  %4549 = vmatmul.mubr.bf16.gmra.mxu1 %v10673_v63 }
 0x3a0   :  { %4205 = vmatprep.mubr.bf16.mxu0 %v10798_v28  ;;  %4558 = vmatprep.mubr.bf16.mxu1 %v10800_v30  ;;  %5720 = vst [vmem:[%s12813_s3 + $0xb18] sm:$0xff] %v3931_v22 }
 0x3a4   :  { %v3581_v39 = vpop.f32.mrf.mxu0  ;;  %v3934_v11 = vpop.f32.mrf.mxu1 }
 0x3a5   :  { %v3582_v36 = vadd.f32 %v3581_v39, %v9843_v17 }
 0x3a6   :  { %v3583_v43 = vpop.f32.mrf.mxu0  ;;  %v3936_v1 = vpop.f32.mrf.mxu1 }
 0x3a7   :  { %4206 = vmatmul.mubr.bf16.gmra.mxu0 %v10802_v35  ;;  %4559 = vmatmul.mubr.bf16.gmra.mxu1 %v10804_v5  ;;  %v3935_v61 = vadd.f32 %v3934_v11, %v3582_v36  ;;  %v3584_v31 = vadd.f32 %v3583_v43, %v9847_v57 }
 0x3a8   :  { %4215 = vmatprep.mubr.bf16.mxu0 %v10818_v21  ;;  %4568 = vmatprep.mubr.bf16.mxu1 %v10820_v33  ;;  %v3585_v50 = vpop.f32.mrf.mxu0  ;;  %v3938_v37 = vpop.f32.mrf.mxu1 }
 0x3a9   :  { %5725 = vst [vmem:[%s12813_s3 + $0xb40] sm:$0xff] %v3935_v61  ;;  %v3937_v55 = vadd.f32 %v3936_v1, %v3584_v31  ;;  %v3586_v3 = vadd.f32 %v3585_v50, %v9843_v17  ;;  %v13763_v61 = vld [vmem:[#allocation79_spill] sm:$0xff] }
 0x3aa   :  { %v3587_v22 = vpop.f32.mrf.mxu0  ;;  %v3940_v39 = vpop.f32.mrf.mxu1  ;;  %v2267_v31 = vsub.s32 2, %v13763_v61 }
 0x3ab   :  { %5726 = vst [vmem:[%s12813_s3 + $0xb48] sm:$0xff] %v3937_v55  ;;  %v3939_v11 = vadd.f32 %v3938_v37, %v3586_v3  ;;  %v3588_v36 = vadd.f32 %v3587_v22, %v9847_v57  ;;  %v2271_v22 = vsub.s32 3, %v13763_v61 }
 0x3ad   :  { %5731 = vst [vmem:[%s12813_s3 + $0xb70] sm:$0xff] %v3939_v11  ;;  %v3941_v43 = vadd.f32 %v3940_v39, %v3588_v36 }
 0x3af   :  { %v3591_v33 = vpop.f32.mrf.mxu0  ;;  %v3944_v21 = vpop.f32.mrf.mxu1  ;;  %4216 = vmatmul.mubr.bf16.gmra.mxu0 %v10822_v47  ;;  %4569 = vmatmul.mubr.bf16.gmra.mxu1 %v10824_v0  ;;  %5732 = vst [vmem:[%s12813_s3 + $0xb78] sm:$0xff] %v3941_v43  ;;  %v6579_v43 = vld [vmem:[%s12812_s2] sm:$0x3f] }
 0x3b0   :  { %v3592_v1 = vadd.f32 %v3591_v33, %v9843_v17  ;;  %4225 = vmatprep.mubr.bf16.mxu0 %v10838_v14  ;;  %4578 = vmatprep.mubr.bf16.mxu1 %v10840_v48  ;;  %v11605_v48 = vrot.slane %v6579_v43, %v2267_v31  ;;  %v11611_v14 = vrot.slane %v6579_v43, %v2271_v22 }
 0x3b1   :  { %v3593_v50 = vpop.f32.mrf.mxu0  ;;  %v3946_v37 = vpop.f32.mrf.mxu1 }
 0x3b2   :  { %v3945_v55 = vadd.f32 %v3944_v21, %v3592_v1  ;;  %v3594_v3 = vadd.f32 %v3593_v50, %v9847_v57 }
 0x3b3   :  { %v3595_v39 = vpop.f32.mrf.mxu0  ;;  %v3948_v11 = vpop.f32.mrf.mxu1 }
 0x3b4   :  { %5737 = vst [vmem:[%s12813_s3 + $0xba0] sm:$0xff] %v3945_v55  ;;  %v3947_v33 = vadd.f32 %v3946_v37, %v3594_v3  ;;  %v3596_v36 = vadd.f32 %v3595_v39, %v9843_v17  ;;  %v13764_v3 = vld [vmem:[#allocation31_spill] sm:$0xff] }
 0x3b5   :  { %v3597_v21 = vpop.f32.mrf.mxu0  ;;  %v3950_v1 = vpop.f32.mrf.mxu1 }
 0x3b6   :  { %5738 = vst [vmem:[%s12813_s3 + $0xba8] sm:$0xff] %v3947_v33  ;;  %v3949_v50 = vadd.f32 %v3948_v11, %v3596_v36  ;;  %v3598_v61 = vadd.f32 %v3597_v21, %v9847_v57 }
 0x3b7   :  { %v3987_v37 = vpop.f32.mrf.mxu0  ;;  %4226 = vmatmul.mubr.bf16.gmra.mxu0 %v10842_v19  ;;  %v4340_v17 = vpop.f32.mrf.mxu1  ;;  %4579 = vmatmul.mubr.bf16.gmra.mxu1 %v10844_v52 }
 0x3b8   :  { %5743 = vst [vmem:[%s12813_s3 + $0xbd0] sm:$0xff] %v3949_v50  ;;  %v3951_v31 = vadd.f32 %v3950_v1, %v3598_v61  ;;  %v3988_v55 = vadd.f32 %v3987_v37, %v11605_v48  ;;  %4235 = vmatprep.mubr.bf16.mxu0 %v10858_v54  ;;  %4588 = vmatprep.mubr.bf16.mxu1 %v13764_v3 }
 0x3b9   :  { %v3989_v57 = vpop.f32.mrf.mxu0  ;;  %v4342_v22 = vpop.f32.mrf.mxu1 }
 0x3ba   :  { %5744 = vst [vmem:[%s12813_s3 + $0xbd8] sm:$0xff] %v3951_v31  ;;  %v4341_v39 = vadd.f32 %v4340_v17, %v3988_v55  ;;  %v3990_v11 = vadd.f32 %v3989_v57, %v11611_v14  ;;  %v13765_v31 = vld [vmem:[#allocation41_spill] sm:$0xff] }
 0x3bb   :  { %v3991_v33 = vpop.f32.mrf.mxu0  ;;  %v4344_v36 = vpop.f32.mrf.mxu1  ;;  %v13766_v57 = vld [vmem:[#allocation33_spill] sm:$0xff] }
 0x3bc   :  { %5367 = vst [vmem:[%s12813_s3 + $0x10] sm:$0xff] %v4341_v39  ;;  %v4343_v61 = vadd.f32 %v4342_v22, %v3990_v11  ;;  %v3992_v43 = vadd.f32 %v3991_v33, %v11605_v48  ;;  %v13767_v11 = vld [vmem:[#allocation38_spill] sm:$0xff]  ;;  %v13768_v33 = vld [vmem:[#allocation39_spill] sm:$0xff] }
 0x3bd   :  { %v3993_v21 = vpop.f32.mrf.mxu0  ;;  %v4346_v1 = vpop.f32.mrf.mxu1 }
 0x3be   :  { %5368 = vst [vmem:[%s12813_s3 + $0x18] sm:$0xff] %v4343_v61  ;;  %v4345_v50 = vadd.f32 %v4344_v36, %v3992_v43  ;;  %v3994_v37 = vadd.f32 %v3993_v21, %v11611_v14 }
 0x3bf   :  { %v3997_v17 = vpop.f32.mrf.mxu0  ;;  %4236 = vmatmul.mubr.bf16.gmra.mxu0 %v13765_v31  ;;  %v4350_v55 = vpop.f32.mrf.mxu1  ;;  %4589 = vmatmul.mubr.bf16.gmra.mxu1 %v13766_v57 }
 0x3c0   :  { %5373 = vst [vmem:[%s12813_s3 + $0x40] sm:$0xff] %v4345_v50  ;;  %v4347_v22 = vadd.f32 %v4346_v1, %v3994_v37  ;;  %v3998_v39 = vadd.f32 %v3997_v17, %v11605_v48  ;;  %4245 = vmatprep.mubr.bf16.mxu0 %v13767_v11  ;;  %4598 = vmatprep.mubr.bf16.mxu1 %v13768_v33  ;;  %v13770_v11 = vld [vmem:[#allocation52_spill] sm:$0xff] }
 0x3c1   :  { %v3999_v36 = vpop.f32.mrf.mxu0  ;;  %v4352_v61 = vpop.f32.mrf.mxu1 }
 0x3c2   :  { %5374 = vst [vmem:[%s12813_s3 + $0x48] sm:$0xff] %v4347_v22  ;;  %v4351_v43 = vadd.f32 %v4350_v55, %v3998_v39  ;;  %v4000_v21 = vadd.f32 %v3999_v36, %v11611_v14  ;;  %v13769_v39 = vld [vmem:[#allocation36_spill] sm:$0xff] }
 0x3c3   :  { %v4001_v57 = vpop.f32.mrf.mxu0  ;;  %v4354_v31 = vpop.f32.mrf.mxu1 }
 0x3c4   :  { %5379 = vst [vmem:[%s12813_s3 + $0x70] sm:$0xff] %v4351_v43  ;;  %v4353_v1 = vadd.f32 %v4352_v61, %v4000_v21  ;;  %v4002_v50 = vadd.f32 %v4001_v57, %v11605_v48  ;;  %v13771_v43 = vld [vmem:[#allocation55_spill] sm:$0xff] }
 0x3c5   :  { %v4003_v37 = vpop.f32.mrf.mxu0  ;;  %v4356_v17 = vpop.f32.mrf.mxu1 }
 0x3c6   :  { %5380 = vst [vmem:[%s12813_s3 + $0x78] sm:$0xff] %v4353_v1  ;;  %v4355_v33 = vadd.f32 %v4354_v31, %v4002_v50  ;;  %v4004_v55 = vadd.f32 %v4003_v37, %v11611_v14 }
 0x3c7   :  { %v4007_v22 = vpop.f32.mrf.mxu0  ;;  %4246 = vmatmul.mubr.bf16.gmra.mxu0 %v13769_v39  ;;  %v4360_v36 = vpop.f32.mrf.mxu1  ;;  %4599 = vmatmul.mubr.bf16.gmra.mxu1 %v13770_v11 }
 0x3c8   :  { %5385 = vst [vmem:[%s12813_s3 + $0xa0] sm:$0xff] %v4355_v33  ;;  %v4357_v57 = vadd.f32 %v4356_v17, %v4004_v55  ;;  %v4008_v61 = vadd.f32 %v4007_v22, %v11605_v48  ;;  %4255 = vmatprep.mubr.bf16.mxu0 %v10916_v45  ;;  %4608 = vmatprep.mubr.bf16.mxu1 %v13771_v43  ;;  %v13773_v45 = vld [vmem:[#allocation66_spill] sm:$0xff] }
 0x3c9   :  { %v4009_v31 = vpop.f32.mrf.mxu0  ;;  %v4362_v21 = vpop.f32.mrf.mxu1 }
 0x3ca   :  { %5386 = vst [vmem:[%s12813_s3 + $0xa8] sm:$0xff] %v4357_v57  ;;  %v4361_v1 = vadd.f32 %v4360_v36, %v4008_v61  ;;  %v4010_v50 = vadd.f32 %v4009_v31, %v11611_v14  ;;  %v13772_v61 = vld [vmem:[#allocation67_spill] sm:$0xff] }
 0x3cb   :  { %v4011_v37 = vpop.f32.mrf.mxu0  ;;  %v4364_v11 = vpop.f32.mrf.mxu1 }
 0x3cc   :  { %5391 = vst [vmem:[%s12813_s3 + $0xd0] sm:$0xff] %v4361_v1  ;;  %v4363_v33 = vadd.f32 %v4362_v21, %v4010_v50  ;;  %v4012_v17 = vadd.f32 %v4011_v37, %v11605_v48  ;;  %v13774_v50 = vld [vmem:[#allocation58_spill] sm:$0xff] }
 0x3cd   :  { %v4013_v55 = vpop.f32.mrf.mxu0  ;;  %v4366_v22 = vpop.f32.mrf.mxu1 }
 0x3ce   :  { %5392 = vst [vmem:[%s12813_s3 + $0xd8] sm:$0xff] %v4363_v33  ;;  %v4365_v43 = vadd.f32 %v4364_v11, %v4012_v17  ;;  %v4014_v36 = vadd.f32 %v4013_v55, %v11611_v14 }
 0x3cf   :  { %v4017_v57 = vpop.f32.mrf.mxu0  ;;  %4256 = vmatmul.mubr.bf16.gmra.mxu0 %v13772_v61  ;;  %v4370_v31 = vpop.f32.mrf.mxu1  ;;  %4609 = vmatmul.mubr.bf16.gmra.mxu1 %v13773_v45 }
 0x3d0   :  { %5397 = vst [vmem:[%s12813_s3 + $0x100] sm:$0xff] %v4365_v43  ;;  %v4367_v21 = vadd.f32 %v4366_v22, %v4014_v36  ;;  %v4018_v1 = vadd.f32 %v4017_v57, %v11605_v48  ;;  %4265 = vmatprep.mubr.bf16.mxu0 %v10952_v13  ;;  %4618 = vmatprep.mubr.bf16.mxu1 %v13774_v50  ;;  %v13776_v13 = vld [vmem:[#allocation64_spill] sm:$0xff] }
 0x3d1   :  { %v4019_v11 = vpop.f32.mrf.mxu0  ;;  %v4372_v37 = vpop.f32.mrf.mxu1 }
 0x3d2   :  { %5398 = vst [vmem:[%s12813_s3 + $0x108] sm:$0xff] %v4367_v21  ;;  %v4371_v33 = vadd.f32 %v4370_v31, %v4018_v1  ;;  %v4020_v17 = vadd.f32 %v4019_v11, %v11611_v14  ;;  %v13775_v1 = vld [vmem:[#allocation65_spill] sm:$0xff] }
 0x3d3   :  { %v4021_v55 = vpop.f32.mrf.mxu0  ;;  %v4374_v45 = vpop.f32.mrf.mxu1 }
 0x3d4   :  { %5403 = vst [vmem:[%s12813_s3 + $0x130] sm:$0xff] %v4371_v33  ;;  %v4373_v43 = vadd.f32 %v4372_v37, %v4020_v17  ;;  %v4022_v22 = vadd.f32 %v4021_v55, %v11605_v48 }
 0x3d5   :  { %v4023_v36 = vpop.f32.mrf.mxu0  ;;  %v4376_v57 = vpop.f32.mrf.mxu1 }
 0x3d6   :  { %5404 = vst [vmem:[%s12813_s3 + $0x138] sm:$0xff] %v4373_v43  ;;  %v4375_v50 = vadd.f32 %v4374_v45, %v4022_v22  ;;  %v4024_v31 = vadd.f32 %v4023_v36, %v11611_v14 }
 0x3d7   :  { %v4027_v21 = vpop.f32.mrf.mxu0  ;;  %4266 = vmatmul.mubr.bf16.gmra.mxu0 %v13775_v1  ;;  %v4380_v11 = vpop.f32.mrf.mxu1  ;;  %4619 = vmatmul.mubr.bf16.gmra.mxu1 %v13776_v13 }
 0x3d8   :  { %5409 = vst [vmem:[%s12813_s3 + $0x160] sm:$0xff] %v4375_v50  ;;  %v4377_v37 = vadd.f32 %v4376_v57, %v4024_v31  ;;  %v4028_v33 = vadd.f32 %v4027_v21, %v11605_v48  ;;  %4275 = vmatprep.mubr.bf16.mxu0 %v10996_v34  ;;  %4628 = vmatprep.mubr.bf16.mxu1 %v10998_v44 }
 0x3d9   :  { %v4029_v45 = vpop.f32.mrf.mxu0  ;;  %v4382_v17 = vpop.f32.mrf.mxu1 }
 0x3da   :  { %5410 = vst [vmem:[%s12813_s3 + $0x168] sm:$0xff] %v4377_v37  ;;  %v4381_v55 = vadd.f32 %v4380_v11, %v4028_v33  ;;  %v4030_v43 = vadd.f32 %v4029_v45, %v11611_v14 }
 0x3db   :  { %v4031_v22 = vpop.f32.mrf.mxu0  ;;  %v4384_v36 = vpop.f32.mrf.mxu1 }
 0x3dc   :  { %5415 = vst [vmem:[%s12813_s3 + $0x190] sm:$0xff] %v4381_v55  ;;  %v4383_v50 = vadd.f32 %v4382_v17, %v4030_v43  ;;  %v4032_v57 = vadd.f32 %v4031_v22, %v11605_v48 }
 0x3dd   :  { %v4033_v31 = vpop.f32.mrf.mxu0  ;;  %v4386_v21 = vpop.f32.mrf.mxu1 }
 0x3de   :  { %5416 = vst [vmem:[%s12813_s3 + $0x198] sm:$0xff] %v4383_v50  ;;  %v4385_v44 = vadd.f32 %v4384_v36, %v4032_v57  ;;  %v4034_v11 = vadd.f32 %v4033_v31, %v11611_v14 }
 0x3df   :  { %v4037_v37 = vpop.f32.mrf.mxu0  ;;  %4276 = vmatmul.mubr.bf16.gmra.mxu0 %v11000_v10  ;;  %v4390_v33 = vpop.f32.mrf.mxu1  ;;  %4629 = vmatmul.mubr.bf16.gmra.mxu1 %v11002_v12 }
 0x3e0   :  { %5421 = vst [vmem:[%s12813_s3 + $0x1c0] sm:$0xff] %v4385_v44  ;;  %v4387_v45 = vadd.f32 %v4386_v21, %v4034_v11  ;;  %v4038_v17 = vadd.f32 %v4037_v37, %v11605_v48  ;;  %4285 = vmatprep.mubr.bf16.mxu0 %v11035_v49  ;;  %4638 = vmatprep.mubr.bf16.mxu1 %v11037_v51 }
 0x3e1   :  { %v4039_v55 = vpop.f32.mrf.mxu0  ;;  %v4392_v43 = vpop.f32.mrf.mxu1 }
 0x3e2   :  { %5422 = vst [vmem:[%s12813_s3 + $0x1c8] sm:$0xff] %v4387_v45  ;;  %v4391_v22 = vadd.f32 %v4390_v33, %v4038_v17  ;;  %v4040_v36 = vadd.f32 %v4039_v55, %v11611_v14 }
 0x3e3   :  { %v4041_v50 = vpop.f32.mrf.mxu0  ;;  %v4394_v57 = vpop.f32.mrf.mxu1 }
 0x3e4   :  { %5427 = vst [vmem:[%s12813_s3 + $0x1f0] sm:$0xff] %v4391_v22  ;;  %v4393_v44 = vadd.f32 %v4392_v43, %v4040_v36  ;;  %v4042_v31 = vadd.f32 %v4041_v50, %v11605_v48 }
 0x3e5   :  { %v4043_v21 = vpop.f32.mrf.mxu0  ;;  %v4396_v11 = vpop.f32.mrf.mxu1 }
 0x3e6   :  { %5428 = vst [vmem:[%s12813_s3 + $0x1f8] sm:$0xff] %v4393_v44  ;;  %v4395_v37 = vadd.f32 %v4394_v57, %v4042_v31  ;;  %v4044_v33 = vadd.f32 %v4043_v21, %v11611_v14 }
 0x3e7   :  { %v4047_v45 = vpop.f32.mrf.mxu0  ;;  %4286 = vmatmul.mubr.bf16.gmra.mxu0 %v11039_v32  ;;  %v4400_v17 = vpop.f32.mrf.mxu1  ;;  %4639 = vmatmul.mubr.bf16.gmra.mxu1 %v11041_v8 }
 0x3e8   :  { %5433 = vst [vmem:[%s12813_s3 + $0x220] sm:$0xff] %v4395_v37  ;;  %v4397_v55 = vadd.f32 %v4396_v11, %v4044_v33  ;;  %v4048_v43 = vadd.f32 %v4047_v45, %v11605_v48  ;;  %4295 = vmatprep.mubr.bf16.mxu0 %v11071_v15  ;;  %4648 = vmatprep.mubr.bf16.mxu1 %v11073_v20 }
 0x3e9   :  { %v4049_v22 = vpop.f32.mrf.mxu0  ;;  %v4402_v36 = vpop.f32.mrf.mxu1 }
 0x3ea   :  { %5434 = vst [vmem:[%s12813_s3 + $0x228] sm:$0xff] %v4397_v55  ;;  %v4401_v50 = vadd.f32 %v4400_v17, %v4048_v43  ;;  %v4050_v57 = vadd.f32 %v4049_v22, %v11611_v14 }
 0x3eb   :  { %v4051_v44 = vpop.f32.mrf.mxu0  ;;  %v4404_v31 = vpop.f32.mrf.mxu1 }
 0x3ec   :  { %5439 = vst [vmem:[%s12813_s3 + $0x250] sm:$0xff] %v4401_v50  ;;  %v4403_v21 = vadd.f32 %v4402_v36, %v4050_v57  ;;  %v4052_v11 = vadd.f32 %v4051_v44, %v11605_v48 }
 0x3ed   :  { %v4053_v37 = vpop.f32.mrf.mxu0  ;;  %v4406_v33 = vpop.f32.mrf.mxu1 }
 0x3ee   :  { %5440 = vst [vmem:[%s12813_s3 + $0x258] sm:$0xff] %v4403_v21  ;;  %v4405_v45 = vadd.f32 %v4404_v31, %v4052_v11  ;;  %v4054_v17 = vadd.f32 %v4053_v37, %v11611_v14 }
 0x3ef   :  { %v4057_v55 = vpop.f32.mrf.mxu0  ;;  %4296 = vmatmul.mubr.bf16.gmra.mxu0 %v11075_v38  ;;  %v4410_v43 = vpop.f32.mrf.mxu1  ;;  %4649 = vmatmul.mubr.bf16.gmra.mxu1 %v11077_v27 }
 0x3f0   :  { %5445 = vst [vmem:[%s12813_s3 + $0x280] sm:$0xff] %v4405_v45  ;;  %v4407_v22 = vadd.f32 %v4406_v33, %v4054_v17  ;;  %v4058_v36 = vadd.f32 %v4057_v55, %v11605_v48  ;;  %4691 = vmatprep.mubr.bf16.mxu0 %v13685_v62  ;;  %5044 = vmatprep.mubr.bf16.mxu1 %v13686_v24 }
 0x3f1   :  { %v4059_v50 = vpop.f32.mrf.mxu0  ;;  %v4412_v57 = vpop.f32.mrf.mxu1 }
 0x3f2   :  { %5446 = vst [vmem:[%s12813_s3 + $0x288] sm:$0xff] %v4407_v22  ;;  %v4411_v44 = vadd.f32 %v4410_v43, %v4058_v36  ;;  %v4060_v31 = vadd.f32 %v4059_v50, %v11611_v14 }
 0x3f3   :  { %v4061_v21 = vpop.f32.mrf.mxu0  ;;  %v4414_v11 = vpop.f32.mrf.mxu1 }
 0x3f4   :  { %5451 = vst [vmem:[%s12813_s3 + $0x2b0] sm:$0xff] %v4411_v44  ;;  %v4413_v37 = vadd.f32 %v4412_v57, %v4060_v31  ;;  %v4062_v62 = vadd.f32 %v4061_v21, %v11605_v48 }
 0x3f5   :  { %v4063_v33 = vpop.f32.mrf.mxu0  ;;  %v4416_v24 = vpop.f32.mrf.mxu1 }
 0x3f6   :  { %5452 = vst [vmem:[%s12813_s3 + $0x2b8] sm:$0xff] %v4413_v37  ;;  %v4415_v45 = vadd.f32 %v4414_v11, %v4062_v62  ;;  %v4064_v17 = vadd.f32 %v4063_v33, %v11611_v14 }
 0x3f7   :  { %v4067_v55 = vpop.f32.mrf.mxu0  ;;  %v4420_v43 = vpop.f32.mrf.mxu1  ;;  %4692 = vmatmul.mubr.bf16.vlgmr.msra.gmra.mxu0 %v13687_v23  ;;  %5045 = vmatmul.mubr.bf16.vlgmr.msra.gmra.mxu1 %v13688_v26 }
 0x3f8   :  { %5457 = vst [vmem:[%s12813_s3 + $0x2e0] sm:$0xff] %v4415_v45  ;;  %v4417_v22 = vadd.f32 %v4416_v24, %v4064_v17  ;;  %v4068_v36 = vadd.f32 %v4067_v55, %v11605_v48  ;;  %4701 = vmatprep.mubr.bf16.mxu0 %v13689_v6  ;;  %5054 = vmatprep.mubr.bf16.mxu1 %v13690_v58  ;;  %v13777_v55 = vld [vmem:[#allocation98_spill] sm:$0xff] }
 0x3f9   :  { %v4069_v50 = vpop.f32.mrf.mxu0  ;;  %v4422_v57 = vpop.f32.mrf.mxu1 }
 0x3fa   :  { %5458 = vst [vmem:[%s12813_s3 + $0x2e8] sm:$0xff] %v4417_v22  ;;  %v4421_v23 = vadd.f32 %v4420_v43, %v4068_v36  ;;  %v4070_v26 = vadd.f32 %v4069_v50, %v11611_v14 }
 0x3fb   :  { %v4071_v44 = vpop.f32.mrf.mxu0  ;;  %v4424_v31 = vpop.f32.mrf.mxu1 }
 0x3fc   :  { %5463 = vst [vmem:[%s12813_s3 + $0x310] sm:$0xff] %v4421_v23  ;;  %v4423_v21 = vadd.f32 %v4422_v57, %v4070_v26  ;;  %v4072_v6 = vadd.f32 %v4071_v44, %v11605_v48 }
 0x3fd   :  { %v4073_v11 = vpop.f32.mrf.mxu0  ;;  %v4426_v58 = vpop.f32.mrf.mxu1 }
 0x3fe   :  { %5464 = vst [vmem:[%s12813_s3 + $0x318] sm:$0xff] %v4423_v21  ;;  %v4425_v37 = vadd.f32 %v4424_v31, %v4072_v6  ;;  %v4074_v62 = vadd.f32 %v4073_v11, %v11611_v14  ;;  %v13778_v11 = vld [vmem:[#allocation99_spill] sm:$0xff] }
 0x3ff   :  { %v4077_v33 = vpop.f32.mrf.mxu0  ;;  %v4430_v24 = vpop.f32.mrf.mxu1  ;;  %4702 = vmatmul.mubr.bf16.gmra.mxu0 %v13691_v42  ;;  %5055 = vmatmul.mubr.bf16.gmra.mxu1 %v13692_v59 }
 0x400   :  { %5469 = vst [vmem:[%s12813_s3 + $0x340] sm:$0xff] %v4425_v37  ;;  %v4427_v45 = vadd.f32 %v4426_v58, %v4074_v62  ;;  %v4078_v17 = vadd.f32 %v4077_v33, %v11605_v48  ;;  %4711 = vmatprep.mubr.bf16.mxu0 %v13693_v7  ;;  %5064 = vmatprep.mubr.bf16.mxu1 %v13777_v55  ;;  %v13779_v58 = vld [vmem:[#allocation101_spill] sm:$0xff]  ;;  %v13780_v33 = vld [vmem:[#allocation7_spill] sm:$0xff] }
 0x401   :  { %v4079_v43 = vpop.f32.mrf.mxu0  ;;  %v4432_v22 = vpop.f32.mrf.mxu1 }
 0x402   :  { %5470 = vst [vmem:[%s12813_s3 + $0x348] sm:$0xff] %v4427_v45  ;;  %v4431_v42 = vadd.f32 %v4430_v24, %v4078_v17  ;;  %v4080_v59 = vadd.f32 %v4079_v43, %v11611_v14  ;;  %v13781_v24 = vld [vmem:[#allocation11_spill] sm:$0xff] }
 0x403   :  { %v4081_v36 = vpop.f32.mrf.mxu0  ;;  %v4434_v50 = vpop.f32.mrf.mxu1 }
 0x404   :  { %5475 = vst [vmem:[%s12813_s3 + $0x370] sm:$0xff] %v4431_v42  ;;  %v4433_v57 = vadd.f32 %v4432_v22, %v4080_v59  ;;  %v4082_v7 = vadd.f32 %v4081_v36, %v11605_v48 }
 0x405   :  { %v4083_v23 = vpop.f32.mrf.mxu0  ;;  %v4436_v26 = vpop.f32.mrf.mxu1 }
 0x406   :  { %5476 = vst [vmem:[%s12813_s3 + $0x378] sm:$0xff] %v4433_v57  ;;  %v4435_v44 = vadd.f32 %v4434_v50, %v4082_v7  ;;  %v4084_v31 = vadd.f32 %v4083_v23, %v11611_v14 }
 0x407   :  { %v4087_v21 = vpop.f32.mrf.mxu0  ;;  %v4440_v6 = vpop.f32.mrf.mxu1  ;;  %4712 = vmatmul.mubr.bf16.gmra.mxu0 %v13778_v11  ;;  %5065 = vmatmul.mubr.bf16.gmra.mxu1 %v13779_v58  ;;  %v13784_v58 = vld [vmem:[#allocation14_spill] sm:$0xff] }
 0x408   :  { %5481 = vst [vmem:[%s12813_s3 + $0x3a0] sm:$0xff] %v4435_v44  ;;  %v4437_v37 = vadd.f32 %v4436_v26, %v4084_v31  ;;  %v4088_v62 = vadd.f32 %v4087_v21, %v11605_v48  ;;  %4721 = vmatprep.mubr.bf16.mxu0 %v13780_v33  ;;  %5074 = vmatprep.mubr.bf16.mxu1 %v13781_v24  ;;  %v13782_v31 = vld [vmem:[#allocation10_spill] sm:$0xff] }
 0x409   :  { %v4089_v45 = vpop.f32.mrf.mxu0  ;;  %v4442_v17 = vpop.f32.mrf.mxu1  ;;  %v13783_v21 = vld [vmem:[#allocation6_spill] sm:$0xff] }
 0x40a   :  { %5482 = vst [vmem:[%s12813_s3 + $0x3a8] sm:$0xff] %v4437_v37  ;;  %v4441_v55 = vadd.f32 %v4440_v6, %v4088_v62  ;;  %v4090_v43 = vadd.f32 %v4089_v45, %v11611_v14  ;;  %v13785_v37 = vld [vmem:[#allocation18_spill] sm:$0xff] }
 0x40b   :  { %v4091_v22 = vpop.f32.mrf.mxu0  ;;  %v4444_v42 = vpop.f32.mrf.mxu1 }
 0x40c   :  { %5487 = vst [vmem:[%s12813_s3 + $0x3d0] sm:$0xff] %v4441_v55  ;;  %v4443_v59 = vadd.f32 %v4442_v17, %v4090_v43  ;;  %v4092_v36 = vadd.f32 %v4091_v22, %v11605_v48 }
 0x40d   :  { %v4093_v50 = vpop.f32.mrf.mxu0  ;;  %v4446_v57 = vpop.f32.mrf.mxu1 }
 0x40e   :  { %5488 = vst [vmem:[%s12813_s3 + $0x3d8] sm:$0xff] %v4443_v59  ;;  %v4445_v7 = vadd.f32 %v4444_v42, %v4092_v36  ;;  %v4094_v23 = vadd.f32 %v4093_v50, %v11611_v14 }
 0x40f   :  { %v4097_v26 = vpop.f32.mrf.mxu0  ;;  %v4450_v44 = vpop.f32.mrf.mxu1  ;;  %4722 = vmatmul.mubr.bf16.gmra.mxu0 %v13782_v31  ;;  %5075 = vmatmul.mubr.bf16.gmra.mxu1 %v13783_v21  ;;  %v13788_v21 = vld [vmem:[#allocation21_spill] sm:$0xff] }
 0x410   :  { %5493 = vst [vmem:[%s12813_s3 + $0x400] sm:$0xff] %v4445_v7  ;;  %v4447_v6 = vadd.f32 %v4446_v57, %v4094_v23  ;;  %v4098_v11 = vadd.f32 %v4097_v26, %v11605_v48  ;;  %4731 = vmatprep.mubr.bf16.mxu0 %v13784_v58  ;;  %5084 = vmatprep.mubr.bf16.mxu1 %v13785_v37  ;;  %v13786_v23 = vld [vmem:[#allocation19_spill] sm:$0xff]  ;;  %v13787_v26 = vld [vmem:[#allocation12_spill] sm:$0xff] }
 0x411   :  { %v4099_v62 = vpop.f32.mrf.mxu0  ;;  %v4452_v33 = vpop.f32.mrf.mxu1 }
 0x412   :  { %5494 = vst [vmem:[%s12813_s3 + $0x408] sm:$0xff] %v4447_v6  ;;  %v4451_v24 = vadd.f32 %v4450_v44, %v4098_v11  ;;  %v4100_v45 = vadd.f32 %v4099_v62, %v11611_v14  ;;  %v13789_v6 = vld [vmem:[#allocation25_spill] sm:$0xff] }
 0x413   :  { %v4101_v17 = vpop.f32.mrf.mxu0  ;;  %v4454_v55 = vpop.f32.mrf.mxu1 }
 0x414   :  { %5499 = vst [vmem:[%s12813_s3 + $0x430] sm:$0xff] %v4451_v24  ;;  %v4453_v43 = vadd.f32 %v4452_v33, %v4100_v45  ;;  %v4102_v22 = vadd.f32 %v4101_v17, %v11605_v48 }
 0x415   :  { %v4103_v42 = vpop.f32.mrf.mxu0  ;;  %v4456_v59 = vpop.f32.mrf.mxu1 }
 0x416   :  { %5500 = vst [vmem:[%s12813_s3 + $0x438] sm:$0xff] %v4453_v43  ;;  %v4455_v36 = vadd.f32 %v4454_v55, %v4102_v22  ;;  %v4104_v50 = vadd.f32 %v4103_v42, %v11611_v14 }
 0x417   :  { %v4107_v57 = vpop.f32.mrf.mxu0  ;;  %v4460_v7 = vpop.f32.mrf.mxu1  ;;  %4732 = vmatmul.mubr.bf16.gmra.mxu0 %v13786_v23  ;;  %5085 = vmatmul.mubr.bf16.gmra.mxu1 %v13787_v26  ;;  %v13791_v23 = vld [vmem:[#allocation29_spill] sm:$0xff]  ;;  %v13792_v26 = vld [vmem:[#allocation34_spill] sm:$0xff] }
 0x418   :  { %5505 = vst [vmem:[%s12813_s3 + $0x460] sm:$0xff] %v4455_v36  ;;  %v4457_v44 = vadd.f32 %v4456_v59, %v4104_v50  ;;  %v4108_v31 = vadd.f32 %v4107_v57, %v11605_v48  ;;  %4741 = vmatprep.mubr.bf16.mxu0 %v13788_v21  ;;  %5094 = vmatprep.mubr.bf16.mxu1 %v13789_v6  ;;  %v13790_v50 = vld [vmem:[#allocation20_spill] sm:$0xff] }
 0x419   :  { %v4109_v11 = vpop.f32.mrf.mxu0  ;;  %v4462_v58 = vpop.f32.mrf.mxu1 }
 0x41a   :  { %5506 = vst [vmem:[%s12813_s3 + $0x468] sm:$0xff] %v4457_v44  ;;  %v4461_v37 = vadd.f32 %v4460_v7, %v4108_v31  ;;  %v4110_v62 = vadd.f32 %v4109_v11, %v11611_v14 }
 0x41b   :  { %v4111_v33 = vpop.f32.mrf.mxu0  ;;  %v4464_v24 = vpop.f32.mrf.mxu1 }
 0x41c   :  { %5511 = vst [vmem:[%s12813_s3 + $0x490] sm:$0xff] %v4461_v37  ;;  %v4463_v45 = vadd.f32 %v4462_v58, %v4110_v62  ;;  %v4112_v17 = vadd.f32 %v4111_v33, %v11605_v48 }
 0x41d   :  { %v4113_v55 = vpop.f32.mrf.mxu0  ;;  %v4466_v43 = vpop.f32.mrf.mxu1 }
 0x41e   :  { %5512 = vst [vmem:[%s12813_s3 + $0x498] sm:$0xff] %v4463_v45  ;;  %v4465_v22 = vadd.f32 %v4464_v24, %v4112_v17  ;;  %v4114_v42 = vadd.f32 %v4113_v55, %v11611_v14 }
 0x41f   :  { %v4117_v59 = vpop.f32.mrf.mxu0  ;;  %v4470_v36 = vpop.f32.mrf.mxu1  ;;  %4742 = vmatmul.mubr.bf16.gmra.mxu0 %v13707_v53  ;;  %5095 = vmatmul.mubr.bf16.gmra.mxu1 %v13790_v50  ;;  %v13796_v50 = vld [vmem:[#allocation42_spill] sm:$0xff] }
 0x420   :  { %5517 = vst [vmem:[%s12813_s3 + $0x4c0] sm:$0xff] %v4465_v22  ;;  %v4467_v57 = vadd.f32 %v4466_v43, %v4114_v42  ;;  %v4118_v7 = vadd.f32 %v4117_v59, %v11605_v48  ;;  %4751 = vmatprep.mubr.bf16.mxu0 %v13791_v23  ;;  %5104 = vmatprep.mubr.bf16.mxu1 %v13792_v26  ;;  %v13793_v43 = vld [vmem:[#allocation35_spill] sm:$0xff]  ;;  %v13794_v22 = vld [vmem:[#allocation28_spill] sm:$0xff] }
 0x421   :  { %v4119_v44 = vpop.f32.mrf.mxu0  ;;  %v4472_v31 = vpop.f32.mrf.mxu1 }
 0x422   :  { %5518 = vst [vmem:[%s12813_s3 + $0x4c8] sm:$0xff] %v4467_v57  ;;  %v4471_v53 = vadd.f32 %v4470_v36, %v4118_v7  ;;  %v4120_v21 = vadd.f32 %v4119_v44, %v11611_v14  ;;  %v13795_v36 = vld [vmem:[#allocation37_spill] sm:$0xff] }
 0x423   :  { %v4121_v6 = vpop.f32.mrf.mxu0  ;;  %v4474_v11 = vpop.f32.mrf.mxu1 }
 0x424   :  { %5523 = vst [vmem:[%s12813_s3 + $0x4f0] sm:$0xff] %v4471_v53  ;;  %v4473_v58 = vadd.f32 %v4472_v31, %v4120_v21  ;;  %v4122_v37 = vadd.f32 %v4121_v6, %v11605_v48 }
 0x425   :  { %v4123_v62 = vpop.f32.mrf.mxu0  ;;  %v4476_v33 = vpop.f32.mrf.mxu1 }
 0x426   :  { %5524 = vst [vmem:[%s12813_s3 + $0x4f8] sm:$0xff] %v4473_v58  ;;  %v4475_v24 = vadd.f32 %v4474_v11, %v4122_v37  ;;  %v4124_v45 = vadd.f32 %v4123_v62, %v11611_v14 }
 0x427   :  { %v4127_v17 = vpop.f32.mrf.mxu0  ;;  %v4480_v55 = vpop.f32.mrf.mxu1  ;;  %4752 = vmatmul.mubr.bf16.gmra.mxu0 %v13793_v43  ;;  %5105 = vmatmul.mubr.bf16.gmra.mxu1 %v13794_v22  ;;  %v13799_v43 = vld [vmem:[#allocation46_spill] sm:$0xff]  ;;  %v13800_v22 = vld [vmem:[#allocation45_spill] sm:$0xff] }
 0x428   :  { %5529 = vst [vmem:[%s12813_s3 + $0x520] sm:$0xff] %v4475_v24  ;;  %v4477_v42 = vadd.f32 %v4476_v33, %v4124_v45  ;;  %v4128_v59 = vadd.f32 %v4127_v17, %v11605_v48  ;;  %4761 = vmatprep.mubr.bf16.mxu0 %v13795_v36  ;;  %5114 = vmatprep.mubr.bf16.mxu1 %v13796_v50  ;;  %v13797_v24 = vld [vmem:[#allocation43_spill] sm:$0xff]  ;;  %v13798_v45 = vld [vmem:[#allocation50_spill] sm:$0xff] }
 0x429   :  { %v4129_v57 = vpop.f32.mrf.mxu0  ;;  %v4482_v7 = vpop.f32.mrf.mxu1 }
 0x42a   :  { %5530 = vst [vmem:[%s12813_s3 + $0x528] sm:$0xff] %v4477_v42  ;;  %v4481_v23 = vadd.f32 %v4480_v55, %v4128_v59  ;;  %v4130_v26 = vadd.f32 %v4129_v57, %v11611_v14 }
 0x42b   :  { %v4131_v44 = vpop.f32.mrf.mxu0  ;;  %v4484_v31 = vpop.f32.mrf.mxu1 }
 0x42c   :  { %5535 = vst [vmem:[%s12813_s3 + $0x550] sm:$0xff] %v4481_v23  ;;  %v4483_v53 = vadd.f32 %v4482_v7, %v4130_v26  ;;  %v4132_v21 = vadd.f32 %v4131_v44, %v11605_v48 }
 0x42d   :  { %v4133_v6 = vpop.f32.mrf.mxu0  ;;  %v4486_v11 = vpop.f32.mrf.mxu1 }
 0x42e   :  { %5536 = vst [vmem:[%s12813_s3 + $0x558] sm:$0xff] %v4483_v53  ;;  %v4485_v58 = vadd.f32 %v4484_v31, %v4132_v21  ;;  %v4134_v37 = vadd.f32 %v4133_v6, %v11611_v14 }
 0x42f   :  { %v4137_v62 = vpop.f32.mrf.mxu0  ;;  %v4490_v33 = vpop.f32.mrf.mxu1  ;;  %4762 = vmatmul.mubr.bf16.gmra.mxu0 %v13797_v24  ;;  %5115 = vmatmul.mubr.bf16.gmra.mxu1 %v13798_v45  ;;  %v13803_v24 = vld [vmem:[#allocation56_spill] sm:$0xff] }
 0x430   :  { %5541 = vst [vmem:[%s12813_s3 + $0x580] sm:$0xff] %v4485_v58  ;;  %v4487_v17 = vadd.f32 %v4486_v11, %v4134_v37  ;;  %v4138_v55 = vadd.f32 %v4137_v62, %v11605_v48  ;;  %4771 = vmatprep.mubr.bf16.mxu0 %v13799_v43  ;;  %5124 = vmatprep.mubr.bf16.mxu1 %v13800_v22  ;;  %v13801_v58 = vld [vmem:[#allocation49_spill] sm:$0xff]  ;;  %v13802_v37 = vld [vmem:[#allocation51_spill] sm:$0xff]  ;;  %v13804_v45 = vld [vmem:[#allocation44_spill] sm:$0xff] }
 0x431   :  { %v4139_v42 = vpop.f32.mrf.mxu0  ;;  %v4492_v59 = vpop.f32.mrf.mxu1 }
 0x432   :  { %5542 = vst [vmem:[%s12813_s3 + $0x588] sm:$0xff] %v4487_v17  ;;  %v4491_v36 = vadd.f32 %v4490_v33, %v4138_v55  ;;  %v4140_v50 = vadd.f32 %v4139_v42, %v11611_v14 }
 0x433   :  { %v4141_v57 = vpop.f32.mrf.mxu0  ;;  %v4494_v7 = vpop.f32.mrf.mxu1 }
 0x434   :  { %5547 = vst [vmem:[%s12813_s3 + $0x5b0] sm:$0xff] %v4491_v36  ;;  %v4493_v23 = vadd.f32 %v4492_v59, %v4140_v50  ;;  %v4142_v26 = vadd.f32 %v4141_v57, %v11605_v48 }
 0x435   :  { %v4143_v44 = vpop.f32.mrf.mxu0  ;;  %v4496_v31 = vpop.f32.mrf.mxu1 }
 0x436   :  { %5548 = vst [vmem:[%s12813_s3 + $0x5b8] sm:$0xff] %v4493_v23  ;;  %v4495_v53 = vadd.f32 %v4494_v7, %v4142_v26  ;;  %v4144_v21 = vadd.f32 %v4143_v44, %v11611_v14 }
 0x437   :  { %v4147_v6 = vpop.f32.mrf.mxu0  ;;  %v4500_v11 = vpop.f32.mrf.mxu1  ;;  %4772 = vmatmul.mubr.bf16.gmra.mxu0 %v13801_v58  ;;  %5125 = vmatmul.mubr.bf16.gmra.mxu1 %v13802_v37  ;;  %v13807_v58 = vld [vmem:[#allocation54_spill] sm:$0xff]  ;;  %v13808_v37 = vld [vmem:[#allocation53_spill] sm:$0xff] }
 0x438   :  { %5553 = vst [vmem:[%s12813_s3 + $0x5e0] sm:$0xff] %v4495_v53  ;;  %v4497_v62 = vadd.f32 %v4496_v31, %v4144_v21  ;;  %v4148_v33 = vadd.f32 %v4147_v6, %v11605_v48  ;;  %4781 = vmatprep.mubr.bf16.mxu0 %v13803_v24  ;;  %5134 = vmatprep.mubr.bf16.mxu1 %v13804_v45  ;;  %v13805_v53 = vld [vmem:[#allocation48_spill] sm:$0xff]  ;;  %v13806_v21 = vld [vmem:[#allocation47_spill] sm:$0xff] }
 0x439   :  { %v4149_v17 = vpop.f32.mrf.mxu0  ;;  %v4502_v55 = vpop.f32.mrf.mxu1 }
 0x43a   :  { %5554 = vst [vmem:[%s12813_s3 + $0x5e8] sm:$0xff] %v4497_v62  ;;  %v4501_v43 = vadd.f32 %v4500_v11, %v4148_v33  ;;  %v4150_v22 = vadd.f32 %v4149_v17, %v11611_v14 }
 0x43b   :  { %v4151_v42 = vpop.f32.mrf.mxu0  ;;  %v4504_v59 = vpop.f32.mrf.mxu1 }
 0x43c   :  { %5559 = vst [vmem:[%s12813_s3 + $0x610] sm:$0xff] %v4501_v43  ;;  %v4503_v36 = vadd.f32 %v4502_v55, %v4150_v22  ;;  %v4152_v50 = vadd.f32 %v4151_v42, %v11605_v48 }
 0x43d   :  { %v4153_v57 = vpop.f32.mrf.mxu0  ;;  %v4506_v7 = vpop.f32.mrf.mxu1 }
 0x43e   :  { %5560 = vst [vmem:[%s12813_s3 + $0x618] sm:$0xff] %v4503_v36  ;;  %v4505_v23 = vadd.f32 %v4504_v59, %v4152_v50  ;;  %v4154_v26 = vadd.f32 %v4153_v57, %v11611_v14 }
 0x43f   :  { %v4157_v44 = vpop.f32.mrf.mxu0  ;;  %v4510_v31 = vpop.f32.mrf.mxu1  ;;  %4782 = vmatmul.mubr.bf16.gmra.mxu0 %v13805_v53  ;;  %5135 = vmatmul.mubr.bf16.gmra.mxu1 %v13806_v21  ;;  %v13811_v53 = vld [vmem:[#allocation70_spill] sm:$0xff]  ;;  %v13812_v21 = vld [vmem:[#allocation72_spill] sm:$0xff] }
 0x440   :  { %5565 = vst [vmem:[%s12813_s3 + $0x640] sm:$0xff] %v4505_v23  ;;  %v4507_v6 = vadd.f32 %v4506_v7, %v4154_v26  ;;  %v4158_v11 = vadd.f32 %v4157_v44, %v11605_v48  ;;  %4791 = vmatprep.mubr.bf16.mxu0 %v13807_v58  ;;  %5144 = vmatprep.mubr.bf16.mxu1 %v13808_v37  ;;  %v13809_v23 = vld [vmem:[#allocation59_spill] sm:$0xff]  ;;  %v13810_v26 = vld [vmem:[#allocation57_spill] sm:$0xff] }
 0x441   :  { %v4159_v62 = vpop.f32.mrf.mxu0  ;;  %v4512_v33 = vpop.f32.mrf.mxu1 }
 0x442   :  { %5566 = vst [vmem:[%s12813_s3 + $0x648] sm:$0xff] %v4507_v6  ;;  %v4511_v24 = vadd.f32 %v4510_v31, %v4158_v11  ;;  %v4160_v45 = vadd.f32 %v4159_v62, %v11611_v14 }
 0x443   :  { %v4161_v17 = vpop.f32.mrf.mxu0  ;;  %v4514_v55 = vpop.f32.mrf.mxu1 }
 0x444   :  { %5571 = vst [vmem:[%s12813_s3 + $0x670] sm:$0xff] %v4511_v24  ;;  %v4513_v43 = vadd.f32 %v4512_v33, %v4160_v45  ;;  %v4162_v22 = vadd.f32 %v4161_v17, %v11605_v48 }
 0x445   :  { %v4163_v42 = vpop.f32.mrf.mxu0  ;;  %v4516_v59 = vpop.f32.mrf.mxu1 }
 0x446   :  { %5572 = vst [vmem:[%s12813_s3 + $0x678] sm:$0xff] %v4513_v43  ;;  %v4515_v36 = vadd.f32 %v4514_v55, %v4162_v22  ;;  %v4164_v50 = vadd.f32 %v4163_v42, %v11611_v14 }
 0x447   :  { %v4167_v57 = vpop.f32.mrf.mxu0  ;;  %v4520_v7 = vpop.f32.mrf.mxu1  ;;  %4792 = vmatmul.mubr.bf16.gmra.mxu0 %v13809_v23  ;;  %5145 = vmatmul.mubr.bf16.gmra.mxu1 %v13810_v26  ;;  %v13815_v23 = vld [vmem:[#allocation80_spill] sm:$0xff] }
 0x448   :  { %5577 = vst [vmem:[%s12813_s3 + $0x6a0] sm:$0xff] %v4515_v36  ;;  %v4517_v44 = vadd.f32 %v4516_v59, %v4164_v50  ;;  %v4168_v31 = vadd.f32 %v4167_v57, %v11605_v48  ;;  %4801 = vmatprep.mubr.bf16.mxu0 %v13811_v53  ;;  %5154 = vmatprep.mubr.bf16.mxu1 %v13812_v21  ;;  %v13813_v36 = vld [vmem:[#allocation75_spill] sm:$0xff]  ;;  %v13814_v50 = vld [vmem:[#allocation77_spill] sm:$0xff]  ;;  %v13816_v26 = vld [vmem:[#allocation120_spill] sm:$0xff] }
 0x449   :  { %v4169_v6 = vpop.f32.mrf.mxu0  ;;  %v4522_v11 = vpop.f32.mrf.mxu1 }
 0x44a   :  { %5578 = vst [vmem:[%s12813_s3 + $0x6a8] sm:$0xff] %v4517_v44  ;;  %v4521_v58 = vadd.f32 %v4520_v7, %v4168_v31  ;;  %v4170_v37 = vadd.f32 %v4169_v6, %v11611_v14 }
 0x44b   :  { %v4171_v62 = vpop.f32.mrf.mxu0  ;;  %v4524_v33 = vpop.f32.mrf.mxu1 }
 0x44c   :  { %5583 = vst [vmem:[%s12813_s3 + $0x6d0] sm:$0xff] %v4521_v58  ;;  %v4523_v24 = vadd.f32 %v4522_v11, %v4170_v37  ;;  %v4172_v45 = vadd.f32 %v4171_v62, %v11605_v48 }
 0x44d   :  { %v4173_v17 = vpop.f32.mrf.mxu0  ;;  %v4526_v55 = vpop.f32.mrf.mxu1 }
 0x44e   :  { %5584 = vst [vmem:[%s12813_s3 + $0x6d8] sm:$0xff] %v4523_v24  ;;  %v4525_v43 = vadd.f32 %v4524_v33, %v4172_v45  ;;  %v4174_v22 = vadd.f32 %v4173_v17, %v11611_v14 }
 0x44f   :  { %v4177_v42 = vpop.f32.mrf.mxu0  ;;  %v4530_v59 = vpop.f32.mrf.mxu1  ;;  %4802 = vmatmul.mubr.bf16.gmra.mxu0 %v13813_v36  ;;  %5155 = vmatmul.mubr.bf16.gmra.mxu1 %v13814_v50  ;;  %v13819_v36 = vld [vmem:[#allocation131_spill] sm:$0xff]  ;;  %v13820_v50 = vld [vmem:[#allocation132_spill] sm:$0xff] }
 0x450   :  { %5589 = vst [vmem:[%s12813_s3 + $0x700] sm:$0xff] %v4525_v43  ;;  %v4527_v57 = vadd.f32 %v4526_v55, %v4174_v22  ;;  %v4178_v7 = vadd.f32 %v4177_v42, %v11605_v48  ;;  %4811 = vmatprep.mubr.bf16.mxu0 %v13815_v23  ;;  %5164 = vmatprep.mubr.bf16.mxu1 %v13816_v26  ;;  %v13817_v43 = vld [vmem:[#allocation121_spill] sm:$0xff] }
 0x451   :  { %v4179_v44 = vpop.f32.mrf.mxu0  ;;  %v4532_v31 = vpop.f32.mrf.mxu1  ;;  %v13818_v22 = vld [vmem:[#allocation125_spill] sm:$0xff] }
 0x452   :  { %5590 = vst [vmem:[%s12813_s3 + $0x708] sm:$0xff] %v4527_v57  ;;  %v4531_v53 = vadd.f32 %v4530_v59, %v4178_v7  ;;  %v4180_v21 = vadd.f32 %v4179_v44, %v11611_v14 }
 0x453   :  { %v4181_v6 = vpop.f32.mrf.mxu0  ;;  %v4534_v11 = vpop.f32.mrf.mxu1 }
 0x454   :  { %5595 = vst [vmem:[%s12813_s3 + $0x730] sm:$0xff] %v4531_v53  ;;  %v4533_v58 = vadd.f32 %v4532_v31, %v4180_v21  ;;  %v4182_v37 = vadd.f32 %v4181_v6, %v11605_v48 }
 0x455   :  { %v4183_v62 = vpop.f32.mrf.mxu0  ;;  %v4536_v33 = vpop.f32.mrf.mxu1 }
 0x456   :  { %5596 = vst [vmem:[%s12813_s3 + $0x738] sm:$0xff] %v4533_v58  ;;  %v4535_v24 = vadd.f32 %v4534_v11, %v4182_v37  ;;  %v4184_v45 = vadd.f32 %v4183_v62, %v11611_v14 }
 0x457   :  { %v4187_v17 = vpop.f32.mrf.mxu0  ;;  %v4540_v55 = vpop.f32.mrf.mxu1  ;;  %4812 = vmatmul.mubr.bf16.gmra.mxu0 %v13817_v43  ;;  %5165 = vmatmul.mubr.bf16.gmra.mxu1 %v13818_v22  ;;  %v13823_v43 = vld [vmem:[#allocation137_spill] sm:$0xff]  ;;  %v13824_v22 = vld [vmem:[#allocation138_spill] sm:$0xff] }
 0x458   :  { %5601 = vst [vmem:[%s12813_s3 + $0x760] sm:$0xff] %v4535_v24  ;;  %v4537_v42 = vadd.f32 %v4536_v33, %v4184_v45  ;;  %v4188_v59 = vadd.f32 %v4187_v17, %v11605_v48  ;;  %4821 = vmatprep.mubr.bf16.mxu0 %v13819_v36  ;;  %5174 = vmatprep.mubr.bf16.mxu1 %v13820_v50  ;;  %v13821_v24 = vld [vmem:[#allocation133_spill] sm:$0xff]  ;;  %v13822_v45 = vld [vmem:[#allocation134_spill] sm:$0xff] }
 0x459   :  { %v4189_v57 = vpop.f32.mrf.mxu0  ;;  %v4542_v7 = vpop.f32.mrf.mxu1 }
 0x45a   :  { %5602 = vst [vmem:[%s12813_s3 + $0x768] sm:$0xff] %v4537_v42  ;;  %v4541_v23 = vadd.f32 %v4540_v55, %v4188_v59  ;;  %v4190_v26 = vadd.f32 %v4189_v57, %v11611_v14 }
 0x45b   :  { %v4191_v44 = vpop.f32.mrf.mxu0  ;;  %v4544_v31 = vpop.f32.mrf.mxu1 }
 0x45c   :  { %5607 = vst [vmem:[%s12813_s3 + $0x790] sm:$0xff] %v4541_v23  ;;  %v4543_v53 = vadd.f32 %v4542_v7, %v4190_v26  ;;  %v4192_v21 = vadd.f32 %v4191_v44, %v11605_v48 }
 0x45d   :  { %v4193_v6 = vpop.f32.mrf.mxu0  ;;  %v4546_v11 = vpop.f32.mrf.mxu1 }
 0x45e   :  { %5608 = vst [vmem:[%s12813_s3 + $0x798] sm:$0xff] %v4543_v53  ;;  %v4545_v58 = vadd.f32 %v4544_v31, %v4192_v21  ;;  %v4194_v37 = vadd.f32 %v4193_v6, %v11611_v14 }
 0x45f   :  { %v4197_v62 = vpop.f32.mrf.mxu0  ;;  %v4550_v33 = vpop.f32.mrf.mxu1  ;;  %4822 = vmatmul.mubr.bf16.gmra.mxu0 %v13821_v24  ;;  %5175 = vmatmul.mubr.bf16.gmra.mxu1 %v13822_v45  ;;  %v13827_v24 = vld [vmem:[#allocation145_spill] sm:$0xff]  ;;  %v13828_v45 = vld [vmem:[#allocation146_spill] sm:$0xff] }
 0x460   :  { %5613 = vst [vmem:[%s12813_s3 + $0x7c0] sm:$0xff] %v4545_v58  ;;  %v4547_v17 = vadd.f32 %v4546_v11, %v4194_v37  ;;  %v4198_v55 = vadd.f32 %v4197_v62, %v11605_v48  ;;  %4831 = vmatprep.mubr.bf16.mxu0 %v13823_v43  ;;  %5184 = vmatprep.mubr.bf16.mxu1 %v13824_v22  ;;  %v13825_v58 = vld [vmem:[#allocation139_spill] sm:$0xff]  ;;  %v13826_v37 = vld [vmem:[#allocation140_spill] sm:$0xff] }
 0x461   :  { %v4199_v42 = vpop.f32.mrf.mxu0  ;;  %v4552_v59 = vpop.f32.mrf.mxu1 }
 0x462   :  { %5614 = vst [vmem:[%s12813_s3 + $0x7c8] sm:$0xff] %v4547_v17  ;;  %v4551_v36 = vadd.f32 %v4550_v33, %v4198_v55  ;;  %v4200_v50 = vadd.f32 %v4199_v42, %v11611_v14 }
 0x463   :  { %v4201_v57 = vpop.f32.mrf.mxu0  ;;  %v4554_v7 = vpop.f32.mrf.mxu1 }
 0x464   :  { %5619 = vst [vmem:[%s12813_s3 + $0x7f0] sm:$0xff] %v4551_v36  ;;  %v4553_v23 = vadd.f32 %v4552_v59, %v4200_v50  ;;  %v4202_v26 = vadd.f32 %v4201_v57, %v11605_v48 }
 0x465   :  { %v4203_v44 = vpop.f32.mrf.mxu0  ;;  %v4556_v31 = vpop.f32.mrf.mxu1 }
 0x466   :  { %5620 = vst [vmem:[%s12813_s3 + $0x7f8] sm:$0xff] %v4553_v23  ;;  %v4555_v53 = vadd.f32 %v4554_v7, %v4202_v26  ;;  %v4204_v21 = vadd.f32 %v4203_v44, %v11611_v14 }
 0x467   :  { %v4207_v6 = vpop.f32.mrf.mxu0  ;;  %v4560_v11 = vpop.f32.mrf.mxu1  ;;  %4832 = vmatmul.mubr.bf16.gmra.mxu0 %v13825_v58  ;;  %5185 = vmatmul.mubr.bf16.gmra.mxu1 %v13826_v37  ;;  %v13831_v58 = vld [vmem:[#allocation151_spill] sm:$0xff]  ;;  %v13832_v37 = vld [vmem:[#allocation152_spill] sm:$0xff] }
 0x468   :  { %5625 = vst [vmem:[%s12813_s3 + $0x820] sm:$0xff] %v4555_v53  ;;  %v4557_v62 = vadd.f32 %v4556_v31, %v4204_v21  ;;  %v4208_v33 = vadd.f32 %v4207_v6, %v11605_v48  ;;  %4841 = vmatprep.mubr.bf16.mxu0 %v13827_v24  ;;  %5194 = vmatprep.mubr.bf16.mxu1 %v13828_v45  ;;  %v13829_v53 = vld [vmem:[#allocation104_spill] sm:$0xff]  ;;  %v13830_v21 = vld [vmem:[#allocation147_spill] sm:$0xff] }
 0x469   :  { %v4209_v17 = vpop.f32.mrf.mxu0  ;;  %v4562_v55 = vpop.f32.mrf.mxu1 }
 0x46a   :  { %5626 = vst [vmem:[%s12813_s3 + $0x828] sm:$0xff] %v4557_v62  ;;  %v4561_v43 = vadd.f32 %v4560_v11, %v4208_v33  ;;  %v4210_v22 = vadd.f32 %v4209_v17, %v11611_v14 }
 0x46b   :  { %v4211_v42 = vpop.f32.mrf.mxu0  ;;  %v4564_v59 = vpop.f32.mrf.mxu1 }
 0x46c   :  { %5631 = vst [vmem:[%s12813_s3 + $0x850] sm:$0xff] %v4561_v43  ;;  %v4563_v36 = vadd.f32 %v4562_v55, %v4210_v22  ;;  %v4212_v50 = vadd.f32 %v4211_v42, %v11605_v48 }
 0x46d   :  { %v4213_v57 = vpop.f32.mrf.mxu0  ;;  %v4566_v7 = vpop.f32.mrf.mxu1 }
 0x46e   :  { %5632 = vst [vmem:[%s12813_s3 + $0x858] sm:$0xff] %v4563_v36  ;;  %v4565_v23 = vadd.f32 %v4564_v59, %v4212_v50  ;;  %v4214_v26 = vadd.f32 %v4213_v57, %v11611_v14 }
 0x46f   :  { %v4217_v44 = vpop.f32.mrf.mxu0  ;;  %v4570_v31 = vpop.f32.mrf.mxu1  ;;  %4842 = vmatmul.mubr.bf16.gmra.mxu0 %v13829_v53  ;;  %5195 = vmatmul.mubr.bf16.gmra.mxu1 %v13830_v21  ;;  %v13835_v53 = vld [vmem:[#allocation108_spill] sm:$0xff] }
 0x470   :  { %5637 = vst [vmem:[%s12813_s3 + $0x880] sm:$0xff] %v4565_v23  ;;  %v4567_v6 = vadd.f32 %v4566_v7, %v4214_v26  ;;  %v4218_v11 = vadd.f32 %v4217_v44, %v11605_v48  ;;  %4851 = vmatprep.mubr.bf16.mxu0 %v13831_v58  ;;  %5204 = vmatprep.mubr.bf16.mxu1 %v13832_v37  ;;  %v13833_v23 = vld [vmem:[#allocation153_spill] sm:$0xff] }
 0x471   :  { %v4219_v62 = vpop.f32.mrf.mxu0  ;;  %v4572_v33 = vpop.f32.mrf.mxu1 }
 0x472   :  { %5638 = vst [vmem:[%s12813_s3 + $0x888] sm:$0xff] %v4567_v6  ;;  %v4571_v24 = vadd.f32 %v4570_v31, %v4218_v11  ;;  %v4220_v45 = vadd.f32 %v4219_v62, %v11611_v14  ;;  %v13834_v31 = vld [vmem:[#allocation8_spill] sm:$0xff] }
 0x473   :  { %v4221_v17 = vpop.f32.mrf.mxu0  ;;  %v4574_v55 = vpop.f32.mrf.mxu1 }
 0x474   :  { %5643 = vst [vmem:[%s12813_s3 + $0x8b0] sm:$0xff] %v4571_v24  ;;  %v4573_v43 = vadd.f32 %v4572_v33, %v4220_v45  ;;  %v4222_v22 = vadd.f32 %v4221_v17, %v11605_v48 }
 0x475   :  { %v4223_v42 = vpop.f32.mrf.mxu0  ;;  %v4576_v59 = vpop.f32.mrf.mxu1 }
 0x476   :  { %5644 = vst [vmem:[%s12813_s3 + $0x8b8] sm:$0xff] %v4573_v43  ;;  %v4575_v36 = vadd.f32 %v4574_v55, %v4222_v22  ;;  %v4224_v50 = vadd.f32 %v4223_v42, %v11611_v14  ;;  %v13836_v42 = vld [vmem:[#allocation107_spill] sm:$0xff] }
 0x477   :  { %v4227_v57 = vpop.f32.mrf.mxu0  ;;  %v4580_v7 = vpop.f32.mrf.mxu1  ;;  %4852 = vmatmul.mubr.bf16.gmra.mxu0 %v13833_v23  ;;  %5205 = vmatmul.mubr.bf16.gmra.mxu1 %v13752_v46 }
 0x478   :  { %5649 = vst [vmem:[%s12813_s3 + $0x8e0] sm:$0xff] %v4575_v36  ;;  %v4577_v26 = vadd.f32 %v4576_v59, %v4224_v50  ;;  %v4228_v44 = vadd.f32 %v4227_v57, %v11605_v48  ;;  %4861 = vmatprep.mubr.bf16.mxu0 %v13834_v31  ;;  %5214 = vmatprep.mubr.bf16.mxu1 %v13835_v53  ;;  %v13837_v50 = vld [vmem:[#allocation27_spill] sm:$0xff] }
 0x479   :  { %v4229_v21 = vpop.f32.mrf.mxu0  ;;  %v4582_v6 = vpop.f32.mrf.mxu1 }
 0x47a   :  { %5650 = vst [vmem:[%s12813_s3 + $0x8e8] sm:$0xff] %v4577_v26  ;;  %v4581_v11 = vadd.f32 %v4580_v7, %v4228_v44  ;;  %v4230_v46 = vadd.f32 %v4229_v21, %v11611_v14 }
 0x47b   :  { %v4231_v58 = vpop.f32.mrf.mxu0  ;;  %v4584_v37 = vpop.f32.mrf.mxu1 }
 0x47c   :  { %5655 = vst [vmem:[%s12813_s3 + $0x910] sm:$0xff] %v4581_v11  ;;  %v4583_v62 = vadd.f32 %v4582_v6, %v4230_v46  ;;  %v4232_v33 = vadd.f32 %v4231_v58, %v11605_v48 }
 0x47d   :  { %v4233_v24 = vpop.f32.mrf.mxu0  ;;  %v4586_v45 = vpop.f32.mrf.mxu1 }
 0x47e   :  { %5656 = vst [vmem:[%s12813_s3 + $0x918] sm:$0xff] %v4583_v62  ;;  %v4585_v17 = vadd.f32 %v4584_v37, %v4232_v33  ;;  %v4234_v55 = vadd.f32 %v4233_v24, %v11611_v14  ;;  %v13838_v37 = vld [vmem:[#allocation15_spill] sm:$0xff]  ;;  %v13839_v62 = vld [vmem:[#allocation112_spill] sm:$0xff] }
 0x47f   :  { %v4237_v43 = vpop.f32.mrf.mxu0  ;;  %v4590_v22 = vpop.f32.mrf.mxu1  ;;  %4862 = vmatmul.mubr.bf16.gmra.mxu0 %v13755_v2  ;;  %5215 = vmatmul.mubr.bf16.gmra.mxu1 %v13836_v42 }
 0x480   :  { %5661 = vst [vmem:[%s12813_s3 + $0x940] sm:$0xff] %v4585_v17  ;;  %v4587_v59 = vadd.f32 %v4586_v45, %v4234_v55  ;;  %v4238_v36 = vadd.f32 %v4237_v43, %v11605_v48  ;;  %4871 = vmatprep.mubr.bf16.mxu0 %v10419_v25  ;;  %5224 = vmatprep.mubr.bf16.mxu1 %v13837_v50  ;;  %v13840_v45 = vld [vmem:[#allocation17_spill] sm:$0xff]  ;;  %v13841_v17 = vld [vmem:[#allocation111_spill] sm:$0xff] }
 0x481   :  { %v4239_v57 = vpop.f32.mrf.mxu0  ;;  %v4592_v7 = vpop.f32.mrf.mxu1 }
 0x482   :  { %5662 = vst [vmem:[%s12813_s3 + $0x948] sm:$0xff] %v4587_v59  ;;  %v4591_v2 = vadd.f32 %v4590_v22, %v4238_v36  ;;  %v4240_v23 = vadd.f32 %v4239_v57, %v11611_v14 }
 0x483   :  { %v4241_v26 = vpop.f32.mrf.mxu0  ;;  %v4594_v44 = vpop.f32.mrf.mxu1 }
 0x484   :  { %5667 = vst [vmem:[%s12813_s3 + $0x970] sm:$0xff] %v4591_v2  ;;  %v4593_v31 = vadd.f32 %v4592_v7, %v4240_v23  ;;  %v4242_v25 = vadd.f32 %v4241_v26, %v11605_v48 }
 0x485   :  { %v4243_v53 = vpop.f32.mrf.mxu0  ;;  %v4596_v21 = vpop.f32.mrf.mxu1 }
 0x486   :  { %5668 = vst [vmem:[%s12813_s3 + $0x978] sm:$0xff] %v4593_v31  ;;  %v4595_v6 = vadd.f32 %v4594_v44, %v4242_v25  ;;  %v4244_v11 = vadd.f32 %v4243_v53, %v11611_v14 }
 0x487   :  { %v4247_v46 = vpop.f32.mrf.mxu0  ;;  %v4600_v58 = vpop.f32.mrf.mxu1  ;;  %4872 = vmatmul.mubr.bf16.gmra.mxu0 %v13838_v37  ;;  %5225 = vmatmul.mubr.bf16.gmra.mxu1 %v13839_v62 }
 0x488   :  { %5673 = vst [vmem:[%s12813_s3 + $0x9a0] sm:$0xff] %v4595_v6  ;;  %v4597_v33 = vadd.f32 %v4596_v21, %v4244_v11  ;;  %v4248_v24 = vadd.f32 %v4247_v46, %v11605_v48  ;;  %4881 = vmatprep.mubr.bf16.mxu0 %v13840_v45  ;;  %5234 = vmatprep.mubr.bf16.mxu1 %v13841_v17 }
 0x489   :  { %v4249_v55 = vpop.f32.mrf.mxu0  ;;  %v4602_v43 = vpop.f32.mrf.mxu1 }
 0x48a   :  { %5674 = vst [vmem:[%s12813_s3 + $0x9a8] sm:$0xff] %v4597_v33  ;;  %v4601_v22 = vadd.f32 %v4600_v58, %v4248_v24  ;;  %v4250_v42 = vadd.f32 %v4249_v55, %v11611_v14 }
 0x48b   :  { %v4251_v59 = vpop.f32.mrf.mxu0  ;;  %v4604_v36 = vpop.f32.mrf.mxu1 }
 0x48c   :  { %5679 = vst [vmem:[%s12813_s3 + $0x9d0] sm:$0xff] %v4601_v22  ;;  %v4603_v50 = vadd.f32 %v4602_v43, %v4250_v42  ;;  %v4252_v57 = vadd.f32 %v4251_v59, %v11605_v48 }
 0x48d   :  { %v4253_v7 = vpop.f32.mrf.mxu0  ;;  %v4606_v2 = vpop.f32.mrf.mxu1 }
 0x48e   :  { %5680 = vst [vmem:[%s12813_s3 + $0x9d8] sm:$0xff] %v4603_v50  ;;  %v4605_v23 = vadd.f32 %v4604_v36, %v4252_v57  ;;  %v4254_v26 = vadd.f32 %v4253_v7, %v11611_v14 }
 0x48f   :  { %v4257_v44 = vpop.f32.mrf.mxu0  ;;  %v4610_v31 = vpop.f32.mrf.mxu1  ;;  %4882 = vmatmul.mubr.bf16.gmra.mxu0 %v13761_v9  ;;  %5235 = vmatmul.mubr.bf16.gmra.mxu1 %v13762_v4 }
 0x490   :  { %5685 = vst [vmem:[%s12813_s3 + $0xa00] sm:$0xff] %v4605_v23  ;;  %v4607_v25 = vadd.f32 %v4606_v2, %v4254_v26  ;;  %v4258_v53 = vadd.f32 %v4257_v44, %v11605_v48  ;;  %4891 = vmatprep.mubr.bf16.mxu0 %v10593_v41  ;;  %5244 = vmatprep.mubr.bf16.mxu1 %v10605_v60 }
 0x491   :  { %v4259_v21 = vpop.f32.mrf.mxu0  ;;  %v4612_v6 = vpop.f32.mrf.mxu1 }
 0x492   :  { %5686 = vst [vmem:[%s12813_s3 + $0xa08] sm:$0xff] %v4607_v25  ;;  %v4611_v9 = vadd.f32 %v4610_v31, %v4258_v53  ;;  %v4260_v4 = vadd.f32 %v4259_v21, %v11611_v14 }
 0x493   :  { %v4261_v11 = vpop.f32.mrf.mxu0  ;;  %v4614_v46 = vpop.f32.mrf.mxu1 }
 0x494   :  { %5691 = vst [vmem:[%s12813_s3 + $0xa30] sm:$0xff] %v4611_v9  ;;  %v4613_v58 = vadd.f32 %v4612_v6, %v4260_v4  ;;  %v4262_v41 = vadd.f32 %v4261_v11, %v11605_v48 }
 0x495   :  { %v4263_v37 = vpop.f32.mrf.mxu0  ;;  %v4616_v60 = vpop.f32.mrf.mxu1 }
 0x496   :  { %5692 = vst [vmem:[%s12813_s3 + $0xa38] sm:$0xff] %v4613_v58  ;;  %v4615_v62 = vadd.f32 %v4614_v46, %v4262_v41  ;;  %v4264_v33 = vadd.f32 %v4263_v37, %v11611_v14 }
 0x497   :  { %v4267_v24 = vpop.f32.mrf.mxu0  ;;  %v4620_v45 = vpop.f32.mrf.mxu1  ;;  %4892 = vmatmul.mubr.bf16.gmra.mxu0 %v10618_v40  ;;  %5245 = vmatmul.mubr.bf16.gmra.mxu1 %v10620_v18 }
 0x498   :  { %5697 = vst [vmem:[%s12813_s3 + $0xa60] sm:$0xff] %v4615_v62  ;;  %v4617_v17 = vadd.f32 %v4616_v60, %v4264_v33  ;;  %v4268_v55 = vadd.f32 %v4267_v24, %v11605_v48  ;;  %4901 = vmatprep.mubr.bf16.mxu0 %v10646_v29  ;;  %5254 = vmatprep.mubr.bf16.mxu1 %v10655_v56  ;;  %v13842_v60 = vld [vmem:[#allocation114_spill] sm:$0xff]  ;;  %v13843_v62 = vld [vmem:[#allocation23_spill] sm:$0xff] }
 0x499   :  { %v4269_v43 = vpop.f32.mrf.mxu0  ;;  %v4622_v22 = vpop.f32.mrf.mxu1 }
 0x49a   :  { %5698 = vst [vmem:[%s12813_s3 + $0xa68] sm:$0xff] %v4617_v17  ;;  %v4621_v40 = vadd.f32 %v4620_v45, %v4268_v55  ;;  %v4270_v18 = vadd.f32 %v4269_v43, %v11611_v14 }
 0x49b   :  { %v4271_v42 = vpop.f32.mrf.mxu0  ;;  %v4624_v59 = vpop.f32.mrf.mxu1 }
 0x49c   :  { %5703 = vst [vmem:[%s12813_s3 + $0xa90] sm:$0xff] %v4621_v40  ;;  %v4623_v36 = vadd.f32 %v4622_v22, %v4270_v18  ;;  %v4272_v29 = vadd.f32 %v4271_v42, %v11605_v48 }
 0x49d   :  { %v4273_v50 = vpop.f32.mrf.mxu0  ;;  %v4626_v56 = vpop.f32.mrf.mxu1 }
 0x49e   :  { %5704 = vst [vmem:[%s12813_s3 + $0xa98] sm:$0xff] %v4623_v36  ;;  %v4625_v57 = vadd.f32 %v4624_v59, %v4272_v29  ;;  %v4274_v7 = vadd.f32 %v4273_v50, %v11611_v14 }
 0x49f   :  { %v4277_v2 = vpop.f32.mrf.mxu0  ;;  %v4630_v23 = vpop.f32.mrf.mxu1  ;;  %4902 = vmatmul.mubr.bf16.gmra.mxu0 %v10666_v16  ;;  %5255 = vmatmul.mubr.bf16.gmra.mxu1 %v10673_v63 }
 0x4a0   :  { %5709 = vst [vmem:[%s12813_s3 + $0xac0] sm:$0xff] %v4625_v57  ;;  %v4627_v26 = vadd.f32 %v4626_v56, %v4274_v7  ;;  %v4278_v44 = vadd.f32 %v4277_v2, %v11605_v48  ;;  %4911 = vmatprep.mubr.bf16.mxu0 %v10798_v28  ;;  %5264 = vmatprep.mubr.bf16.mxu1 %v10800_v30  ;;  %v13844_v56 = vld [vmem:[#allocation110_spill] sm:$0xff]  ;;  %v13845_v57 = vld [vmem:[#allocation113_spill] sm:$0xff]  ;;  %v13846_v7 = vld [vmem:[#allocation79_spill] sm:$0xff] }
 0x4a1   :  { %v4279_v31 = vpop.f32.mrf.mxu0  ;;  %v4632_v25 = vpop.f32.mrf.mxu1  ;;  %v2275_v2 = vsub.s32 4, %v13846_v7 }
 0x4a2   :  { %5710 = vst [vmem:[%s12813_s3 + $0xac8] sm:$0xff] %v4627_v26  ;;  %v4631_v16 = vadd.f32 %v4630_v23, %v4278_v44  ;;  %v4280_v63 = vadd.f32 %v4279_v31, %v11611_v14  ;;  %v2279_v44 = vsub.s32 5, %v13846_v7 }
 0x4a3   :  { %v4281_v53 = vpop.f32.mrf.mxu0  ;;  %v4634_v21 = vpop.f32.mrf.mxu1 }
 0x4a4   :  { %5715 = vst [vmem:[%s12813_s3 + $0xaf0] sm:$0xff] %v4631_v16  ;;  %v4633_v6 = vadd.f32 %v4632_v25, %v4280_v63  ;;  %v4282_v28 = vadd.f32 %v4281_v53, %v11605_v48  ;;  %v6580_v53 = vld [vmem:[%s12812_s2] sm:$0x3f] }
 0x4a5   :  { %v4283_v9 = vpop.f32.mrf.mxu0  ;;  %v4636_v30 = vpop.f32.mrf.mxu1 }
 0x4a6   :  { %5716 = vst [vmem:[%s12813_s3 + $0xaf8] sm:$0xff] %v4633_v6  ;;  %v4635_v4 = vadd.f32 %v4634_v21, %v4282_v28  ;;  %v4284_v11 = vadd.f32 %v4283_v9, %v11611_v14  ;;  %v12254_v21 = vrot.slane %v6580_v53, %v2275_v2 }
 0x4a7   :  { %v4287_v46 = vpop.f32.mrf.mxu0  ;;  %v4640_v58 = vpop.f32.mrf.mxu1  ;;  %4912 = vmatmul.mubr.bf16.gmra.mxu0 %v10802_v35  ;;  %5265 = vmatmul.mubr.bf16.gmra.mxu1 %v10804_v5 }
 0x4a8   :  { %5721 = vst [vmem:[%s12813_s3 + $0xb20] sm:$0xff] %v4635_v4  ;;  %v4637_v41 = vadd.f32 %v4636_v30, %v4284_v11  ;;  %v4288_v37 = vadd.f32 %v4287_v46, %v11605_v48  ;;  %4921 = vmatprep.mubr.bf16.mxu0 %v13842_v60  ;;  %5274 = vmatprep.mubr.bf16.mxu1 %v13843_v62 }
 0x4a9   :  { %v4289_v33 = vpop.f32.mrf.mxu0  ;;  %v4642_v24 = vpop.f32.mrf.mxu1  ;;  %v12260_v4 = vrot.slane %v6580_v53, %v2279_v44  ;;  %v13853_v53 = vld [vmem:[#allocation55_spill] sm:$0xff] }
 0x4aa   :  { %5722 = vst [vmem:[%s12813_s3 + $0xb28] sm:$0xff] %v4637_v41  ;;  %v4641_v35 = vadd.f32 %v4640_v58, %v4288_v37  ;;  %v4290_v5 = vadd.f32 %v4289_v33, %v11611_v14 }
 0x4ab   :  { %v4291_v45 = vpop.f32.mrf.mxu0  ;;  %v4644_v17 = vpop.f32.mrf.mxu1 }
 0x4ac   :  { %5727 = vst [vmem:[%s12813_s3 + $0xb50] sm:$0xff] %v4641_v35  ;;  %v4643_v55 = vadd.f32 %v4642_v24, %v4290_v5  ;;  %v4292_v43 = vadd.f32 %v4291_v45, %v11605_v48  ;;  %v13847_v45 = vld [vmem:[#allocation41_spill] sm:$0xff] }
 0x4ad   :  { %v4293_v22 = vpop.f32.mrf.mxu0  ;;  %v4646_v40 = vpop.f32.mrf.mxu1 }
 0x4ae   :  { %5728 = vst [vmem:[%s12813_s3 + $0xb58] sm:$0xff] %v4643_v55  ;;  %v4645_v18 = vadd.f32 %v4644_v17, %v4292_v43  ;;  %v4294_v42 = vadd.f32 %v4293_v22, %v11611_v14  ;;  %v13848_v55 = vld [vmem:[#allocation33_spill] sm:$0xff] }
 0x4af   :  { %v4297_v59 = vpop.f32.mrf.mxu0  ;;  %v4650_v36 = vpop.f32.mrf.mxu1  ;;  %4922 = vmatmul.mubr.bf16.gmra.mxu0 %v10822_v47  ;;  %5275 = vmatmul.mubr.bf16.gmra.mxu1 %v10824_v0 }
 0x4b0   :  { %5733 = vst [vmem:[%s12813_s3 + $0xb80] sm:$0xff] %v4645_v18  ;;  %v4647_v29 = vadd.f32 %v4646_v40, %v4294_v42  ;;  %v4298_v50 = vadd.f32 %v4297_v59, %v11605_v48  ;;  %4931 = vmatprep.mubr.bf16.mxu0 %v13844_v56  ;;  %5284 = vmatprep.mubr.bf16.mxu1 %v13845_v57  ;;  %v13849_v40 = vld [vmem:[#allocation38_spill] sm:$0xff]  ;;  %v13850_v18 = vld [vmem:[#allocation39_spill] sm:$0xff] }
 0x4b1   :  { %v4299_v23 = vpop.f32.mrf.mxu0  ;;  %v4652_v26 = vpop.f32.mrf.mxu1 }
 0x4b2   :  { %5734 = vst [vmem:[%s12813_s3 + $0xb88] sm:$0xff] %v4647_v29  ;;  %v4651_v47 = vadd.f32 %v4650_v36, %v4298_v50  ;;  %v4300_v0 = vadd.f32 %v4299_v23, %v11611_v14 }
 0x4b3   :  { %v4301_v31 = vpop.f32.mrf.mxu0  ;;  %v4654_v25 = vpop.f32.mrf.mxu1 }
 0x4b4   :  { %5739 = vst [vmem:[%s12813_s3 + $0xbb0] sm:$0xff] %v4651_v47  ;;  %v4653_v16 = vadd.f32 %v4652_v26, %v4300_v0  ;;  %v4302_v63 = vadd.f32 %v4301_v31, %v11605_v48  ;;  %v13851_v31 = vld [vmem:[#allocation52_spill] sm:$0xff] }
 0x4b5   :  { %v4303_v6 = vpop.f32.mrf.mxu0  ;;  %v4656_v28 = vpop.f32.mrf.mxu1 }
 0x4b6   :  { %5740 = vst [vmem:[%s12813_s3 + $0xbb8] sm:$0xff] %v4653_v16  ;;  %v4655_v9 = vadd.f32 %v4654_v25, %v4302_v63  ;;  %v4304_v30 = vadd.f32 %v4303_v6, %v11611_v14  ;;  %v13852_v63 = vld [vmem:[#allocation61_spill] sm:$0xff] }
 0x4b7   :  { %v4693_v11 = vpop.f32.mrf.mxu0  ;;  %4932 = vmatmul.mubr.bf16.gmra.mxu0 %v10842_v19  ;;  %v5046_v48 = vpop.f32.mrf.mxu1  ;;  %5285 = vmatmul.mubr.bf16.gmra.mxu1 %v10844_v52 }
 0x4b8   :  { %5745 = vst [vmem:[%s12813_s3 + $0xbe0] sm:$0xff] %v4655_v9  ;;  %v4657_v46 = vadd.f32 %v4656_v28, %v4304_v30  ;;  %v4694_v58 = vadd.f32 %v4693_v11, %v12254_v21  ;;  %4941 = vmatprep.mubr.bf16.mxu0 %v10858_v54  ;;  %5294 = vmatprep.mubr.bf16.mxu1 %v13764_v3 }
 0x4b9   :  { %v4695_v14 = vpop.f32.mrf.mxu0  ;;  %v5048_v41 = vpop.f32.mrf.mxu1 }
 0x4ba   :  { %5746 = vst [vmem:[%s12813_s3 + $0xbe8] sm:$0xff] %v4657_v46  ;;  %v5047_v19 = vadd.f32 %v5046_v48, %v4694_v58  ;;  %v4696_v52 = vadd.f32 %v4695_v14, %v12260_v4 }
 0x4bb   :  { %v4697_v37 = vpop.f32.mrf.mxu0  ;;  %v5050_v60 = vpop.f32.mrf.mxu1 }
 0x4bc   :  { %5369 = vst [vmem:[%s12813_s3 + $0x20] sm:$0xff] %v5047_v19  ;;  %v5049_v62 = vadd.f32 %v5048_v41, %v4696_v52  ;;  %v4698_v54 = vadd.f32 %v4697_v37, %v12254_v21 }
 0x4bd   :  { %v4699_v33 = vpop.f32.mrf.mxu0  ;;  %v5052_v3 = vpop.f32.mrf.mxu1 }
 0x4be   :  { %5370 = vst [vmem:[%s12813_s3 + $0x28] sm:$0xff] %v5049_v62  ;;  %v5051_v24 = vadd.f32 %v5050_v60, %v4698_v54  ;;  %v4700_v35 = vadd.f32 %v4699_v33, %v12260_v4  ;;  %v13854_v60 = vld [vmem:[#allocation66_spill] sm:$0xff] }
 0x4bf   :  { %v4703_v5 = vpop.f32.mrf.mxu0  ;;  %4942 = vmatmul.mubr.bf16.gmra.mxu0 %v13847_v45  ;;  %v5056_v17 = vpop.f32.mrf.mxu1  ;;  %5295 = vmatmul.mubr.bf16.gmra.mxu1 %v13848_v55  ;;  %v13855_v33 = vld [vmem:[#allocation62_spill] sm:$0xff] }
 0x4c0   :  { %5375 = vst [vmem:[%s12813_s3 + $0x50] sm:$0xff] %v5051_v24  ;;  %v5053_v43 = vadd.f32 %v5052_v3, %v4700_v35  ;;  %v4704_v22 = vadd.f32 %v4703_v5, %v12254_v21  ;;  %4951 = vmatprep.mubr.bf16.mxu0 %v13849_v40  ;;  %5304 = vmatprep.mubr.bf16.mxu1 %v13850_v18  ;;  %v13856_v3 = vld [vmem:[#allocation58_spill] sm:$0xff] }
 0x4c1   :  { %v4705_v42 = vpop.f32.mrf.mxu0  ;;  %v5058_v59 = vpop.f32.mrf.mxu1 }
 0x4c2   :  { %5376 = vst [vmem:[%s12813_s3 + $0x58] sm:$0xff] %v5053_v43  ;;  %v5057_v36 = vadd.f32 %v5056_v17, %v4704_v22  ;;  %v4706_v29 = vadd.f32 %v4705_v42, %v12260_v4 }
 0x4c3   :  { %v4707_v50 = vpop.f32.mrf.mxu0  ;;  %v5060_v56 = vpop.f32.mrf.mxu1 }
 0x4c4   :  { %5381 = vst [vmem:[%s12813_s3 + $0x80] sm:$0xff] %v5057_v36  ;;  %v5059_v57 = vadd.f32 %v5058_v59, %v4706_v29  ;;  %v4708_v7 = vadd.f32 %v4707_v50, %v12254_v21 }
 0x4c5   :  { %v4709_v2 = vpop.f32.mrf.mxu0  ;;  %v5062_v23 = vpop.f32.mrf.mxu1 }
 0x4c6   :  { %5382 = vst [vmem:[%s12813_s3 + $0x88] sm:$0xff] %v5059_v57  ;;  %v5061_v26 = vadd.f32 %v5060_v56, %v4708_v7  ;;  %v4710_v47 = vadd.f32 %v4709_v2, %v12260_v4  ;;  %v13857_v56 = vld [vmem:[#allocation68_spill] sm:$0xff] }
 0x4c7   :  { %v4713_v0 = vpop.f32.mrf.mxu0  ;;  %4952 = vmatmul.mubr.bf16.gmra.mxu0 %v13769_v39  ;;  %v5066_v44 = vpop.f32.mrf.mxu1  ;;  %5305 = vmatmul.mubr.bf16.gmra.mxu1 %v13851_v31 }
 0x4c8   :  { %5387 = vst [vmem:[%s12813_s3 + $0xb0] sm:$0xff] %v5061_v26  ;;  %v5063_v25 = vadd.f32 %v5062_v23, %v4710_v47  ;;  %v4714_v16 = vadd.f32 %v4713_v0, %v12254_v21  ;;  %4961 = vmatprep.mubr.bf16.mxu0 %v13852_v63  ;;  %5314 = vmatprep.mubr.bf16.mxu1 %v13853_v53 }
 0x4c9   :  { %v4715_v6 = vpop.f32.mrf.mxu0  ;;  %v5068_v28 = vpop.f32.mrf.mxu1 }
 0x4ca   :  { %5388 = vst [vmem:[%s12813_s3 + $0xb8] sm:$0xff] %v5063_v25  ;;  %v5067_v39 = vadd.f32 %v5066_v44, %v4714_v16  ;;  %v4716_v9 = vadd.f32 %v4715_v6, %v12260_v4 }
 0x4cb   :  { %v4717_v30 = vpop.f32.mrf.mxu0  ;;  %v5070_v11 = vpop.f32.mrf.mxu1 }
 0x4cc   :  { %5393 = vst [vmem:[%s12813_s3 + $0xe0] sm:$0xff] %v5067_v39  ;;  %v5069_v48 = vadd.f32 %v5068_v28, %v4716_v9  ;;  %v4718_v46 = vadd.f32 %v4717_v30, %v12254_v21 }
 0x4cd   :  { %v4719_v58 = vpop.f32.mrf.mxu0  ;;  %v5072_v14 = vpop.f32.mrf.mxu1 }
 0x4ce   :  { %5394 = vst [vmem:[%s12813_s3 + $0xe8] sm:$0xff] %v5069_v48  ;;  %v5071_v41 = vadd.f32 %v5070_v11, %v4718_v46  ;;  %v4720_v19 = vadd.f32 %v4719_v58, %v12260_v4 }
 0x4cf   :  { %v4723_v52 = vpop.f32.mrf.mxu0  ;;  %4962 = vmatmul.mubr.bf16.gmra.mxu0 %v13772_v61  ;;  %v5076_v37 = vpop.f32.mrf.mxu1  ;;  %5315 = vmatmul.mubr.bf16.gmra.mxu1 %v13854_v60 }
 0x4d0   :  { %5399 = vst [vmem:[%s12813_s3 + $0x110] sm:$0xff] %v5071_v41  ;;  %v5073_v62 = vadd.f32 %v5072_v14, %v4720_v19  ;;  %v4724_v54 = vadd.f32 %v4723_v52, %v12254_v21  ;;  %4971 = vmatprep.mubr.bf16.mxu0 %v13855_v33  ;;  %5324 = vmatprep.mubr.bf16.mxu1 %v13856_v3 }
 0x4d1   :  { %v4725_v24 = vpop.f32.mrf.mxu0  ;;  %v5078_v35 = vpop.f32.mrf.mxu1 }
 0x4d2   :  { %5400 = vst [vmem:[%s12813_s3 + $0x118] sm:$0xff] %v5073_v62  ;;  %v5077_v61 = vadd.f32 %v5076_v37, %v4724_v54  ;;  %v4726_v5 = vadd.f32 %v4725_v24, %v12260_v4 }
 0x4d3   :  { %v4727_v45 = vpop.f32.mrf.mxu0  ;;  %v5080_v17 = vpop.f32.mrf.mxu1 }
 0x4d4   :  { %5405 = vst [vmem:[%s12813_s3 + $0x140] sm:$0xff] %v5077_v61  ;;  %v5079_v55 = vadd.f32 %v5078_v35, %v4726_v5  ;;  %v4728_v43 = vadd.f32 %v4727_v45, %v12254_v21 }
 0x4d5   :  { %v4729_v22 = vpop.f32.mrf.mxu0  ;;  %v5082_v40 = vpop.f32.mrf.mxu1 }
 0x4d6   :  { %5406 = vst [vmem:[%s12813_s3 + $0x148] sm:$0xff] %v5079_v55  ;;  %v5081_v18 = vadd.f32 %v5080_v17, %v4728_v43  ;;  %v4730_v42 = vadd.f32 %v4729_v22, %v12260_v4 }
 0x4d7   :  { %v4733_v59 = vpop.f32.mrf.mxu0  ;;  %4972 = vmatmul.mubr.bf16.gmra.mxu0 %v13775_v1  ;;  %v5086_v36 = vpop.f32.mrf.mxu1  ;;  %5325 = vmatmul.mubr.bf16.gmra.mxu1 %v13776_v13 }
 0x4d8   :  { %5411 = vst [vmem:[%s12813_s3 + $0x170] sm:$0xff] %v5081_v18  ;;  %v5083_v29 = vadd.f32 %v5082_v40, %v4730_v42  ;;  %v4734_v50 = vadd.f32 %v4733_v59, %v12254_v21  ;;  %4981 = vmatprep.mubr.bf16.mxu0 %v10996_v34  ;;  %5334 = vmatprep.mubr.bf16.mxu1 %v13857_v56 }
 0x4d9   :  { %v4735_v57 = vpop.f32.mrf.mxu0  ;;  %v5088_v7 = vpop.f32.mrf.mxu1 }
 0x4da   :  { %5412 = vst [vmem:[%s12813_s3 + $0x178] sm:$0xff] %v5083_v29  ;;  %v5087_v1 = vadd.f32 %v5086_v36, %v4734_v50  ;;  %v4736_v13 = vadd.f32 %v4735_v57, %v12260_v4 }
 0x4db   :  { %v4737_v2 = vpop.f32.mrf.mxu0  ;;  %v5090_v23 = vpop.f32.mrf.mxu1 }
 0x4dc   :  { %5417 = vst [vmem:[%s12813_s3 + $0x1a0] sm:$0xff] %v5087_v1  ;;  %v5089_v26 = vadd.f32 %v5088_v7, %v4736_v13  ;;  %v4738_v34 = vadd.f32 %v4737_v2, %v12254_v21 }
 0x4dd   :  { %v4739_v47 = vpop.f32.mrf.mxu0  ;;  %v5092_v0 = vpop.f32.mrf.mxu1 }
 0x4de   :  { %5418 = vst [vmem:[%s12813_s3 + $0x1a8] sm:$0xff] %v5089_v26  ;;  %v5091_v44 = vadd.f32 %v5090_v23, %v4738_v34  ;;  %v4740_v31 = vadd.f32 %v4739_v47, %v12260_v4 }
 0x4df   :  { %v4743_v25 = vpop.f32.mrf.mxu0  ;;  %4982 = vmatmul.mubr.bf16.gmra.mxu0 %v11000_v10  ;;  %v5096_v16 = vpop.f32.mrf.mxu1  ;;  %5335 = vmatmul.mubr.bf16.gmra.mxu1 %v11002_v12 }
 0x4e0   :  { %5423 = vst [vmem:[%s12813_s3 + $0x1d0] sm:$0xff] %v5091_v44  ;;  %v5093_v63 = vadd.f32 %v5092_v0, %v4740_v31  ;;  %v4744_v53 = vadd.f32 %v4743_v25, %v12254_v21  ;;  %4991 = vmatprep.mubr.bf16.mxu0 %v11035_v49  ;;  %5344 = vmatprep.mubr.bf16.mxu1 %v11037_v51 }
 0x4e1   :  { %v4745_v6 = vpop.f32.mrf.mxu0  ;;  %v5098_v28 = vpop.f32.mrf.mxu1 }
 0x4e2   :  { %5424 = vst [vmem:[%s12813_s3 + $0x1d8] sm:$0xff] %v5093_v63  ;;  %v5097_v10 = vadd.f32 %v5096_v16, %v4744_v53  ;;  %v4746_v12 = vadd.f32 %v4745_v6, %v12260_v4 }
 0x4e3   :  { %v4747_v39 = vpop.f32.mrf.mxu0  ;;  %v5100_v9 = vpop.f32.mrf.mxu1 }
 0x4e4   :  { %5429 = vst [vmem:[%s12813_s3 + $0x200] sm:$0xff] %v5097_v10  ;;  %v5099_v30 = vadd.f32 %v5098_v28, %v4746_v12  ;;  %v4748_v49 = vadd.f32 %v4747_v39, %v12254_v21 }
 0x4e5   :  { %v4749_v11 = vpop.f32.mrf.mxu0  ;;  %v5102_v51 = vpop.f32.mrf.mxu1 }
 0x4e6   :  { %5430 = vst [vmem:[%s12813_s3 + $0x208] sm:$0xff] %v5099_v30  ;;  %v5101_v48 = vadd.f32 %v5100_v9, %v4748_v49  ;;  %v4750_v46 = vadd.f32 %v4749_v11, %v12260_v4 }
 0x4e7   :  { %v4753_v58 = vpop.f32.mrf.mxu0  ;;  %4992 = vmatmul.mubr.bf16.gmra.mxu0 %v11039_v32  ;;  %v5106_v14 = vpop.f32.mrf.mxu1  ;;  %5345 = vmatmul.mubr.bf16.gmra.mxu1 %v11041_v8 }
 0x4e8   :  { %5435 = vst [vmem:[%s12813_s3 + $0x230] sm:$0xff] %v5101_v48  ;;  %v5103_v41 = vadd.f32 %v5102_v51, %v4750_v46  ;;  %v4754_v19 = vadd.f32 %v4753_v58, %v12254_v21  ;;  %5001 = vmatprep.mubr.bf16.mxu0 %v11071_v15  ;;  %5354 = vmatprep.mubr.bf16.mxu1 %v11073_v20 }
 0x4e9   :  { %v4755_v52 = vpop.f32.mrf.mxu0  ;;  %v5108_v37 = vpop.f32.mrf.mxu1 }
 0x4ea   :  { %5436 = vst [vmem:[%s12813_s3 + $0x238] sm:$0xff] %v5103_v41  ;;  %v5107_v32 = vadd.f32 %v5106_v14, %v4754_v19  ;;  %v4756_v8 = vadd.f32 %v4755_v52, %v12260_v4 }
 0x4eb   :  { %v4757_v60 = vpop.f32.mrf.mxu0  ;;  %v5110_v62 = vpop.f32.mrf.mxu1 }
 0x4ec   :  { %5441 = vst [vmem:[%s12813_s3 + $0x260] sm:$0xff] %v5107_v32  ;;  %v5109_v54 = vadd.f32 %v5108_v37, %v4756_v8  ;;  %v4758_v15 = vadd.f32 %v4757_v60, %v12254_v21 }
 0x4ed   :  { %v4759_v33 = vpop.f32.mrf.mxu0  ;;  %v5112_v20 = vpop.f32.mrf.mxu1 }
 0x4ee   :  { %5442 = vst [vmem:[%s12813_s3 + $0x268] sm:$0xff] %v5109_v54  ;;  %v5111_v3 = vadd.f32 %v5110_v62, %v4758_v15  ;;  %v4760_v24 = vadd.f32 %v4759_v33, %v12260_v4 }
 0x4ef   :  { %v4763_v35 = vpop.f32.mrf.mxu0  ;;  %5002 = vmatmul.mubr.bf16.gmra.mxu0 %v11075_v38  ;;  %v5116_v61 = vpop.f32.mrf.mxu1  ;;  %5355 = vmatmul.mubr.bf16.gmra.mxu1 %v11077_v27 }
 0x4f0   :  { %5447 = vst [vmem:[%s12813_s3 + $0x290] sm:$0xff] %v5111_v3  ;;  %v5113_v5 = vadd.f32 %v5112_v20, %v4760_v24  ;;  %v4764_v45 = vadd.f32 %v4763_v35, %v12254_v21 }
 0x4f1   :  { %v4765_v17 = vpop.f32.mrf.mxu0  ;;  %v5118_v55 = vpop.f32.mrf.mxu1 }
 0x4f2   :  { %5448 = vst [vmem:[%s12813_s3 + $0x298] sm:$0xff] %v5113_v5  ;;  %v5117_v43 = vadd.f32 %v5116_v61, %v4764_v45  ;;  %v4766_v22 = vadd.f32 %v4765_v17, %v12260_v4 }
 0x4f3   :  { %v4767_v38 = vpop.f32.mrf.mxu0  ;;  %v5120_v40 = vpop.f32.mrf.mxu1 }
 0x4f4   :  { %5453 = vst [vmem:[%s12813_s3 + $0x2c0] sm:$0xff] %v5117_v43  ;;  %v5119_v27 = vadd.f32 %v5118_v55, %v4766_v22  ;;  %v4768_v18 = vadd.f32 %v4767_v38, %v12254_v21 }
 0x4f5   :  { %v4769_v42 = vpop.f32.mrf.mxu0  ;;  %v5122_v59 = vpop.f32.mrf.mxu1 }
 0x4f6   :  { %5454 = vst [vmem:[%s12813_s3 + $0x2c8] sm:$0xff] %v5119_v27  ;;  %v5121_v36 = vadd.f32 %v5120_v40, %v4768_v18  ;;  %v4770_v29 = vadd.f32 %v4769_v42, %v12260_v4 }
 0x4f7   :  { %v4773_v50 = vpop.f32.mrf.mxu0  ;;  %v5126_v56 = vpop.f32.mrf.mxu1 }
 0x4f8   :  { %5459 = vst [vmem:[%s12813_s3 + $0x2f0] sm:$0xff] %v5121_v36  ;;  %v5123_v57 = vadd.f32 %v5122_v59, %v4770_v29  ;;  %v4774_v7 = vadd.f32 %v4773_v50, %v12254_v21 }
 0x4f9   :  { %v4775_v1 = vpop.f32.mrf.mxu0  ;;  %v5128_v13 = vpop.f32.mrf.mxu1 }
 0x4fa   :  { %5460 = vst [vmem:[%s12813_s3 + $0x2f8] sm:$0xff] %v5123_v57  ;;  %v5127_v2 = vadd.f32 %v5126_v56, %v4774_v7  ;;  %v4776_v23 = vadd.f32 %v4775_v1, %v12260_v4 }
 0x4fb   :  { %v4777_v26 = vpop.f32.mrf.mxu0  ;;  %v5130_v34 = vpop.f32.mrf.mxu1 }
 0x4fc   :  { %5465 = vst [vmem:[%s12813_s3 + $0x320] sm:$0xff] %v5127_v2  ;;  %v5129_v47 = vadd.f32 %v5128_v13, %v4776_v23  ;;  %v4778_v0 = vadd.f32 %v4777_v26, %v12254_v21 }
 0x4fd   :  { %v4779_v44 = vpop.f32.mrf.mxu0  ;;  %v5132_v31 = vpop.f32.mrf.mxu1 }
 0x4fe   :  { %5466 = vst [vmem:[%s12813_s3 + $0x328] sm:$0xff] %v5129_v47  ;;  %v5131_v25 = vadd.f32 %v5130_v34, %v4778_v0  ;;  %v4780_v16 = vadd.f32 %v4779_v44, %v12260_v4 }
 0x4ff   :  { %v4783_v63 = vpop.f32.mrf.mxu0  ;;  %v5136_v53 = vpop.f32.mrf.mxu1 }
 0x500   :  { %5471 = vst [vmem:[%s12813_s3 + $0x350] sm:$0xff] %v5131_v25  ;;  %v5133_v6 = vadd.f32 %v5132_v31, %v4780_v16  ;;  %v4784_v28 = vadd.f32 %v4783_v63, %v12254_v21 }
 0x501   :  { %v4785_v10 = vpop.f32.mrf.mxu0  ;;  %v5138_v12 = vpop.f32.mrf.mxu1 }
 0x502   :  { %5472 = vst [vmem:[%s12813_s3 + $0x358] sm:$0xff] %v5133_v6  ;;  %v5137_v39 = vadd.f32 %v5136_v53, %v4784_v28  ;;  %v4786_v9 = vadd.f32 %v4785_v10, %v12260_v4 }
 0x503   :  { %v4787_v30 = vpop.f32.mrf.mxu0  ;;  %v5140_v49 = vpop.f32.mrf.mxu1 }
 0x504   :  { %5477 = vst [vmem:[%s12813_s3 + $0x380] sm:$0xff] %v5137_v39  ;;  %v5139_v11 = vadd.f32 %v5138_v12, %v4786_v9  ;;  %v4788_v51 = vadd.f32 %v4787_v30, %v12254_v21 }
 0x505   :  { %v4789_v48 = vpop.f32.mrf.mxu0  ;;  %v5142_v46 = vpop.f32.mrf.mxu1 }
 0x506   :  { %5478 = vst [vmem:[%s12813_s3 + $0x388] sm:$0xff] %v5139_v11  ;;  %v5141_v58 = vadd.f32 %v5140_v49, %v4788_v51  ;;  %v4790_v14 = vadd.f32 %v4789_v48, %v12260_v4 }
 0x507   :  { %v4793_v41 = vpop.f32.mrf.mxu0  ;;  %v5146_v19 = vpop.f32.mrf.mxu1 }
 0x508   :  { %5483 = vst [vmem:[%s12813_s3 + $0x3b0] sm:$0xff] %v5141_v58  ;;  %v5143_v52 = vadd.f32 %v5142_v46, %v4790_v14  ;;  %v4794_v37 = vadd.f32 %v4793_v41, %v12254_v21 }
 0x509   :  { %v4795_v32 = vpop.f32.mrf.mxu0  ;;  %v5148_v8 = vpop.f32.mrf.mxu1 }
 0x50a   :  { %5484 = vst [vmem:[%s12813_s3 + $0x3b8] sm:$0xff] %v5143_v52  ;;  %v5147_v60 = vadd.f32 %v5146_v19, %v4794_v37  ;;  %v4796_v62 = vadd.f32 %v4795_v32, %v12260_v4 }
 0x50b   :  { %v4797_v54 = vpop.f32.mrf.mxu0  ;;  %v5150_v15 = vpop.f32.mrf.mxu1 }
 0x50c   :  { %5489 = vst [vmem:[%s12813_s3 + $0x3e0] sm:$0xff] %v5147_v60  ;;  %v5149_v33 = vadd.f32 %v5148_v8, %v4796_v62  ;;  %v4798_v20 = vadd.f32 %v4797_v54, %v12254_v21 }
 0x50d   :  { %v4799_v3 = vpop.f32.mrf.mxu0  ;;  %v5152_v24 = vpop.f32.mrf.mxu1 }
 0x50e   :  { %5490 = vst [vmem:[%s12813_s3 + $0x3e8] sm:$0xff] %v5149_v33  ;;  %v5151_v35 = vadd.f32 %v5150_v15, %v4798_v20  ;;  %v4800_v61 = vadd.f32 %v4799_v3, %v12260_v4 }
 0x50f   :  { %v4803_v5 = vpop.f32.mrf.mxu0  ;;  %v5156_v45 = vpop.f32.mrf.mxu1 }
 0x510   :  { %5495 = vst [vmem:[%s12813_s3 + $0x410] sm:$0xff] %v5151_v35  ;;  %v5153_v17 = vadd.f32 %v5152_v24, %v4800_v61  ;;  %v4804_v55 = vadd.f32 %v4803_v5, %v12254_v21 }
 0x511   :  { %v4805_v43 = vpop.f32.mrf.mxu0  ;;  %v5158_v22 = vpop.f32.mrf.mxu1 }
 0x512   :  { %5496 = vst [vmem:[%s12813_s3 + $0x418] sm:$0xff] %v5153_v17  ;;  %v5157_v38 = vadd.f32 %v5156_v45, %v4804_v55  ;;  %v4806_v40 = vadd.f32 %v4805_v43, %v12260_v4 }
 0x513   :  { %v4807_v27 = vpop.f32.mrf.mxu0  ;;  %v5160_v18 = vpop.f32.mrf.mxu1 }
 0x514   :  { %5501 = vst [vmem:[%s12813_s3 + $0x440] sm:$0xff] %v5157_v38  ;;  %v5159_v42 = vadd.f32 %v5158_v22, %v4806_v40  ;;  %v4808_v59 = vadd.f32 %v4807_v27, %v12254_v21 }
 0x515   :  { %v4809_v36 = vpop.f32.mrf.mxu0  ;;  %v5162_v29 = vpop.f32.mrf.mxu1 }
 0x516   :  { %5502 = vst [vmem:[%s12813_s3 + $0x448] sm:$0xff] %v5159_v42  ;;  %v5161_v50 = vadd.f32 %v5160_v18, %v4808_v59  ;;  %v4810_v56 = vadd.f32 %v4809_v36, %v12260_v4 }
 0x517   :  { %v4813_v57 = vpop.f32.mrf.mxu0  ;;  %v5166_v7 = vpop.f32.mrf.mxu1 }
 0x518   :  { %5507 = vst [vmem:[%s12813_s3 + $0x470] sm:$0xff] %v5161_v50  ;;  %v5163_v1 = vadd.f32 %v5162_v29, %v4810_v56  ;;  %v4814_v13 = vadd.f32 %v4813_v57, %v12254_v21 }
 0x519   :  { %v4815_v2 = vpop.f32.mrf.mxu0  ;;  %v5168_v23 = vpop.f32.mrf.mxu1 }
 0x51a   :  { %5508 = vst [vmem:[%s12813_s3 + $0x478] sm:$0xff] %v5163_v1  ;;  %v5167_v26 = vadd.f32 %v5166_v7, %v4814_v13  ;;  %v4816_v34 = vadd.f32 %v4815_v2, %v12260_v4 }
 0x51b   :  { %v4817_v47 = vpop.f32.mrf.mxu0  ;;  %v5170_v0 = vpop.f32.mrf.mxu1 }
 0x51c   :  { %5513 = vst [vmem:[%s12813_s3 + $0x4a0] sm:$0xff] %v5167_v26  ;;  %v5169_v44 = vadd.f32 %v5168_v23, %v4816_v34  ;;  %v4818_v31 = vadd.f32 %v4817_v47, %v12254_v21 }
 0x51d   :  { %v4819_v25 = vpop.f32.mrf.mxu0  ;;  %v5172_v16 = vpop.f32.mrf.mxu1 }
 0x51e   :  { %5514 = vst [vmem:[%s12813_s3 + $0x4a8] sm:$0xff] %v5169_v44  ;;  %v5171_v63 = vadd.f32 %v5170_v0, %v4818_v31  ;;  %v4820_v53 = vadd.f32 %v4819_v25, %v12260_v4 }
 0x51f   :  { %v4823_v6 = vpop.f32.mrf.mxu0  ;;  %v5176_v28 = vpop.f32.mrf.mxu1 }
 0x520   :  { %5519 = vst [vmem:[%s12813_s3 + $0x4d0] sm:$0xff] %v5171_v63  ;;  %v5173_v10 = vadd.f32 %v5172_v16, %v4820_v53  ;;  %v4824_v12 = vadd.f32 %v4823_v6, %v12254_v21 }
 0x521   :  { %v4825_v39 = vpop.f32.mrf.mxu0  ;;  %v5178_v9 = vpop.f32.mrf.mxu1 }
 0x522   :  { %5520 = vst [vmem:[%s12813_s3 + $0x4d8] sm:$0xff] %v5173_v10  ;;  %v5177_v30 = vadd.f32 %v5176_v28, %v4824_v12  ;;  %v4826_v49 = vadd.f32 %v4825_v39, %v12260_v4 }
 0x523   :  { %v4827_v11 = vpop.f32.mrf.mxu0  ;;  %v5180_v51 = vpop.f32.mrf.mxu1 }
 0x524   :  { %5525 = vst [vmem:[%s12813_s3 + $0x500] sm:$0xff] %v5177_v30  ;;  %v5179_v48 = vadd.f32 %v5178_v9, %v4826_v49  ;;  %v4828_v46 = vadd.f32 %v4827_v11, %v12254_v21 }
 0x525   :  { %v4829_v58 = vpop.f32.mrf.mxu0  ;;  %v5182_v14 = vpop.f32.mrf.mxu1 }
 0x526   :  { %5526 = vst [vmem:[%s12813_s3 + $0x508] sm:$0xff] %v5179_v48  ;;  %v5181_v41 = vadd.f32 %v5180_v51, %v4828_v46  ;;  %v4830_v19 = vadd.f32 %v4829_v58, %v12260_v4 }
 0x527   :  { %v4833_v52 = vpop.f32.mrf.mxu0  ;;  %v5186_v37 = vpop.f32.mrf.mxu1 }
 0x528   :  { %5531 = vst [vmem:[%s12813_s3 + $0x530] sm:$0xff] %v5181_v41  ;;  %v5183_v32 = vadd.f32 %v5182_v14, %v4830_v19  ;;  %v4834_v8 = vadd.f32 %v4833_v52, %v12254_v21 }
 0x529   :  { %v4835_v60 = vpop.f32.mrf.mxu0  ;;  %v5188_v62 = vpop.f32.mrf.mxu1 }
 0x52a   :  { %5532 = vst [vmem:[%s12813_s3 + $0x538] sm:$0xff] %v5183_v32  ;;  %v5187_v54 = vadd.f32 %v5186_v37, %v4834_v8  ;;  %v4836_v15 = vadd.f32 %v4835_v60, %v12260_v4 }
 0x52b   :  { %v4837_v33 = vpop.f32.mrf.mxu0  ;;  %v5190_v20 = vpop.f32.mrf.mxu1 }
 0x52c   :  { %5537 = vst [vmem:[%s12813_s3 + $0x560] sm:$0xff] %v5187_v54  ;;  %v5189_v3 = vadd.f32 %v5188_v62, %v4836_v15  ;;  %v4838_v24 = vadd.f32 %v4837_v33, %v12254_v21 }
 0x52d   :  { %v4839_v35 = vpop.f32.mrf.mxu0  ;;  %v5192_v61 = vpop.f32.mrf.mxu1 }
 0x52e   :  { %5538 = vst [vmem:[%s12813_s3 + $0x568] sm:$0xff] %v5189_v3  ;;  %v5191_v5 = vadd.f32 %v5190_v20, %v4838_v24  ;;  %v4840_v45 = vadd.f32 %v4839_v35, %v12260_v4 }
 0x52f   :  { %v4843_v17 = vpop.f32.mrf.mxu0  ;;  %v5196_v55 = vpop.f32.mrf.mxu1 }
 0x530   :  { %5543 = vst [vmem:[%s12813_s3 + $0x590] sm:$0xff] %v5191_v5  ;;  %v5193_v43 = vadd.f32 %v5192_v61, %v4840_v45  ;;  %v4844_v22 = vadd.f32 %v4843_v17, %v12254_v21 }
 0x531   :  { %v4845_v38 = vpop.f32.mrf.mxu0  ;;  %v5198_v40 = vpop.f32.mrf.mxu1 }
 0x532   :  { %5544 = vst [vmem:[%s12813_s3 + $0x598] sm:$0xff] %v5193_v43  ;;  %v5197_v27 = vadd.f32 %v5196_v55, %v4844_v22  ;;  %v4846_v18 = vadd.f32 %v4845_v38, %v12260_v4 }
 0x533   :  { %v4847_v42 = vpop.f32.mrf.mxu0  ;;  %v5200_v59 = vpop.f32.mrf.mxu1 }
 0x534   :  { %5549 = vst [vmem:[%s12813_s3 + $0x5c0] sm:$0xff] %v5197_v27  ;;  %v5199_v36 = vadd.f32 %v5198_v40, %v4846_v18  ;;  %v4848_v29 = vadd.f32 %v4847_v42, %v12254_v21 }
 0x535   :  { %v4849_v50 = vpop.f32.mrf.mxu0  ;;  %v5202_v56 = vpop.f32.mrf.mxu1 }
 0x536   :  { %5550 = vst [vmem:[%s12813_s3 + $0x5c8] sm:$0xff] %v5199_v36  ;;  %v5201_v57 = vadd.f32 %v5200_v59, %v4848_v29  ;;  %v4850_v7 = vadd.f32 %v4849_v50, %v12260_v4 }
 0x537   :  { %v4853_v1 = vpop.f32.mrf.mxu0  ;;  %v5206_v13 = vpop.f32.mrf.mxu1 }
 0x538   :  { %5555 = vst [vmem:[%s12813_s3 + $0x5f0] sm:$0xff] %v5201_v57  ;;  %v5203_v2 = vadd.f32 %v5202_v56, %v4850_v7  ;;  %v4854_v23 = vadd.f32 %v4853_v1, %v12254_v21 }
 0x539   :  { %v4855_v26 = vpop.f32.mrf.mxu0  ;;  %v5208_v34 = vpop.f32.mrf.mxu1 }
 0x53a   :  { %5556 = vst [vmem:[%s12813_s3 + $0x5f8] sm:$0xff] %v5203_v2  ;;  %v5207_v47 = vadd.f32 %v5206_v13, %v4854_v23  ;;  %v4856_v0 = vadd.f32 %v4855_v26, %v12260_v4 }
 0x53b   :  { %v4857_v44 = vpop.f32.mrf.mxu0  ;;  %v5210_v31 = vpop.f32.mrf.mxu1 }
 0x53c   :  { %5561 = vst [vmem:[%s12813_s3 + $0x620] sm:$0xff] %v5207_v47  ;;  %v5209_v25 = vadd.f32 %v5208_v34, %v4856_v0  ;;  %v4858_v16 = vadd.f32 %v4857_v44, %v12254_v21 }
 0x53d   :  { %v4859_v63 = vpop.f32.mrf.mxu0  ;;  %v5212_v53 = vpop.f32.mrf.mxu1 }
 0x53e   :  { %5562 = vst [vmem:[%s12813_s3 + $0x628] sm:$0xff] %v5209_v25  ;;  %v5211_v6 = vadd.f32 %v5210_v31, %v4858_v16  ;;  %v4860_v28 = vadd.f32 %v4859_v63, %v12260_v4 }
 0x53f   :  { %v4863_v10 = vpop.f32.mrf.mxu0  ;;  %v5216_v12 = vpop.f32.mrf.mxu1 }
 0x540   :  { %5567 = vst [vmem:[%s12813_s3 + $0x650] sm:$0xff] %v5211_v6  ;;  %v5213_v39 = vadd.f32 %v5212_v53, %v4860_v28  ;;  %v4864_v9 = vadd.f32 %v4863_v10, %v12254_v21 }
 0x541   :  { %v4865_v30 = vpop.f32.mrf.mxu0  ;;  %v5218_v49 = vpop.f32.mrf.mxu1 }
 0x542   :  { %5568 = vst [vmem:[%s12813_s3 + $0x658] sm:$0xff] %v5213_v39  ;;  %v5217_v11 = vadd.f32 %v5216_v12, %v4864_v9  ;;  %v4866_v51 = vadd.f32 %v4865_v30, %v12260_v4 }
 0x543   :  { %v4867_v48 = vpop.f32.mrf.mxu0  ;;  %v5220_v46 = vpop.f32.mrf.mxu1 }
 0x544   :  { %5573 = vst [vmem:[%s12813_s3 + $0x680] sm:$0xff] %v5217_v11  ;;  %v5219_v58 = vadd.f32 %v5218_v49, %v4866_v51  ;;  %v4868_v14 = vadd.f32 %v4867_v48, %v12254_v21 }
 0x545   :  { %v4869_v41 = vpop.f32.mrf.mxu0  ;;  %v5222_v19 = vpop.f32.mrf.mxu1 }
 0x546   :  { %5574 = vst [vmem:[%s12813_s3 + $0x688] sm:$0xff] %v5219_v58  ;;  %v5221_v52 = vadd.f32 %v5220_v46, %v4868_v14  ;;  %v4870_v37 = vadd.f32 %v4869_v41, %v12260_v4 }
 0x547   :  { %v4873_v32 = vpop.f32.mrf.mxu0  ;;  %v5226_v8 = vpop.f32.mrf.mxu1 }
 0x548   :  { %5579 = vst [vmem:[%s12813_s3 + $0x6b0] sm:$0xff] %v5221_v52  ;;  %v5223_v60 = vadd.f32 %v5222_v19, %v4870_v37  ;;  %v4874_v62 = vadd.f32 %v4873_v32, %v12254_v21 }
 0x549   :  { %v4875_v54 = vpop.f32.mrf.mxu0  ;;  %v5228_v15 = vpop.f32.mrf.mxu1 }
 0x54a   :  { %5580 = vst [vmem:[%s12813_s3 + $0x6b8] sm:$0xff] %v5223_v60  ;;  %v5227_v33 = vadd.f32 %v5226_v8, %v4874_v62  ;;  %v4876_v20 = vadd.f32 %v4875_v54, %v12260_v4 }
 0x54b   :  { %v4877_v3 = vpop.f32.mrf.mxu0  ;;  %v5230_v24 = vpop.f32.mrf.mxu1 }
 0x54c   :  { %5585 = vst [vmem:[%s12813_s3 + $0x6e0] sm:$0xff] %v5227_v33  ;;  %v5229_v35 = vadd.f32 %v5228_v15, %v4876_v20  ;;  %v4878_v61 = vadd.f32 %v4877_v3, %v12254_v21 }
 0x54d   :  { %v4879_v5 = vpop.f32.mrf.mxu0  ;;  %v5232_v45 = vpop.f32.mrf.mxu1 }
 0x54e   :  { %5586 = vst [vmem:[%s12813_s3 + $0x6e8] sm:$0xff] %v5229_v35  ;;  %v5231_v17 = vadd.f32 %v5230_v24, %v4878_v61  ;;  %v4880_v55 = vadd.f32 %v4879_v5, %v12260_v4 }
 0x54f   :  { %v4883_v43 = vpop.f32.mrf.mxu0  ;;  %v5236_v22 = vpop.f32.mrf.mxu1 }
 0x550   :  { %5591 = vst [vmem:[%s12813_s3 + $0x710] sm:$0xff] %v5231_v17  ;;  %v5233_v38 = vadd.f32 %v5232_v45, %v4880_v55  ;;  %v4884_v40 = vadd.f32 %v4883_v43, %v12254_v21 }
 0x551   :  { %v4885_v27 = vpop.f32.mrf.mxu0  ;;  %v5238_v18 = vpop.f32.mrf.mxu1 }
 0x552   :  { %5592 = vst [vmem:[%s12813_s3 + $0x718] sm:$0xff] %v5233_v38  ;;  %v5237_v42 = vadd.f32 %v5236_v22, %v4884_v40  ;;  %v4886_v59 = vadd.f32 %v4885_v27, %v12260_v4 }
 0x553   :  { %v4887_v36 = vpop.f32.mrf.mxu0  ;;  %v5240_v29 = vpop.f32.mrf.mxu1 }
 0x554   :  { %5597 = vst [vmem:[%s12813_s3 + $0x740] sm:$0xff] %v5237_v42  ;;  %v5239_v50 = vadd.f32 %v5238_v18, %v4886_v59  ;;  %v4888_v56 = vadd.f32 %v4887_v36, %v12254_v21 }
 0x555   :  { %v4889_v57 = vpop.f32.mrf.mxu0  ;;  %v5242_v7 = vpop.f32.mrf.mxu1 }
 0x556   :  { %5598 = vst [vmem:[%s12813_s3 + $0x748] sm:$0xff] %v5239_v50  ;;  %v5241_v1 = vadd.f32 %v5240_v29, %v4888_v56  ;;  %v4890_v13 = vadd.f32 %v4889_v57, %v12260_v4 }
 0x557   :  { %v4893_v2 = vpop.f32.mrf.mxu0  ;;  %v5246_v23 = vpop.f32.mrf.mxu1 }
 0x558   :  { %5603 = vst [vmem:[%s12813_s3 + $0x770] sm:$0xff] %v5241_v1  ;;  %v5243_v26 = vadd.f32 %v5242_v7, %v4890_v13  ;;  %v4894_v34 = vadd.f32 %v4893_v2, %v12254_v21 }
 0x559   :  { %v4895_v47 = vpop.f32.mrf.mxu0  ;;  %v5248_v0 = vpop.f32.mrf.mxu1 }
 0x55a   :  { %5604 = vst [vmem:[%s12813_s3 + $0x778] sm:$0xff] %v5243_v26  ;;  %v5247_v44 = vadd.f32 %v5246_v23, %v4894_v34  ;;  %v4896_v31 = vadd.f32 %v4895_v47, %v12260_v4 }
 0x55b   :  { %v4897_v25 = vpop.f32.mrf.mxu0  ;;  %v5250_v16 = vpop.f32.mrf.mxu1 }
 0x55c   :  { %5609 = vst [vmem:[%s12813_s3 + $0x7a0] sm:$0xff] %v5247_v44  ;;  %v5249_v63 = vadd.f32 %v5248_v0, %v4896_v31  ;;  %v4898_v53 = vadd.f32 %v4897_v25, %v12254_v21 }
 0x55d   :  { %v4899_v6 = vpop.f32.mrf.mxu0  ;;  %v5252_v28 = vpop.f32.mrf.mxu1 }
 0x55e   :  { %5610 = vst [vmem:[%s12813_s3 + $0x7a8] sm:$0xff] %v5249_v63  ;;  %v5251_v10 = vadd.f32 %v5250_v16, %v4898_v53  ;;  %v4900_v12 = vadd.f32 %v4899_v6, %v12260_v4 }
 0x55f   :  { %v4903_v39 = vpop.f32.mrf.mxu0  ;;  %v5256_v9 = vpop.f32.mrf.mxu1 }
 0x560   :  { %5615 = vst [vmem:[%s12813_s3 + $0x7d0] sm:$0xff] %v5251_v10  ;;  %v5253_v30 = vadd.f32 %v5252_v28, %v4900_v12  ;;  %v4904_v49 = vadd.f32 %v4903_v39, %v12254_v21 }
 0x561   :  { %v4905_v11 = vpop.f32.mrf.mxu0  ;;  %v5258_v51 = vpop.f32.mrf.mxu1 }
 0x562   :  { %5616 = vst [vmem:[%s12813_s3 + $0x7d8] sm:$0xff] %v5253_v30  ;;  %v5257_v48 = vadd.f32 %v5256_v9, %v4904_v49  ;;  %v4906_v46 = vadd.f32 %v4905_v11, %v12260_v4 }
 0x563   :  { %v4907_v58 = vpop.f32.mrf.mxu0  ;;  %v5260_v14 = vpop.f32.mrf.mxu1 }
 0x564   :  { %5621 = vst [vmem:[%s12813_s3 + $0x800] sm:$0xff] %v5257_v48  ;;  %v5259_v41 = vadd.f32 %v5258_v51, %v4906_v46  ;;  %v4908_v19 = vadd.f32 %v4907_v58, %v12254_v21 }
 0x565   :  { %v4909_v52 = vpop.f32.mrf.mxu0  ;;  %v5262_v37 = vpop.f32.mrf.mxu1 }
 0x566   :  { %5622 = vst [vmem:[%s12813_s3 + $0x808] sm:$0xff] %v5259_v41  ;;  %v5261_v32 = vadd.f32 %v5260_v14, %v4908_v19  ;;  %v4910_v8 = vadd.f32 %v4909_v52, %v12260_v4 }
 0x567   :  { %v4913_v60 = vpop.f32.mrf.mxu0  ;;  %v5266_v62 = vpop.f32.mrf.mxu1 }
 0x568   :  { %5627 = vst [vmem:[%s12813_s3 + $0x830] sm:$0xff] %v5261_v32  ;;  %v5263_v54 = vadd.f32 %v5262_v37, %v4910_v8  ;;  %v4914_v15 = vadd.f32 %v4913_v60, %v12254_v21 }
 0x569   :  { %v4915_v33 = vpop.f32.mrf.mxu0  ;;  %v5268_v20 = vpop.f32.mrf.mxu1 }
 0x56a   :  { %5628 = vst [vmem:[%s12813_s3 + $0x838] sm:$0xff] %v5263_v54  ;;  %v5267_v3 = vadd.f32 %v5266_v62, %v4914_v15  ;;  %v4916_v24 = vadd.f32 %v4915_v33, %v12260_v4 }
 0x56b   :  { %v4917_v35 = vpop.f32.mrf.mxu0  ;;  %v5270_v61 = vpop.f32.mrf.mxu1 }
 0x56c   :  { %5633 = vst [vmem:[%s12813_s3 + $0x860] sm:$0xff] %v5267_v3  ;;  %v5269_v5 = vadd.f32 %v5268_v20, %v4916_v24  ;;  %v4918_v45 = vadd.f32 %v4917_v35, %v12254_v21 }
 0x56d   :  { %v4919_v17 = vpop.f32.mrf.mxu0  ;;  %v5272_v55 = vpop.f32.mrf.mxu1 }
 0x56e   :  { %5634 = vst [vmem:[%s12813_s3 + $0x868] sm:$0xff] %v5269_v5  ;;  %v5271_v43 = vadd.f32 %v5270_v61, %v4918_v45  ;;  %v4920_v22 = vadd.f32 %v4919_v17, %v12260_v4 }
 0x56f   :  { %v4923_v38 = vpop.f32.mrf.mxu0  ;;  %v5276_v40 = vpop.f32.mrf.mxu1 }
 0x570   :  { %5639 = vst [vmem:[%s12813_s3 + $0x890] sm:$0xff] %v5271_v43  ;;  %v5273_v27 = vadd.f32 %v5272_v55, %v4920_v22  ;;  %v4924_v18 = vadd.f32 %v4923_v38, %v12254_v21 }
 0x571   :  { %v4925_v42 = vpop.f32.mrf.mxu0  ;;  %v5278_v59 = vpop.f32.mrf.mxu1 }
 0x572   :  { %5640 = vst [vmem:[%s12813_s3 + $0x898] sm:$0xff] %v5273_v27  ;;  %v5277_v36 = vadd.f32 %v5276_v40, %v4924_v18  ;;  %v4926_v29 = vadd.f32 %v4925_v42, %v12260_v4 }
 0x573   :  { %v4927_v50 = vpop.f32.mrf.mxu0  ;;  %v5280_v56 = vpop.f32.mrf.mxu1 }
 0x574   :  { %5645 = vst [vmem:[%s12813_s3 + $0x8c0] sm:$0xff] %v5277_v36  ;;  %v5279_v57 = vadd.f32 %v5278_v59, %v4926_v29  ;;  %v4928_v7 = vadd.f32 %v4927_v50, %v12254_v21 }
 0x575   :  { %v4929_v1 = vpop.f32.mrf.mxu0  ;;  %v5282_v13 = vpop.f32.mrf.mxu1 }
 0x576   :  { %5646 = vst [vmem:[%s12813_s3 + $0x8c8] sm:$0xff] %v5279_v57  ;;  %v5281_v2 = vadd.f32 %v5280_v56, %v4928_v7  ;;  %v4930_v23 = vadd.f32 %v4929_v1, %v12260_v4 }
 0x577   :  { %v4933_v26 = vpop.f32.mrf.mxu0  ;;  %v5286_v34 = vpop.f32.mrf.mxu1 }
 0x578   :  { %5651 = vst [vmem:[%s12813_s3 + $0x8f0] sm:$0xff] %v5281_v2  ;;  %v5283_v47 = vadd.f32 %v5282_v13, %v4930_v23  ;;  %v4934_v0 = vadd.f32 %v4933_v26, %v12254_v21 }
 0x579   :  { %v4935_v44 = vpop.f32.mrf.mxu0  ;;  %v5288_v31 = vpop.f32.mrf.mxu1 }
 0x57a   :  { %5652 = vst [vmem:[%s12813_s3 + $0x8f8] sm:$0xff] %v5283_v47  ;;  %v5287_v25 = vadd.f32 %v5286_v34, %v4934_v0  ;;  %v4936_v16 = vadd.f32 %v4935_v44, %v12260_v4 }
 0x57b   :  { %v4937_v63 = vpop.f32.mrf.mxu0  ;;  %v5290_v53 = vpop.f32.mrf.mxu1 }
 0x57c   :  { %5657 = vst [vmem:[%s12813_s3 + $0x920] sm:$0xff] %v5287_v25  ;;  %v5289_v6 = vadd.f32 %v5288_v31, %v4936_v16  ;;  %v4938_v28 = vadd.f32 %v4937_v63, %v12254_v21 }
 0x57d   :  { %v4939_v10 = vpop.f32.mrf.mxu0  ;;  %v5292_v12 = vpop.f32.mrf.mxu1 }
 0x57e   :  { %5658 = vst [vmem:[%s12813_s3 + $0x928] sm:$0xff] %v5289_v6  ;;  %v5291_v39 = vadd.f32 %v5290_v53, %v4938_v28  ;;  %v4940_v9 = vadd.f32 %v4939_v10, %v12260_v4 }
 0x57f   :  { %v4943_v30 = vpop.f32.mrf.mxu0  ;;  %v5296_v49 = vpop.f32.mrf.mxu1 }
 0x580   :  { %5663 = vst [vmem:[%s12813_s3 + $0x950] sm:$0xff] %v5291_v39  ;;  %v5293_v11 = vadd.f32 %v5292_v12, %v4940_v9  ;;  %v4944_v51 = vadd.f32 %v4943_v30, %v12254_v21 }
 0x581   :  { %v4945_v48 = vpop.f32.mrf.mxu0  ;;  %v5298_v46 = vpop.f32.mrf.mxu1 }
 0x582   :  { %5664 = vst [vmem:[%s12813_s3 + $0x958] sm:$0xff] %v5293_v11  ;;  %v5297_v58 = vadd.f32 %v5296_v49, %v4944_v51  ;;  %v4946_v14 = vadd.f32 %v4945_v48, %v12260_v4 }
 0x583   :  { %v4947_v41 = vpop.f32.mrf.mxu0  ;;  %v5300_v19 = vpop.f32.mrf.mxu1 }
 0x584   :  { %5669 = vst [vmem:[%s12813_s3 + $0x980] sm:$0xff] %v5297_v58  ;;  %v5299_v52 = vadd.f32 %v5298_v46, %v4946_v14  ;;  %v4948_v37 = vadd.f32 %v4947_v41, %v12254_v21 }
 0x585   :  { %v4949_v32 = vpop.f32.mrf.mxu0  ;;  %v5302_v8 = vpop.f32.mrf.mxu1 }
 0x586   :  { %5670 = vst [vmem:[%s12813_s3 + $0x988] sm:$0xff] %v5299_v52  ;;  %v5301_v60 = vadd.f32 %v5300_v19, %v4948_v37  ;;  %v4950_v62 = vadd.f32 %v4949_v32, %v12260_v4 }
 0x587   :  { %v4953_v54 = vpop.f32.mrf.mxu0  ;;  %v5306_v15 = vpop.f32.mrf.mxu1 }
 0x588   :  { %5675 = vst [vmem:[%s12813_s3 + $0x9b0] sm:$0xff] %v5301_v60  ;;  %v5303_v33 = vadd.f32 %v5302_v8, %v4950_v62  ;;  %v4954_v20 = vadd.f32 %v4953_v54, %v12254_v21 }
 0x589   :  { %v4955_v3 = vpop.f32.mrf.mxu0  ;;  %v5308_v24 = vpop.f32.mrf.mxu1 }
 0x58a   :  { %5676 = vst [vmem:[%s12813_s3 + $0x9b8] sm:$0xff] %v5303_v33  ;;  %v5307_v35 = vadd.f32 %v5306_v15, %v4954_v20  ;;  %v4956_v61 = vadd.f32 %v4955_v3, %v12260_v4 }
 0x58b   :  { %v4957_v5 = vpop.f32.mrf.mxu0  ;;  %v5310_v45 = vpop.f32.mrf.mxu1 }
 0x58c   :  { %5681 = vst [vmem:[%s12813_s3 + $0x9e0] sm:$0xff] %v5307_v35  ;;  %v5309_v17 = vadd.f32 %v5308_v24, %v4956_v61  ;;  %v4958_v55 = vadd.f32 %v4957_v5, %v12254_v21 }
 0x58d   :  { %v4959_v43 = vpop.f32.mrf.mxu0  ;;  %v5312_v22 = vpop.f32.mrf.mxu1 }
 0x58e   :  { %5682 = vst [vmem:[%s12813_s3 + $0x9e8] sm:$0xff] %v5309_v17  ;;  %v5311_v38 = vadd.f32 %v5310_v45, %v4958_v55  ;;  %v4960_v40 = vadd.f32 %v4959_v43, %v12260_v4 }
 0x58f   :  { %v4963_v27 = vpop.f32.mrf.mxu0  ;;  %v5316_v18 = vpop.f32.mrf.mxu1 }
 0x590   :  { %5687 = vst [vmem:[%s12813_s3 + $0xa10] sm:$0xff] %v5311_v38  ;;  %v5313_v42 = vadd.f32 %v5312_v22, %v4960_v40  ;;  %v4964_v59 = vadd.f32 %v4963_v27, %v12254_v21 }
 0x591   :  { %v4965_v36 = vpop.f32.mrf.mxu0  ;;  %v5318_v29 = vpop.f32.mrf.mxu1 }
 0x592   :  { %5688 = vst [vmem:[%s12813_s3 + $0xa18] sm:$0xff] %v5313_v42  ;;  %v5317_v50 = vadd.f32 %v5316_v18, %v4964_v59  ;;  %v4966_v56 = vadd.f32 %v4965_v36, %v12260_v4 }
 0x593   :  { %v4967_v57 = vpop.f32.mrf.mxu0  ;;  %v5320_v7 = vpop.f32.mrf.mxu1 }
 0x594   :  { %5693 = vst [vmem:[%s12813_s3 + $0xa40] sm:$0xff] %v5317_v50  ;;  %v5319_v1 = vadd.f32 %v5318_v29, %v4966_v56  ;;  %v4968_v13 = vadd.f32 %v4967_v57, %v12254_v21 }
 0x595   :  { %v4969_v2 = vpop.f32.mrf.mxu0  ;;  %v5322_v23 = vpop.f32.mrf.mxu1 }
 0x596   :  { %5694 = vst [vmem:[%s12813_s3 + $0xa48] sm:$0xff] %v5319_v1  ;;  %v5321_v26 = vadd.f32 %v5320_v7, %v4968_v13  ;;  %v4970_v34 = vadd.f32 %v4969_v2, %v12260_v4 }
 0x597   :  { %v4973_v47 = vpop.f32.mrf.mxu0  ;;  %v5326_v0 = vpop.f32.mrf.mxu1 }
 0x598   :  { %5699 = vst [vmem:[%s12813_s3 + $0xa70] sm:$0xff] %v5321_v26  ;;  %v5323_v44 = vadd.f32 %v5322_v23, %v4970_v34  ;;  %v4974_v31 = vadd.f32 %v4973_v47, %v12254_v21 }
 0x599   :  { %v4975_v25 = vpop.f32.mrf.mxu0  ;;  %v5328_v16 = vpop.f32.mrf.mxu1 }
 0x59a   :  { %5700 = vst [vmem:[%s12813_s3 + $0xa78] sm:$0xff] %v5323_v44  ;;  %v5327_v63 = vadd.f32 %v5326_v0, %v4974_v31  ;;  %v4976_v53 = vadd.f32 %v4975_v25, %v12260_v4 }
 0x59b   :  { %v4977_v6 = vpop.f32.mrf.mxu0  ;;  %v5330_v28 = vpop.f32.mrf.mxu1 }
 0x59c   :  { %5705 = vst [vmem:[%s12813_s3 + $0xaa0] sm:$0xff] %v5327_v63  ;;  %v5329_v10 = vadd.f32 %v5328_v16, %v4976_v53  ;;  %v4978_v12 = vadd.f32 %v4977_v6, %v12254_v21 }
 0x59d   :  { %v4979_v39 = vpop.f32.mrf.mxu0  ;;  %v5332_v9 = vpop.f32.mrf.mxu1 }
 0x59e   :  { %5706 = vst [vmem:[%s12813_s3 + $0xaa8] sm:$0xff] %v5329_v10  ;;  %v5331_v30 = vadd.f32 %v5330_v28, %v4978_v12  ;;  %v4980_v49 = vadd.f32 %v4979_v39, %v12260_v4 }
 0x59f   :  { %v4983_v11 = vpop.f32.mrf.mxu0  ;;  %v5336_v51 = vpop.f32.mrf.mxu1 }
 0x5a0   :  { %5711 = vst [vmem:[%s12813_s3 + $0xad0] sm:$0xff] %v5331_v30  ;;  %v5333_v48 = vadd.f32 %v5332_v9, %v4980_v49  ;;  %v4984_v46 = vadd.f32 %v4983_v11, %v12254_v21 }
 0x5a1   :  { %v4985_v58 = vpop.f32.mrf.mxu0  ;;  %v5338_v14 = vpop.f32.mrf.mxu1 }
 0x5a2   :  { %5712 = vst [vmem:[%s12813_s3 + $0xad8] sm:$0xff] %v5333_v48  ;;  %v5337_v41 = vadd.f32 %v5336_v51, %v4984_v46  ;;  %v4986_v19 = vadd.f32 %v4985_v58, %v12260_v4 }
 0x5a3   :  { %v4987_v52 = vpop.f32.mrf.mxu0  ;;  %v5340_v37 = vpop.f32.mrf.mxu1 }
 0x5a4   :  { %5717 = vst [vmem:[%s12813_s3 + $0xb00] sm:$0xff] %v5337_v41  ;;  %v5339_v32 = vadd.f32 %v5338_v14, %v4986_v19  ;;  %v4988_v8 = vadd.f32 %v4987_v52, %v12254_v21 }
 0x5a5   :  { %v4989_v60 = vpop.f32.mrf.mxu0  ;;  %v5342_v62 = vpop.f32.mrf.mxu1 }
 0x5a6   :  { %5718 = vst [vmem:[%s12813_s3 + $0xb08] sm:$0xff] %v5339_v32  ;;  %v5341_v54 = vadd.f32 %v5340_v37, %v4988_v8  ;;  %v4990_v15 = vadd.f32 %v4989_v60, %v12260_v4 }
 0x5a7   :  { %v4993_v33 = vpop.f32.mrf.mxu0  ;;  %v5346_v20 = vpop.f32.mrf.mxu1 }
 0x5a8   :  { %5723 = vst [vmem:[%s12813_s3 + $0xb30] sm:$0xff] %v5341_v54  ;;  %v5343_v3 = vadd.f32 %v5342_v62, %v4990_v15  ;;  %v4994_v24 = vadd.f32 %v4993_v33, %v12254_v21 }
 0x5a9   :  { %v4995_v35 = vpop.f32.mrf.mxu0  ;;  %v5348_v61 = vpop.f32.mrf.mxu1 }
 0x5aa   :  { %5724 = vst [vmem:[%s12813_s3 + $0xb38] sm:$0xff] %v5343_v3  ;;  %v5347_v5 = vadd.f32 %v5346_v20, %v4994_v24  ;;  %v4996_v45 = vadd.f32 %v4995_v35, %v12260_v4 }
 0x5ab   :  { %v4997_v17 = vpop.f32.mrf.mxu0  ;;  %v5350_v55 = vpop.f32.mrf.mxu1 }
 0x5ac   :  { %5729 = vst [vmem:[%s12813_s3 + $0xb60] sm:$0xff] %v5347_v5  ;;  %v5349_v43 = vadd.f32 %v5348_v61, %v4996_v45  ;;  %v4998_v22 = vadd.f32 %v4997_v17, %v12254_v21 }
 0x5ad   :  { %v4999_v38 = vpop.f32.mrf.mxu0  ;;  %v5352_v40 = vpop.f32.mrf.mxu1 }
 0x5ae   :  { %5730 = vst [vmem:[%s12813_s3 + $0xb68] sm:$0xff] %v5349_v43  ;;  %v5351_v27 = vadd.f32 %v5350_v55, %v4998_v22  ;;  %v5000_v18 = vadd.f32 %v4999_v38, %v12260_v4 }
 0x5af   :  { %v5003_v42 = vpop.f32.mrf.mxu0  ;;  %v5356_v59 = vpop.f32.mrf.mxu1 }
 0x5b0   :  { %5735 = vst [vmem:[%s12813_s3 + $0xb90] sm:$0xff] %v5351_v27  ;;  %v5353_v36 = vadd.f32 %v5352_v40, %v5000_v18  ;;  %v5004_v29 = vadd.f32 %v5003_v42, %v12254_v21 }
 0x5b1   :  { %v5005_v50 = vpop.f32.mrf.mxu0  ;;  %v5358_v56 = vpop.f32.mrf.mxu1 }
 0x5b2   :  { %5736 = vst [vmem:[%s12813_s3 + $0xb98] sm:$0xff] %v5353_v36  ;;  %v5357_v57 = vadd.f32 %v5356_v59, %v5004_v29  ;;  %v5006_v7 = vadd.f32 %v5005_v50, %v12260_v4 }
 0x5b3   :  { %v5007_v1 = vpop.f32.mrf.mxu0  ;;  %v5360_v13 = vpop.f32.mrf.mxu1 }
 0x5b4   :  { %5741 = vst [vmem:[%s12813_s3 + $0xbc0] sm:$0xff] %v5357_v57  ;;  %v5359_v2 = vadd.f32 %v5358_v56, %v5006_v7  ;;  %v5008_v23 = vadd.f32 %v5007_v1, %v12254_v21 }
 0x5b5   :  { %v5009_v26 = vpop.f32.mrf.mxu0  ;;  %v5362_v0 = vpop.f32.mrf.mxu1 }
 0x5b6   :  { %5742 = vst [vmem:[%s12813_s3 + $0xbc8] sm:$0xff] %v5359_v2  ;;  %v5361_v34 = vadd.f32 %v5360_v13, %v5008_v23  ;;  %v5010_v47 = vadd.f32 %v5009_v26, %v12260_v4 }
 0x5b8   :  { %5747 = vst [vmem:[%s12813_s3 + $0xbf0] sm:$0xff] %v5361_v34  ;;  %v5363_v44 = vadd.f32 %v5362_v0, %v5010_v47 }
 0x5ba   :  { %5748 = vst [vmem:[%s12813_s3 + $0xbf8] sm:$0xff] %v5363_v44 }

</bundles_post_ra>
